<compile_context>
chip_gen: v6e
topology: v6e:2x2x1
jax: 0.10.0
libtpu: 0.0.40
codegen_flags: <defaults>
</compile_context>

<pallas_src>
import jax
import jax.numpy as jnp
from jax import lax
from jax.experimental import pallas as pl
from jax.experimental.pallas import tpu as pltpu


def fold_bn(gamma, beta, mean, var, eps=1e-5):
    scale = gamma / jnp.sqrt(var + eps)
    bias = beta - mean * scale
    return scale, bias


def _rows_per_band(H, Wp, target_flat=160):
    """Largest divisor of H whose flat band (rows*Wp) keeps the per-band
    (band+2, 3*planes) f32 dot result comfortably inside the vreg budget."""
    for rc in range(H, 0, -1):
        if H % rc == 0 and rc * Wp <= target_flat:
            return rc
    return 1


def basicblock_forward(x_nchw, params, compute_dtype=jnp.bfloat16):
    """x_nchw: (N, C, H, W) float32. Returns (N, C, H, W) float32."""
    N, Cin, H, W = x_nchw.shape
    P = params["w1_oihw"].shape[0]                 # planes
    assert Cin == P, "identity shortcut requires inplanes == planes"
    cdt = compute_dtype

    Wp = W + 2                    # padded row width
    HW = H * Wp                   # flat rows of the shifted-output layout
    HIN = (H + 3) * Wp            # padded input rows (1 top pad + 2 bottom slack)
    HP2 = (H + 3) * Wp            # padded conv1-output scratch rows
    CM = _rows_per_band(H, Wp) * Wp               # flat rows per in-kernel band
    assert HW % CM == 0

    # ---- host-side prep: BN folding, tap-stacked weight relayout, halo pad ---
    s1, b1 = fold_bn(*params["bn1"])
    s2, b2 = fold_bn(*params["bn2"])

    def stack_taps(w_oihw, scale):
        # OIHW -> (ky, kx, Cin, P); fold BN scale over output channels; then
        # stack the 3 kx taps along output columns -> (3, Cin, 3*P).
        w = jnp.transpose(w_oihw, (2, 3, 1, 0)) * scale.reshape(1, 1, 1, -1)
        return jnp.transpose(w, (0, 2, 1, 3)).reshape(3, w.shape[2],
                                                      3 * w.shape[3])

    w1 = stack_taps(params["w1_oihw"], s1).astype(cdt)        # (3, Cin, 3P)
    w2 = stack_taps(params["w2_oihw"], s2).astype(cdt)        # (3, P,   3P)
    b1 = b1.reshape(1, P).astype(jnp.float32)
    b2 = b2.reshape(1, P).astype(jnp.float32)

    x = jnp.transpose(x_nchw, (0, 2, 3, 1)).astype(jnp.float32)   # NCHW -> NHWC
    xpad = jnp.pad(x, ((0, 0), (1, 2), (1, 1), (0, 0))).reshape(N, HIN, Cin)

    def kernel(x_ref, w1_ref, b1_ref, w2_ref, b2_ref, o_ref, p2_ref):
        # Zero only the thin border strips of the scratch that the interior
        # store never touches (cheap; re-done every step => megacore-safe).
        p2_ref[0:Wp + 1, :] = jnp.zeros((Wp + 1, P), jnp.float32)
        p2_ref[Wp + 1 + HW:HP2, :] = jnp.zeros((HP2 - (Wp + 1 + HW), P),
                                               jnp.float32)

        def conv3x3(src_ref, w_ref, c0):
            """Fused 3x3 conv (shifted flat layout) for output rows
            [c0, c0+CM): 3 MXU dots of (CM+2, C) x (C, 3P) in compute_dtype,
            kx chunks recombined with sublane shifts 0/1/2, f32 accumulation."""
            acc = jnp.zeros((CM, P), jnp.float32)
            for ky in range(3):
                off = ky * Wp + c0
                lhs = src_ref[off:off + CM + 2, :].astype(cdt)
                d = jnp.dot(lhs, w_ref[ky],
                            preferred_element_type=jnp.float32)   # (CM+2, 3P)
                for kx in range(3):
                    acc = acc + d[kx:kx + CM, kx * P:(kx + 1) * P]
            return acc

        # ---- phase 1: conv1 + bn1 + relu, banded over output rows -----------
        for c0 in range(0, HW, CM):
            out1 = jnp.maximum(conv3x3(x_ref, w1_ref, c0) + b1_ref[...], 0.0)
            # Zero the two pad columns of every image row so conv2's wrapped
            # reads see proper zero padding (mask built in-kernel, no DMA).
            pos = c0 + lax.broadcasted_iota(jnp.int32, (CM, 1), 0)
            out1 = jnp.where(pos % Wp < W, out1, 0.0)
            p2_ref[Wp + 1 + c0:Wp + 1 + c0 + CM, :] = out1   # f32 scratch

        # ---- phase 2: conv2 + bn2 + identity + relu --------------------------
        for c0 in range(0, HW, CM):
            out2 = conv3x3(p2_ref, w2_ref, c0) + b2_ref[...]
            identity = x_ref[Wp + 1 + c0:Wp + 1 + c0 + CM, :]    # f32
            o_ref[c0:c0 + CM, :] = jnp.maximum(out2 + identity,
                                               0.0).astype(o_ref.dtype)

    out_flat = pl.pallas_call(
        kernel,
        out_shape=jax.ShapeDtypeStruct((N, HW, P), jnp.float32),
        grid_spec=pltpu.PrefetchScalarGridSpec(
            num_scalar_prefetch=0,
            grid=(N,),
            in_specs=[
                pl.BlockSpec((None, HIN, Cin), lambda n: (n, 0, 0)),
                pl.BlockSpec((3, Cin, 3 * P), lambda n: (0, 0, 0)),
                pl.BlockSpec((1, P), lambda n: (0, 0)),
                pl.BlockSpec((3, P, 3 * P), lambda n: (0, 0, 0)),
                pl.BlockSpec((1, P), lambda n: (0, 0)),
            ],
            out_specs=pl.BlockSpec((None, HW, P), lambda n: (n, 0, 0)),
            scratch_shapes=[pltpu.VMEM((HP2, P), jnp.float32)],
        ),
        compiler_params=pltpu.CompilerParams(
            dimension_semantics=("parallel",),
            vmem_limit_bytes=32 * 1024 * 1024),
    )(xpad, w1, b1, w2, b2)

    # Drop the two garbage pad columns per row, back to NCHW (XLA plumbing).
    out = out_flat.reshape(N, H, Wp, P)[:, :, :W, :]
    return jnp.transpose(out, (0, 3, 1, 2))


# ---------------------- pure-JAX reference (NCHW, like PyTorch) --------------
def basicblock_reference(x, params):
    def conv(x, w):
        return lax.conv_general_dilated(
            x, w, window_strides=(1, 1), padding=[(1, 1), (1, 1)],
            dimension_numbers=("NCHW", "OIHW", "NCHW"))

    def bn(x, gamma, beta, mean, var, eps=1e-5):
        g = gamma.reshape(1, -1, 1, 1)
        b = beta.reshape(1, -1, 1, 1)
        m = mean.reshape(1, -1, 1, 1)
        v = var.reshape(1, -1, 1, 1)
        return (x - m) / jnp.sqrt(v + eps) * g + b

    out = jax.nn.relu(bn(conv(x, params["w1_oihw"]), *params["bn1"]))
    out = bn(conv(out, params["w2_oihw"]), *params["bn2"])
    return jax.nn.relu(out + x)


def make_params(key, inplanes, planes):
    ks = jax.random.split(key, 4)
    w1 = 0.1 * jax.random.normal(ks[0], (planes, inplanes, 3, 3), jnp.float32)
    w2 = 0.1 * jax.random.normal(ks[1], (planes, planes, 3, 3), jnp.float32)

    def bn_params(k, c):
        k1, k2, k3, k4 = jax.random.split(k, 4)
        gamma = 0.5 + jax.random.uniform(k1, (c,), jnp.float32)
        beta = 0.1 * jax.random.normal(k2, (c,), jnp.float32)
        mean = 0.1 * jax.random.normal(k3, (c,), jnp.float32)
        var = 0.5 + jax.random.uniform(k4, (c,), jnp.float32)
        return (gamma, beta, mean, var)

    return {"w1_oihw": w1, "w2_oihw": w2,
            "bn1": bn_params(ks[2], planes), "bn2": bn_params(ks[3], planes)}


if __name__ == "__main__":
    # BasicBlock(inplanes=64, planes=64), stride=1, downsample=None
    # (ResNet-18 layer1 block channel count, small spatial size / batch).
    N, C, H, W = 2, 64, 16, 16
    key = jax.random.PRNGKey(0)
    kx_, kp = jax.random.split(key)
    x = jax.random.normal(kx_, (N, C, H, W), jnp.float32)
    params = make_params(kp, C, C)

    ref = basicblock_reference(x, params)

    # Exact path (f32 MXU operands): tight structural check of taps / layout.
    out_f32 = jax.block_until_ready(basicblock_forward(x, params, jnp.float32))
    assert out_f32.shape == ref.shape == (N, C, H, W)
    err_f32 = float(jnp.max(jnp.abs(out_f32 - ref)))
    assert jnp.allclose(out_f32, ref, rtol=1e-3, atol=1e-3), err_f32

    # Fast path (default): bf16 MXU operands, f32 accumulation + epilogue.
    # Two stacked bf16 convs vs an f32 reference carry bf16-operand rounding,
    # so the check is a bf16-scale sanity bound (a layout/tap bug would produce
    # errors of order max|ref| itself, ~30x larger than this tolerance).
    out_bf16 = jax.block_until_ready(basicblock_forward(x, params,
                                                        jnp.bfloat16))
    err_bf16 = float(jnp.max(jnp.abs(out_bf16 - ref)))
    tol_bf16 = 3e-2 * (1.0 + float(jnp.max(jnp.abs(ref))))
    assert err_bf16 <= tol_bf16, (err_bf16, tol_bf16)

    print("KERNEL_OK")
</pallas_src>

<mosaic_0001>
module attributes {stable_mosaic.version = 11 : i64} {
  func.func @kernel(%arg0: i32, %arg1: memref<1x342x64xf32, #tpu.memory_space<vmem>>, %arg2: memref<3x64x192xf32, #tpu.memory_space<vmem>>, %arg3: memref<1x64xf32, #tpu.memory_space<vmem>>, %arg4: memref<3x64x192xf32, #tpu.memory_space<vmem>>, %arg5: memref<1x64xf32, #tpu.memory_space<vmem>>, %arg6: memref<1x288x64xf32, #tpu.memory_space<vmem>>, %arg7: memref<342x64xf32, #tpu.memory_space<vmem>>) attributes {dimension_semantics = [#tpu.dimension_semantics<parallel>], iteration_bounds = array<i64: 2>, scalar_prefetch = 0 : i64, scratch_operands = 1 : i64, tpu.core_type = #tpu.core_type<tc>, window_params = [{transform_indices = @transform_0, window_bounds = array<i64: 1, 342, 64>}, {pipeline_mode = #tpu.pipeline_mode<synchronous>, transform_indices = @transform_1, window_bounds = array<i64: 3, 64, 192>}, {pipeline_mode = #tpu.pipeline_mode<synchronous>, transform_indices = @transform_2, window_bounds = array<i64: 1, 64>}, {pipeline_mode = #tpu.pipeline_mode<synchronous>, transform_indices = @transform_3, window_bounds = array<i64: 3, 64, 192>}, {pipeline_mode = #tpu.pipeline_mode<synchronous>, transform_indices = @transform_4, window_bounds = array<i64: 1, 64>}, {transform_indices = @transform_5, window_bounds = array<i64: 1, 288, 64>}]} {
    %cst = arith.constant 0.000000e+00 : f32
    %0 = vector.broadcast %cst : f32 to vector<19x64xf32>
    %c0 = arith.constant 0 : index
    %c0_0 = arith.constant 0 : index
    %1 = vector.load %arg7[%c0, %c0_0] : memref<342x64xf32, #tpu.memory_space<vmem>>, vector<19x64xf32>
    tpu.vector_store %arg7[%c0, %c0_0], %0 {strides = array<i32>} : memref<342x64xf32, #tpu.memory_space<vmem>>, vector<19x64xf32>,
    %cst_1 = arith.constant 0.000000e+00 : f32
    %2 = vector.broadcast %cst_1 : f32 to vector<35x64xf32>
    %c307 = arith.constant 307 : index
    %c0_2 = arith.constant 0 : index
    %3 = vector.load %arg7[%c307, %c0_2] : memref<342x64xf32, #tpu.memory_space<vmem>>, vector<35x64xf32>
    tpu.vector_store %arg7[%c307, %c0_2], %2 {strides = array<i32>} : memref<342x64xf32, #tpu.memory_space<vmem>>, vector<35x64xf32>,
    %cst_3 = arith.constant 0.000000e+00 : f32
    %4 = vector.broadcast %cst_3 : f32 to vector<144x64xf32>
    %c0_4 = arith.constant 0 : index
    %c0_5 = arith.constant 0 : index
    %c0_6 = arith.constant 0 : index
    %5 = vector.load %arg1[%c0_4, %c0_5, %c0_6] : memref<1x342x64xf32, #tpu.memory_space<vmem>>, vector<1x146x64xf32>
    %6 = vector.shape_cast %5 : vector<1x146x64xf32> to vector<146x64xf32>
    %c0_7 = arith.constant 0 : index
    %c0_8 = arith.constant 0 : index
    %c0_9 = arith.constant 0 : index
    %7 = vector.load %arg2[%c0_7, %c0_8, %c0_9] : memref<3x64x192xf32, #tpu.memory_space<vmem>>, vector<1x64x192xf32>
    %8 = vector.shape_cast %7 : vector<1x64x192xf32> to vector<64x192xf32>
    %cst_10 = arith.constant dense<0.000000e+00> : vector<146x192xf32>
    %9 = tpu.matmul %6, %8, %cst_10 {dimension_numbers = #tpu.dot_dimension_numbers<[1], [0], [0], [1], [0, 0, 1, 1], [], []>} : vector<146x64xf32>, vector<64x192xf32>, vector<146x192xf32> -> vector<146x192xf32>
    %10 = vector.extract_strided_slice %9 {offsets = [0, 0], sizes = [144, 64], strides = [1, 1]} : vector<146x192xf32> to vector<144x64xf32>
    %11 = arith.addf %4, %10 : vector<144x64xf32>
    %12 = vector.extract_strided_slice %9 {offsets = [1, 64], sizes = [144, 64], strides = [1, 1]} : vector<146x192xf32> to vector<144x64xf32>
    %13 = arith.addf %11, %12 : vector<144x64xf32>
    %14 = vector.extract_strided_slice %9 {offsets = [2, 128], sizes = [144, 64], strides = [1, 1]} : vector<146x192xf32> to vector<144x64xf32>
    %15 = arith.addf %13, %14 : vector<144x64xf32>
    %c0_11 = arith.constant 0 : index
    %c18 = arith.constant 18 : index
    %c0_12 = arith.constant 0 : index
    %16 = vector.load %arg1[%c0_11, %c18, %c0_12] : memref<1x342x64xf32, #tpu.memory_space<vmem>>, vector<1x146x64xf32>
    %17 = vector.shape_cast %16 : vector<1x146x64xf32> to vector<146x64xf32>
    %c1 = arith.constant 1 : index
    %c0_13 = arith.constant 0 : index
    %c0_14 = arith.constant 0 : index
    %18 = vector.load %arg2[%c1, %c0_13, %c0_14] : memref<3x64x192xf32, #tpu.memory_space<vmem>>, vector<1x64x192xf32>
    %19 = vector.shape_cast %18 : vector<1x64x192xf32> to vector<64x192xf32>
    %cst_15 = arith.constant dense<0.000000e+00> : vector<146x192xf32>
    %20 = tpu.matmul %17, %19, %cst_15 {dimension_numbers = #tpu.dot_dimension_numbers<[1], [0], [0], [1], [0, 0, 1, 1], [], []>} : vector<146x64xf32>, vector<64x192xf32>, vector<146x192xf32> -> vector<146x192xf32>
    %21 = vector.extract_strided_slice %20 {offsets = [0, 0], sizes = [144, 64], strides = [1, 1]} : vector<146x192xf32> to vector<144x64xf32>
    %22 = arith.addf %15, %21 : vector<144x64xf32>
    %23 = vector.extract_strided_slice %20 {offsets = [1, 64], sizes = [144, 64], strides = [1, 1]} : vector<146x192xf32> to vector<144x64xf32>
    %24 = arith.addf %22, %23 : vector<144x64xf32>
    %25 = vector.extract_strided_slice %20 {offsets = [2, 128], sizes = [144, 64], strides = [1, 1]} : vector<146x192xf32> to vector<144x64xf32>
    %26 = arith.addf %24, %25 : vector<144x64xf32>
    %c0_16 = arith.constant 0 : index
    %c36 = arith.constant 36 : index
    %c0_17 = arith.constant 0 : index
    %27 = vector.load %arg1[%c0_16, %c36, %c0_17] : memref<1x342x64xf32, #tpu.memory_space<vmem>>, vector<1x146x64xf32>
    %28 = vector.shape_cast %27 : vector<1x146x64xf32> to vector<146x64xf32>
    %c2 = arith.constant 2 : index
    %c0_18 = arith.constant 0 : index
    %c0_19 = arith.constant 0 : index
    %29 = vector.load %arg2[%c2, %c0_18, %c0_19] : memref<3x64x192xf32, #tpu.memory_space<vmem>>, vector<1x64x192xf32>
    %30 = vector.shape_cast %29 : vector<1x64x192xf32> to vector<64x192xf32>
    %cst_20 = arith.constant dense<0.000000e+00> : vector<146x192xf32>
    %31 = tpu.matmul %28, %30, %cst_20 {dimension_numbers = #tpu.dot_dimension_numbers<[1], [0], [0], [1], [0, 0, 1, 1], [], []>} : vector<146x64xf32>, vector<64x192xf32>, vector<146x192xf32> -> vector<146x192xf32>
    %32 = vector.extract_strided_slice %31 {offsets = [0, 0], sizes = [144, 64], strides = [1, 1]} : vector<146x192xf32> to vector<144x64xf32>
    %33 = arith.addf %26, %32 : vector<144x64xf32>
    %34 = vector.extract_strided_slice %31 {offsets = [1, 64], sizes = [144, 64], strides = [1, 1]} : vector<146x192xf32> to vector<144x64xf32>
    %35 = arith.addf %33, %34 : vector<144x64xf32>
    %36 = vector.extract_strided_slice %31 {offsets = [2, 128], sizes = [144, 64], strides = [1, 1]} : vector<146x192xf32> to vector<144x64xf32>
    %37 = arith.addf %35, %36 : vector<144x64xf32>
    %c0_21 = arith.constant 0 : index
    %c0_22 = arith.constant 0 : index
    %38 = vector.load %arg3[%c0_21, %c0_22] : memref<1x64xf32, #tpu.memory_space<vmem>>, vector<1x64xf32>
    %39 = vector.broadcast %38 : vector<1x64xf32> to vector<144x64xf32>
    %40 = arith.addf %37, %39 : vector<144x64xf32>
    %cst_23 = arith.constant 0.000000e+00 : f32
    %41 = vector.broadcast %cst_23 : f32 to vector<144x64xf32>
    %42 = arith.maximumf %40, %41 : vector<144x64xf32>
    %43 = tpu.iota {dimensions = array<i32: 0>} : vector<144x1xi32>
    %c0_i32 = arith.constant 0 : i32
    %44 = vector.broadcast %c0_i32 : i32 to vector<144x1xi32>
    %45 = arith.addi %44, %43 : vector<144x1xi32>
    %c18_i32 = arith.constant 18 : i32
    %c0_i32_24 = arith.constant 0 : i32
    %46 = arith.cmpi eq, %c18_i32, %c0_i32_24 : i32
    %c1_i32 = arith.constant 1 : i32
    %47 = arith.select %46, %c1_i32, %c18_i32 : i32
    %48 = vector.broadcast %47 : i32 to vector<144x1xi32>
    %49 = arith.remsi %45, %48 : vector<144x1xi32>
    %c0_i32_25 = arith.constant 0 : i32
    %50 = vector.broadcast %c0_i32_25 : i32 to vector<144x1xi32>
    %51 = arith.cmpi ne, %49, %50 : vector<144x1xi32>
    %c0_i32_26 = arith.constant 0 : i32
    %52 = vector.broadcast %c0_i32_26 : i32 to vector<144x1xi32>
    %53 = arith.cmpi slt, %49, %52 : vector<144x1xi32>
    %c0_i32_27 = arith.constant 0 : i32
    %54 = arith.cmpi slt, %47, %c0_i32_27 : i32
    %55 = vector.broadcast %54 : i1 to vector<144x1xi1>
    %56 = vector.broadcast %55 : vector<144x1xi1> to vector<144x1xi1>
    %57 = arith.xori %53, %56 : vector<144x1xi1>
    %58 = arith.andi %57, %51 : vector<144x1xi1>
    %59 = vector.broadcast %47 : i32 to vector<144x1xi32>
    %60 = arith.addi %49, %59 : vector<144x1xi32>
    %61 = arith.select %58, %60, %49 : vector<144x1xi1>, vector<144x1xi32>
    %c16_i32 = arith.constant 16 : i32
    %62 = vector.broadcast %c16_i32 : i32 to vector<144x1xi32>
    %63 = arith.cmpi slt, %61, %62 : vector<144x1xi32>
    %cst_28 = arith.constant 0.000000e+00 : f32
    %64 = vector.shape_cast %63 : vector<144x1xi1> to vector<144x1xi1>
    %65 = vector.broadcast %64 : vector<144x1xi1> to vector<144x64xi1>
    %66 = vector.broadcast %cst_28 : f32 to vector<144x64xf32>
    %67 = arith.select %65, %42, %66 : vector<144x64xi1>, vector<144x64xf32>
    %c19 = arith.constant 19 : index
    %c0_29 = arith.constant 0 : index
    %68 = vector.load %arg7[%c19, %c0_29] : memref<342x64xf32, #tpu.memory_space<vmem>>, vector<144x64xf32>
    tpu.vector_store %arg7[%c19, %c0_29], %67 {strides = array<i32>} : memref<342x64xf32, #tpu.memory_space<vmem>>, vector<144x64xf32>,
    %cst_30 = arith.constant 0.000000e+00 : f32
    %69 = vector.broadcast %cst_30 : f32 to vector<144x64xf32>
    %c0_31 = arith.constant 0 : index
    %c144 = arith.constant 144 : index
    %c0_32 = arith.constant 0 : index
    %70 = vector.load %arg1[%c0_31, %c144, %c0_32] : memref<1x342x64xf32, #tpu.memory_space<vmem>>, vector<1x146x64xf32>
    %71 = vector.shape_cast %70 : vector<1x146x64xf32> to vector<146x64xf32>
    %c0_33 = arith.constant 0 : index
    %c0_34 = arith.constant 0 : index
    %c0_35 = arith.constant 0 : index
    %72 = vector.load %arg2[%c0_33, %c0_34, %c0_35] : memref<3x64x192xf32, #tpu.memory_space<vmem>>, vector<1x64x192xf32>
    %73 = vector.shape_cast %72 : vector<1x64x192xf32> to vector<64x192xf32>
    %cst_36 = arith.constant dense<0.000000e+00> : vector<146x192xf32>
    %74 = tpu.matmul %71, %73, %cst_36 {dimension_numbers = #tpu.dot_dimension_numbers<[1], [0], [0], [1], [0, 0, 1, 1], [], []>} : vector<146x64xf32>, vector<64x192xf32>, vector<146x192xf32> -> vector<146x192xf32>
    %75 = vector.extract_strided_slice %74 {offsets = [0, 0], sizes = [144, 64], strides = [1, 1]} : vector<146x192xf32> to vector<144x64xf32>
    %76 = arith.addf %69, %75 : vector<144x64xf32>
    %77 = vector.extract_strided_slice %74 {offsets = [1, 64], sizes = [144, 64], strides = [1, 1]} : vector<146x192xf32> to vector<144x64xf32>
    %78 = arith.addf %76, %77 : vector<144x64xf32>
    %79 = vector.extract_strided_slice %74 {offsets = [2, 128], sizes = [144, 64], strides = [1, 1]} : vector<146x192xf32> to vector<144x64xf32>
    %80 = arith.addf %78, %79 : vector<144x64xf32>
    %c0_37 = arith.constant 0 : index
    %c162 = arith.constant 162 : index
    %c0_38 = arith.constant 0 : index
    %81 = vector.load %arg1[%c0_37, %c162, %c0_38] : memref<1x342x64xf32, #tpu.memory_space<vmem>>, vector<1x146x64xf32>
    %82 = vector.shape_cast %81 : vector<1x146x64xf32> to vector<146x64xf32>
    %c1_39 = arith.constant 1 : index
    %c0_40 = arith.constant 0 : index
    %c0_41 = arith.constant 0 : index
    %83 = vector.load %arg2[%c1_39, %c0_40, %c0_41] : memref<3x64x192xf32, #tpu.memory_space<vmem>>, vector<1x64x192xf32>
    %84 = vector.shape_cast %83 : vector<1x64x192xf32> to vector<64x192xf32>
    %cst_42 = arith.constant dense<0.000000e+00> : vector<146x192xf32>
    %85 = tpu.matmul %82, %84, %cst_42 {dimension_numbers = #tpu.dot_dimension_numbers<[1], [0], [0], [1], [0, 0, 1, 1], [], []>} : vector<146x64xf32>, vector<64x192xf32>, vector<146x192xf32> -> vector<146x192xf32>
    %86 = vector.extract_strided_slice %85 {offsets = [0, 0], sizes = [144, 64], strides = [1, 1]} : vector<146x192xf32> to vector<144x64xf32>
    %87 = arith.addf %80, %86 : vector<144x64xf32>
    %88 = vector.extract_strided_slice %85 {offsets = [1, 64], sizes = [144, 64], strides = [1, 1]} : vector<146x192xf32> to vector<144x64xf32>
    %89 = arith.addf %87, %88 : vector<144x64xf32>
    %90 = vector.extract_strided_slice %85 {offsets = [2, 128], sizes = [144, 64], strides = [1, 1]} : vector<146x192xf32> to vector<144x64xf32>
    %91 = arith.addf %89, %90 : vector<144x64xf32>
    %c0_43 = arith.constant 0 : index
    %c180 = arith.constant 180 : index
    %c0_44 = arith.constant 0 : index
    %92 = vector.load %arg1[%c0_43, %c180, %c0_44] : memref<1x342x64xf32, #tpu.memory_space<vmem>>, vector<1x146x64xf32>
    %93 = vector.shape_cast %92 : vector<1x146x64xf32> to vector<146x64xf32>
    %c2_45 = arith.constant 2 : index
    %c0_46 = arith.constant 0 : index
    %c0_47 = arith.constant 0 : index
    %94 = vector.load %arg2[%c2_45, %c0_46, %c0_47] : memref<3x64x192xf32, #tpu.memory_space<vmem>>, vector<1x64x192xf32>
    %95 = vector.shape_cast %94 : vector<1x64x192xf32> to vector<64x192xf32>
    %cst_48 = arith.constant dense<0.000000e+00> : vector<146x192xf32>
    %96 = tpu.matmul %93, %95, %cst_48 {dimension_numbers = #tpu.dot_dimension_numbers<[1], [0], [0], [1], [0, 0, 1, 1], [], []>} : vector<146x64xf32>, vector<64x192xf32>, vector<146x192xf32> -> vector<146x192xf32>
    %97 = vector.extract_strided_slice %96 {offsets = [0, 0], sizes = [144, 64], strides = [1, 1]} : vector<146x192xf32> to vector<144x64xf32>
    %98 = arith.addf %91, %97 : vector<144x64xf32>
    %99 = vector.extract_strided_slice %96 {offsets = [1, 64], sizes = [144, 64], strides = [1, 1]} : vector<146x192xf32> to vector<144x64xf32>
    %100 = arith.addf %98, %99 : vector<144x64xf32>
    %101 = vector.extract_strided_slice %96 {offsets = [2, 128], sizes = [144, 64], strides = [1, 1]} : vector<146x192xf32> to vector<144x64xf32>
    %102 = arith.addf %100, %101 : vector<144x64xf32>
    %c0_49 = arith.constant 0 : index
    %c0_50 = arith.constant 0 : index
    %103 = vector.load %arg3[%c0_49, %c0_50] : memref<1x64xf32, #tpu.memory_space<vmem>>, vector<1x64xf32>
    %104 = vector.broadcast %103 : vector<1x64xf32> to vector<144x64xf32>
    %105 = arith.addf %102, %104 : vector<144x64xf32>
    %cst_51 = arith.constant 0.000000e+00 : f32
    %106 = vector.broadcast %cst_51 : f32 to vector<144x64xf32>
    %107 = arith.maximumf %105, %106 : vector<144x64xf32>
    %108 = tpu.iota {dimensions = array<i32: 0>} : vector<144x1xi32>
    %c144_i32 = arith.constant 144 : i32
    %109 = vector.broadcast %c144_i32 : i32 to vector<144x1xi32>
    %110 = arith.addi %109, %108 : vector<144x1xi32>
    %c18_i32_52 = arith.constant 18 : i32
    %c0_i32_53 = arith.constant 0 : i32
    %111 = arith.cmpi eq, %c18_i32_52, %c0_i32_53 : i32
    %c1_i32_54 = arith.constant 1 : i32
    %112 = arith.select %111, %c1_i32_54, %c18_i32_52 : i32
    %113 = vector.broadcast %112 : i32 to vector<144x1xi32>
    %114 = arith.remsi %110, %113 : vector<144x1xi32>
    %c0_i32_55 = arith.constant 0 : i32
    %115 = vector.broadcast %c0_i32_55 : i32 to vector<144x1xi32>
    %116 = arith.cmpi ne, %114, %115 : vector<144x1xi32>
    %c0_i32_56 = arith.constant 0 : i32
    %117 = vector.broadcast %c0_i32_56 : i32 to vector<144x1xi32>
    %118 = arith.cmpi slt, %114, %117 : vector<144x1xi32>
    %c0_i32_57 = arith.constant 0 : i32
    %119 = arith.cmpi slt, %112, %c0_i32_57 : i32
    %120 = vector.broadcast %119 : i1 to vector<144x1xi1>
    %121 = vector.broadcast %120 : vector<144x1xi1> to vector<144x1xi1>
    %122 = arith.xori %118, %121 : vector<144x1xi1>
    %123 = arith.andi %122, %116 : vector<144x1xi1>
    %124 = vector.broadcast %112 : i32 to vector<144x1xi32>
    %125 = arith.addi %114, %124 : vector<144x1xi32>
    %126 = arith.select %123, %125, %114 : vector<144x1xi1>, vector<144x1xi32>
    %c16_i32_58 = arith.constant 16 : i32
    %127 = vector.broadcast %c16_i32_58 : i32 to vector<144x1xi32>
    %128 = arith.cmpi slt, %126, %127 : vector<144x1xi32>
    %cst_59 = arith.constant 0.000000e+00 : f32
    %129 = vector.shape_cast %128 : vector<144x1xi1> to vector<144x1xi1>
    %130 = vector.broadcast %129 : vector<144x1xi1> to vector<144x64xi1>
    %131 = vector.broadcast %cst_59 : f32 to vector<144x64xf32>
    %132 = arith.select %130, %107, %131 : vector<144x64xi1>, vector<144x64xf32>
    %c163 = arith.constant 163 : index
    %c0_60 = arith.constant 0 : index
    %133 = vector.load %arg7[%c163, %c0_60] : memref<342x64xf32, #tpu.memory_space<vmem>>, vector<144x64xf32>
    tpu.vector_store %arg7[%c163, %c0_60], %132 {strides = array<i32>} : memref<342x64xf32, #tpu.memory_space<vmem>>, vector<144x64xf32>,
    %cst_61 = arith.constant 0.000000e+00 : f32
    %134 = vector.broadcast %cst_61 : f32 to vector<144x64xf32>
    %c0_62 = arith.constant 0 : index
    %c0_63 = arith.constant 0 : index
    %135 = vector.load %arg7[%c0_62, %c0_63] : memref<342x64xf32, #tpu.memory_space<vmem>>, vector<146x64xf32>
    %c0_64 = arith.constant 0 : index
    %c0_65 = arith.constant 0 : index
    %c0_66 = arith.constant 0 : index
    %136 = vector.load %arg4[%c0_64, %c0_65, %c0_66] : memref<3x64x192xf32, #tpu.memory_space<vmem>>, vector<1x64x192xf32>
    %137 = vector.shape_cast %136 : vector<1x64x192xf32> to vector<64x192xf32>
    %cst_67 = arith.constant dense<0.000000e+00> : vector<146x192xf32>
    %138 = tpu.matmul %135, %137, %cst_67 {dimension_numbers = #tpu.dot_dimension_numbers<[1], [0], [0], [1], [0, 0, 1, 1], [], []>} : vector<146x64xf32>, vector<64x192xf32>, vector<146x192xf32> -> vector<146x192xf32>
    %139 = vector.extract_strided_slice %138 {offsets = [0, 0], sizes = [144, 64], strides = [1, 1]} : vector<146x192xf32> to vector<144x64xf32>
    %140 = arith.addf %134, %139 : vector<144x64xf32>
    %141 = vector.extract_strided_slice %138 {offsets = [1, 64], sizes = [144, 64], strides = [1, 1]} : vector<146x192xf32> to vector<144x64xf32>
    %142 = arith.addf %140, %141 : vector<144x64xf32>
    %143 = vector.extract_strided_slice %138 {offsets = [2, 128], sizes = [144, 64], strides = [1, 1]} : vector<146x192xf32> to vector<144x64xf32>
    %144 = arith.addf %142, %143 : vector<144x64xf32>
    %c18_68 = arith.constant 18 : index
    %c0_69 = arith.constant 0 : index
    %145 = vector.load %arg7[%c18_68, %c0_69] : memref<342x64xf32, #tpu.memory_space<vmem>>, vector<146x64xf32>
    %c1_70 = arith.constant 1 : index
    %c0_71 = arith.constant 0 : index
    %c0_72 = arith.constant 0 : index
    %146 = vector.load %arg4[%c1_70, %c0_71, %c0_72] : memref<3x64x192xf32, #tpu.memory_space<vmem>>, vector<1x64x192xf32>
    %147 = vector.shape_cast %146 : vector<1x64x192xf32> to vector<64x192xf32>
    %cst_73 = arith.constant dense<0.000000e+00> : vector<146x192xf32>
    %148 = tpu.matmul %145, %147, %cst_73 {dimension_numbers = #tpu.dot_dimension_numbers<[1], [0], [0], [1], [0, 0, 1, 1], [], []>} : vector<146x64xf32>, vector<64x192xf32>, vector<146x192xf32> -> vector<146x192xf32>
    %149 = vector.extract_strided_slice %148 {offsets = [0, 0], sizes = [144, 64], strides = [1, 1]} : vector<146x192xf32> to vector<144x64xf32>
    %150 = arith.addf %144, %149 : vector<144x64xf32>
    %151 = vector.extract_strided_slice %148 {offsets = [1, 64], sizes = [144, 64], strides = [1, 1]} : vector<146x192xf32> to vector<144x64xf32>
    %152 = arith.addf %150, %151 : vector<144x64xf32>
    %153 = vector.extract_strided_slice %148 {offsets = [2, 128], sizes = [144, 64], strides = [1, 1]} : vector<146x192xf32> to vector<144x64xf32>
    %154 = arith.addf %152, %153 : vector<144x64xf32>
    %c36_74 = arith.constant 36 : index
    %c0_75 = arith.constant 0 : index
    %155 = vector.load %arg7[%c36_74, %c0_75] : memref<342x64xf32, #tpu.memory_space<vmem>>, vector<146x64xf32>
    %c2_76 = arith.constant 2 : index
    %c0_77 = arith.constant 0 : index
    %c0_78 = arith.constant 0 : index
    %156 = vector.load %arg4[%c2_76, %c0_77, %c0_78] : memref<3x64x192xf32, #tpu.memory_space<vmem>>, vector<1x64x192xf32>
    %157 = vector.shape_cast %156 : vector<1x64x192xf32> to vector<64x192xf32>
    %cst_79 = arith.constant dense<0.000000e+00> : vector<146x192xf32>
    %158 = tpu.matmul %155, %157, %cst_79 {dimension_numbers = #tpu.dot_dimension_numbers<[1], [0], [0], [1], [0, 0, 1, 1], [], []>} : vector<146x64xf32>, vector<64x192xf32>, vector<146x192xf32> -> vector<146x192xf32>
    %159 = vector.extract_strided_slice %158 {offsets = [0, 0], sizes = [144, 64], strides = [1, 1]} : vector<146x192xf32> to vector<144x64xf32>
    %160 = arith.addf %154, %159 : vector<144x64xf32>
    %161 = vector.extract_strided_slice %158 {offsets = [1, 64], sizes = [144, 64], strides = [1, 1]} : vector<146x192xf32> to vector<144x64xf32>
    %162 = arith.addf %160, %161 : vector<144x64xf32>
    %163 = vector.extract_strided_slice %158 {offsets = [2, 128], sizes = [144, 64], strides = [1, 1]} : vector<146x192xf32> to vector<144x64xf32>
    %164 = arith.addf %162, %163 : vector<144x64xf32>
    %c0_80 = arith.constant 0 : index
    %c0_81 = arith.constant 0 : index
    %165 = vector.load %arg5[%c0_80, %c0_81] : memref<1x64xf32, #tpu.memory_space<vmem>>, vector<1x64xf32>
    %166 = vector.broadcast %165 : vector<1x64xf32> to vector<144x64xf32>
    %167 = arith.addf %164, %166 : vector<144x64xf32>
    %c0_82 = arith.constant 0 : index
    %c19_83 = arith.constant 19 : index
    %c0_84 = arith.constant 0 : index
    %168 = vector.load %arg1[%c0_82, %c19_83, %c0_84] : memref<1x342x64xf32, #tpu.memory_space<vmem>>, vector<1x144x64xf32>
    %169 = vector.shape_cast %168 : vector<1x144x64xf32> to vector<144x64xf32>
    %170 = arith.addf %167, %169 : vector<144x64xf32>
    %cst_85 = arith.constant 0.000000e+00 : f32
    %171 = vector.broadcast %cst_85 : f32 to vector<144x64xf32>
    %172 = arith.maximumf %170, %171 : vector<144x64xf32>
    %c0_86 = arith.constant 0 : index
    %c0_87 = arith.constant 0 : index
    %c0_88 = arith.constant 0 : index
    %173 = vector.load %arg6[%c0_86, %c0_87, %c0_88] : memref<1x288x64xf32, #tpu.memory_space<vmem>>, vector<1x144x64xf32>
    %174 = vector.shape_cast %173 : vector<1x144x64xf32> to vector<144x64xf32>
    %175 = vector.shape_cast %172 : vector<144x64xf32> to vector<1x144x64xf32>
    tpu.vector_store %arg6[%c0_86, %c0_87, %c0_88], %175 {strides = array<i32>} : memref<1x288x64xf32, #tpu.memory_space<vmem>>, vector<1x144x64xf32>,
    %cst_89 = arith.constant 0.000000e+00 : f32
    %176 = vector.broadcast %cst_89 : f32 to vector<144x64xf32>
    %c144_90 = arith.constant 144 : index
    %c0_91 = arith.constant 0 : index
    %177 = vector.load %arg7[%c144_90, %c0_91] : memref<342x64xf32, #tpu.memory_space<vmem>>, vector<146x64xf32>
    %c0_92 = arith.constant 0 : index
    %c0_93 = arith.constant 0 : index
    %c0_94 = arith.constant 0 : index
    %178 = vector.load %arg4[%c0_92, %c0_93, %c0_94] : memref<3x64x192xf32, #tpu.memory_space<vmem>>, vector<1x64x192xf32>
    %179 = vector.shape_cast %178 : vector<1x64x192xf32> to vector<64x192xf32>
    %cst_95 = arith.constant dense<0.000000e+00> : vector<146x192xf32>
    %180 = tpu.matmul %177, %179, %cst_95 {dimension_numbers = #tpu.dot_dimension_numbers<[1], [0], [0], [1], [0, 0, 1, 1], [], []>} : vector<146x64xf32>, vector<64x192xf32>, vector<146x192xf32> -> vector<146x192xf32>
    %181 = vector.extract_strided_slice %180 {offsets = [0, 0], sizes = [144, 64], strides = [1, 1]} : vector<146x192xf32> to vector<144x64xf32>
    %182 = arith.addf %176, %181 : vector<144x64xf32>
    %183 = vector.extract_strided_slice %180 {offsets = [1, 64], sizes = [144, 64], strides = [1, 1]} : vector<146x192xf32> to vector<144x64xf32>
    %184 = arith.addf %182, %183 : vector<144x64xf32>
    %185 = vector.extract_strided_slice %180 {offsets = [2, 128], sizes = [144, 64], strides = [1, 1]} : vector<146x192xf32> to vector<144x64xf32>
    %186 = arith.addf %184, %185 : vector<144x64xf32>
    %c162_96 = arith.constant 162 : index
    %c0_97 = arith.constant 0 : index
    %187 = vector.load %arg7[%c162_96, %c0_97] : memref<342x64xf32, #tpu.memory_space<vmem>>, vector<146x64xf32>
    %c1_98 = arith.constant 1 : index
    %c0_99 = arith.constant 0 : index
    %c0_100 = arith.constant 0 : index
    %188 = vector.load %arg4[%c1_98, %c0_99, %c0_100] : memref<3x64x192xf32, #tpu.memory_space<vmem>>, vector<1x64x192xf32>
    %189 = vector.shape_cast %188 : vector<1x64x192xf32> to vector<64x192xf32>
    %cst_101 = arith.constant dense<0.000000e+00> : vector<146x192xf32>
    %190 = tpu.matmul %187, %189, %cst_101 {dimension_numbers = #tpu.dot_dimension_numbers<[1], [0], [0], [1], [0, 0, 1, 1], [], []>} : vector<146x64xf32>, vector<64x192xf32>, vector<146x192xf32> -> vector<146x192xf32>
    %191 = vector.extract_strided_slice %190 {offsets = [0, 0], sizes = [144, 64], strides = [1, 1]} : vector<146x192xf32> to vector<144x64xf32>
    %192 = arith.addf %186, %191 : vector<144x64xf32>
    %193 = vector.extract_strided_slice %190 {offsets = [1, 64], sizes = [144, 64], strides = [1, 1]} : vector<146x192xf32> to vector<144x64xf32>
    %194 = arith.addf %192, %193 : vector<144x64xf32>
    %195 = vector.extract_strided_slice %190 {offsets = [2, 128], sizes = [144, 64], strides = [1, 1]} : vector<146x192xf32> to vector<144x64xf32>
    %196 = arith.addf %194, %195 : vector<144x64xf32>
    %c180_102 = arith.constant 180 : index
    %c0_103 = arith.constant 0 : index
    %197 = vector.load %arg7[%c180_102, %c0_103] : memref<342x64xf32, #tpu.memory_space<vmem>>, vector<146x64xf32>
    %c2_104 = arith.constant 2 : index
    %c0_105 = arith.constant 0 : index
    %c0_106 = arith.constant 0 : index
    %198 = vector.load %arg4[%c2_104, %c0_105, %c0_106] : memref<3x64x192xf32, #tpu.memory_space<vmem>>, vector<1x64x192xf32>
    %199 = vector.shape_cast %198 : vector<1x64x192xf32> to vector<64x192xf32>
    %cst_107 = arith.constant dense<0.000000e+00> : vector<146x192xf32>
    %200 = tpu.matmul %197, %199, %cst_107 {dimension_numbers = #tpu.dot_dimension_numbers<[1], [0], [0], [1], [0, 0, 1, 1], [], []>} : vector<146x64xf32>, vector<64x192xf32>, vector<146x192xf32> -> vector<146x192xf32>
    %201 = vector.extract_strided_slice %200 {offsets = [0, 0], sizes = [144, 64], strides = [1, 1]} : vector<146x192xf32> to vector<144x64xf32>
    %202 = arith.addf %196, %201 : vector<144x64xf32>
    %203 = vector.extract_strided_slice %200 {offsets = [1, 64], sizes = [144, 64], strides = [1, 1]} : vector<146x192xf32> to vector<144x64xf32>
    %204 = arith.addf %202, %203 : vector<144x64xf32>
    %205 = vector.extract_strided_slice %200 {offsets = [2, 128], sizes = [144, 64], strides = [1, 1]} : vector<146x192xf32> to vector<144x64xf32>
    %206 = arith.addf %204, %205 : vector<144x64xf32>
    %c0_108 = arith.constant 0 : index
    %c0_109 = arith.constant 0 : index
    %207 = vector.load %arg5[%c0_108, %c0_109] : memref<1x64xf32, #tpu.memory_space<vmem>>, vector<1x64xf32>
    %208 = vector.broadcast %207 : vector<1x64xf32> to vector<144x64xf32>
    %209 = arith.addf %206, %208 : vector<144x64xf32>
    %c0_110 = arith.constant 0 : index
    %c163_111 = arith.constant 163 : index
    %c0_112 = arith.constant 0 : index
    %210 = vector.load %arg1[%c0_110, %c163_111, %c0_112] : memref<1x342x64xf32, #tpu.memory_space<vmem>>, vector<1x144x64xf32>
    %211 = vector.shape_cast %210 : vector<1x144x64xf32> to vector<144x64xf32>
    %212 = arith.addf %209, %211 : vector<144x64xf32>
    %cst_113 = arith.constant 0.000000e+00 : f32
    %213 = vector.broadcast %cst_113 : f32 to vector<144x64xf32>
    %214 = arith.maximumf %212, %213 : vector<144x64xf32>
    %c0_114 = arith.constant 0 : index
    %c144_115 = arith.constant 144 : index
    %c0_116 = arith.constant 0 : index
    %215 = vector.load %arg6[%c0_114, %c144_115, %c0_116] : memref<1x288x64xf32, #tpu.memory_space<vmem>>, vector<1x144x64xf32>
    %216 = vector.shape_cast %215 : vector<1x144x64xf32> to vector<144x64xf32>
    %217 = vector.shape_cast %214 : vector<144x64xf32> to vector<1x144x64xf32>
    tpu.vector_store %arg6[%c0_114, %c144_115, %c0_116], %217 {strides = array<i32>} : memref<1x288x64xf32, #tpu.memory_space<vmem>>, vector<1x144x64xf32>,
    return
  }
  func.func @transform_0(%arg0: i32) -> (i32, i32, i32) {
    %c0_i32 = arith.constant 0 : i32
    %c0_i32_0 = arith.constant 0 : i32
    %c0_i32_1 = arith.constant 0 : i32
    return %arg0, %c0_i32, %c0_i32_0 : i32, i32, i32
  }
  func.func @transform_1(%arg0: i32) -> (i32, i32, i32) {
    %c0_i32 = arith.constant 0 : i32
    %c0_i32_0 = arith.constant 0 : i32
    %c0_i32_1 = arith.constant 0 : i32
    %c0_i32_2 = arith.constant 0 : i32
    return %c0_i32, %c0_i32_0, %c0_i32_1 : i32, i32, i32
  }
  func.func @transform_2(%arg0: i32) -> (i32, i32) {
    %c0_i32 = arith.constant 0 : i32
    %c0_i32_0 = arith.constant 0 : i32
    %c0_i32_1 = arith.constant 0 : i32
    return %c0_i32, %c0_i32_0 : i32, i32
  }
  func.func @transform_3(%arg0: i32) -> (i32, i32, i32) {
    %c0_i32 = arith.constant 0 : i32
    %c0_i32_0 = arith.constant 0 : i32
    %c0_i32_1 = arith.constant 0 : i32
    %c0_i32_2 = arith.constant 0 : i32
    return %c0_i32, %c0_i32_0, %c0_i32_1 : i32, i32, i32
  }
  func.func @transform_4(%arg0: i32) -> (i32, i32) {
    %c0_i32 = arith.constant 0 : i32
    %c0_i32_0 = arith.constant 0 : i32
    %c0_i32_1 = arith.constant 0 : i32
    return %c0_i32, %c0_i32_0 : i32, i32
  }
  func.func @transform_5(%arg0: i32) -> (i32, i32, i32) {
    %c0_i32 = arith.constant 0 : i32
    %c0_i32_0 = arith.constant 0 : i32
    %c0_i32_1 = arith.constant 0 : i32
    return %arg0, %c0_i32, %c0_i32_0 : i32, i32, i32
  }
}

</mosaic_0001>

<bundles_post_ra>
// kernel: tpu_custom_call.1
= control target key start
LH: loop header
LB: loop body
LE: loop exit
PB: predicated region body
PF: predicated region fallthrough
CT: control target
= control target key end

     0   :  { %s7973_s18 = smov 0   ;;  %s13978_s0 = inlined_call_operand.vmem [shape: f32[2,342,64], index: 0, kind: input, shape index: {}]   ;;  %s13979_s1 = inlined_call_operand.vmem [shape: f32[3,64,192], index: 1, kind: input, shape index: {}]   ;;  %s13980_s2 = inlined_call_operand.vmem [shape: f32[1,64], index: 2, kind: input, shape index: {}]   ;;  %s13981_s3 = inlined_call_operand.vmem [shape: f32[3,64,192], index: 3, kind: input, shape index: {}]   ;;  %s13982_s4 = inlined_call_operand.vmem [shape: f32[1,64], index: 4, kind: input, shape index: {}]   ;;  %s13983_s5 = inlined_call_operand.vmem [shape: f32[2,288,64], index: 5, kind: output, shape index: {}]  }
   0x1 LB: > { %s7477_s19 = sadd.s32 4294967295, %s7939_s18   ;;  %p7481_p0 = scmp.ge.s32.totalorder %s7939_s18, 1  ;;  %s7939_s18 = sphi %s7973_s18, %s15_s18  }
   0x2   : > { %p187_p1 = scmp.lt.s32.totalorder %s7939_s18, 3 }
   0x4   : > { %p188_p2 = pnand %p7481_p0, %p187_p1 }
   0x6   : > { %191 = sbr.rel (%p188_p2) target bundleno = 1037 (0x40d), region = 40 }
   0xb   : > { %v7984_v0 = vld [vmem:[%s13979_s1 + $0x78] sm:$0xff]  ;;  %v7994_v2 = vld [vmem:[%s13979_s1 + $0x70] sm:$0xff]  ;;  %p7998_p3 = scmp.lt.s32.totalorder %s7477_s19, 1  ;;  %vm14098_vm0 = vcmask 523264   ;;  %v8012_v4 = vld [vmem:[%s13979_s1 + $0x68] sm:$0xff]  ;;  %v13985_v6 = vmov 0.0  }
   0xc   : > { %v7989_v1 = vld [vmem:[%s13979_s1 + $0xf8] sm:$0xff]  ;;  %343 = vmatprep.subr.mxu0 %v7984_v0  ;;  %v8007_v3 = vld [vmem:[%s13979_s1 + $0xf0] sm:$0xff]  ;;  %v8017_v5 = vld [vmem:[%s13979_s1 + $0xe8] sm:$0xff]  ;;  %226 = vst.msk [vmem:[#allocation2] sm:$0xff] %vm14098_vm0, %v13985_v6  ;;  %391 = vmatprep.mubr.f32.mxu0 %v13985_v6  ;;  %vm543_vm1 = vcmask 1046528   ;;  %vm14100_vm2 = vcmask 1045504  }
   0xd   : > { %855 = vmatprep.subr.mxu1 %v7989_v1  ;;  %227 = vst.msk [vmem:[#allocation2 + $0x8] sm:$0xff] %vm14098_vm0, %v13985_v6  ;;  %230 = vst.msk [vmem:[#allocation2 + $0x133] sm:$0xff] %vm14098_vm0, %v13985_v6  ;;  %344 = vmatpush1.msra.mxu0 %v7994_v2  ;;  %v8034_v7 = vld [vmem:[%s13979_s1 + $0x60] sm:$0xff]  ;;  %v8044_v9 = vld [vmem:[%s13979_s1 + $0x58] sm:$0xff]  ;;  %s15864_s19 = smov (!%p7998_p3, %s7477_s19), 1  ;;  %s7942_s16 = smov 64  }
   0xe   : > { %231 = vst.msk [vmem:[#allocation2 + $0x13b] sm:$0xff] %vm14098_vm0, %v13985_v6  ;;  %232 = vst.msk [vmem:[#allocation2 + $0x143] sm:$0xff] %vm14098_vm0, %v13985_v6  ;;  %856 = vmatpush1.msra.mxu1 %v8007_v3  ;;  %v8039_v8 = vld [vmem:[%s13979_s1 + $0xe0] sm:$0xff]  ;;  %345 = vmatprep.subr.mxu0 %v8012_v4  ;;  %v8051_v10 = vld [vmem:[%s13979_s1 + $0xd8] sm:$0xff]  ;;  %s7846_s17 = smul.u32 344, %s15864_s19  ;;  %vm228_vm3 = vcmask 518144  }
   0xf   : > { %857 = vmatprep.subr.mxu1 %v8017_v5  ;;  %v8056_v11 = vld [vmem:[%s13979_s1 + $0x50] sm:$0xff]  ;;  %346 = vmatpush1.msra.mxu0 %v8034_v7  ;;  %v8068_v13 = vld [vmem:[%s13979_s1 + $0x48] sm:$0xff]  ;;  %v8086_v15 = vld [vmem:[%s13979_s1 + $0x40] sm:$0xff]  ;;  %s7847_s21 = smul.u32 288, %s15864_s19 }
  0x10   : > { %v8061_v12 = vld [vmem:[%s13979_s1 + $0xd0] sm:$0xff]  ;;  %858 = vmatpush1.msra.mxu1 %v8039_v8  ;;  %v8073_v14 = vld [vmem:[%s13979_s1 + $0xc8] sm:$0xff]  ;;  %347 = vmatprep.subr.mxu0 %v8044_v9  ;;  %v8091_v16 = vld [vmem:[%s13979_s1 + $0xc0] sm:$0xff]  ;;  %s8181_s13 = scalar_lea.vmem %s13978_s0, %s7846_s17 }
  0x11   : > { %859 = vmatprep.subr.mxu1 %v8051_v10  ;;  %348 = vmatpush1.msra.mxu0 %v8056_v11  ;;  %v8098_v17 = vld [vmem:[%s13979_s1 + $0x38] sm:$0xff]  ;;  %v8110_v19 = vld [vmem:[%s13979_s1 + $0x30] sm:$0xff]  ;;  %v8122_v21 = vld [vmem:[%s13979_s1 + $0x28] sm:$0xff]  ;;  %s13498_s23 = scalar_lea.vmem %s13983_s5, %s7847_s21 }
  0x12   : > { %860 = vmatpush1.msra.mxu1 %v8061_v12  ;;  %v8103_v18 = vld [vmem:[%s13979_s1 + $0xb8] sm:$0xff]  ;;  %349 = vmatprep.subr.mxu0 %v8068_v13  ;;  %v8115_v20 = vld [vmem:[%s13979_s1 + $0xb0] sm:$0xff]  ;;  %v8127_v22 = vld [vmem:[%s13979_s1 + $0xa8] sm:$0xff] }
  0x13   : > { %861 = vmatprep.subr.mxu1 %v8073_v14  ;;  %350 = vmatpush1.msra.mxu0 %v8086_v15  ;;  %v8135_v23 = vld [vmem:[%s13979_s1 + $0x20] sm:$0xff]  ;;  %v8147_v25 = vld [vmem:[%s13979_s1 + $0x18] sm:$0xff]  ;;  %v8159_v27 = vld [vmem:[%s13979_s1 + $0x10] sm:$0xff] }
  0x14   : > { %862 = vmatpush1.msra.mxu1 %v8091_v16  ;;  %351 = vmatprep.subr.mxu0 %v8098_v17  ;;  %v8140_v24 = vld [vmem:[%s13979_s1 + $0xa0] sm:$0xff]  ;;  %v8152_v26 = vld [vmem:[%s13979_s1 + $0x98] sm:$0xff]  ;;  %v8164_v28 = vld [vmem:[%s13979_s1 + $0x90] sm:$0xff] }
  0x15   : > { %863 = vmatprep.subr.mxu1 %v8103_v18  ;;  %352 = vmatpush1.msra.mxu0 %v8110_v19  ;;  %v8171_v29 = vld [vmem:[%s13979_s1 + $0x8] sm:$0xff]  ;;  %v8188_v31 = vld [vmem:[%s13979_s1] sm:$0xff]  ;;  %v746_v34 = vld [vmem:[%s8181_s13 + $0x12] sm:$0xff] }
  0x16   : > { %864 = vmatpush1.msra.mxu1 %v8115_v20  ;;  %353 = vmatprep.subr.mxu0 %v8122_v21  ;;  %v8176_v30 = vld [vmem:[%s13979_s1 + $0x88] sm:$0xff]  ;;  %v8195_v32 = vld [vmem:[%s13979_s1 + $0x80] sm:$0xff]  ;;  %v8206_v35 = vld [vmem:[%s13979_s1 + $0x178] sm:$0xff] }
  0x17   : > { %865 = vmatprep.subr.mxu1 %v8127_v22  ;;  %354 = vmatpush1.msra.mxu0 %v8135_v23  ;;  %v235_v33 = vld [vmem:[%s8181_s13] sm:$0xff]  ;;  %v8213_v36 = vld [vmem:[%s13979_s1 + $0x170] sm:$0xff]  ;;  %v8220_v37 = vld [vmem:[%s13979_s1 + $0x168] sm:$0xff] }
  0x18   : > { %866 = vmatpush1.msra.mxu1 %v8140_v24  ;;  %355 = vmatprep.subr.mxu0 %v8147_v25  ;;  %v236_v38 = vld [vmem:[%s8181_s13 + $0x8] sm:$0xff]  ;;  %v747_v39 = vld [vmem:[%s8181_s13 + $0x1a] sm:$0xff]  ;;  %v237_v42 = vld [vmem:[%s8181_s13 + $0x10] sm:$0xff] }
  0x19   : > { %867 = vmatprep.subr.mxu1 %v8152_v26  ;;  %356 = vmatpush1.msra.mxu0 %v8159_v27  ;;  %v8233_v40 = vld [vmem:[%s13979_s1 + $0x160] sm:$0xff]  ;;  %v8240_v41 = vld [vmem:[%s13979_s1 + $0x158] sm:$0xff]  ;;  %v8253_v44 = vld [vmem:[%s13979_s1 + $0x150] sm:$0xff] }
  0x1a   : > { %868 = vmatpush1.msra.mxu1 %v8164_v28  ;;  %357 = vmatprep.subr.mxu0 %v8171_v29  ;;  %v748_v43 = vld [vmem:[%s8181_s13 + $0x22] sm:$0xff]  ;;  %v238_v46 = vld [vmem:[%s8181_s13 + $0x18] sm:$0xff]  ;;  %v749_v47 = vld [vmem:[%s8181_s13 + $0x2a] sm:$0xff] }
  0x1b   : > { %869 = vmatprep.subr.mxu1 %v8176_v30  ;;  %358 = vmatpush1.msra.mxu0 %v8188_v31  ;;  %v8260_v45 = vld [vmem:[%s13979_s1 + $0x148] sm:$0xff]  ;;  %v8273_v48 = vld [vmem:[%s13979_s1 + $0x140] sm:$0xff]  ;;  %v8280_v49 = vld [vmem:[%s13979_s1 + $0x138] sm:$0xff] }
  0x1c   : > { %870 = vmatpush1.msra.mxu1 %v8195_v32  ;;  %903 = vmatprep.mubr.f32.mxu1 %v13985_v6  ;;  %v239_v50 = vld [vmem:[%s8181_s13 + $0x20] sm:$0xff]  ;;  %v750_v51 = vld [vmem:[%s8181_s13 + $0x32] sm:$0xff]  ;;  %v8300_v53 = vld [vmem:[%s13979_s1 + $0x128] sm:$0xff] }
  0x1d   : > { %7484 = vmatmul.mubr.msk.f32.vlgmr.msra.gmra.mxu0 %vm14098_vm0, %v235_v33  ;;  %7519 = vmatmul.mubr.msk.f32.vlgmr.msra.gmra.mxu1 %vm14098_vm0, %v746_v34  ;;  %v8293_v52 = vld [vmem:[%s13979_s1 + $0x130] sm:$0xff]  ;;  %v240_v54 = vld [vmem:[%s8181_s13 + $0x28] sm:$0xff]  ;;  %v751_v55 = vld [vmem:[%s8181_s13 + $0x3a] sm:$0xff] }
  0x1e   : > { %1365 = vmatprep.subr.mxu0 %v8206_v35  ;;  %397 = vmatprep.mubr.f32.mxu0 %v13985_v6  ;;  %v8313_v56 = vld [vmem:[%s13979_s1 + $0x120] sm:$0xff]  ;;  %v8320_v57 = vld [vmem:[%s13979_s1 + $0x118] sm:$0xff]  ;;  %v241_v58 = vld [vmem:[%s8181_s13 + $0x30] sm:$0xff] }
  0x1f   : > { %1366 = vmatpush1.msra.mxu0 %v8213_v36  ;;  %909 = vmatprep.mubr.f32.mxu1 %v13985_v6  ;;  %v752_v59 = vld [vmem:[%s8181_s13 + $0x42] sm:$0xff]  ;;  %v8333_v60 = vld [vmem:[%s13979_s1 + $0x110] sm:$0xff]  ;;  %v242_v62 = vld [vmem:[%s8181_s13 + $0x38] sm:$0xff] }
  0x20   : > { %2314 = vmatprep.subr.mxu1 %v7984_v0  ;;  %1367 = vmatprep.subr.mxu0 %v8220_v37  ;;  %v8340_v61 = vld [vmem:[%s13979_s1 + $0x108] sm:$0xff]  ;;  %v8353_v0 = vld [vmem:[%s13979_s1 + $0x100] sm:$0xff]  ;;  %v762_v34 = vld [vmem:[%s8181_s13 + $0x92] sm:$0xff] }
  0x21   : > { %7485 = vmatmul.mubr.msk.f32.gmra.mxu0 %vm14098_vm0, %v236_v38  ;;  %7520 = vmatmul.mubr.msk.f32.gmra.mxu1 %vm14098_vm0, %v747_v39  ;;  %v753_v63 = vld [vmem:[%s8181_s13 + $0x4a] sm:$0xff]  ;;  %v251_v33 = vld [vmem:[%s8181_s13 + $0x80] sm:$0xff] }
  0x22   : > { %403 = vmatprep.mubr.f32.mxu0 %v13985_v6  ;;  %915 = vmatprep.mubr.f32.mxu1 %v13985_v6  ;;  %v763_v38 = vld [vmem:[%s8181_s13 + $0x9a] sm:$0xff]  ;;  %v253_v39 = vld [vmem:[%s8181_s13 + $0x90] sm:$0x3] }
  0x23   : > { %2315 = vmatpush1.msra.mxu1 %v7994_v2  ;;  %1368 = vmatpush1.msra.mxu0 %v8233_v40  ;;  %v243_v2 = vld [vmem:[%s8181_s13 + $0x40] sm:$0xff] }
  0x24   : > { %2316 = vmatprep.subr.mxu1 %v8012_v4  ;;  %1369 = vmatprep.subr.mxu0 %v8240_v41  ;;  %v754_v4 = vld [vmem:[%s8181_s13 + $0x52] sm:$0xff] }
  0x25   : > { %7486 = vmatmul.mubr.msk.f32.gmra.mxu0 %vm14098_vm0, %v237_v42  ;;  %7521 = vmatmul.mubr.msk.f32.gmra.mxu1 %vm14098_vm0, %v748_v43  ;;  %v764_v42 = vld [vmem:[%s8181_s13 + $0xa2] sm:$0x3]  ;;  %v1256_v43 = vld [vmem:[%s8181_s13 + $0x24] sm:$0xff] }
  0x26   : > { %409 = vmatprep.mubr.f32.mxu0 %v13985_v6  ;;  %921 = vmatprep.mubr.f32.mxu1 %v13985_v6 }
  0x27   : > { %2317 = vmatpush1.msra.mxu1 %v8034_v7  ;;  %1370 = vmatpush1.msra.mxu0 %v8253_v44  ;;  %v244_v7 = vld [vmem:[%s8181_s13 + $0x48] sm:$0xff] }
  0x28   : > { %2318 = vmatprep.subr.mxu1 %v8044_v9  ;;  %1371 = vmatprep.subr.mxu0 %v8260_v45  ;;  %v755_v9 = vld [vmem:[%s8181_s13 + $0x5a] sm:$0xff] }
  0x29   : > { %7487 = vmatmul.mubr.msk.f32.gmra.mxu0 %vm14098_vm0, %v238_v46  ;;  %7522 = vmatmul.mubr.msk.f32.gmra.mxu1 %vm14098_vm0, %v749_v47  ;;  %v2206_v46 = vld [vmem:[%s8181_s13 + $0x90] sm:$0xff] }
  0x2a   : > { %415 = vmatprep.mubr.f32.mxu0 %v13985_v6  ;;  %927 = vmatprep.mubr.f32.mxu1 %v13985_v6  ;;  %v1257_v47 = vld [vmem:[%s8181_s13 + $0x2c] sm:$0xff] }
  0x2b   : > { %2319 = vmatpush1.msra.mxu1 %v8056_v11  ;;  %1372 = vmatpush1.msra.mxu0 %v8273_v48  ;;  %v756_v11 = vld [vmem:[%s8181_s13 + $0x62] sm:$0xff] }
  0x2c   : > { %2320 = vmatprep.subr.mxu1 %v8068_v13  ;;  %1373 = vmatprep.subr.mxu0 %v8280_v49  ;;  %v246_v13 = vld [vmem:[%s8181_s13 + $0x58] sm:$0xff] }
  0x2d   : > { %7488 = vmatmul.mubr.msk.f32.gmra.mxu0 %vm14098_vm0, %v239_v50  ;;  %7523 = vmatmul.mubr.msk.f32.gmra.mxu1 %vm14098_vm0, %v750_v51  ;;  %v2207_v50 = vld [vmem:[%s8181_s13 + $0x98] sm:$0xff]  ;;  %v2208_v51 = vld [vmem:[%s8181_s13 + $0xa0] sm:$0xff] }
  0x2e   : > { %421 = vmatprep.mubr.f32.mxu0 %v13985_v6  ;;  %933 = vmatprep.mubr.f32.mxu1 %v13985_v6 }
  0x2f   : > { %2321 = vmatpush1.msra.mxu1 %v8086_v15  ;;  %1374 = vmatpush1.msra.mxu0 %v8293_v52  ;;  %v757_v15 = vld [vmem:[%s8181_s13 + $0x6a] sm:$0xff] }
  0x30   : > { %2322 = vmatprep.subr.mxu1 %v8098_v17  ;;  %1375 = vmatprep.subr.mxu0 %v8300_v53  ;;  %v247_v17 = vld [vmem:[%s8181_s13 + $0x60] sm:$0xff] }
  0x31   : > { %7489 = vmatmul.mubr.msk.f32.gmra.mxu0 %vm14098_vm0, %v240_v54  ;;  %7524 = vmatmul.mubr.msk.f32.gmra.mxu1 %vm14098_vm0, %v751_v55  ;;  %v1271_v54 = vld [vmem:[%s8181_s13 + $0x9c] sm:$0xff]  ;;  %v2221_v55 = vld [vmem:[%s8181_s13 + $0x108] sm:$0xff] }
  0x32   : > { %427 = vmatprep.mubr.f32.mxu0 %v13985_v6  ;;  %939 = vmatprep.mubr.f32.mxu1 %v13985_v6 }
  0x33   : > { %2323 = vmatpush1.msra.mxu1 %v8110_v19  ;;  %1376 = vmatpush1.msra.mxu0 %v8313_v56  ;;  %v758_v19 = vld [vmem:[%s8181_s13 + $0x72] sm:$0xff] }
  0x34   : > { %2324 = vmatprep.subr.mxu1 %v8122_v21  ;;  %1377 = vmatprep.subr.mxu0 %v8320_v57  ;;  %v248_v21 = vld [vmem:[%s8181_s13 + $0x68] sm:$0xff] }
  0x35   : > { %7490 = vmatmul.mubr.msk.f32.gmra.mxu0 %vm14098_vm0, %v241_v58  ;;  %7525 = vmatmul.mubr.msk.f32.gmra.mxu1 %vm14098_vm0, %v752_v59  ;;  %v4206_v58 = vld [vmem:[%s13981_s3 + $0x78] sm:$0xff]  ;;  %v1273_v59 = vld [vmem:[%s8181_s13 + $0xac] sm:$0xff] }
  0x36   : > { %433 = vmatprep.mubr.f32.mxu0 %v13985_v6  ;;  %945 = vmatprep.mubr.f32.mxu1 %v13985_v6 }
  0x37   : > { %2325 = vmatpush1.msra.mxu1 %v8135_v23  ;;  %1378 = vmatpush1.msra.mxu0 %v8333_v60  ;;  %v759_v23 = vld [vmem:[%s8181_s13 + $0x7a] sm:$0xff] }
  0x38   : > { %2326 = vmatprep.subr.mxu1 %v8147_v25  ;;  %1379 = vmatprep.subr.mxu0 %v8340_v61  ;;  %v249_v25 = vld [vmem:[%s8181_s13 + $0x70] sm:$0xff] }
  0x39   : > { %7491 = vmatmul.mubr.msk.f32.gmra.mxu0 %vm14098_vm0, %v242_v62  ;;  %7526 = vmatmul.mubr.msk.f32.gmra.mxu1 %vm14098_vm0, %v753_v63  ;;  %v2224_v62 = vld [vmem:[%s8181_s13 + $0x120] sm:$0x3]  ;;  %v2715_v63 = vld [vmem:[%s8181_s13 + $0xa2] sm:$0xff] }
  0x3a   : > { %439 = vmatprep.mubr.f32.mxu0 %v13985_v6  ;;  %951 = vmatprep.mubr.f32.mxu1 %v13985_v6 }
  0x3b   : > { %2327 = vmatpush1.msra.mxu1 %v8159_v27  ;;  %1380 = vmatpush1.msra.mxu0 %v8353_v0  ;;  %v760_v27 = vld [vmem:[%s8181_s13 + $0x82] sm:$0xff] }
  0x3c   : > { %2328 = vmatprep.subr.mxu1 %v8171_v29  ;;  %2823 = vmatprep.subr.mxu0 %v7989_v1  ;;  %v245_v1 = vld [vmem:[%s8181_s13 + $0x50] sm:$0xff]  ;;  %v250_v29 = vld [vmem:[%s8181_s13 + $0x78] sm:$0xff] }
  0x3d   : > { %7492 = vmatmul.mubr.msk.f32.gmra.mxu0 %vm14098_vm0, %v243_v2  ;;  %7527 = vmatmul.mubr.msk.f32.gmra.mxu1 %vm14098_vm0, %v754_v4  ;;  %v4205_v2 = vld [vmem:[%s13981_s3 + $0x70] sm:$0xff]  ;;  %v4204_v4 = vld [vmem:[%s13981_s3 + $0x68] sm:$0xff] }
  0x3e   : > { %445 = vmatprep.mubr.f32.mxu0 %v13985_v6  ;;  %957 = vmatprep.mubr.f32.mxu1 %v13985_v6 }
  0x3f   : > { %2329 = vmatpush1.msra.mxu1 %v8188_v31  ;;  %v761_v31 = vld [vmem:[%s8181_s13 + $0x8a] sm:$0xff] }
  0x40   : > { %3332 = vmatprep.subr.mxu1 %v8206_v35  ;;  %v252_v35 = vld [vmem:[%s8181_s13 + $0x88] sm:$0xff] }
  0x41   : > { %7493 = vmatmul.mubr.msk.f32.gmra.mxu0 %vm14098_vm0, %v244_v7  ;;  %7528 = vmatmul.mubr.msk.f32.gmra.mxu1 %vm14098_vm0, %v755_v9  ;;  %v2716_v7 = vld [vmem:[%s8181_s13 + $0xaa] sm:$0xff]  ;;  %v3225_v9 = vld [vmem:[%s8181_s13 + $0xbc] sm:$0xff] }
  0x42   : > { %451 = vmatprep.mubr.f32.mxu0 %v13985_v6  ;;  %963 = vmatprep.mubr.f32.mxu1 %v13985_v6 }
  0x45   : > { %7494 = vmatmul.mubr.msk.f32.gmra.mxu0 %vm14098_vm0, %v245_v1  ;;  %7529 = vmatmul.mubr.msk.f32.gmra.mxu1 %vm14098_vm0, %v756_v11  ;;  %v4203_v1 = vld [vmem:[%s13981_s3 + $0x60] sm:$0xff]  ;;  %v4202_v11 = vld [vmem:[%s13981_s3 + $0x58] sm:$0xff] }
  0x46   : > { %457 = vmatprep.mubr.f32.mxu0 %v13985_v6  ;;  %969 = vmatprep.mubr.f32.mxu1 %v13985_v6 }
  0x49   : > { %7495 = vmatmul.mubr.msk.f32.gmra.mxu0 %vm14098_vm0, %v246_v13  ;;  %7530 = vmatmul.mubr.msk.f32.gmra.mxu1 %vm14098_vm0, %v757_v15  ;;  %v2717_v13 = vld [vmem:[%s8181_s13 + $0xb2] sm:$0xff]  ;;  %v3226_v15 = vld [vmem:[%s8181_s13 + $0xc4] sm:$0xff] }
  0x4a   : > { %463 = vmatprep.mubr.f32.mxu0 %v13985_v6  ;;  %975 = vmatprep.mubr.f32.mxu1 %v13985_v6 }
  0x4d   : > { %7496 = vmatmul.mubr.msk.f32.gmra.mxu0 %vm14098_vm0, %v247_v17  ;;  %7531 = vmatmul.mubr.msk.f32.gmra.mxu1 %vm14098_vm0, %v758_v19  ;;  %v4201_v17 = vld [vmem:[%s13981_s3 + $0x50] sm:$0xff]  ;;  %v4200_v19 = vld [vmem:[%s13981_s3 + $0x48] sm:$0xff] }
  0x4e   : > { %469 = vmatprep.mubr.f32.mxu0 %v13985_v6  ;;  %981 = vmatprep.mubr.f32.mxu1 %v13985_v6 }
  0x51   : > { %7497 = vmatmul.mubr.msk.f32.gmra.mxu0 %vm14098_vm0, %v248_v21  ;;  %7532 = vmatmul.mubr.msk.f32.gmra.mxu1 %vm14098_vm0, %v759_v23  ;;  %v2718_v21 = vld [vmem:[%s8181_s13 + $0xba] sm:$0xff]  ;;  %v3227_v23 = vld [vmem:[%s8181_s13 + $0xcc] sm:$0xff] }
  0x52   : > { %475 = vmatprep.mubr.f32.mxu0 %v13985_v6  ;;  %987 = vmatprep.mubr.f32.mxu1 %v13985_v6 }
  0x55   : > { %7498 = vmatmul.mubr.msk.f32.gmra.mxu0 %vm14098_vm0, %v249_v25  ;;  %7533 = vmatmul.mubr.msk.f32.gmra.mxu1 %vm14098_vm0, %v760_v27  ;;  %v4199_v25 = vld [vmem:[%s13981_s3 + $0x40] sm:$0xff]  ;;  %v4198_v27 = vld [vmem:[%s13981_s3 + $0x38] sm:$0xff] }
  0x56   : > { %481 = vmatprep.mubr.f32.mxu0 %v13985_v6  ;;  %993 = vmatprep.mubr.f32.mxu1 %v13985_v6 }
  0x59   : > { %7499 = vmatmul.mubr.msk.f32.gmra.mxu0 %vm14098_vm0, %v250_v29  ;;  %7534 = vmatmul.mubr.msk.f32.gmra.mxu1 %vm14098_vm0, %v761_v31  ;;  %v2719_v29 = vld [vmem:[%s8181_s13 + $0xc2] sm:$0xff]  ;;  %v3228_v31 = vld [vmem:[%s8181_s13 + $0xd4] sm:$0xff] }
  0x5a   : > { %487 = vmatprep.mubr.f32.mxu0 %v13985_v6  ;;  %999 = vmatprep.mubr.f32.mxu1 %v13985_v6 }
  0x5d   : > { %7500 = vmatmul.mubr.msk.f32.gmra.mxu0 %vm14098_vm0, %v251_v33  ;;  %7535 = vmatmul.mubr.msk.f32.gmra.mxu1 %vm14098_vm0, %v762_v34  ;;  %v4197_v33 = vld [vmem:[%s13981_s3 + $0x30] sm:$0xff]  ;;  %v4196_v34 = vld [vmem:[%s13981_s3 + $0x28] sm:$0xff] }
  0x5e   : > { %493 = vmatprep.mubr.f32.mxu0 %v13985_v6  ;;  %1005 = vmatprep.mubr.f32.mxu1 %v13985_v6 }
  0x61   : > { %7501 = vmatmul.mubr.msk.f32.gmra.mxu0 %vm14098_vm0, %v252_v35  ;;  %7536 = vmatmul.mubr.msk.f32.gmra.mxu1 %vm14098_vm0, %v763_v38  ;;  %v2720_v35 = vld [vmem:[%s8181_s13 + $0xca] sm:$0xff]  ;;  %v3229_v38 = vld [vmem:[%s8181_s13 + $0xdc] sm:$0xff] }
  0x62   : > { %499 = vmatprep.mubr.f32.mxu0 %v13985_v6  ;;  %1011 = vmatprep.mubr.f32.mxu1 %v13985_v6 }
  0x65   : > { %7502 = vmatmul.mubr.msk.f32.gmra.mxu0 %vm14098_vm0, %v253_v39  ;;  %7537 = vmatmul.mubr.msk.f32.gmra.mxu1 %vm14098_vm0, %v764_v42  ;;  %v4195_v39 = vld [vmem:[%s13981_s3 + $0x20] sm:$0xff]  ;;  %v4194_v42 = vld [vmem:[%s13981_s3 + $0x18] sm:$0xff] }
  0x66   : > { %1413 = vmatprep.mubr.f32.mxu0 %v13985_v6  ;;  %2362 = vmatprep.mubr.f32.mxu1 %v13985_v6 }
  0x69   : > { %7554 = vmatmul.mubr.msk.f32.vlgmr.msra.gmra.mxu0 %vm14098_vm0, %v1256_v43  ;;  %7574 = vmatmul.mubr.msk.f32.vlgmr.msra.gmra.mxu1 %vm14098_vm0, %v2206_v46  ;;  %v2721_v43 = vld [vmem:[%s8181_s13 + $0xd2] sm:$0xff]  ;;  %v3230_v46 = vld [vmem:[%s8181_s13 + $0xe4] sm:$0xff] }
  0x6a   : > { %2824 = vmatpush1.msra.mxu0 %v8007_v3  ;;  %1419 = vmatprep.mubr.f32.mxu0 %v13985_v6  ;;  %v1258_v3 = vld [vmem:[%s8181_s13 + $0x34] sm:$0xff] }
  0x6b   : > { %2368 = vmatprep.mubr.f32.mxu1 %v13985_v6  ;;  %3333 = vmatpush1.msra.mxu1 %v8213_v36  ;;  %v2209_v36 = vld [vmem:[%s8181_s13 + $0xa8] sm:$0xff] }
  0x6c   : > { %2825 = vmatprep.subr.mxu0 %v8017_v5  ;;  %3334 = vmatprep.subr.mxu1 %v8220_v37  ;;  %v1259_v5 = vld [vmem:[%s8181_s13 + $0x3c] sm:$0xff] }
  0x6d   : > { %7555 = vmatmul.mubr.msk.f32.gmra.mxu0 %vm14098_vm0, %v1257_v47  ;;  %7575 = vmatmul.mubr.msk.f32.gmra.mxu1 %vm14098_vm0, %v2207_v50  ;;  %v2216_v37 = vld [vmem:[%s8181_s13 + $0xe0] sm:$0xff]  ;;  %v4193_v47 = vld [vmem:[%s13981_s3 + $0x10] sm:$0xff]  ;;  %v4192_v50 = vld [vmem:[%s13981_s3 + $0x8] sm:$0xff] }
  0x6e   : > { %1425 = vmatprep.mubr.f32.mxu0 %v13985_v6  ;;  %2374 = vmatprep.mubr.f32.mxu1 %v13985_v6 }
  0x6f   : > { %2826 = vmatpush1.msra.mxu0 %v8039_v8  ;;  %3335 = vmatpush1.msra.mxu1 %v8233_v40  ;;  %v1260_v8 = vld [vmem:[%s8181_s13 + $0x44] sm:$0xff]  ;;  %v1267_v40 = vld [vmem:[%s8181_s13 + $0x7c] sm:$0xff] }
  0x70   : > { %2827 = vmatprep.subr.mxu0 %v8051_v10  ;;  %3336 = vmatprep.subr.mxu1 %v8240_v41  ;;  %v2210_v10 = vld [vmem:[%s8181_s13 + $0xb0] sm:$0xff]  ;;  %v2217_v41 = vld [vmem:[%s8181_s13 + $0xe8] sm:$0xff] }
  0x71   : > { %7556 = vmatmul.mubr.msk.f32.gmra.mxu0 %vm14098_vm0, %v1258_v3  ;;  %7576 = vmatmul.mubr.msk.f32.gmra.mxu1 %vm14098_vm0, %v2208_v51  ;;  %v2722_v3 = vld [vmem:[%s8181_s13 + $0xda] sm:$0xff]  ;;  %v3231_v51 = vld [vmem:[%s8181_s13 + $0xec] sm:$0xff] }
  0x72   : > { %1431 = vmatprep.mubr.f32.mxu0 %v13985_v6  ;;  %2380 = vmatprep.mubr.f32.mxu1 %v13985_v6 }
  0x73   : > { %2828 = vmatpush1.msra.mxu0 %v8061_v12  ;;  %3337 = vmatpush1.msra.mxu1 %v8253_v44  ;;  %v1261_v12 = vld [vmem:[%s8181_s13 + $0x4c] sm:$0xff]  ;;  %v1268_v44 = vld [vmem:[%s8181_s13 + $0x84] sm:$0xff] }
  0x74   : > { %2829 = vmatprep.subr.mxu0 %v8073_v14  ;;  %3338 = vmatprep.subr.mxu1 %v8260_v45  ;;  %v2211_v14 = vld [vmem:[%s8181_s13 + $0xb8] sm:$0xff]  ;;  %v2218_v45 = vld [vmem:[%s8181_s13 + $0xf0] sm:$0xff] }
  0x75   : > { %7557 = vmatmul.mubr.msk.f32.gmra.mxu0 %vm14098_vm0, %v1259_v5  ;;  %7577 = vmatmul.mubr.msk.f32.gmra.mxu1 %vm14098_vm0, %v2209_v36  ;;  %v4191_v5 = vld [vmem:[%s13981_s3] sm:$0xff] }
  0x76   : > { %1437 = vmatprep.mubr.f32.mxu0 %v13985_v6  ;;  %2386 = vmatprep.mubr.f32.mxu1 %v13985_v6  ;;  %v2723_v36 = vld [vmem:[%s8181_s13 + $0xe2] sm:$0xff] }
  0x77   : > { %2830 = vmatpush1.msra.mxu0 %v8091_v16  ;;  %3339 = vmatpush1.msra.mxu1 %v8273_v48  ;;  %v1262_v16 = vld [vmem:[%s8181_s13 + $0x54] sm:$0xff]  ;;  %v1269_v48 = vld [vmem:[%s8181_s13 + $0x8c] sm:$0xff] }
  0x78   : > { %2831 = vmatprep.subr.mxu0 %v8103_v18  ;;  %3340 = vmatprep.subr.mxu1 %v8280_v49  ;;  %v2212_v18 = vld [vmem:[%s8181_s13 + $0xc0] sm:$0xff]  ;;  %v2219_v49 = vld [vmem:[%s8181_s13 + $0xf8] sm:$0xff] }
  0x79   : > { %7558 = vmatmul.mubr.msk.f32.gmra.mxu0 %vm14098_vm0, %v1260_v8  ;;  %7578 = vmatmul.mubr.msk.f32.gmra.mxu1 %vm14098_vm0, %v2210_v10  ;;  %v3232_v8 = vld [vmem:[%s8181_s13 + $0xf4] sm:$0xff]  ;;  %v2724_v10 = vld [vmem:[%s8181_s13 + $0xea] sm:$0xff] }
  0x7a   : > { %1443 = vmatprep.mubr.f32.mxu0 %v13985_v6  ;;  %2392 = vmatprep.mubr.f32.mxu1 %v13985_v6 }
  0x7b   : > { %2832 = vmatpush1.msra.mxu0 %v8115_v20  ;;  %3341 = vmatpush1.msra.mxu1 %v8293_v52  ;;  %v1263_v20 = vld [vmem:[%s8181_s13 + $0x5c] sm:$0xff]  ;;  %v1270_v52 = vld [vmem:[%s8181_s13 + $0x94] sm:$0xff] }
  0x7c   : > { %2833 = vmatprep.subr.mxu0 %v8127_v22  ;;  %3342 = vmatprep.subr.mxu1 %v8300_v53  ;;  %v2213_v22 = vld [vmem:[%s8181_s13 + $0xc8] sm:$0xff]  ;;  %v2220_v53 = vld [vmem:[%s8181_s13 + $0x100] sm:$0xff] }
  0x7d   : > { %7559 = vmatmul.mubr.msk.f32.gmra.mxu0 %vm14098_vm0, %v1261_v12  ;;  %7579 = vmatmul.mubr.msk.f32.gmra.mxu1 %vm14098_vm0, %v2211_v14  ;;  %v3233_v12 = vld [vmem:[%s8181_s13 + $0xfc] sm:$0xff]  ;;  %v2725_v14 = vld [vmem:[%s8181_s13 + $0xf2] sm:$0xff] }
  0x7e   : > { %1449 = vmatprep.mubr.f32.mxu0 %v13985_v6  ;;  %2398 = vmatprep.mubr.f32.mxu1 %v13985_v6 }
  0x7f   : > { %2834 = vmatpush1.msra.mxu0 %v8140_v24  ;;  %3343 = vmatpush1.msra.mxu1 %v8313_v56  ;;  %v1264_v24 = vld [vmem:[%s8181_s13 + $0x64] sm:$0xff] }
  0x80   : > { %2835 = vmatprep.subr.mxu0 %v8152_v26  ;;  %3344 = vmatprep.subr.mxu1 %v8320_v57  ;;  %v2214_v26 = vld [vmem:[%s8181_s13 + $0xd0] sm:$0xff]  ;;  %v1272_v56 = vld [vmem:[%s8181_s13 + $0xa4] sm:$0xff] }
  0x81   : > { %7560 = vmatmul.mubr.msk.f32.gmra.mxu0 %vm14098_vm0, %v1262_v16  ;;  %7580 = vmatmul.mubr.msk.f32.gmra.mxu1 %vm14098_vm0, %v2212_v18  ;;  %v2222_v57 = vld [vmem:[%s8181_s13 + $0x110] sm:$0xff]  ;;  %v3234_v16 = vld [vmem:[%s8181_s13 + $0x104] sm:$0xff] }
  0x82   : > { %1455 = vmatprep.mubr.f32.mxu0 %v13985_v6  ;;  %2404 = vmatprep.mubr.f32.mxu1 %v13985_v6 }
  0x83   : > { %2836 = vmatpush1.msra.mxu0 %v8164_v28  ;;  %3345 = vmatpush1.msra.mxu1 %v8333_v60  ;;  %v1265_v28 = vld [vmem:[%s8181_s13 + $0x6c] sm:$0xff]  ;;  %v2223_v60 = vld [vmem:[%s8181_s13 + $0x118] sm:$0xff] }
  0x84   : > { %2837 = vmatprep.subr.mxu0 %v8176_v30  ;;  %3346 = vmatprep.subr.mxu1 %v8340_v61  ;;  %v2215_v30 = vld [vmem:[%s8181_s13 + $0xd8] sm:$0xff]  ;;  %v1274_v61 = vld [vmem:[%s8181_s13 + $0xb4] sm:$0x3] }
  0x85   : > { %7561 = vmatmul.mubr.msk.f32.gmra.mxu0 %vm14098_vm0, %v1263_v20  ;;  %7581 = vmatmul.mubr.msk.f32.gmra.mxu1 %vm14098_vm0, %v2213_v22  ;;  %v2726_v22 = vld [vmem:[%s8181_s13 + $0xfa] sm:$0xff] }
  0x86   : > { %1461 = vmatprep.mubr.f32.mxu0 %v13985_v6  ;;  %2410 = vmatprep.mubr.f32.mxu1 %v13985_v6 }
  0x87   : > { %2838 = vmatpush1.msra.mxu0 %v8195_v32  ;;  %3347 = vmatpush1.msra.mxu1 %v8353_v0  ;;  %v1266_v32 = vld [vmem:[%s8181_s13 + $0x74] sm:$0xff] }
  0x88   : > { %4280 = vmatprep.subr.mxu0 %v4206_v58  ;;  %v3224_v0 = vld [vmem:[%s8181_s13 + $0xb4] sm:$0xff] }
  0x89   : > { %7562 = vmatmul.mubr.msk.f32.gmra.mxu0 %vm14098_vm0, %v1264_v24  ;;  %7582 = vmatmul.mubr.msk.f32.gmra.mxu1 %vm14098_vm0, %v2214_v26  ;;  %v3235_v24 = vld [vmem:[%s8181_s13 + $0x10c] sm:$0xff] }
  0x8a   : > { %1467 = vmatprep.mubr.f32.mxu0 %v13985_v6  ;;  %2416 = vmatprep.mubr.f32.mxu1 %v13985_v6 }
  0x8d   : > { %7563 = vmatmul.mubr.msk.f32.gmra.mxu0 %vm14098_vm0, %v1265_v28  ;;  %7583 = vmatmul.mubr.msk.f32.gmra.mxu1 %vm14098_vm0, %v2215_v30 }
  0x8e   : > { %1473 = vmatprep.mubr.f32.mxu0 %v13985_v6  ;;  %2422 = vmatprep.mubr.f32.mxu1 %v13985_v6 }
  0x91   : > { %7564 = vmatmul.mubr.msk.f32.gmra.mxu0 %vm14098_vm0, %v1266_v32  ;;  %7584 = vmatmul.mubr.msk.f32.gmra.mxu1 %vm14098_vm0, %v2216_v37 }
  0x92   : > { %1479 = vmatprep.mubr.f32.mxu0 %v13985_v6  ;;  %2428 = vmatprep.mubr.f32.mxu1 %v13985_v6 }
  0x95   : > { %7565 = vmatmul.mubr.msk.f32.gmra.mxu0 %vm14098_vm0, %v1267_v40  ;;  %7585 = vmatmul.mubr.msk.f32.gmra.mxu1 %vm14098_vm0, %v2217_v41 }
  0x96   : > { %1485 = vmatprep.mubr.f32.mxu0 %v13985_v6  ;;  %2434 = vmatprep.mubr.f32.mxu1 %v13985_v6 }
  0x99   : > { %7566 = vmatmul.mubr.msk.f32.gmra.mxu0 %vm14098_vm0, %v1268_v44  ;;  %7586 = vmatmul.mubr.msk.f32.gmra.mxu1 %vm14098_vm0, %v2218_v45 }
  0x9a   : > { %1491 = vmatprep.mubr.f32.mxu0 %v13985_v6  ;;  %2440 = vmatprep.mubr.f32.mxu1 %v13985_v6 }
  0x9d   : > { %7567 = vmatmul.mubr.msk.f32.gmra.mxu0 %vm14098_vm0, %v1269_v48  ;;  %7587 = vmatmul.mubr.msk.f32.gmra.mxu1 %vm14098_vm0, %v2219_v49  ;;  %v2727_v49 = vld [vmem:[%s8181_s13 + $0x102] sm:$0xff] }
  0x9e   : > { %1497 = vmatprep.mubr.f32.mxu0 %v13985_v6  ;;  %2446 = vmatprep.mubr.f32.mxu1 %v13985_v6 }
  0xa1   : > { %7568 = vmatmul.mubr.msk.f32.gmra.mxu0 %vm14098_vm0, %v1270_v52  ;;  %7588 = vmatmul.mubr.msk.f32.gmra.mxu1 %vm14098_vm0, %v2220_v53  ;;  %v3236_v52 = vld [vmem:[%s8181_s13 + $0x114] sm:$0xff] }
  0xa2   : > { %1503 = vmatprep.mubr.f32.mxu0 %v13985_v6  ;;  %2452 = vmatprep.mubr.f32.mxu1 %v13985_v6 }
  0xa5   : > { %7569 = vmatmul.mubr.msk.f32.gmra.mxu0 %vm14098_vm0, %v1271_v54  ;;  %7589 = vmatmul.mubr.msk.f32.gmra.mxu1 %vm14098_vm0, %v2221_v55 }
  0xa6   : > { %1509 = vmatprep.mubr.f32.mxu0 %v13985_v6  ;;  %2458 = vmatprep.mubr.f32.mxu1 %v13985_v6 }
  0xa9   : > { %7570 = vmatmul.mubr.msk.f32.gmra.mxu0 %vm14098_vm0, %v1272_v56  ;;  %7590 = vmatmul.mubr.msk.f32.gmra.mxu1 %vm14098_vm0, %v2222_v57 }
  0xaa   : > { %1515 = vmatprep.mubr.f32.mxu0 %v13985_v6  ;;  %2464 = vmatprep.mubr.f32.mxu1 %v13985_v6 }
  0xad   : > { %7571 = vmatmul.mubr.msk.f32.gmra.mxu0 %vm14098_vm0, %v1273_v59  ;;  %7591 = vmatmul.mubr.msk.f32.gmra.mxu1 %vm14098_vm0, %v2223_v60 }
  0xae   : > { %1521 = vmatprep.mubr.f32.mxu0 %v13985_v6  ;;  %2470 = vmatprep.mubr.f32.mxu1 %v13985_v6 }
  0xb1   : > { %7572 = vmatmul.mubr.msk.f32.gmra.mxu0 %vm14098_vm0, %v1274_v61  ;;  %7592 = vmatmul.mubr.msk.f32.gmra.mxu1 %vm14098_vm0, %v2224_v62 }
  0xb2   : > { %2871 = vmatprep.mubr.f32.mxu0 %v13985_v6  ;;  %3380 = vmatprep.mubr.f32.mxu1 %v13985_v6 }
  0xb5   : > { %7609 = vmatmul.mubr.msk.f32.vlgmr.msra.gmra.mxu0 %vm14098_vm0, %v2715_v63  ;;  %7644 = vmatmul.mubr.msk.f32.vlgmr.msra.gmra.mxu1 %vm14098_vm0, %v3224_v0  ;;  %v2728_v0 = vld [vmem:[%s8181_s13 + $0x10a] sm:$0xff] }
  0xb6   : > { %2877 = vmatprep.mubr.f32.mxu0 %v13985_v6  ;;  %3386 = vmatprep.mubr.f32.mxu1 %v13985_v6 }
  0xb7   : > { %4281 = vmatpush1.msra.mxu0 %v4205_v2  ;;  %v3237_v2 = vld [vmem:[%s8181_s13 + $0x11c] sm:$0xff] }
  0xb8   : > { %4282 = vmatprep.subr.mxu0 %v4204_v4 }
  0xb9   : > { %7610 = vmatmul.mubr.msk.f32.gmra.mxu0 %vm14098_vm0, %v2716_v7  ;;  %7645 = vmatmul.mubr.msk.f32.gmra.mxu1 %vm14098_vm0, %v3225_v9 }
  0xba   : > { %2883 = vmatprep.mubr.f32.mxu0 %v13985_v6  ;;  %3392 = vmatprep.mubr.f32.mxu1 %v13985_v6 }
  0xbb   : > { %4283 = vmatpush1.msra.mxu0 %v4203_v1 }
  0xbc   : > { %4284 = vmatprep.subr.mxu0 %v4202_v11 }
  0xbd   : > { %7611 = vmatmul.mubr.msk.f32.gmra.mxu0 %vm14098_vm0, %v2717_v13  ;;  %7646 = vmatmul.mubr.msk.f32.gmra.mxu1 %vm14098_vm0, %v3226_v15 }
  0xbe   : > { %2889 = vmatprep.mubr.f32.mxu0 %v13985_v6  ;;  %3398 = vmatprep.mubr.f32.mxu1 %v13985_v6 }
  0xbf   : > { %4285 = vmatpush1.msra.mxu0 %v4201_v17 }
  0xc0   : > { %4286 = vmatprep.subr.mxu0 %v4200_v19 }
  0xc1   : > { %7612 = vmatmul.mubr.msk.f32.gmra.mxu0 %vm14098_vm0, %v2718_v21  ;;  %7647 = vmatmul.mubr.msk.f32.gmra.mxu1 %vm14098_vm0, %v3227_v23  ;;  %v2729_v23 = vld [vmem:[%s8181_s13 + $0x112] sm:$0xff] }
  0xc2   : > { %2895 = vmatprep.mubr.f32.mxu0 %v13985_v6  ;;  %3404 = vmatprep.mubr.f32.mxu1 %v13985_v6 }
  0xc3   : > { %4287 = vmatpush1.msra.mxu0 %v4199_v25  ;;  %v3238_v25 = vld [vmem:[%s8181_s13 + $0x124] sm:$0xff] }
  0xc4   : > { %4288 = vmatprep.subr.mxu0 %v4198_v27 }
  0xc5   : > { %7613 = vmatmul.mubr.msk.f32.gmra.mxu0 %vm14098_vm0, %v2719_v29  ;;  %7648 = vmatmul.mubr.msk.f32.gmra.mxu1 %vm14098_vm0, %v3228_v31 }
  0xc6   : > { %2901 = vmatprep.mubr.f32.mxu0 %v13985_v6  ;;  %3410 = vmatprep.mubr.f32.mxu1 %v13985_v6 }
  0xc7   : > { %4289 = vmatpush1.msra.mxu0 %v4197_v33 }
  0xc8   : > { %4290 = vmatprep.subr.mxu0 %v4196_v34 }
  0xc9   : > { %7614 = vmatmul.mubr.msk.f32.gmra.mxu0 %vm14098_vm0, %v2720_v35  ;;  %7649 = vmatmul.mubr.msk.f32.gmra.mxu1 %vm14098_vm0, %v3229_v38 }
  0xca   : > { %2907 = vmatprep.mubr.f32.mxu0 %v13985_v6  ;;  %3416 = vmatprep.mubr.f32.mxu1 %v13985_v6 }
  0xcb   : > { %4291 = vmatpush1.msra.mxu0 %v4195_v39  ;;  %v2730_v39 = vld [vmem:[%s8181_s13 + $0x11a] sm:$0xff] }
  0xcc   : > { %4292 = vmatprep.subr.mxu0 %v4194_v42  ;;  %v3239_v42 = vld [vmem:[%s8181_s13 + $0x12c] sm:$0xff] }
  0xcd   : > { %7615 = vmatmul.mubr.msk.f32.gmra.mxu0 %vm14098_vm0, %v2721_v43  ;;  %7650 = vmatmul.mubr.msk.f32.gmra.mxu1 %vm14098_vm0, %v3230_v46 }
  0xce   : > { %2913 = vmatprep.mubr.f32.mxu0 %v13985_v6  ;;  %3422 = vmatprep.mubr.f32.mxu1 %v13985_v6 }
  0xcf   : > { %4293 = vmatpush1.msra.mxu0 %v4193_v47 }
  0xd0   : > { %4294 = vmatprep.subr.mxu0 %v4192_v50 }
  0xd1   : > { %7616 = vmatmul.mubr.msk.f32.gmra.mxu0 %vm14098_vm0, %v2722_v3  ;;  %7651 = vmatmul.mubr.msk.f32.gmra.mxu1 %vm14098_vm0, %v3231_v51 }
  0xd2   : > { %2919 = vmatprep.mubr.f32.mxu0 %v13985_v6  ;;  %3428 = vmatprep.mubr.f32.mxu1 %v13985_v6 }
  0xd3   : > { %4295 = vmatpush1.msra.mxu0 %v4191_v5 }
  0xd5   : > { %7617 = vmatmul.mubr.msk.f32.gmra.mxu0 %vm14098_vm0, %v2723_v36  ;;  %7652 = vmatmul.mubr.msk.f32.gmra.mxu1 %vm14098_vm0, %v3232_v8  ;;  %v2731_v8 = vld [vmem:[%s8181_s13 + $0x122] sm:$0xff] }
  0xd6   : > { %2925 = vmatprep.mubr.f32.mxu0 %v13985_v6  ;;  %3434 = vmatprep.mubr.f32.mxu1 %v13985_v6 }
  0xd9   : > { %7618 = vmatmul.mubr.msk.f32.gmra.mxu0 %vm14098_vm0, %v2724_v10  ;;  %7653 = vmatmul.mubr.msk.f32.gmra.mxu1 %vm14098_vm0, %v3233_v12  ;;  %v3240_v10 = vld [vmem:[%s8181_s13 + $0x134] sm:$0xff] }
  0xda   : > { %2931 = vmatprep.mubr.f32.mxu0 %v13985_v6  ;;  %3440 = vmatprep.mubr.f32.mxu1 %v13985_v6 }
  0xdd   : > { %v8685_v18 = vpop.f32.mrf.mxu0  ;;  %v8687_v20 = vpop.f32.mrf.mxu1  ;;  %7619 = vmatmul.mubr.msk.f32.gmra.mxu0 %vm14098_vm0, %v2725_v14  ;;  %7654 = vmatmul.mubr.msk.f32.gmra.mxu1 %vm14098_vm0, %v3234_v16 }
  0xde   : > { %14299 = vst [vmem:[#allocation3_spill] sm:$0xff] %v8687_v20  ;;  %2937 = vmatprep.mubr.f32.mxu0 %v13985_v6  ;;  %3446 = vmatprep.mubr.f32.mxu1 %v13985_v6  ;;  %v1055_v30 = vrot.slane %v8687_v20, 1  ;;  %v544_v40 = vrot.slane %v8685_v18, 1 }
  0xdf   : > { %v395_v26 = vpop.f32.mrf.mxu0  ;;  %v8695_v28 = vpop.f32.mrf.mxu1 }
  0xe0   : > { %v673_v53 = vrot.slane %v395_v26, 2 }
  0xe1   : > { %v8698_v32 = vpop.f32.mrf.mxu0  ;;  %v8700_v37 = vpop.f32.mrf.mxu1  ;;  %7620 = vmatmul.mubr.msk.f32.gmra.mxu0 %vm14098_vm0, %v2726_v22  ;;  %7655 = vmatmul.mubr.msk.f32.gmra.mxu1 %vm14098_vm0, %v3235_v24 }
  0xe2   : > { %14300 = vst [vmem:[#allocation4_spill] sm:$0xff] %v8698_v32  ;;  %14301 = vst [vmem:[#allocation5_spill] sm:$0xff] %v8700_v37  ;;  %v545_v41 = vrot.slane %v8698_v32, 1  ;;  %v1056_v44 = vrot.slane %v8700_v37, 1  ;;  %2943 = vmatprep.mubr.f32.mxu0 %v13985_v6  ;;  %3452 = vmatprep.mubr.f32.mxu1 %v13985_v6 }
  0xe3   : > { %v401_v45 = vpop.f32.mrf.mxu0  ;;  %v8709_v48 = vpop.f32.mrf.mxu1 }
  0xe4   : > { %v674_v54 = vrot.slane %v401_v45, 2  ;;  %v546_v55 = vsel %vm543_vm1, %v544_v40, %v545_v41  ;;  %v1057_v56 = vsel %vm543_vm1, %v1055_v30, %v1056_v44 }
  0xe5   : > { %v8715_v57 = vpop.f32.mrf.mxu1  ;;  %581 = vrot.lane.b32.xlu0 %v546_v55, %s7942_s16  ;;  %v8718_v58 = vpop.f32.mrf.mxu0  ;;  %1092 = vrot.lane.b32.xlu1 %v1057_v56, %s7942_s16 }
  0xe6   : > { %14302 = vst [vmem:[#allocation6_spill] sm:$0xff] %v8715_v57  ;;  %14303 = vst [vmem:[#allocation7_spill] sm:$0xff] %v8718_v58  ;;  %v1058_v59 = vrot.slane %v8715_v57, 1  ;;  %v547_v60 = vrot.slane %v8718_v58, 1  ;;  %7621 = vmatmul.mubr.msk.f32.gmra.mxu0 %vm14098_vm0, %v2727_v49  ;;  %7656 = vmatmul.mubr.msk.f32.gmra.mxu1 %vm14098_vm0, %v3236_v52  ;;  %v8726_v61 = vsel %vm14100_vm2, %v673_v53, %v674_v54 }
  0xe7   : > { %14304 = vst [vmem:[#allocation8_spill] sm:$0xff] %v8726_v61  ;;  %v8728_v62 = vpop.f32.mrf.mxu0  ;;  %v8730_v63 = vpop.f32.mrf.mxu1  ;;  %2949 = vmatprep.mubr.f32.mxu0 %v13985_v6  ;;  %3458 = vmatprep.mubr.f32.mxu1 %v13985_v6 }
  0xe8   : > { %v13984_v4 = vrot.slane %v8728_v62, 2  ;;  %v548_v7 = vsel %vm543_vm1, %v545_v41, %v547_v60  ;;  %v1059_v15 = vsel %vm543_vm1, %v1056_v44, %v1058_v59  ;;  %v2732_v41 = vld [vmem:[%s8181_s13 + $0x12a] sm:$0xff]  ;;  %v3241_v44 = vld [vmem:[%s8181_s13 + $0x13c] sm:$0xff]  ;;  %v14345_v32 = vrot.slane %v8728_v62, 2 }
  0xe9   : > { %v8738_v9 = vpop.f32.mrf.mxu1  ;;  %583 = vrot.lane.b32.xlu0 %v548_v7, %s7942_s16  ;;  %v8741_v1 = vpop.f32.mrf.mxu0  ;;  %v7685_v62 = vld [vmem:[%s13981_s3 + $0x90] sm:$0xff] }
  0xea   : > { %14305 = vst [vmem:[#allocation9_spill] sm:$0xff] %v8738_v9  ;;  %14306 = vst [vmem:[#allocation10_spill] sm:$0xff] %v8741_v1  ;;  %v1060_v11 = vrot.slane %v8738_v9, 1  ;;  %v549_v13 = vrot.slane %v8741_v1, 1  ;;  %7622 = vmatmul.mubr.msk.f32.gmra.mxu0 %vm14098_vm0, %v2728_v0  ;;  %7657 = vmatmul.mubr.msk.f32.gmra.mxu1 %vm14098_vm0, %v3237_v2  ;;  %v8751_v17 = vsel %vm14100_vm2, %v674_v54, %v13984_v4  ;;  %v7698_v54 = vld [vmem:[%s13981_s3 + $0xf8] sm:$0xff]  ;;  %v7688_v1 = vld [vmem:[%s13981_s3 + $0xa8] sm:$0xff] }
  0xeb   : > { %14307 = vst [vmem:[#allocation11_spill] sm:$0xff] %v8751_v17  ;;  %v8753_v19 = vpop.f32.mrf.mxu0  ;;  %v8755_v21 = vpop.f32.mrf.mxu1  ;;  %2955 = vmatprep.mubr.f32.mxu0 %v13985_v6  ;;  %3464 = vmatprep.mubr.f32.mxu1 %v13985_v6  ;;  %v2733_v0 = vld [vmem:[%s8181_s13 + $0x132] sm:$0x3]  ;;  %v3242_v2 = vld [vmem:[%s8181_s13 + $0x144] sm:$0x3] }
  0xec   : > { %v550_v27 = vsel %vm543_vm1, %v547_v60, %v549_v13  ;;  %v1061_v34 = vsel %vm543_vm1, %v1058_v59, %v1060_v11  ;;  %4790 = vmatprep.subr.mxu1 %v7698_v54  ;;  %v1188_v17 = vrot.slane %v8755_v21, 2 }
  0xed   : > { %v8762_v29 = vpop.f32.mrf.mxu1  ;;  %1094 = vrot.lane.b32.xlu0 %v1059_v15, %s7942_s16  ;;  %585 = vrot.lane.b32.xlu1 %v550_v27, %s7942_s16  ;;  %v8766_v31 = vpop.f32.mrf.mxu0 }
  0xee   : > { %14308 = vst [vmem:[#allocation12_spill] sm:$0xff] %v8762_v29  ;;  %14309 = vst [vmem:[#allocation13_spill] sm:$0xff] %v8766_v31  ;;  %v1062_v33 = vrot.slane %v8762_v29, 1  ;;  %7623 = vmatmul.mubr.msk.f32.gmra.mxu0 %vm14098_vm0, %v2729_v23  ;;  %7658 = vmatmul.mubr.msk.f32.gmra.mxu1 %vm14098_vm0, %v3238_v25  ;;  %v551_v43 = vrot.slane %v8766_v31, 1  ;;  %v678_v29 = vrot.slane %v8753_v19, 2 }
  0xef   : > { %v8772_v35 = vpop.f32.mrf.mxu0  ;;  %v8774_v38 = vpop.f32.mrf.mxu1  ;;  %2961 = vmatprep.mubr.f32.mxu0 %v13985_v6  ;;  %3470 = vmatprep.mubr.f32.mxu1 %v13985_v6 }
  0xf0   : > { %v1063_v46 = vsel %vm543_vm1, %v1060_v11, %v1062_v33  ;;  %v552_v12 = vsel %vm543_vm1, %v549_v13, %v551_v43  ;;  %v7697_v13 = vld [vmem:[%s13981_s3 + $0xf0] sm:$0xff]  ;;  %v680_v20 = vrot.slane %v8772_v35, 2 }
  0xf1   : > { %v8782_v47 = vpop.f32.mrf.mxu1  ;;  %1098 = vrot.lane.b32.xlu0 %v1063_v46, %s7942_s16  ;;  %1096 = vrot.lane.b32.xlu1 %v1061_v34, %s7942_s16  ;;  %v8786_v50 = vpop.f32.mrf.mxu0  ;;  %v7696_v46 = vld [vmem:[%s13981_s3 + $0xe8] sm:$0xff] }
  0xf2   : > { %14310 = vst [vmem:[#allocation14_spill] sm:$0xff] %v8782_v47  ;;  %14311 = vst [vmem:[#allocation15_spill] sm:$0xff] %v8786_v50  ;;  %v1064_v3 = vrot.slane %v8782_v47, 1  ;;  %v553_v51 = vrot.slane %v8786_v50, 1  ;;  %7624 = vmatmul.mubr.msk.f32.gmra.mxu0 %vm14098_vm0, %v2730_v39  ;;  %7659 = vmatmul.mubr.msk.f32.gmra.mxu1 %vm14098_vm0, %v3239_v42  ;;  %v4172_v39 = vld [vmem:[#allocation2] sm:$0xff]  ;;  %v1186_v50 = vrot.slane %v8730_v63, 2 }
  0xf3   : > { %v8792_v5 = vpop.f32.mrf.mxu0  ;;  %v8794_v36 = vpop.f32.mrf.mxu1  ;;  %2967 = vmatprep.mubr.f32.mxu0 %v13985_v6  ;;  %3476 = vmatprep.mubr.f32.mxu1 %v13985_v6 }
  0xf4   : > { %v554_v14 = vsel %vm543_vm1, %v551_v43, %v553_v51  ;;  %v1065_v26 = vsel %vm543_vm1, %v1062_v33, %v1064_v3  ;;  %4791 = vmatpush1.msra.mxu1 %v7697_v13  ;;  %v1192_v35 = vrot.slane %v8794_v36, 2  ;;  %v9108_v61 = vsel %vm14100_vm2, %v1186_v50, %v1188_v17 }
  0xf5   : > { %v8802_v16 = vpop.f32.mrf.mxu1  ;;  %587 = vrot.lane.b32.xlu1 %v552_v12, %s7942_s16  ;;  %589 = vrot.lane.b32.xlu0 %v554_v14, %s7942_s16  ;;  %v8806_v22 = vpop.f32.mrf.mxu0 }
  0xf6   : > { %14312 = vst [vmem:[#allocation16_spill] sm:$0xff] %v8802_v16  ;;  %14313 = vst [vmem:[#allocation17_spill] sm:$0xff] %v8806_v22  ;;  %v1066_v24 = vrot.slane %v8802_v16, 1  ;;  %7625 = vmatmul.mubr.msk.f32.gmra.mxu0 %vm14098_vm0, %v2731_v8  ;;  %7660 = vmatmul.mubr.msk.f32.gmra.mxu1 %vm14098_vm0, %v3240_v10  ;;  %v555_v45 = vrot.slane %v8806_v22, 1  ;;  %v1809_v22 = vlaneseq }
  0xf7   : > { %v8812_v30 = vpop.f32.mrf.mxu0  ;;  %v8814_v40 = vpop.f32.mrf.mxu1  ;;  %2973 = vmatprep.mubr.f32.mxu0 %v13985_v6  ;;  %3482 = vmatprep.mubr.f32.mxu1 %v13985_v6 }
  0xf8   : > { %v1067_v49 = vsel %vm543_vm1, %v1064_v3, %v1066_v24  ;;  %v556_v7 = vsel %vm543_vm1, %v553_v51, %v555_v45  ;;  %4792 = vmatprep.subr.mxu1 %v7696_v46  ;;  %v9055_v37 = vshrl.u32 %v1809_v22, 7  ;;  %v682_v22 = vrot.slane %v8792_v5, 2 }
  0xf9   : > { %v8822_v52 = vpop.f32.mrf.mxu1  ;;  %1100 = vrot.lane.b32.xlu1 %v1065_v26, %s7942_s16  ;;  %1102 = vrot.lane.b32.xlu0 %v1067_v49, %s7942_s16  ;;  %v8826_v53 = vpop.f32.mrf.mxu0  ;;  %v1194_v5 = vrot.slane %v8814_v40, 2  ;;  %v7684_v40 = vld [vmem:[%s13981_s3 + $0x88] sm:$0xff] }
  0xfa   : > { %14314 = vst [vmem:[#allocation18_spill] sm:$0xff] %v8822_v52  ;;  %14315 = vst [vmem:[#allocation19_spill] sm:$0xff] %v8826_v53  ;;  %v1068_v55 = vrot.slane %v8822_v52, 1  ;;  %v557_v56 = vrot.slane %v8826_v53, 1  ;;  %7626 = vmatmul.mubr.msk.f32.gmra.mxu0 %vm14098_vm0, %v2732_v41  ;;  %7661 = vmatmul.mubr.msk.f32.gmra.mxu1 %vm14098_vm0, %v3241_v44  ;;  %v7695_v44 = vld [vmem:[%s13981_s3 + $0xe0] sm:$0xff] }
  0xfb   : > { %v8835_v59 = vpop.f32.mrf.mxu0  ;;  %v8837_v60 = vpop.f32.mrf.mxu1  ;;  %2979 = vmatprep.mubr.f32.mxu0 %v13985_v6  ;;  %3488 = vmatprep.mubr.f32.mxu1 %v13985_v6 }
  0xfc   : > { %v558_v11 = vsel %vm543_vm1, %v555_v45, %v557_v56  ;;  %v1069_v27 = vsel %vm543_vm1, %v1066_v24, %v1068_v55  ;;  %v4173_v24 = vld [vmem:[#allocation2 + $0x8] sm:$0xff]  ;;  %4793 = vmatpush1.msra.mxu1 %v7695_v44 }
  0xfd   : > { %v8848_v15 = vpop.f32.mrf.mxu1  ;;  %591 = vrot.lane.b32.xlu1 %v556_v7, %s7942_s16  ;;  %593 = vrot.lane.b32.xlu0 %v558_v11, %s7942_s16  ;;  %v8852_v23 = vpop.f32.mrf.mxu0 }
  0xfe   : > { %14316 = vst [vmem:[#allocation20_spill] sm:$0xff] %v8848_v15  ;;  %14317 = vst [vmem:[#allocation21_spill] sm:$0xff] %v8852_v23  ;;  %v1070_v25 = vrot.slane %v8848_v15, 1  ;;  %7627 = vmatmul.mubr.msk.f32.gmra.mxu0 %vm14098_vm0, %v2733_v0  ;;  %7662 = vmatmul.mubr.msk.f32.gmra.mxu1 %vm14098_vm0, %v3242_v2  ;;  %v559_v42 = vrot.slane %v8852_v23, 1 }
  0xff   : > { %v8858_v33 = vpop.f32.mrf.mxu0  ;;  %v8860_v34 = vpop.f32.mrf.mxu1  ;;  %4328 = vmatprep.mubr.f32.mxu0 %v13985_v6  ;;  %4838 = vmatprep.mubr.f32.mxu1 %v13985_v6 }
 0x100   : > { %v1071_v43 = vsel %vm543_vm1, %v1068_v55, %v1070_v25  ;;  %v560_v26 = vsel %vm543_vm1, %v557_v56, %v559_v42 }
 0x101   : > { %v8869_v3 = vpop.f32.mrf.mxu1  ;;  %1104 = vrot.lane.b32.xlu1 %v1069_v27, %s7942_s16  ;;  %1106 = vrot.lane.b32.xlu0 %v1071_v43, %s7942_s16  ;;  %v8873_v51 = vpop.f32.mrf.mxu0 }
 0x102   : > { %14318 = vst [vmem:[#allocation22_spill] sm:$0xff] %v8869_v3  ;;  %14319 = vst [vmem:[#allocation23_spill] sm:$0xff] %v8873_v51  ;;  %v1072_v8 = vrot.slane %v8869_v3, 1  ;;  %v561_v10 = vrot.slane %v8873_v51, 1  ;;  %7664 = vmatmul.mubr.msk.f32.vlgmr.msra.gmra.mxu0 %vm14098_vm0, %v4172_v39 }
 0x103   : > { %v8878_v12 = vpop.f32.mrf.mxu0  ;;  %v8880_v14 = vpop.f32.mrf.mxu1  ;;  %4334 = vmatprep.mubr.f32.mxu0 %v13985_v6 }
 0x104   : > { %v562_v41 = vsel %vm543_vm1, %v559_v42, %v561_v10  ;;  %v1073_v55 = vsel %vm543_vm1, %v1070_v25, %v1072_v8 }
 0x105   : > { %v8888_v45 = vpop.f32.mrf.mxu1  ;;  %595 = vrot.lane.b32.xlu1 %v560_v26, %s7942_s16  ;;  %597 = vrot.lane.b32.xlu0 %v562_v41, %s7942_s16  ;;  %v8892_v49 = vpop.f32.mrf.mxu0 }
 0x106   : > { %14320 = vst [vmem:[#allocation24_spill] sm:$0xff] %v8888_v45  ;;  %14321 = vst [vmem:[#allocation25_spill] sm:$0xff] %v8892_v49  ;;  %v1074_v54 = vrot.slane %v8888_v45, 1  ;;  %7665 = vmatmul.mubr.msk.f32.gmra.mxu0 %vm14098_vm0, %v4173_v24  ;;  %v563_v2 = vrot.slane %v8892_v49, 1  ;;  %v7693_v24 = vld [vmem:[%s13981_s3 + $0xd0] sm:$0xff] }
 0x107   : > { %v8897_v56 = vpop.f32.mrf.mxu0  ;;  %v8899_v0 = vpop.f32.mrf.mxu1  ;;  %4340 = vmatprep.mubr.f32.mxu0 %v13985_v6 }
 0x108   : > { %v1075_v7 = vsel %vm543_vm1, %v1072_v8, %v1074_v54  ;;  %v564_v43 = vsel %vm543_vm1, %v561_v10, %v563_v2  ;;  %v7694_v8 = vld [vmem:[%s13981_s3 + $0xd8] sm:$0xff] }
 0x109   : > { %v8904_v11 = vpop.f32.mrf.mxu1  ;;  %1108 = vrot.lane.b32.xlu1 %v1073_v55, %s7942_s16  ;;  %1110 = vrot.lane.b32.xlu0 %v1075_v7, %s7942_s16  ;;  %v8908_v13 = vpop.f32.mrf.mxu0 }
 0x10a   : > { %14322 = vst [vmem:[#allocation26_spill] sm:$0xff] %v8904_v11  ;;  %14323 = vst [vmem:[#allocation27_spill] sm:$0xff] %v8908_v13  ;;  %v1076_v25 = vrot.slane %v8904_v11, 1  ;;  %v565_v27 = vrot.slane %v8908_v13, 1  ;;  %4794 = vmatprep.subr.mxu1 %v7694_v8 }
 0x10b   : > { %v8912_v39 = vpop.f32.mrf.mxu0  ;;  %v8914_v42 = vpop.f32.mrf.mxu1  ;;  %4795 = vmatpush1.msra.mxu1 %v7693_v24 }
 0x10c   : > { %v566_v46 = vsel %vm543_vm1, %v563_v2, %v565_v27  ;;  %v1077_v44 = vsel %vm543_vm1, %v1074_v54, %v1076_v25 }
 0x10d   : > { %v8924_v26 = vpop.f32.mrf.mxu1  ;;  %599 = vrot.lane.b32.xlu1 %v564_v43, %s7942_s16  ;;  %601 = vrot.lane.b32.xlu0 %v566_v46, %s7942_s16  ;;  %v8928_v41 = vpop.f32.mrf.mxu0 }
 0x10e   : > { %14324 = vst [vmem:[#allocation28_spill] sm:$0xff] %v8924_v26  ;;  %14325 = vst [vmem:[#allocation29_spill] sm:$0xff] %v8928_v41  ;;  %v1078_v10 = vrot.slane %v8924_v26, 1  ;;  %v567_v7 = vrot.slane %v8928_v41, 1 }
 0x10f   : > { %v8932_v55 = vpop.f32.mrf.mxu0  ;;  %v8934_v2 = vpop.f32.mrf.mxu1 }
 0x110   : > { %v1079_v4 = vsel %vm543_vm1, %v1076_v25, %v1078_v10  ;;  %v568_v24 = vsel %vm543_vm1, %v565_v27, %v567_v7 }
 0x111   : > { %v8938_v6 = vpop.f32.mrf.mxu1  ;;  %1112 = vrot.lane.b32.xlu1 %v1077_v44, %s7942_s16  ;;  %1114 = vrot.lane.b32.xlu0 %v1079_v4, %s7942_s16  ;;  %v8942_v43 = vpop.f32.mrf.mxu0  ;;  %v7692_v44 = vld [vmem:[%s13981_s3 + $0xc8] sm:$0xff]  ;;  %v7691_v4 = vld [vmem:[%s13981_s3 + $0xc0] sm:$0xff] }
 0x112   : > { %14326 = vst [vmem:[#allocation30_spill] sm:$0xff] %v8938_v6  ;;  %14327 = vst [vmem:[#allocation31_spill] sm:$0xff] %v8942_v43  ;;  %v1080_v54 = vrot.slane %v8938_v6, 1  ;;  %v569_v46 = vrot.slane %v8942_v43, 1  ;;  %4796 = vmatprep.subr.mxu1 %v7692_v44  ;;  %v7690_v44 = vld [vmem:[%s13981_s3 + $0xb8] sm:$0xff] }
 0x113   : > { %v8946_v8 = vpop.f32.mrf.mxu0  ;;  %v8948_v11 = vpop.f32.mrf.mxu1  ;;  %4797 = vmatpush1.msra.mxu1 %v7691_v4  ;;  %v7689_v4 = vld [vmem:[%s13981_s3 + $0xb0] sm:$0xff] }
 0x114   : > { %v570_v25 = vsel %vm543_vm1, %v567_v7, %v569_v46  ;;  %v1081_v7 = vsel %vm543_vm1, %v1078_v10, %v1080_v54  ;;  %4798 = vmatprep.subr.mxu1 %v7690_v44 }
 0x115   : > { %v8958_v26 = vpop.f32.mrf.mxu1  ;;  %603 = vrot.lane.b32.xlu1 %v568_v24, %s7942_s16  ;;  %605 = vrot.lane.b32.xlu0 %v570_v25, %s7942_s16  ;;  %v8962_v6 = vpop.f32.mrf.mxu0 }
 0x116   : > { %14328 = vst [vmem:[#allocation32_spill] sm:$0xff] %v8958_v26  ;;  %14329 = vst [vmem:[#allocation33_spill] sm:$0xff] %v8962_v6  ;;  %v13995_v27 = vrot.slane %v8958_v26, 1  ;;  %v571_v41 = vrot.slane %v8962_v6, 1  ;;  %4799 = vmatpush1.msra.mxu1 %v7689_v4 }
 0x117   : > { %v8966_v43 = vpop.f32.mrf.mxu0  ;;  %v8968_v13 = vpop.f32.mrf.mxu1  ;;  %4800 = vmatprep.subr.mxu1 %v7688_v1  ;;  %v14342_v1 = vmov 0.0  }
 0x118   : > { %v1083_v24 = vsel %vm543_vm1, %v1080_v54, %v13995_v27  ;;  %229 = vst.msk [vmem:[#allocation2 + $0x10] sm:$0x7] %vm228_vm3, %v14342_v1  ;;  %v1196_v1 = vrot.slane %v8837_v60, 2 }
 0x119   : > { %1116 = vrot.lane.b32.xlu1 %v1081_v7, %s7942_s16  ;;  %1118 = vrot.lane.b32.xlu0 %v1083_v24, %s7942_s16  ;;  %v8976_v25 = vpop.f32.mrf.mxu0  ;;  %v8978_v45 = vpop.f32.mrf.mxu1  ;;  %v572_v7 = vsel %vm543_vm1, %v569_v46, %v571_v41 }
 0x11a   : > { %14330 = vst [vmem:[#allocation34_spill] sm:$0xff] %v8976_v25  ;;  %14331 = vst [vmem:[#allocation35_spill] sm:$0xff] %v8978_v45  ;;  %v573_v10 = vrot.slane %v8976_v25, 1 }
 0x11b   : > { %v8987_v6 = vpop.f32.mrf.mxu0  ;;  %v8989_v54 = vpop.f32.mrf.mxu1 }
 0x11c   : > { %v574_v24 = vsel %vm543_vm1, %v571_v41, %v573_v10 }
 0x11d   : > { %607 = vrot.lane.b32.xlu1 %v572_v7, %s7942_s16  ;;  %609 = vrot.lane.b32.xlu0 %v574_v24, %s7942_s16  ;;  %v8995_v27 = vpop.f32.mrf.mxu0  ;;  %v8997_v25 = vpop.f32.mrf.mxu1 }
 0x11e   : > { %14332 = vst [vmem:[#allocation36_spill] sm:$0xff] %v8995_v27  ;;  %14333 = vst [vmem:[#allocation37_spill] sm:$0xff] %v8997_v25  ;;  %v14004_v3 = vrot.slane %v8995_v27, 1 }
 0x11f   : > { %v9000_v49 = vpop.f32.mrf.mxu0  ;;  %v9002_v51 = vpop.f32.mrf.mxu1 }
 0x120   : > { %v576_v46 = vsel %vm543_vm1, %v573_v10, %v14004_v3  ;;  %v1184_v3 = vrot.slane %v8709_v48, 2 }
 0x121   : > { %611 = vrot.lane.b32.xlu1 %v576_v46, %s7942_s16  ;;  %v9008_v41 = vpop.f32.mrf.mxu0  ;;  %v9010_v44 = vpop.f32.mrf.mxu1  ;;  %v1183_v46 = vrot.slane %v8695_v28, 2  ;;  %v7687_v28 = vld [vmem:[%s13981_s3 + $0xa0] sm:$0xff] }
 0x122   : > { %14334 = vst [vmem:[#allocation38_spill] sm:$0xff] %v9008_v41  ;;  %14335 = vst [vmem:[#allocation39_spill] sm:$0xff] %v9010_v44  ;;  %4801 = vmatpush1.msra.mxu1 %v7687_v28 }
 0x123   : > { %v9012_v4 = vpop.f32.mrf.mxu0  ;;  %v9014_v7 = vpop.f32.mrf.mxu1  ;;  %v9053_v58 = vsel %vm14100_vm2, %v1183_v46, %v1184_v3  ;;  %v1190_v46 = vrot.slane %v8774_v38, 2  ;;  %v684_v38 = vrot.slane %v8812_v30, 2 }
 0x124   : > { %14340 = vst [vmem:[#allocation44_spill] sm:$0xff] %v9053_v58  ;;  %v9094_v36 = vmul.u32.u64.low 3817748708, %v9055_v37  ;;  %v9095_v30 = vmul.u32.u64.high 3817748708, %v9055_v37, %v9094_v36 }
 0x125   : > { %v9016_v24 = vpop.f32.mrf.mxu0  ;;  %v9018_v15 = vpop.f32.mrf.mxu1  ;;  %v9114_v36 = vsel %vm14100_vm2, %v1188_v17, %v1190_v46 }
 0x126   : > { %14349 = vst [vmem:[#allocation49_spill] sm:$0xff] %v9114_v36 }
 0x127   : > { %v9020_v52 = vpop.f32.mrf.mxu0  ;;  %v9022_v16 = vpop.f32.mrf.mxu1 }
 0x129   : > { %v9024_v47 = vpop.f32.mrf.mxu0  ;;  %v9026_v10 = vpop.f32.mrf.mxu1 }
 0x12a   : > { %14336 = vst [vmem:[#allocation40_spill] sm:$0xff] %v9024_v47  ;;  %14337 = vst [vmem:[#allocation41_spill] sm:$0xff] %v9026_v10  ;;  %v1565_v48 = vrot.slane %v9024_v47, 1 }
 0x12b   : > { %v9030_v23 = vpop.f32.mrf.mxu0  ;;  %v9032_v53 = vpop.f32.mrf.mxu1 }
 0x12d   : > { %v9036_v9 = vpop.f32.mrf.mxu0  ;;  %v9038_v31 = vpop.f32.mrf.mxu1 }
 0x12e   : > { %14338 = vst [vmem:[#allocation42_spill] sm:$0xff] %v9036_v9  ;;  %14339 = vst [vmem:[#allocation43_spill] sm:$0xff] %v9038_v31  ;;  %v1566_v57 = vrot.slane %v9036_v9, 1  ;;  %v9061_v9 = vsel %vm14100_vm2, %v1184_v3, %v1186_v50  ;;  %v7686_v3 = vld [vmem:[%s13981_s3 + $0x98] sm:$0xff]  ;;  %v9124_v50 = vsel %vm14100_vm2, %v678_v29, %v680_v20 }
 0x12f   : > { %v9048_v63 = vpop.f32.mrf.mxu0  ;;  %v9050_v19 = vpop.f32.mrf.mxu1  ;;  %14341 = vst [vmem:[#allocation45_spill] sm:$0xff] %v9061_v9  ;;  %4802 = vmatprep.subr.mxu1 %v7686_v3  ;;  %v1084_v3 = vrot.slane %v8978_v45, 1  ;;  %v1198_v45 = vrot.slane %v8860_v34, 2  ;;  %14352 = vst [vmem:[#allocation52_spill] sm:$0xff] %v9124_v50  ;;  %v9134_v34 = vsel %vm14100_vm2, %v1190_v46, %v1192_v35  ;;  %v9153_v46 = vsel %vm14100_vm2, %v1194_v5, %v1196_v1 }
 0x130   : > { %v1567_v47 = vsel %vm543_vm1, %v1565_v48, %v1566_v57  ;;  %v9075_v48 = vsel %vm14100_vm2, %v14345_v32, %v678_v29  ;;  %4803 = vmatpush1.msra.mxu1 %v7685_v62  ;;  %v14348_v32 = vrot.slane %v8995_v27, 1  ;;  %v7683_v62 = vld [vmem:[%s13981_s3 + $0x80] sm:$0xff]  ;;  %14355 = vst [vmem:[#allocation55_spill] sm:$0xff] %v9134_v34  ;;  %14360 = vst [vmem:[#allocation59_spill] sm:$0xff] %v9153_v46  ;;  %v9161_v34 = vadd.s32 16, %v9055_v37 }
 0x131   : > { %1602 = vrot.lane.b32.xlu0 %v1567_v47, %s7942_s16  ;;  %v9068_v28 = vpop.f32.mrf.mxu0  ;;  %v9070_v21 = vpop.f32.mrf.mxu1  ;;  %14346 = vst [vmem:[#allocation48_spill] sm:$0xff] %v9075_v48  ;;  %4804 = vmatprep.subr.mxu1 %v7684_v40  ;;  %v9130_v40 = vsel %vm14100_vm2, %v1192_v35, %v1194_v5  ;;  %v688_v35 = vrot.slane %v8858_v33, 2  ;;  %v692_v5 = vrot.slane %v8897_v56, 2 }
 0x132   : > { %14343 = vst [vmem:[#allocation46_spill] sm:$0xff] %v9068_v28  ;;  %14344 = vst [vmem:[#allocation47_spill] sm:$0xff] %v9070_v21  ;;  %v1568_v47 = vrot.slane %v9068_v28, 1  ;;  %v14347_v28 = vrot.slane %v9008_v41, 1  ;;  %4805 = vmatpush1.msra.mxu1 %v7683_v62  ;;  %v14361_v62 = vrot.slane %v8958_v26, 1 }
 0x133   : > { %v9089_v9 = vpop.f32.mrf.mxu0  ;;  %v9091_v48 = vpop.f32.mrf.mxu1  ;;  %14354 = vst [vmem:[#allocation54_spill] sm:$0xff] %v9130_v40  ;;  %v14358_v40 = vrot.slane %v8835_v59, 2  ;;  %14362 = vst [vmem:[#allocation60_spill] sm:$0xff] %v9161_v34 }
 0x134   : > { %v578_v60 = vsel %vm543_vm1, %v14348_v32, %v14347_v28  ;;  %v1569_v58 = vsel %vm543_vm1, %v1566_v57, %v1568_v47  ;;  %v9127_v32 = vsel %vm14100_vm2, %v680_v20, %v682_v22  ;;  %v9145_v20 = vsel %vm14100_vm2, %v682_v22, %v684_v38 }
 0x135   : > { %613 = vrot.lane.b32.xlu0 %v578_v60, %s7942_s16  ;;  %1604 = vrot.lane.b32.xlu1 %v1569_v58, %s7942_s16  ;;  %v9119_v28 = vpop.f32.mrf.mxu0  ;;  %v9121_v57 = vpop.f32.mrf.mxu1  ;;  %14353 = vst [vmem:[#allocation53_spill] sm:$0xff] %v9127_v32  ;;  %v9137_v58 = vadd.s32 8, %v9055_v37  ;;  %14357 = vst [vmem:[#allocation57_spill] sm:$0xff] %v9145_v20  ;;  %v1085_v60 = vsel %vm543_vm1, %v14361_v62, %v1084_v3  ;;  %v9164_v22 = vsel %vm14100_vm2, %v1196_v1, %v1198_v45 }
 0x136   : > { %14350 = vst [vmem:[#allocation50_spill] sm:$0xff] %v9119_v28  ;;  %14351 = vst [vmem:[#allocation51_spill] sm:$0xff] %v9121_v57  ;;  %v1570_v17 = vrot.slane %v9119_v28, 1  ;;  %v9150_v28 = vsel %vm14100_vm2, %v684_v38, %v14358_v40  ;;  %v690_v38 = vrot.slane %v8878_v12, 2  ;;  %v1200_v40 = vrot.slane %v8880_v14, 2 }
 0x137   : > { %14356 = vst [vmem:[#allocation56_spill] sm:$0xff] %v9137_v58  ;;  %v9140_v27 = vpop.f32.mrf.mxu0  ;;  %v9142_v29 = vpop.f32.mrf.mxu1  ;;  %14359 = vst [vmem:[#allocation58_spill] sm:$0xff] %v9150_v28  ;;  %v694_v12 = vrot.slane %v8912_v39, 2  ;;  %v1204_v14 = vrot.slane %v8914_v42, 2  ;;  %v696_v39 = vrot.slane %v8932_v55, 2  ;;  %v1206_v42 = vrot.slane %v8934_v2, 2 }
 0x138   : > { %v1571_v36 = vsel %vm543_vm1, %v1568_v47, %v1570_v17  ;;  %14363 = vst [vmem:[#allocation61_spill] sm:$0xff] %v9164_v22  ;;  %v1202_v47 = vrot.slane %v8899_v0, 2  ;;  %v9178_v1 = vmul.u32.u64.low 3817748708, %v9137_v58  ;;  %v9179_v22 = vmul.u32.u64.high 3817748708, %v9137_v58, %v9178_v1  ;;  %v7733_v55 = vld [vmem:[%s13981_s3 + $0x178] sm:$0xff]  ;;  %v7732_v2 = vld [vmem:[%s13981_s3 + $0x170] sm:$0xff] }
 0x139   : > { %1120 = vrot.lane.b32.xlu1 %v1085_v60, %s7942_s16  ;;  %1606 = vrot.lane.b32.xlu0 %v1571_v36, %s7942_s16  ;;  %v9171_v33 = vpop.f32.mrf.mxu0  ;;  %v9173_v62 = vpop.f32.mrf.mxu1  ;;  %v14366_v36 = vrot.slane %v8997_v25, 1  ;;  %v1834_v0 = vshrl.u32 %v9095_v30, 4  ;;  %v9194_v1 = vmul.u32.u64.low 3817748708, %v9161_v34  ;;  %v9195_v20 = vmul.u32.u64.high 3817748708, %v9161_v34, %v9194_v1 }
 0x13a   : > { %14364 = vst [vmem:[#allocation62_spill] sm:$0xff] %v9171_v33  ;;  %14365 = vst [vmem:[#allocation63_spill] sm:$0xff] %v9173_v62  ;;  %v1572_v26 = vrot.slane %v9171_v33, 1  ;;  %v579_v33 = vrot.slane %v9016_v24, 1  ;;  %v14369_v24 = vrot.slane %v8835_v59, 2  ;;  %v9223_v59 = vsel %vm14100_vm2, %v1198_v45, %v1200_v40  ;;  %5300 = vmatprep.subr.mxu0 %v7733_v55 }
 0x13b   : > { %v9183_v56 = vpop.f32.mrf.mxu0  ;;  %v1087_v60 = vsel %vm543_vm1, %v1084_v3, %v14366_v36  ;;  %v9188_v46 = vpop.f32.mrf.mxu1  ;;  %v1208_v36 = vrot.slane %v8948_v11, 2  ;;  %14372 = vst [vmem:[#allocation68_spill] sm:$0xff] %v9223_v59  ;;  %v9226_v1 = vsel %vm14100_vm2, %v1200_v40, %v1202_v47  ;;  %v9234_v11 = vsel %vm14100_vm2, %v690_v38, %v692_v5  ;;  %5301 = vmatpush1.msra.mxu0 %v7732_v2 }
 0x13c   : > { %v1573_v28 = vsel %vm543_vm1, %v1570_v17, %v1572_v26  ;;  %v9209_v17 = vsel %vm14100_vm2, %v14369_v24, %v688_v35  ;;  %14373 = vst [vmem:[#allocation69_spill] sm:$0xff] %v9226_v1  ;;  %v1210_v24 = vrot.slane %v8968_v13, 2  ;;  %14374 = vst [vmem:[#allocation70_spill] sm:$0xff] %v9234_v11  ;;  %v14376_v45 = vrot.slane %v9008_v41, 1 }
 0x13d   : > { %1122 = vrot.lane.b32.xlu0 %v1087_v60, %s7942_s16  ;;  %1608 = vrot.lane.b32.xlu1 %v1573_v28, %s7942_s16  ;;  %v9202_v3 = vpop.f32.mrf.mxu0  ;;  %v9204_v30 = vpop.f32.mrf.mxu1  ;;  %14370 = vst [vmem:[#allocation66_spill] sm:$0xff] %v9209_v17  ;;  %v9220_v60 = vsel %vm14100_vm2, %v688_v35, %v690_v38  ;;  %v9244_v55 = vsel %vm14100_vm2, %v1202_v47, %v1204_v14  ;;  %v1835_v13 = vmul.u32 18, %v1834_v0  ;;  %v9264_v47 = vadd.s32 24, %v9055_v37 }
 0x13e   : > { %14367 = vst [vmem:[#allocation64_spill] sm:$0xff] %v9202_v3  ;;  %14368 = vst [vmem:[#allocation65_spill] sm:$0xff] %v9204_v30  ;;  %v1574_v28 = vrot.slane %v9202_v3, 1  ;;  %v9237_v3 = vsel %vm14100_vm2, %v692_v5, %v694_v12  ;;  %v580_v35 = vsel %vm543_vm1, %v14376_v45, %v579_v33  ;;  %v9247_v1 = vsel %vm14100_vm2, %v1204_v14, %v1206_v42 }
 0x13f   : > { %14371 = vst [vmem:[#allocation67_spill] sm:$0xff] %v9220_v60  ;;  %v9229_v32 = vpop.f32.mrf.mxu0  ;;  %v9231_v17 = vpop.f32.mrf.mxu1  ;;  %14375 = vst [vmem:[#allocation71_spill] sm:$0xff] %v9237_v3  ;;  %v9256_v2 = vsel %vm14100_vm2, %v694_v12, %v696_v39  ;;  %v700_v14 = vrot.slane %v8966_v43, 2  ;;  %v9269_v45 = vsel %vm14100_vm2, %v1206_v42, %v1208_v36  ;;  %v9273_v12 = vsel %vm14100_vm2, %v1208_v36, %v1210_v24 }
 0x140   : > { %v1575_v40 = vsel %vm543_vm1, %v1572_v26, %v1574_v28  ;;  %14377 = vst [vmem:[#allocation72_spill] sm:$0xff] %v9244_v55  ;;  %14378 = vst [vmem:[#allocation73_spill] sm:$0xff] %v9247_v1  ;;  %v14382_v26 = vrot.slane %v8946_v8, 2  ;;  %v9282_v43 = vadd.s32 32, %v9055_v37  ;;  %v1212_v1 = vrot.slane %v8989_v54, 2 }
 0x141   : > { %615 = vrot.lane.b32.xlu1 %v580_v35, %s7942_s16  ;;  %1610 = vrot.lane.b32.xlu0 %v1575_v40, %s7942_s16  ;;  %v9251_v38 = vpop.f32.mrf.mxu0  ;;  %v9253_v5 = vpop.f32.mrf.mxu1  ;;  %14381 = vst [vmem:[#allocation76_spill] sm:$0xff] %v9256_v2  ;;  %14384 = vst [vmem:[#allocation78_spill] sm:$0xff] %v9264_v47  ;;  %v1845_v35 = vshrl.u32 %v9179_v22, 4  ;;  %v702_v40 = vrot.slane %v8987_v6, 2  ;;  %v9287_v22 = vsub.s32 %v9055_v37, %v1835_v13  ;;  %v1856_v36 = vshrl.u32 %v9195_v20, 4 }
 0x142   : > { %14379 = vst [vmem:[#allocation74_spill] sm:$0xff] %v9251_v38  ;;  %14380 = vst [vmem:[#allocation75_spill] sm:$0xff] %v9253_v5  ;;  %v9261_v33 = vsel %vm14100_vm2, %v696_v39, %v14382_v26  ;;  %v1576_v0 = vrot.slane %v9251_v38, 1  ;;  %v1088_v39 = vrot.slane %v9010_v44, 1  ;;  %v704_v6 = vrot.slane %v9000_v49, 2 }
 0x143   : > { %14383 = vst [vmem:[#allocation77_spill] sm:$0xff] %v9261_v33  ;;  %14385 = vst [vmem:[#allocation79_spill] sm:$0xff] %v9269_v45  ;;  %v9277_v26 = vpop.f32.mrf.mxu0  ;;  %v9279_v41 = vpop.f32.mrf.mxu1  ;;  %v1214_v44 = vrot.slane %v9002_v51, 2  ;;  %v9298_v55 = vmul.u32.u64.low 3817748708, %v9264_v47  ;;  %v9299_v54 = vmul.u32.u64.high 3817748708, %v9264_v47, %v9298_v55  ;;  %v706_v20 = vrot.slane %v9012_v4, 2 }
 0x144   : > { %14386 = vst [vmem:[#allocation80_spill] sm:$0xff] %v9273_v12  ;;  %14387 = vst [vmem:[#allocation81_spill] sm:$0xff] %v9282_v43  ;;  %v1577_v42 = vsel %vm543_vm1, %v1574_v28, %v1576_v0  ;;  %v7731_v28 = vld [vmem:[%s13981_s3 + $0x168] sm:$0xff]  ;;  %v1846_v13 = vmul.u32 18, %v1845_v35  ;;  %v14391_v33 = vrot.slane %v8997_v25, 1  ;;  %vm2026_vm4 = vcmp.ne.s32.totalorder %v9287_v22, 0 }
 0x145   : > { %14388 = vst [vmem:[#allocation82_spill] sm:$0xff] %v9287_v22  ;;  %1612 = vrot.lane.b32.xlu1 %v1577_v42, %s7942_s16  ;;  %v9293_v12 = vpop.f32.mrf.mxu0  ;;  %v9295_v45 = vpop.f32.mrf.mxu1  ;;  %5302 = vmatprep.subr.mxu0 %v7731_v28  ;;  %v1090_v42 = vrot.slane %v9018_v15, 1  ;;  %v9316_v59 = vmul.u32.u64.low 3817748708, %v9282_v43  ;;  %v9317_v3 = vmul.u32.u64.high 3817748708, %v9282_v43, %v9316_v59  ;;  %vm2044_vm5 = vcmp.lt.s32.totalorder %v9287_v22, 0 }
 0x146   : > { %14389 = vst [vmem:[#allocation83_spill] sm:$0xff] %v9293_v12  ;;  %14390 = vst [vmem:[#allocation84_spill] sm:$0xff] %v9295_v45  ;;  %v1578_v51 = vrot.slane %v9293_v12, 1  ;;  %v1089_v55 = vsel %vm543_vm1, %v14391_v33, %v1088_v39  ;;  %v1857_v35 = vmul.u32 18, %v1856_v36  ;;  %v708_v15 = vrot.slane %v9020_v52, 2  ;;  %v7730_v52 = vld [vmem:[%s13981_s3 + $0x160] sm:$0xff] }
 0x147   : > { %v9308_v2 = vpop.f32.mrf.mxu0  ;;  %v9313_v38 = vpop.f32.mrf.mxu1  ;;  %v14394_v49 = vrot.slane %v8946_v8, 2  ;;  %v9338_v36 = vsel %vm14100_vm2, %v1210_v24, %v1212_v1  ;;  %v9348_v8 = vsel %vm14100_vm2, %v702_v40, %v704_v6  ;;  %5303 = vmatpush1.msra.mxu0 %v7730_v52  ;;  %v2514_v24 = vrot.slane %v9026_v10, 1  ;;  %vm9366_vm6 = vmand %vm2044_vm5, %vm2026_vm4 }
 0x148   : > { %v1579_v4 = vsel %vm543_vm1, %v1576_v0, %v1578_v51  ;;  %v9335_v0 = vsel %vm14100_vm2, %v700_v14, %v702_v40  ;;  %14397 = vst [vmem:[#allocation89_spill] sm:$0xff] %v9338_v36  ;;  %14398 = vst [vmem:[#allocation90_spill] sm:$0xff] %v9348_v8  ;;  %v14401_v40 = vmov 0  ;;  %v9374_v52 = vsel %vm14100_vm2, %v1212_v1, %v1214_v44 }
 0x149   : > { %1124 = vrot.lane.b32.xlu1 %v1089_v55, %s7942_s16  ;;  %1614 = vrot.lane.b32.xlu0 %v1579_v4, %s7942_s16  ;;  %v9325_v33 = vpop.f32.mrf.mxu0  ;;  %v9327_v28 = vpop.f32.mrf.mxu1  ;;  %v9332_v59 = vsel %vm14100_vm2, %v14394_v49, %v700_v14  ;;  %14396 = vst [vmem:[#allocation88_spill] sm:$0xff] %v9335_v0  ;;  %v5832_v55 = vld [vmem:[%s13981_s3 + $0x78] sm:$0xff]  ;;  %v9351_v49 = vadd.s32 18, %v9287_v22  ;;  %v9354_v14 = vsub.s32 %v9137_v58, %v1846_v13  ;;  %v14402_v40 = vsel %vm9366_vm6, 4294967295, %v14401_v40 }
 0x14a   : > { %14392 = vst [vmem:[#allocation85_spill] sm:$0xff] %v9325_v33  ;;  %14393 = vst [vmem:[#allocation86_spill] sm:$0xff] %v9327_v28  ;;  %v1580_v4 = vrot.slane %v9325_v33, 1  ;;  %5906 = vmatprep.subr.mxu1 %v5832_v55  ;;  %v9371_v13 = vsel %vm14100_vm2, %v704_v6, %v706_v20  ;;  %v1091_v55 = vsel %vm543_vm1, %v1088_v39, %v1090_v42  ;;  %v14407_v58 = vrot.slane %v9014_v7, 2 }
 0x14b   : > { %14395 = vst [vmem:[#allocation87_spill] sm:$0xff] %v9332_v59  ;;  %14399 = vst [vmem:[#allocation91_spill] sm:$0xff] %v9351_v49  ;;  %v9358_v25 = vpop.f32.mrf.mxu0  ;;  %v9360_v0 = vpop.f32.mrf.mxu1  ;;  %v9379_v10 = vsub.s32 %v9161_v34, %v1857_v35  ;;  %v1218_v59 = vrot.slane %v9022_v16, 2  ;;  %v1867_v39 = vshrl.u32 %v9299_v54, 4  ;;  %v9398_v42 = vadd.s32 40, %v9055_v37 }
 0x14c   : > { %14400 = vst [vmem:[#allocation92_spill] sm:$0xff] %v9354_v14  ;;  %14403 = vst [vmem:[#allocation93_spill] sm:$0xff] %v14402_v40  ;;  %v1581_v36 = vsel %vm543_vm1, %v1578_v51, %v1580_v4  ;;  %v9384_v8 = vsel %vm14100_vm2, %v1214_v44, %v14407_v58  ;;  %v9395_v51 = vsel %vm14100_vm2, %v706_v20, %v708_v15  ;;  %v2642_v44 = vrot.slane %v9032_v53, 2 }
 0x14d   : > { %14404 = vst [vmem:[#allocation94_spill] sm:$0xff] %v9371_v13  ;;  %14405 = vst [vmem:[#allocation95_spill] sm:$0xff] %v9374_v52  ;;  %1126 = vrot.lane.b32.xlu0 %v1091_v55, %s7942_s16  ;;  %1616 = vrot.lane.b32.xlu1 %v1581_v36, %s7942_s16  ;;  %v9389_v1 = vpop.f32.mrf.mxu0  ;;  %v9391_v6 = vpop.f32.mrf.mxu1  ;;  %vm2027_vm7 = vcmp.ne.s32.totalorder %v9354_v14, 0  ;;  %v14413_v54 = vrot.slane %v9038_v31, 1  ;;  %vm2045_vm8 = vcmp.lt.s32.totalorder %v9354_v14, 0  ;;  %v9416_v53 = vadd.s32 18, %v9354_v14 }
 0x14e   : > { %14406 = vst [vmem:[#allocation96_spill] sm:$0xff] %v9379_v10  ;;  %14408 = vst [vmem:[#allocation97_spill] sm:$0xff] %v9384_v8  ;;  %v1582_v16 = vrot.slane %v9389_v1, 1  ;;  %v1878_v36 = vshrl.u32 %v9317_v3, 4  ;;  %v2519_v55 = vrot.slane %v9121_v57, 1  ;;  %vm2028_vm9 = vcmp.ne.s32.totalorder %v9379_v10, 0 }
 0x14f   : > { %14409 = vst [vmem:[#allocation98_spill] sm:$0xff] %v9389_v1  ;;  %14410 = vst [vmem:[#allocation99_spill] sm:$0xff] %v9391_v6  ;;  %v9407_v35 = vpop.f32.mrf.mxu0  ;;  %v2516_v20 = vsel %vm543_vm1, %v2514_v24, %v14413_v54  ;;  %v9412_v15 = vpop.f32.mrf.mxu1  ;;  %vm2046_vm10 = vcmp.lt.s32.totalorder %v9379_v10, 0  ;;  %v1868_v8 = vmul.u32 18, %v1867_v39  ;;  %v9434_v57 = vadd.s32 48, %v9055_v37 }
 0x150   : > { %14411 = vst [vmem:[#allocation100_spill] sm:$0xff] %v9395_v51  ;;  %14412 = vst [vmem:[#allocation101_spill] sm:$0xff] %v9398_v42  ;;  %v1583_v58 = vsel %vm543_vm1, %v1580_v4, %v1582_v16  ;;  %v9430_v52 = vmul.u32.u64.low 3817748708, %v9398_v42  ;;  %v9431_v3 = vmul.u32.u64.high 3817748708, %v9398_v42, %v9430_v52  ;;  %v7729_v4 = vld [vmem:[%s13981_s3 + $0x158] sm:$0xff]  ;;  %v2517_v34 = vrot.slane %v9070_v21, 1 }
 0x151   : > { %14414 = vst [vmem:[#allocation102_spill] sm:$0xff] %v9416_v53  ;;  %2551 = vrot.lane.b32.xlu1 %v2516_v20, %s7942_s16  ;;  %1618 = vrot.lane.b32.xlu0 %v1583_v58, %s7942_s16  ;;  %v9425_v24 = vpop.f32.mrf.mxu0  ;;  %v9427_v54 = vpop.f32.mrf.mxu1  ;;  %14417 = vst [vmem:[#allocation105_spill] sm:$0xff] %v9434_v57  ;;  %v7728_v58 = vld [vmem:[%s13981_s3 + $0x150] sm:$0xff]  ;;  %v1694_v20 = vrot.slane %v9048_v63, 2  ;;  %v14418_v52 = vmov 0  ;;  %v9454_v51 = vadd.s32 18, %v9379_v10 }
 0x152   : > { %14415 = vst [vmem:[#allocation103_spill] sm:$0xff] %v9425_v24  ;;  %14416 = vst [vmem:[#allocation104_spill] sm:$0xff] %v9427_v54  ;;  %5304 = vmatprep.subr.mxu0 %v7729_v4  ;;  %v2643_v13 = vrot.slane %v9050_v19, 2  ;;  %v14423_v33 = vmov 0  ;;  %v1879_v22 = vmul.u32 18, %v1878_v36  ;;  %v1693_v19 = vrot.slane %v9030_v23, 2 }
 0x153   : > { %vm9449_vm11 = vmand %vm2045_vm8, %vm2027_vm7  ;;  %14421 = vst [vmem:[#allocation107_spill] sm:$0xff] %v9454_v51  ;;  %v9459_v1 = vpop.f32.mrf.mxu0  ;;  %v9461_v39 = vpop.f32.mrf.mxu1  ;;  %5305 = vmatpush1.msra.mxu0 %v7728_v58  ;;  %v2521_v4 = vrot.slane %v9173_v62, 1  ;;  %v2520_v21 = vsel %vm543_vm1, %v2517_v34, %v2519_v55  ;;  %v14426_v63 = vrot.slane %v9425_v24, 1  ;;  %v9484_v36 = vsub.s32 %v9264_v47, %v1868_v8  ;;  %v14448_v47 = vld [vmem:[#allocation4_spill] sm:$0xff]  ;;  %v14461_v53 = vld [vmem:[#allocation5_spill] sm:$0xff] }
 0x154   : > { %v14419_v52 = vsel %vm9449_vm11, 4294967295, %v14418_v52  ;;  %14422 = vst [vmem:[#allocation108_spill] sm:$0xff] %v9461_v39  ;;  %vm9467_vm12 = vmand %vm2046_vm10, %vm2028_vm9  ;;  %v9487_v23 = vmul.u32.u64.low 3817748708, %v9434_v57  ;;  %v9488_v58 = vmul.u32.u64.high 3817748708, %v9434_v57, %v9487_v23  ;;  %v14430_v62 = vrot.slane %v9014_v7, 2 }
 0x155   : > { %14420 = vst [vmem:[#allocation106_spill] sm:$0xff] %v14419_v52  ;;  %v14424_v33 = vsel %vm9467_vm12, 4294967295, %v14423_v33  ;;  %v1585_v49 = vsel %vm543_vm1, %v1582_v16, %v14426_v63  ;;  %2555 = vrot.lane.b32.xlu0 %v2520_v21, %s7942_s16  ;;  %v9479_v40 = vpop.f32.mrf.mxu0  ;;  %v9481_v12 = vpop.f32.mrf.mxu1  ;;  %14429 = vst [vmem:[#allocation112_spill] sm:$0xff] %v9484_v36  ;;  %v14432_v21 = vrot.slane %v9038_v31, 1  ;;  %v9499_v16 = vsel %vm14100_vm2, %v1693_v19, %v1694_v20 }
 0x156   : > { %14425 = vst [vmem:[#allocation109_spill] sm:$0xff] %v14424_v33  ;;  %1620 = vrot.lane.b32.xlu1 %v1585_v49, %s7942_s16  ;;  %14427 = vst [vmem:[#allocation110_spill] sm:$0xff] %v9479_v40  ;;  %v9493_v11 = vsel %vm14100_vm2, %v14430_v62, %v1218_v59  ;;  %v14434_v59 = vrot.slane %v9089_v9, 2  ;;  %v9517_v19 = vsub.s32 %v9282_v43, %v1879_v22  ;;  %v1586_v31 = vrot.slane %v9479_v40, 1 }
 0x157   : > { %14428 = vst [vmem:[#allocation111_spill] sm:$0xff] %v9481_v12  ;;  %14431 = vst [vmem:[#allocation113_spill] sm:$0xff] %v9493_v11  ;;  %v2518_v49 = vsel %vm543_vm1, %v14432_v21, %v2517_v34  ;;  %v582_v63 = vpop.permute.xlu0 %581  ;;  %v9509_v62 = vpop.f32.mrf.mxu0  ;;  %v9520_v23 = vsel %vm14100_vm2, %v2642_v44, %v2643_v13  ;;  %v14438_v21 = vrot.slane %v9091_v48, 2  ;;  %v2523_v44 = vrot.slane %v9204_v30, 1 }
 0x158   : > { %14433 = vst [vmem:[#allocation114_spill] sm:$0xff] %v9499_v16  ;;  %v9514_v34 = vsel %vm14100_vm2, %v1694_v20, %v14434_v59  ;;  %14436 = vst [vmem:[#allocation116_spill] sm:$0xff] %v9517_v19  ;;  %v635_v11 = vadd.f32 %v582_v63, %v8685_v18  ;;  %v2522_v20 = vsel %vm543_vm1, %v2519_v55, %v2521_v4  ;;  %v9531_v59 = vpop.f32.mrf.mxu1  ;;  %vm2029_vm13 = vcmp.ne.s32.totalorder %v9484_v36, 0  ;;  %v7727_v18 = vld [vmem:[%s13981_s3 + $0x148] sm:$0xff]  ;;  %v7726_v55 = vld [vmem:[%s13981_s3 + $0x140] sm:$0xff] }
 0x159   : > { %14435 = vst [vmem:[#allocation115_spill] sm:$0xff] %v9514_v34  ;;  %14437 = vst [vmem:[#allocation117_spill] sm:$0xff] %v9520_v23  ;;  %v9525_v8 = vsel %vm14100_vm2, %v2643_v13, %v14438_v21  ;;  %2557 = vrot.lane.b32.xlu0 %v2522_v20, %s7942_s16  ;;  %v9537_v13 = vpop.f32.mrf.mxu0  ;;  %v1093_v21 = vpop.permute.xlu1 %1092  ;;  %v1889_v7 = vshrl.u32 %v9431_v3, 4  ;;  %v14442_v63 = vld [vmem:[#allocation8_spill] sm:$0xff]  ;;  %vm2047_vm14 = vcmp.lt.s32.totalorder %v9484_v36, 0  ;;  %v9553_v30 = vadd.s32 56, %v9055_v37  ;;  %5306 = vmatprep.subr.mxu0 %v7727_v18 }
 0x15a   : > { %14439 = vst [vmem:[#allocation118_spill] sm:$0xff] %v9525_v8  ;;  %14440 = vst [vmem:[#allocation119_spill] sm:$0xff] %v9531_v59  ;;  %2553 = vrot.lane.b32.xlu1 %v2518_v49, %s7942_s16  ;;  %v728_v22 = vadd.f32 %v14442_v63, %v635_v11  ;;  %v9549_v49 = vpop.f32.mrf.mxu1  ;;  %v9559_v43 = vadd.s32 18, %v9484_v36  ;;  %vm2030_vm15 = vcmp.ne.s32.totalorder %v9517_v19, 0  ;;  %v9563_v11 = vadd.s32 64, %v9055_v37  ;;  %5307 = vmatpush1.msra.mxu0 %v7726_v55  ;;  %v14447_v63 = vld [vmem:[#allocation3_spill] sm:$0xff] }
 0x15b   : > { %14441 = vst [vmem:[#allocation120_spill] sm:$0xff] %v9537_v13  ;;  %14443 = vst [vmem:[#allocation8_spill] sm:$0xff] %v9549_v49  ;;  %v584_v8 = vpop.permute.xlu0 %583  ;;  %v9556_v23 = vpop.f32.mrf.mxu0  ;;  %v14449_v18 = vrot.slane %v9425_v24, 1  ;;  %v14450_v34 = vrot.slane %v9537_v13, 1  ;;  %vm2048_vm3 = vcmp.lt.s32.totalorder %v9517_v19, 0  ;;  %v14479_v36 = vld [vmem:[#allocation6_spill] sm:$0xff] }
 0x15c   : > { %14444 = vst [vmem:[#allocation121_spill] sm:$0xff] %v9553_v30  ;;  %14445 = vst [vmem:[#allocation122_spill] sm:$0xff] %v9559_v43  ;;  %v1018_v20 = vadd.f32 %v14447_v63, %v728_v22  ;;  %v636_v40 = vadd.f32 %v584_v8, %v14448_v47  ;;  %v9573_v51 = vpop.f32.mrf.mxu1  ;;  %v2524_v22 = vsel %vm543_vm1, %v2521_v4, %v2523_v44  ;;  %v1890_v47 = vmul.u32 18, %v1889_v7  ;;  %v14453_v63 = vld [vmem:[#allocation11_spill] sm:$0xff] }
 0x15d   : > { %14446 = vst [vmem:[#allocation123_spill] sm:$0xff] %v9563_v11  ;;  %v1587_v3 = vsel %vm543_vm1, %v14449_v18, %v1586_v31  ;;  %v1589_v10 = vsel %vm543_vm1, %v1586_v31, %v14450_v34  ;;  %14451 = vst [vmem:[#allocation3_spill] sm:$0xff] %v9573_v51  ;;  %v9577_v33 = vpop.f32.mrf.mxu0  ;;  %v1900_v8 = vshrl.u32 %v9488_v58, 4  ;;  %v14455_v31 = vmov 0 }
 0x15e   : > { %1622 = vrot.lane.b32.xlu0 %v1587_v3, %s7942_s16  ;;  %1624 = vrot.lane.b32.xlu1 %v1589_v10, %s7942_s16  ;;  %14452 = vst [vmem:[#allocation4_spill] sm:$0xff] %v9577_v33  ;;  %v1146_v55 = vadd.f32 %v1093_v21, %v1018_v20  ;;  %v729_v18 = vadd.f32 %v14453_v63, %v636_v40  ;;  %v9583_v24 = vpop.f32.mrf.mxu1  ;;  %vm9589_vm4 = vmand %vm2047_vm14, %vm2029_vm13  ;;  %v9594_v10 = vmul.u32.u64.low 3817748708, %v9553_v30  ;;  %v9595_v4 = vmul.u32.u64.high 3817748708, %v9553_v30, %v9594_v10  ;;  %v14460_v63 = vld [vmem:[#allocation44_spill] sm:$0xff] }
 0x15f   : > { %14454 = vst [vmem:[#allocation11_spill] sm:$0xff] %v9583_v24  ;;  %v14456_v31 = vsel %vm9589_vm4, 4294967295, %v14455_v31  ;;  %v1095_v7 = vpop.permute.xlu0 %1094  ;;  %v586_v34 = vpop.permute.xlu1 %585  ;;  %v14458_v58 = vrot.slane %v9253_v5, 1  ;;  %v9601_v21 = vmul.u32.u64.low 3817748708, %v9563_v11  ;;  %v9602_v20 = vmul.u32.u64.high 3817748708, %v9563_v11, %v9601_v21  ;;  %v14462_v10 = vld [vmem:[#allocation7_spill] sm:$0xff]  ;;  %vm9653_vm5 = vmand %vm2048_vm3, %vm2030_vm15 }
 0x160   : > { %14457 = vst [vmem:[#allocation124_spill] sm:$0xff] %v14456_v31  ;;  %v9605_v3 = vadd.s32 72, %v9055_v37  ;;  %v1238_v16 = vadd.f32 %v14460_v63, %v1146_v55  ;;  %v1590_v14 = vrot.slane %v9577_v33, 1  ;;  %v1019_v52 = vadd.f32 %v14461_v53, %v729_v18  ;;  %v9611_v50 = vpop.f32.mrf.mxu0  ;;  %v9613_v24 = vpop.f32.mrf.mxu1  ;;  %v14468_v63 = vld [vmem:[#allocation48_spill] sm:$0xff]  ;;  %v7724_v53 = vld [vmem:[%s13981_s3 + $0x130] sm:$0xff]  ;;  %v14478_v33 = vld [vmem:[#allocation45_spill] sm:$0xff] }
 0x161   : > { %v2526_v40 = vsel %vm543_vm1, %v2523_v44, %v14458_v58  ;;  %v637_v60 = vadd.f32 %v586_v34, %v14462_v10  ;;  %14463 = vst [vmem:[#allocation44_spill] sm:$0xff] %v9613_v24  ;;  %v14464_v58 = vrot.slane %v9140_v27, 2  ;;  %v14465_v55 = vrot.slane %v9089_v9, 2  ;;  %v14471_v44 = vld [vmem:[#allocation40_spill] sm:$0xff] }
 0x162   : > { %14459 = vst [vmem:[#allocation125_spill] sm:$0xff] %v9605_v3  ;;  %2559 = vrot.lane.b32.xlu0 %v2524_v22, %s7942_s16  ;;  %2561 = vrot.lane.b32.xlu1 %v2526_v40, %s7942_s16  ;;  %v9630_v18 = vadd.s32 18, %v9517_v19  ;;  %v1147_v34 = vadd.f32 %v1095_v7, %v1019_v52  ;;  %v9633_v10 = vpop.f32.mrf.mxu0  ;;  %v9635_v40 = vpop.f32.mrf.mxu1  ;;  %v9638_v9 = vadd.f32 %v14471_v44, %v1238_v16  ;;  %v14474_v16 = vmov 0 }
 0x163   : > { %v9623_v21 = vsel %vm14100_vm2, %v14465_v55, %v14464_v58  ;;  %v730_v22 = vadd.f32 %v14468_v63, %v637_v60  ;;  %14469 = vst [vmem:[#allocation48_spill] sm:$0xff] %v9633_v10  ;;  %14470 = vst [vmem:[#allocation126_spill] sm:$0xff] %v9635_v40  ;;  %v1901_v58 = vmul.u32 18, %v1900_v8  ;;  %v7725_v55 = vld [vmem:[%s13981_s3 + $0x138] sm:$0xff]  ;;  %v9647_v7 = vpop.permute.xlu0 %1098  ;;  %v1097_v60 = vpop.permute.xlu1 %1096  ;;  %v14475_v16 = vsel %vm9653_vm5, 4294967295, %v14474_v16 }
 0x164   : > { %14466 = vst [vmem:[#allocation5_spill] sm:$0xff] %v9623_v21  ;;  %14467 = vst [vmem:[#allocation7_spill] sm:$0xff] %v9630_v18  ;;  %v9658_v8 = vsub.s32 %v9398_v42, %v1890_v47  ;;  %v9661_v44 = vmul.u32.u64.low 3817748708, %v9605_v3  ;;  %v9662_v63 = vmul.u32.u64.high 3817748708, %v9605_v3, %v9661_v44  ;;  %5308 = vmatprep.subr.mxu0 %v7725_v55  ;;  %v2527_v52 = vrot.slane %v9295_v45, 1  ;;  %v9667_v31 = vpop.f32.mrf.mxu0  ;;  %v9672_v24 = vpop.f32.mrf.mxu1 }
 0x165   : > { %14472 = vst [vmem:[#allocation40_spill] sm:$0xff] %v9638_v9  ;;  %14473 = vst [vmem:[#allocation127_spill] sm:$0xff] %v9647_v7  ;;  %v1239_v21 = vadd.f32 %v14478_v33, %v1147_v34  ;;  %v1020_v43 = vadd.f32 %v14479_v36, %v730_v22  ;;  %v14480_v9 = vrot.slane %v9537_v13, 1  ;;  %5309 = vmatpush1.msra.mxu0 %v7724_v53  ;;  %v14482_v55 = vrot.slane %v9633_v10, 1  ;;  %v14488_v44 = vld [vmem:[#allocation42_spill] sm:$0xff] }
 0x166   : > { %14476 = vst [vmem:[#allocation128_spill] sm:$0xff] %v14475_v16  ;;  %14477 = vst [vmem:[#allocation129_spill] sm:$0xff] %v9658_v8  ;;  %v14483_v36 = vrot.slane %v9183_v56, 2  ;;  %v14484_v34 = vrot.slane %v9140_v27, 2  ;;  %v9688_v53 = vpop.f32.mrf.mxu0  ;;  %v9690_v47 = vpop.f32.mrf.mxu1  ;;  %v9700_v27 = vsub.s32 %v9434_v57, %v1901_v58  ;;  %vm2031_vm7 = vcmp.ne.s32.totalorder %v9658_v8, 0 }
 0x167   : > { %v1591_v7 = vsel %vm543_vm1, %v14480_v9, %v1590_v14  ;;  %14481 = vst [vmem:[#allocation45_spill] sm:$0xff] %v9672_v24  ;;  %v1593_v33 = vsel %vm543_vm1, %v1590_v14, %v14482_v55  ;;  %v1148_v9 = vadd.f32 %v1097_v60, %v1020_v43  ;;  %14486 = vst [vmem:[#allocation130_spill] sm:$0xff] %v9688_v53  ;;  %v9702_v55 = vpop.permute.xlu1 %587  ;;  %v9704_v43 = vpop.permute.xlu0 %589  ;;  %vm2049_vm8 = vcmp.lt.s32.totalorder %v9658_v8, 0 }
 0x168   : > { %1626 = vrot.lane.b32.xlu0 %v1591_v7, %s7942_s16  ;;  %v9685_v22 = vsel %vm14100_vm2, %v14484_v34, %v14483_v36  ;;  %1628 = vrot.lane.b32.xlu1 %v1593_v33, %s7942_s16  ;;  %14487 = vst [vmem:[#allocation131_spill] sm:$0xff] %v9690_v47  ;;  %v9693_v7 = vadd.f32 %v14488_v44, %v1239_v21  ;;  %14490 = vst [vmem:[#allocation132_spill] sm:$0xff] %v9700_v27  ;;  %v1911_v60 = vshrl.u32 %v9595_v4, 4  ;;  %v9712_v36 = vpop.f32.mrf.mxu0  ;;  %v9717_v14 = vpop.f32.mrf.mxu1 }
 0x169   : > { %14485 = vst [vmem:[#allocation6_spill] sm:$0xff] %v9685_v22  ;;  %v1922_v21 = vshrl.u32 %v9602_v20, 4  ;;  %v1240_v44 = vadd.f32 %v9108_v61, %v1148_v9  ;;  %v1594_v33 = vrot.slane %v9688_v53, 1  ;;  %v14491_v58 = vrot.slane %v9253_v5, 1  ;;  %14492 = vst [vmem:[#allocation133_spill] sm:$0xff] %v9717_v14  ;;  %v7788_v14 = vld [vmem:[%s13981_s3 + $0xf8] sm:$0xff] }
 0x16a   : > { %14489 = vst [vmem:[#allocation42_spill] sm:$0xff] %v9693_v7  ;;  %v9720_v45 = vadd.s32 80, %v9055_v37  ;;  %v1702_v57 = vrot.slane %v9229_v32, 2  ;;  %v2651_v4 = vrot.slane %v9231_v17, 2  ;;  %v14494_v61 = vrot.slane %v9327_v28, 1  ;;  %v9733_v5 = vpop.f32.mrf.mxu0  ;;  %v9735_v42 = vpop.f32.mrf.mxu1  ;;  %v14498_v32 = vld [vmem:[#allocation46_spill] sm:$0xff]  ;;  %vm9750_vm13 = vmand %vm2049_vm8, %vm2031_vm7 }
 0x16b   : > { %v2528_v34 = vsel %vm543_vm1, %v14491_v58, %v2527_v52  ;;  %v9729_v9 = vadd.s32 18, %v9658_v8  ;;  %v1704_v58 = vrot.slane %v9277_v26, 2  ;;  %14496 = vst [vmem:[#allocation136_spill] sm:$0xff] %v9733_v5  ;;  %14497 = vst [vmem:[#allocation137_spill] sm:$0xff] %v9735_v42  ;;  %v9738_v53 = vadd.f32 %v14498_v32, %v1240_v44  ;;  %v9742_v17 = vpop.permute.xlu1 %1100 }
 0x16c   : > { %14493 = vst [vmem:[#allocation134_spill] sm:$0xff] %v9720_v45  ;;  %2563 = vrot.lane.b32.xlu0 %v2528_v34, %s7942_s16  ;;  %v2530_v20 = vsel %vm543_vm1, %v2527_v52, %v14494_v61  ;;  %vm2032_vm9 = vcmp.ne.s32.totalorder %v9700_v27, 0  ;;  %vm2050_vm10 = vcmp.lt.s32.totalorder %v9700_v27, 0  ;;  %v9744_v52 = vpop.permute.xlu0 %1102  ;;  %v14501_v26 = vmov 0  ;;  %v9759_v13 = vpop.f32.mrf.mxu0 }
 0x16d   : > { %14495 = vst [vmem:[#allocation135_spill] sm:$0xff] %v9729_v9  ;;  %2565 = vrot.lane.b32.xlu1 %v2530_v20, %s7942_s16  ;;  %14499 = vst [vmem:[#allocation46_spill] sm:$0xff] %v9738_v53  ;;  %v14502_v26 = vsel %vm9750_vm13, 4294967295, %v14501_v26  ;;  %v1912_v34 = vmul.u32 18, %v1911_v60  ;;  %v1923_v61 = vmul.u32 18, %v1922_v21  ;;  %v1933_v44 = vshrl.u32 %v9662_v63, 4  ;;  %v9764_v18 = vpop.f32.mrf.mxu1 }
 0x16e   : > { %14500 = vst [vmem:[#allocation138_spill] sm:$0xff] %v9744_v52  ;;  %14503 = vst [vmem:[#allocation139_spill] sm:$0xff] %v14502_v26  ;;  %v9756_v20 = vadd.s32 88, %v9055_v37  ;;  %v1596_v32 = vrot.slane %v9733_v5, 1  ;;  %v14506_v22 = vrot.slane %v9633_v10, 1  ;;  %v14508_v63 = vrot.slane %v9183_v56, 2 }
 0x16f   : > { %14505 = vst [vmem:[#allocation141_spill] sm:$0xff] %v9759_v13  ;;  %14507 = vst [vmem:[#allocation142_spill] sm:$0xff] %v9764_v18  ;;  %v9767_v16 = vmul.u32.u64.low 3817748708, %v9720_v45  ;;  %v9768_v53 = vmul.u32.u64.high 3817748708, %v9720_v45, %v9767_v16  ;;  %v9778_v5 = vadd.s32 18, %v9700_v27  ;;  %v14512_v10 = vrot.slane %v9091_v48, 2  ;;  %v9791_v56 = vpop.f32.mrf.mxu1 }
 0x170   : > { %14504 = vst [vmem:[#allocation140_spill] sm:$0xff] %v9756_v20  ;;  %v1595_v19 = vsel %vm543_vm1, %v14506_v22, %v1594_v33  ;;  %v9775_v21 = vsel %vm14100_vm2, %v14508_v63, %v1702_v57  ;;  %v14511_v22 = vrot.slane %v9142_v29, 2  ;;  %v2653_v16 = vrot.slane %v9279_v41, 2  ;;  %14515 = vst [vmem:[#allocation147_spill] sm:$0xff] %v9791_v56  ;;  %v7723_v60 = vld [vmem:[%s13981_s3 + $0x128] sm:$0xff]  ;;  %v7722_v63 = vld [vmem:[%s13981_s3 + $0x120] sm:$0xff]  ;;  %v9821_v8 = vpop.permute.xlu0 %593 }
 0x171   : > { %1630 = vrot.lane.b32.xlu0 %v1595_v19, %s7942_s16  ;;  %14509 = vst [vmem:[#allocation143_spill] sm:$0xff] %v9775_v21  ;;  %14510 = vst [vmem:[#allocation144_spill] sm:$0xff] %v9778_v5  ;;  %v9789_v19 = vpop.f32.mrf.mxu0  ;;  %v14516_v48 = vmov 0  ;;  %v14519_v41 = vrot.slane %v9188_v46, 2  ;;  %v9819_v21 = vpop.permute.xlu1 %591  ;;  %v9824_v9 = vsub.s32 %v9553_v30, %v1912_v34  ;;  %5310 = vmatprep.subr.mxu0 %v7723_v60  ;;  %v9839_v52 = vsub.s32 %v9563_v11, %v1923_v61  ;;  %v14570_v5 = vld [vmem:[#allocation13_spill] sm:$0xff]  ;;  %v14659_v13 = vld [vmem:[#allocation20_spill] sm:$0xff] }
 0x172   : > { %v9785_v7 = vsel %vm14100_vm2, %v14512_v10, %v14511_v22  ;;  %14514 = vst [vmem:[#allocation146_spill] sm:$0xff] %v9789_v19  ;;  %vm9801_vm14 = vmand %vm2050_vm10, %vm2032_vm9  ;;  %v14520_v10 = vmov %v14511_v22  ;;  %v9833_v26 = vpop.f32.mrf.mxu1  ;;  %v1934_v56 = vmul.u32 18, %v1933_v44  ;;  %5311 = vmatpush1.msra.mxu0 %v7722_v63  ;;  %v1708_v44 = vrot.slane %v9358_v25, 2  ;;  %v7720_v25 = vld [vmem:[%s13981_s3 + $0x110] sm:$0xff] }
 0x173   : > { %14513 = vst [vmem:[#allocation145_spill] sm:$0xff] %v9785_v7  ;;  %v14517_v48 = vsel %vm9801_vm14, 4294967295, %v14516_v48  ;;  %v9810_v22 = vsel %vm14100_vm2, %v14520_v10, %v14519_v41  ;;  %v1598_v7 = vrot.slane %v9789_v19, 1  ;;  %14522 = vst [vmem:[#allocation150_spill] sm:$0xff] %v9824_v9  ;;  %v9830_v10 = vpop.f32.mrf.mxu0  ;;  %v9836_v19 = vsel %vm14100_vm2, %v1702_v57, %v1704_v58 }
 0x174   : > { %14518 = vst [vmem:[#allocation148_spill] sm:$0xff] %v14517_v48  ;;  %14521 = vst [vmem:[#allocation149_spill] sm:$0xff] %v9810_v22  ;;  %v9827_v29 = vmul.u32.u64.low 3817748708, %v9756_v20  ;;  %v9828_v41 = vmul.u32.u64.high 3817748708, %v9756_v20, %v9827_v29  ;;  %v1597_v22 = vsel %vm543_vm1, %v1594_v33, %v1596_v32  ;;  %v14527_v33 = vrot.slane %v9308_v2, 2 }
 0x175   : > { %14523 = vst [vmem:[#allocation151_spill] sm:$0xff] %v9830_v10  ;;  %14524 = vst [vmem:[#allocation152_spill] sm:$0xff] %v9833_v26  ;;  %1632 = vrot.lane.b32.xlu0 %v1597_v22, %s7942_s16  ;;  %v1599_v34 = vsel %vm543_vm1, %v1596_v32, %v1598_v7  ;;  %v14529_v57 = vrot.slane %v9188_v46, 2  ;;  %v1523_v32 = vpop.f32.mrf.mxu0  ;;  %v9860_v22 = vpop.f32.mrf.mxu1  ;;  %v9863_v60 = vsel %vm14100_vm2, %v2651_v4, %v2653_v16  ;;  %v7721_v46 = vld [vmem:[%s13981_s3 + $0x118] sm:$0xff]  ;;  %vm2033_vm15 = vcmp.ne.s32.totalorder %v9824_v9, 0 }
 0x176   : > { %14525 = vst [vmem:[#allocation153_spill] sm:$0xff] %v9836_v19  ;;  %14526 = vst [vmem:[#allocation154_spill] sm:$0xff] %v9839_v52  ;;  %v9850_v29 = vsel %vm14100_vm2, %v1704_v58, %v14527_v33  ;;  %1634 = vrot.lane.b32.xlu1 %v1599_v34, %s7942_s16  ;;  %v14532_v58 = vrot.slane %v9313_v38, 2  ;;  %v2531_v34 = vrot.slane %v9391_v6, 1  ;;  %v9877_v63 = vpop.permute.xlu1 %1104  ;;  %vm2051_vm3 = vcmp.lt.s32.totalorder %v9824_v9, 0  ;;  %5312 = vmatprep.subr.mxu0 %v7721_v46 }
 0x177   : > { %14528 = vst [vmem:[#allocation155_spill] sm:$0xff] %v9850_v29  ;;  %v9855_v61 = vsel %vm14100_vm2, %v14529_v57, %v2651_v4  ;;  %14531 = vst [vmem:[#allocation157_spill] sm:$0xff] %v9863_v60  ;;  %v1600_v57 = vrot.slane %v1523_v32, 1  ;;  %v9881_v4 = vpop.f32.mrf.mxu0  ;;  %vm2034_vm7 = vcmp.ne.s32.totalorder %v9839_v52, 0  ;;  %vm2052_vm8 = vcmp.lt.s32.totalorder %v9839_v52, 0  ;;  %5313 = vmatpush1.msra.mxu0 %v7720_v25  ;;  %v9893_v60 = vpop.permute.xlu0 %1106 }
 0x178   : > { %14530 = vst [vmem:[#allocation156_spill] sm:$0xff] %v9855_v61  ;;  %v9868_v33 = vsel %vm14100_vm2, %v2653_v16, %v14532_v58  ;;  %14534 = vst [vmem:[#allocation159_spill] sm:$0xff] %v9881_v4  ;;  %v9883_v16 = vpop.f32.mrf.mxu1  ;;  %v9888_v58 = vsub.s32 %v9605_v3, %v1934_v56  ;;  %v1944_v32 = vshrl.u32 %v9768_v53, 4  ;;  %v1710_v6 = vrot.slane %v9407_v35, 2 }
 0x179   : > { %14533 = vst [vmem:[#allocation158_spill] sm:$0xff] %v9868_v33  ;;  %14535 = vst [vmem:[#allocation160_spill] sm:$0xff] %v9883_v16  ;;  %v2533_v33 = vrot.slane %v9427_v54, 1  ;;  %v1601_v46 = vsel %vm543_vm1, %v1598_v7, %v1600_v57  ;;  %v9897_v61 = vadd.s32 18, %v9824_v9  ;;  %v1712_v11 = vrot.slane %v9459_v1, 2  ;;  %v9901_v56 = vpop.f32.mrf.mxu0 }
 0x17a   : > { %14536 = vst [vmem:[#allocation161_spill] sm:$0xff] %v9888_v58  ;;  %1636 = vrot.lane.b32.xlu1 %v1601_v46, %s7942_s16  ;;  %14538 = vst [vmem:[#allocation163_spill] sm:$0xff] %v9901_v56  ;;  %v9903_v3 = vpop.f32.mrf.mxu1  ;;  %v14540_v35 = vmov 0  ;;  %v14543_v53 = vrot.slane %v9308_v2, 2  ;;  %v9919_v1 = vadd.s32 18, %v9839_v52  ;;  %v14546_v25 = vrot.slane %v9360_v0, 2 }
 0x17b   : > { %14537 = vst [vmem:[#allocation162_spill] sm:$0xff] %v9897_v61  ;;  %14539 = vst [vmem:[#allocation164_spill] sm:$0xff] %v9903_v3  ;;  %v14547_v57 = vrot.slane %v9313_v38, 2  ;;  %v2659_v54 = vrot.slane %v9412_v15, 2  ;;  %v14549_v29 = vrot.slane %v9327_v28, 1  ;;  %v1955_v38 = vshrl.u32 %v9828_v41, 4  ;;  %v9945_v15 = vpop.f32.mrf.mxu0  ;;  %v9952_v28 = vpop.permute.xlu1 %595 }
 0x17c   : > { %vm9909_vm9 = vmand %vm2051_vm3, %vm2033_vm15  ;;  %v9916_v7 = vsel %vm14100_vm2, %v14543_v53, %v1708_v44  ;;  %14545 = vst [vmem:[#allocation167_spill] sm:$0xff] %v9919_v1  ;;  %v14550_v53 = vmov 0  ;;  %vm2035_vm15 = vcmp.ne.s32.totalorder %v9888_v58, 0  ;;  %vm2053_vm3 = vcmp.lt.s32.totalorder %v9888_v58, 0 }
 0x17d   : > { %v14541_v35 = vsel %vm9909_vm9, 4294967295, %v14540_v35  ;;  %14544 = vst [vmem:[#allocation166_spill] sm:$0xff] %v9916_v7  ;;  %v9926_v46 = vsel %vm14100_vm2, %v14547_v57, %v14546_v25  ;;  %v9933_v2 = vsel %vm543_vm1, %v14549_v29, %v2531_v34  ;;  %vm9939_vm10 = vmand %vm2052_vm8, %vm2034_vm7  ;;  %v2535_v25 = vrot.slane %v9481_v12, 1  ;;  %v9947_v57 = vpop.f32.mrf.mxu1  ;;  %v9963_v7 = vpop.f32.mrf.mxu0 }
 0x17e   : > { %14542 = vst [vmem:[#allocation165_spill] sm:$0xff] %v14541_v35  ;;  %14548 = vst [vmem:[#allocation168_spill] sm:$0xff] %v9926_v46  ;;  %v14551_v53 = vsel %vm9939_vm10, 4294967295, %v14550_v53  ;;  %v1945_v29 = vmul.u32 18, %v1944_v32  ;;  %v2534_v46 = vsel %vm543_vm1, %v2531_v34, %v2533_v33  ;;  %v9960_v12 = vsel %vm14100_vm2, %v1708_v44, %v1710_v6 }
 0x17f   : > { %14552 = vst [vmem:[#allocation169_spill] sm:$0xff] %v14551_v53  ;;  %14553 = vst [vmem:[#allocation170_spill] sm:$0xff] %v9947_v57  ;;  %2569 = vrot.lane.b32.xlu1 %v2534_v46, %s7942_s16  ;;  %v9965_v19 = vpop.f32.mrf.mxu1  ;;  %v9972_v34 = vadd.s32 18, %v9888_v58  ;;  %v9975_v30 = vsel %vm14100_vm2, %v1710_v6, %v1712_v11  ;;  %v9978_v44 = vadd.s32 96, %v9055_v37  ;;  %v1714_v46 = vrot.slane %v9509_v62, 2  ;;  %v9994_v52 = vpop.f32.mrf.mxu0  ;;  %v14710_v57 = vld [vmem:[#allocation29_spill] sm:$0xff] }
 0x180   : > { %14554 = vst [vmem:[#allocation171_spill] sm:$0xff] %v9960_v12  ;;  %14555 = vst [vmem:[#allocation172_spill] sm:$0xff] %v9963_v7  ;;  %v3023_v41 = vrot.slane %v9901_v56, 1  ;;  %v9982_v12 = vpop.permute.xlu0 %597  ;;  %v14560_v32 = vmov 0  ;;  %v1956_v6 = vmul.u32 18, %v1955_v38  ;;  %v9999_v56 = vsel %vm543_vm1, %v2533_v33, %v2535_v25 }
 0x181   : > { %14556 = vst [vmem:[#allocation173_spill] sm:$0xff] %v9965_v19  ;;  %14557 = vst [vmem:[#allocation174_spill] sm:$0xff] %v9972_v34  ;;  %v9996_v62 = vpop.f32.mrf.mxu1  ;;  %v10002_v9 = vsub.s32 %v9720_v45, %v1945_v29  ;;  %v14565_v1 = vrot.slane %v9461_v39, 2  ;;  %v14568_v27 = vrot.slane %v9963_v7, 1  ;;  %v14569_v45 = vld [vmem:[#allocation10_spill] sm:$0xff]  ;;  %v10024_v61 = vpop.f32.mrf.mxu0  ;;  %v3532_v29 = vrot.slane %v9903_v3, 1 }
 0x182   : > { %14558 = vst [vmem:[#allocation175_spill] sm:$0xff] %v9975_v30  ;;  %14559 = vst [vmem:[#allocation176_spill] sm:$0xff] %v9978_v44  ;;  %v14567_v30 = vrot.slane %v9549_v49, 1  ;;  %v638_v39 = vadd.f32 %v9702_v55, %v14569_v45  ;;  %v10036_v45 = vsel %vm14100_vm2, %v1712_v11, %v1714_v46  ;;  %v10042_v55 = vadd.s32 104, %v9055_v37 }
 0x183   : > { %vm9989_vm7 = vmand %vm2053_vm3, %vm2035_vm15  ;;  %14563 = vst [vmem:[#allocation178_spill] sm:$0xff] %v9996_v62  ;;  %v10007_v53 = vsel %vm14100_vm2, %v2659_v54, %v14565_v1  ;;  %v3025_v33 = vsel %vm543_vm1, %v3023_v41, %v14568_v27  ;;  %v639_v1 = vadd.f32 %v9704_v43, %v14570_v5  ;;  %v10026_v38 = vpop.f32.mrf.mxu1  ;;  %v14573_v27 = vld [vmem:[#allocation11_spill] sm:$0xff]  ;;  %v10033_v41 = vpop.permute.xlu1 %1108  ;;  %v10039_v5 = vsub.s32 %v9756_v20, %v1956_v6 }
 0x184   : > { %v14561_v32 = vsel %vm9989_vm7, 4294967295, %v14560_v32  ;;  %14564 = vst [vmem:[#allocation179_spill] sm:$0xff] %v10002_v9  ;;  %14566 = vst [vmem:[#allocation180_spill] sm:$0xff] %v10007_v53  ;;  %v2538_v35 = vsel %vm543_vm1, %v2535_v25, %v14567_v30  ;;  %3060 = vrot.lane.b32.xlu0 %v3025_v33, %s7942_s16  ;;  %v2539_v25 = vrot.slane %v14573_v27, 1  ;;  %v10044_v43 = vpop.f32.mrf.mxu0  ;;  %vm2036_vm8 = vcmp.ne.s32.totalorder %v10002_v9, 0  ;;  %v10061_v27 = vpop.permute.xlu0 %1110 }
 0x185   : > { %14562 = vst [vmem:[#allocation177_spill] sm:$0xff] %v14561_v32  ;;  %2573 = vrot.lane.b32.xlu1 %v2538_v35, %s7942_s16  ;;  %14571 = vst [vmem:[#allocation10_spill] sm:$0xff] %v10024_v61  ;;  %v10046_v35 = vpop.f32.mrf.mxu1  ;;  %vm2054_vm15 = vcmp.lt.s32.totalorder %v10002_v9, 0  ;;  %v14578_v33 = vrot.slane %v9556_v23, 2  ;;  %v14580_v11 = vrot.slane %v9360_v0, 2  ;;  %v3533_v20 = vrot.slane %v9965_v19, 1 }
 0x186   : > { %14572 = vst [vmem:[#allocation13_spill] sm:$0xff] %v10026_v38  ;;  %14574 = vst [vmem:[#allocation181_spill] sm:$0xff] %v10036_v45  ;;  %v14582_v45 = vrot.slane %v9635_v40, 1  ;;  %v14584_v0 = vld [vmem:[#allocation53_spill] sm:$0xff]  ;;  %v14587_v53 = vrot.slane %v9573_v51, 2  ;;  %vm2037_vm3 = vcmp.ne.s32.totalorder %v10039_v5, 0 }
 0x187   : > { %14575 = vst [vmem:[#allocation182_spill] sm:$0xff] %v10039_v5  ;;  %14576 = vst [vmem:[#allocation183_spill] sm:$0xff] %v10042_v55  ;;  %v10053_v30 = vsel %vm14100_vm2, %v1714_v46, %v14578_v33  ;;  %v10058_v6 = vsel %vm14100_vm2, %v14580_v11, %v2659_v54  ;;  %v14583_v33 = vld [vmem:[#allocation52_spill] sm:$0xff]  ;;  %v732_v34 = vadd.f32 %v14584_v0, %v639_v1  ;;  %v10074_v54 = vpop.f32.mrf.mxu0  ;;  %v10076_v11 = vpop.f32.mrf.mxu1  ;;  %vm2055_vm0 = vcmp.lt.s32.totalorder %v10039_v5, 0  ;;  %v14601_v51 = vld [vmem:[#allocation9_spill] sm:$0xff] }
 0x188   : > { %14577 = vst [vmem:[#allocation184_spill] sm:$0xff] %v10044_v43  ;;  %14579 = vst [vmem:[#allocation185_spill] sm:$0xff] %v10053_v30  ;;  %v2542_v58 = vsel %vm543_vm1, %v2539_v25, %v14582_v45  ;;  %v731_v30 = vadd.f32 %v14583_v33, %v638_v39  ;;  %2567 = vrot.lane.b32.xlu0 %v9933_v2, %s7942_s16  ;;  %v7719_v39 = vld [vmem:[%s13981_s3 + $0x108] sm:$0xff]  ;;  %v10093_v33 = vadd.s32 18, %v10002_v9  ;;  %v2543_v0 = vrot.slane %v9690_v47, 1  ;;  %v14602_v2 = vld [vmem:[#allocation12_spill] sm:$0xff] }
 0x189   : > { %14581 = vst [vmem:[#allocation186_spill] sm:$0xff] %v10058_v6  ;;  %2577 = vrot.lane.b32.xlu1 %v2542_v58, %s7942_s16  ;;  %14585 = vst [vmem:[#allocation52_spill] sm:$0xff] %v10074_v54  ;;  %v14588_v6 = vrot.slane %v9531_v59, 2  ;;  %v7718_v58 = vld [vmem:[%s13981_s3 + $0x100] sm:$0xff]  ;;  %5314 = vmatprep.subr.mxu0 %v7719_v39  ;;  %v10100_v46 = vpop.f32.mrf.mxu0  ;;  %v14594_v1 = vrot.slane %v9549_v49, 1  ;;  %v14595_v39 = vmov 0  ;;  %v3534_v47 = vsel %vm543_vm1, %v3532_v29, %v3533_v20 }
 0x18a   : > { %14586 = vst [vmem:[#allocation53_spill] sm:$0xff] %v10076_v11  ;;  %14591 = vst [vmem:[#allocation188_spill] sm:$0xff] %v10093_v33  ;;  %5315 = vmatpush1.msra.mxu0 %v7718_v58  ;;  %v14598_v3 = vrot.slane %v10024_v61, 1  ;;  %v14599_v49 = vrot.slane %v9963_v7, 1  ;;  %v1021_v59 = vadd.f32 %v14601_v51, %v731_v30  ;;  %v1022_v24 = vadd.f32 %v14602_v2, %v732_v34  ;;  %v10150_v2 = vpop.permute.xlu0 %601  ;;  %v14609_v32 = vld [vmem:[#allocation17_spill] sm:$0xff] }
 0x18b   : > { %v10083_v45 = vsel %vm14100_vm2, %v14588_v6, %v14587_v53  ;;  %14592 = vst [vmem:[#allocation189_spill] sm:$0xff] %v10100_v46  ;;  %v2540_v19 = vsel %vm543_vm1, %v14594_v1, %v2539_v25  ;;  %vm10111_vm2 = vmand %vm2054_vm15, %vm2036_vm8  ;;  %v10115_v6 = vpop.permute.xlu1 %599  ;;  %v10125_v1 = vadd.s32 18, %v10039_v5  ;;  %v10131_v58 = vpop.f32.mrf.mxu0  ;;  %v2545_v30 = vrot.slane %v9735_v42, 1  ;;  %v14608_v53 = vld [vmem:[#allocation15_spill] sm:$0xff]  ;;  %6415 = vmatprep.subr.mxu0 %v7788_v14 }
 0x18c   : > { %14589 = vst [vmem:[#allocation187_spill] sm:$0xff] %v10083_v45  ;;  %v10102_v45 = vpop.f32.mrf.mxu1  ;;  %v14596_v39 = vsel %vm10111_vm2, 4294967295, %v14595_v39  ;;  %v3027_v25 = vsel %vm543_vm1, %v14599_v49, %v14598_v3  ;;  %3569 = vrot.lane.b32.xlu0 %v3534_v47, %s7942_s16  ;;  %14603 = vst [vmem:[#allocation9_spill] sm:$0xff] %v10131_v58  ;;  %v14605_v49 = vmov 0  ;;  %v640_v7 = vadd.f32 %v9819_v21, %v14608_v53 }
 0x18d   : > { %14593 = vst [vmem:[#allocation190_spill] sm:$0xff] %v10102_v45  ;;  %14597 = vst [vmem:[#allocation191_spill] sm:$0xff] %v14596_v39  ;;  %3062 = vrot.lane.b32.xlu1 %v3027_v25, %s7942_s16  ;;  %v10144_v51 = vmul.u32.u64.low 3817748708, %v9978_v44  ;;  %v10145_v3 = vmul.u32.u64.high 3817748708, %v9978_v44, %v10144_v51  ;;  %v641_v48 = vadd.f32 %v9821_v8, %v14609_v32  ;;  %v14612_v9 = vrot.slane %v10026_v38, 1  ;;  %v14626_v39 = vld [vmem:[#allocation19_spill] sm:$0xff] }
 0x18e   : > { %14600 = vst [vmem:[#allocation192_spill] sm:$0xff] %v10125_v1  ;;  %v10133_v29 = vpop.f32.mrf.mxu1  ;;  %vm10139_vm8 = vmand %vm2055_vm0, %vm2037_vm3  ;;  %v10160_v51 = vpop.f32.mrf.mxu0  ;;  %v10165_v34 = vmul.u32.u64.low 3817748708, %v10042_v55  ;;  %v10166_v42 = vmul.u32.u64.high 3817748708, %v10042_v55, %v10165_v34  ;;  %v14613_v8 = vrot.slane %v9635_v40, 1  ;;  %v14618_v40 = vrot.slane %v9611_v50, 2  ;;  %v14624_v1 = vld [vmem:[#allocation57_spill] sm:$0xff] }
 0x18f   : > { %14604 = vst [vmem:[#allocation12_spill] sm:$0xff] %v10133_v29  ;;  %v14606_v49 = vsel %vm10139_vm8, 4294967295, %v14605_v49  ;;  %14610 = vst [vmem:[#allocation15_spill] sm:$0xff] %v10160_v51  ;;  %v3536_v21 = vsel %vm543_vm1, %v3533_v20, %v14612_v9  ;;  %v1150_v34 = vadd.f32 %v9742_v17, %v1022_v24  ;;  %v14619_v53 = vrot.slane %v9556_v23, 2  ;;  %v14622_v17 = vld [vmem:[#allocation147_spill] sm:$0xff] }
 0x190   : > { %14607 = vst [vmem:[#allocation193_spill] sm:$0xff] %v14606_v49  ;;  %v10162_v47 = vpop.f32.mrf.mxu1  ;;  %v10178_v32 = vsel %vm543_vm1, %v14613_v8, %v2543_v0  ;;  %2571 = vrot.lane.b32.xlu0 %v9999_v56, %s7942_s16  ;;  %v10189_v9 = vpop.f32.mrf.mxu0  ;;  %v14617_v8 = vld [vmem:[#allocation127_spill] sm:$0xff]  ;;  %vm14620_vm0 = vcmask 1045504   ;;  %v2547_v33 = vrot.slane %v14622_v17, 1  ;;  %v10207_v5 = vsel %vm543_vm1, %v2543_v0, %v2545_v30  ;;  %v14633_v0 = vld [vmem:[#allocation21_spill] sm:$0xff] }
 0x191   : > { %14611 = vst [vmem:[#allocation17_spill] sm:$0xff] %v10162_v47  ;;  %14614 = vst [vmem:[#allocation194_spill] sm:$0xff] %v10178_v32  ;;  %3571 = vrot.lane.b32.xlu1 %v3536_v21, %s7942_s16  ;;  %v1149_v25 = vadd.f32 %v14617_v8, %v1021_v59  ;;  %v10199_v14 = vsel %vm14620_vm0, %v14619_v53, %v14618_v40  ;;  %v10203_v56 = vpop.permute.xlu1 %1112  ;;  %v733_v59 = vadd.f32 %v14624_v1, %v640_v7  ;;  %v14625_v8 = vld [vmem:[#allocation58_spill] sm:$0xff]  ;;  %v10226_v7 = vpop.permute.xlu0 %1114 }
 0x192   : > { %14615 = vst [vmem:[#allocation195_spill] sm:$0xff] %v10189_v9  ;;  %v10191_v20 = vpop.f32.mrf.mxu1  ;;  %14621 = vst [vmem:[#allocation127_spill] sm:$0xff] %v10199_v14  ;;  %v734_v49 = vadd.f32 %v14625_v8, %v641_v48  ;;  %v642_v23 = vadd.f32 %v9952_v28, %v14626_v39  ;;  %v10213_v40 = vpop.f32.mrf.mxu0  ;;  %v14629_v24 = vrot.slane %v9667_v31, 2  ;;  %v14630_v17 = vrot.slane %v9611_v50, 2  ;;  %v14637_v50 = vld [vmem:[#allocation55_spill] sm:$0xff] }
 0x193   : > { %14616 = vst [vmem:[#allocation196_spill] sm:$0xff] %v10191_v20  ;;  %14623 = vst [vmem:[#allocation197_spill] sm:$0xff] %v10207_v5  ;;  %v643_v18 = vadd.f32 %v9982_v12, %v14633_v0  ;;  %v3537_v48 = vrot.slane %v10076_v11, 1  ;;  %v14634_v28 = vrot.slane %v10074_v54, 1  ;;  %v14635_v39 = vrot.slane %v10024_v61, 1  ;;  %v14640_v0 = vld [vmem:[#allocation49_spill] sm:$0xff] }
 0x194   : > { %14627 = vst [vmem:[#allocation57_spill] sm:$0xff] %v10213_v40  ;;  %v10215_v53 = vpop.f32.mrf.mxu1  ;;  %vm14631_vm15 = vmmov %vm14620_vm0  ;;  %v10235_v8 = vadd.s32 112, %v9055_v37  ;;  %v1242_v14 = vadd.f32 %v14637_v50, %v1150_v34  ;;  %2575 = vrot.lane.b32.xlu0 %v2540_v19, %s7942_s16  ;;  %v10241_v12 = vpop.f32.mrf.mxu0  ;;  %v1241_v11 = vadd.f32 %v14640_v0, %v1149_v25  ;;  %v1966_v61 = vshrl.u32 %v10145_v3, 4  ;;  %v14645_v5 = vld [vmem:[#allocation66_spill] sm:$0xff] }
 0x195   : > { %14628 = vst [vmem:[#allocation58_spill] sm:$0xff] %v10215_v53  ;;  %v10222_v21 = vsel %vm14631_vm15, %v14630_v17, %v14629_v24  ;;  %v3029_v1 = vsel %vm543_vm1, %v14635_v39, %v14634_v28  ;;  %14638 = vst [vmem:[#allocation55_spill] sm:$0xff] %v10241_v12  ;;  %v14641_v34 = vrot.slane %v10133_v29, 1  ;;  %v10253_v19 = vsel %vm543_vm1, %v2545_v30, %v2547_v33  ;;  %v14648_v39 = vld [vmem:[#allocation67_spill] sm:$0xff] }
 0x196   : > { %14632 = vst [vmem:[#allocation19_spill] sm:$0xff] %v10222_v21  ;;  %14636 = vst [vmem:[#allocation21_spill] sm:$0xff] %v10235_v8  ;;  %3064 = vrot.lane.b32.xlu1 %v3029_v1, %s7942_s16  ;;  %v10243_v17 = vpop.f32.mrf.mxu1  ;;  %v14643_v1 = vld [vmem:[#allocation14_spill] sm:$0xff]  ;;  %v14644_v21 = vld [vmem:[#allocation16_spill] sm:$0xff]  ;;  %v735_v32 = vadd.f32 %v14645_v5, %v642_v23  ;;  %v10258_v25 = vpop.f32.mrf.mxu0  ;;  %v1977_v0 = vshrl.u32 %v10166_v42, 4  ;;  %v2549_v28 = vrot.slane %v9860_v22, 1  ;;  %v736_v26 = vadd.f32 %v14648_v39, %v643_v18 }
 0x197   : > { %14639 = vst [vmem:[#allocation198_spill] sm:$0xff] %v10243_v17  ;;  %v3540_v50 = vsel %vm543_vm1, %v3537_v48, %v14641_v34  ;;  %14642 = vst [vmem:[#allocation49_spill] sm:$0xff] %v10253_v19  ;;  %v1023_v24 = vadd.f32 %v14643_v1, %v733_v59  ;;  %v1024_v10 = vadd.f32 %v14644_v21, %v734_v49  ;;  %v10265_v34 = vpop.permute.xlu1 %603  ;;  %v3030_v30 = vrot.slane %v10131_v58, 1  ;;  %v14652_v42 = vld [vmem:[#allocation50_spill] sm:$0xff] }
 0x198   : > { %14646 = vst [vmem:[#allocation14_spill] sm:$0xff] %v10258_v25  ;;  %v10260_v3 = vpop.f32.mrf.mxu1  ;;  %v14649_v59 = vrot.slane %v10026_v38, 1  ;;  %v10273_v5 = vpop.f32.mrf.mxu0  ;;  %v10278_v22 = vadd.f32 %v14652_v42, %v1241_v11  ;;  %v1967_v18 = vmul.u32 18, %v1966_v61  ;;  %v14655_v61 = vld [vmem:[#allocation18_spill] sm:$0xff]  ;;  %v1978_v25 = vmul.u32 18, %v1977_v0  ;;  %vm14668_vm3 = vmmov %vm14620_vm0 }
 0x199   : > { %14647 = vst [vmem:[#allocation16_spill] sm:$0xff] %v10260_v3  ;;  %14650 = vst [vmem:[#allocation66_spill] sm:$0xff] %v10273_v5  ;;  %v10281_v23 = vmul.u32.u64.low 3817748708, %v10235_v8  ;;  %v10282_v39 = vmul.u32.u64.high 3817748708, %v10235_v8, %v10281_v23  ;;  %v10285_v38 = vpop.permute.xlu0 %605  ;;  %v1152_v11 = vadd.f32 %v9877_v63, %v1024_v10  ;;  %v1025_v42 = vadd.f32 %v14655_v61, %v735_v32  ;;  %v14658_v1 = vld [vmem:[#allocation138_spill] sm:$0xff]  ;;  %v14662_v63 = vld [vmem:[#allocation23_spill] sm:$0xff] }
 0x19a   : > { %v3538_v49 = vsel %vm543_vm1, %v14649_v59, %v3537_v48  ;;  %3575 = vrot.lane.b32.xlu1 %v3540_v50, %s7942_s16  ;;  %v10275_v21 = vpop.f32.mrf.mxu1  ;;  %v14653_v50 = vrot.slane %v10189_v9, 1  ;;  %v10296_v19 = vpop.f32.mrf.mxu0  ;;  %v1151_v4 = vadd.f32 %v14658_v1, %v1023_v24  ;;  %v1026_v48 = vadd.f32 %v14659_v13, %v736_v26 }
 0x19b   : > { %3573 = vrot.lane.b32.xlu0 %v3538_v49, %s7942_s16  ;;  %14651 = vst [vmem:[#allocation67_spill] sm:$0xff] %v10275_v21  ;;  %v14654_v49 = vld [vmem:[#allocation62_spill] sm:$0xff]  ;;  %14656 = vst [vmem:[#allocation50_spill] sm:$0xff] %v10296_v19  ;;  %v3541_v3 = vrot.slane %v10191_v20, 1  ;;  %v644_v32 = vadd.f32 %v10115_v6, %v14662_v63  ;;  %v10319_v26 = vsub.s32 %v9978_v44, %v1967_v18  ;;  %v14666_v0 = vrot.slane %v9712_v36, 2  ;;  %v10330_v1 = vpop.permute.xlu1 %1116 }
 0x19c   : > { %v3033_v59 = vsel %vm543_vm1, %v3030_v30, %v14653_v50  ;;  %v10292_v58 = vadd.f32 %v14654_v49, %v1242_v14  ;;  %v10298_v23 = vpop.f32.mrf.mxu1  ;;  %v14660_v50 = vrot.slane %v10074_v54, 1  ;;  %v10307_v49 = vsel %vm543_vm1, %v2547_v33, %v2549_v28  ;;  %v10314_v24 = vpop.f32.mrf.mxu0  ;;  %v14850_v19 = vld [vmem:[#allocation90_spill] sm:$0xff] }
 0x19d   : > { %14657 = vst [vmem:[#allocation62_spill] sm:$0xff] %v10298_v23  ;;  %14661 = vst [vmem:[#allocation18_spill] sm:$0xff] %v10307_v49  ;;  %v14667_v33 = vrot.slane %v9667_v31, 2  ;;  %v14671_v61 = vrot.slane %v10243_v17, 1  ;;  %v10337_v18 = vadd.s32 120, %v9055_v37  ;;  %v10351_v16 = vpop.permute.xlu0 %1118  ;;  %v3034_v20 = vrot.slane %v10241_v12, 1 }
 0x19e   : > { %v3031_v14 = vsel %vm543_vm1, %v14660_v50, %v3030_v30  ;;  %3068 = vrot.lane.b32.xlu1 %v3033_v59, %s7942_s16  ;;  %14663 = vst [vmem:[#allocation138_spill] sm:$0xff] %v10314_v24  ;;  %v10316_v13 = vpop.f32.mrf.mxu1  ;;  %14665 = vst [vmem:[#allocation23_spill] sm:$0xff] %v10319_v26  ;;  %v14670_v30 = vld [vmem:[#allocation25_spill] sm:$0xff]  ;;  %v10340_v31 = vpop.f32.mrf.mxu0  ;;  %vm2038_vm0 = vcmp.ne.s32.totalorder %v10319_v26, 0  ;;  %v14690_v12 = vld [vmem:[#allocation64_spill] sm:$0xff]  ;;  %v647_v62 = vadd.f32 %v10285_v38, %v14710_v57  ;;  %v3038_v49 = vrot.slane %v10314_v24, 1 }
 0x19f   : > { %3066 = vrot.lane.b32.xlu0 %v3031_v14, %s7942_s16  ;;  %14664 = vst [vmem:[#allocation20_spill] sm:$0xff] %v10316_v13  ;;  %v10326_v28 = vsel %vm14668_vm3, %v14667_v33, %v14666_v0  ;;  %v645_v6 = vadd.f32 %v10150_v2, %v14670_v30  ;;  %v3544_v50 = vsel %vm543_vm1, %v3541_v3, %v14671_v61  ;;  %14672 = vst [vmem:[#allocation25_spill] sm:$0xff] %v10337_v18  ;;  %v14673_v14 = vld [vmem:[#allocation59_spill] sm:$0xff]  ;;  %v14676_v33 = vld [vmem:[#allocation54_spill] sm:$0xff] }
 0x1a0   : > { %14669 = vst [vmem:[#allocation199_spill] sm:$0xff] %v10326_v28  ;;  %v1244_v63 = vadd.f32 %v14673_v14, %v1152_v11  ;;  %14674 = vst [vmem:[#allocation59_spill] sm:$0xff] %v10340_v31  ;;  %v10342_v0 = vpop.f32.mrf.mxu1  ;;  %v1243_v10 = vadd.f32 %v14676_v33, %v1151_v4  ;;  %v1153_v2 = vadd.f32 %v9893_v60, %v1025_v42  ;;  %v14678_v11 = vrot.slane %v10133_v29, 1  ;;  %v14679_v4 = vld [vmem:[#allocation70_spill] sm:$0xff]  ;;  %v10361_v60 = vpop.f32.mrf.mxu0  ;;  %v14719_v38 = vld [vmem:[#allocation27_spill] sm:$0xff] }
 0x1a1   : > { %14675 = vst [vmem:[#allocation200_spill] sm:$0xff] %v10342_v0  ;;  %v10347_v30 = vsub.s32 %v10042_v55, %v1978_v25  ;;  %v1154_v61 = vadd.f32 %v10033_v41, %v1026_v48  ;;  %v737_v33 = vadd.f32 %v14679_v4, %v644_v32  ;;  %14680 = vst [vmem:[#allocation70_spill] sm:$0xff] %v10361_v60  ;;  %v14682_v41 = vld [vmem:[#allocation71_spill] sm:$0xff]  ;;  %v14683_v42 = vrot.slane %v10273_v5, 1  ;;  %v14687_v4 = vld [vmem:[#allocation61_spill] sm:$0xff]  ;;  %v10417_v28 = vpop.permute.xlu0 %609 }
 0x1a2   : > { %v3542_v14 = vsel %vm543_vm1, %v14678_v11, %v3541_v3  ;;  %3579 = vrot.lane.b32.xlu1 %v3544_v50, %s7942_s16  ;;  %v10363_v25 = vpop.f32.mrf.mxu1  ;;  %v738_v48 = vadd.f32 %v14682_v41, %v645_v6  ;;  %v10373_v11 = vadd.s32 18, %v10319_v26  ;;  %v10375_v50 = vpop.f32.mrf.mxu0  ;;  %v1245_v44 = vadd.f32 %v14687_v4, %v1153_v2  ;;  %v14688_v41 = vld [vmem:[#allocation68_spill] sm:$0xff] }
 0x1a3   : > { %14677 = vst [vmem:[#allocation54_spill] sm:$0xff] %v10347_v30  ;;  %3577 = vrot.lane.b32.xlu0 %v3542_v14, %s7942_s16  ;;  %14681 = vst [vmem:[#allocation201_spill] sm:$0xff] %v10363_v25  ;;  %v3037_v32 = vsel %vm543_vm1, %v3034_v20, %v14683_v42  ;;  %v1988_v6 = vshrl.u32 %v10282_v39, 4  ;;  %v1246_v59 = vadd.f32 %v14688_v41, %v1154_v61  ;;  %v10384_v3 = vpop.permute.xlu1 %607  ;;  %v3545_v42 = vrot.slane %v10275_v21, 1  ;;  %v14695_v61 = vld [vmem:[#allocation22_spill] sm:$0xff] }
 0x1a4   : > { %14684 = vst [vmem:[#allocation71_spill] sm:$0xff] %v10373_v11  ;;  %14685 = vst [vmem:[#allocation202_spill] sm:$0xff] %v10375_v50  ;;  %v10377_v14 = vpop.f32.mrf.mxu1  ;;  %v14689_v55 = vrot.slane %v10189_v9, 1  ;;  %v10391_v54 = vadd.f32 %v14690_v12, %v1243_v10  ;;  %vm14691_vm3 = vcmp.lt.s32.totalorder %v10319_v26, 0  ;;  %v14692_v2 = vmov 0  ;;  %v14698_v12 = vld [vmem:[#allocation74_spill] sm:$0xff] }
 0x1a5   : > { %14686 = vst [vmem:[#allocation203_spill] sm:$0xff] %v10377_v14  ;;  %vm10397_vm15 = vmand %vm14691_vm3, %vm2038_vm0  ;;  %v1027_v4 = vadd.f32 %v14695_v61, %v737_v33  ;;  %v10410_v10 = vadd.f32 %v14698_v12, %v1244_v63  ;;  %v10413_v41 = vadd.s32 18, %v10347_v30  ;;  %v14700_v9 = vld [vmem:[#allocation24_spill] sm:$0xff]  ;;  %v14701_v33 = vrot.slane %v10316_v13, 1 }
 0x1a6   : > { %v3035_v29 = vsel %vm543_vm1, %v14689_v55, %v3034_v20  ;;  %v14693_v2 = vsel %vm10397_vm15, 4294967295, %v14692_v2  ;;  %3072 = vrot.lane.b32.xlu1 %v3037_v32, %s7942_s16  ;;  %v10405_v55 = vpop.f32.mrf.mxu0  ;;  %v10407_v20 = vpop.f32.mrf.mxu1  ;;  %v1028_v39 = vadd.f32 %v14700_v9, %v738_v48  ;;  %vm14702_vm0 = vcmp.ne.s32.totalorder %v10347_v30, 0  ;;  %v14709_v48 = vld [vmem:[#allocation83_spill] sm:$0xff] }
 0x1a7   : > { %14694 = vst [vmem:[#allocation61_spill] sm:$0xff] %v14693_v2  ;;  %3070 = vrot.lane.b32.xlu0 %v3035_v29, %s7942_s16  ;;  %14696 = vst [vmem:[#allocation68_spill] sm:$0xff] %v10405_v55  ;;  %v3548_v32 = vsel %vm543_vm1, %v3545_v42, %v14701_v33  ;;  %vm14703_vm3 = vcmp.lt.s32.totalorder %v10347_v30, 0  ;;  %v14704_v63 = vmov 0  ;;  %v10437_v21 = vadd.f32 %v14709_v48, %v1245_v44  ;;  %v14714_v44 = vld [vmem:[#allocation82_spill] sm:$0xff]  ;;  %v14718_v33 = vld [vmem:[#allocation85_spill] sm:$0xff] }
 0x1a8   : > { %14697 = vst [vmem:[#allocation64_spill] sm:$0xff] %v10407_v20  ;;  %14699 = vst [vmem:[#allocation22_spill] sm:$0xff] %v10413_v41  ;;  %v10432_v12 = vpop.f32.mrf.mxu0  ;;  %v10434_v9 = vpop.f32.mrf.mxu1  ;;  %v1989_v29 = vmul.u32 18, %v1988_v6  ;;  %v14711_v61 = vrot.slane %v10243_v17, 1  ;;  %v10459_v6 = vadd.f32 %v14718_v33, %v1246_v59  ;;  %v646_v24 = vadd.f32 %v10265_v34, %v14719_v38  ;;  %v14723_v38 = vld [vmem:[#allocation40_spill] sm:$0xff]  ;;  %v14726_v33 = vld [vmem:[#allocation77_spill] sm:$0xff] }
 0x1a9   : > { %vm10427_vm8 = vmand %vm14703_vm3, %vm14702_vm0  ;;  %14707 = vst [vmem:[#allocation24_spill] sm:$0xff] %v10432_v12  ;;  %v10477_v34 = vpop.permute.xlu1 %611  ;;  %v740_v17 = vadd.f32 %v14726_v33, %v647_v62  ;;  %v3549_v46 = vrot.slane %v10363_v25, 1  ;;  %v14730_v30 = vld [vmem:[#allocation92_spill] sm:$0xff]  ;;  %v14735_v25 = vld [vmem:[#allocation114_spill] sm:$0xff]  ;;  %v14746_v2 = vrot.slane %v10316_v13, 1 }
 0x1aa   : > { %v14705_v63 = vsel %vm10427_vm8, 4294967295, %v14704_v63  ;;  %14708 = vst [vmem:[#allocation204_spill] sm:$0xff] %v10434_v9  ;;  %v3546_v12 = vsel %vm543_vm1, %v14711_v61, %v3545_v42  ;;  %v14713_v9 = vld [vmem:[#allocation91_spill] sm:$0xff]  ;;  %3583 = vrot.lane.b32.xlu1 %v3548_v32, %s7942_s16  ;;  %v10466_v43 = vpop.f32.mrf.mxu0  ;;  %v10468_v42 = vpop.f32.mrf.mxu1  ;;  %v1155_v61 = vadd.f32 %v10061_v27, %v1027_v4  ;;  %v10489_v59 = vsub.s32 %v10235_v8, %v1989_v29  ;;  %v14729_v8 = vld [vmem:[#allocation102_spill] sm:$0xff]  ;;  %v14734_v33 = vld [vmem:[#allocation76_spill] sm:$0xff] }
 0x1ab   : > { %14706 = vst [vmem:[#allocation74_spill] sm:$0xff] %v14705_v63  ;;  %v14715_v48 = vsel %vm9366_vm6, %v14713_v9, %v14714_v44  ;;  %3581 = vrot.lane.b32.xlu0 %v3546_v12, %s7942_s16  ;;  %14720 = vst [vmem:[#allocation83_spill] sm:$0xff] %v10466_v43  ;;  %v1156_v9 = vadd.f32 %v10203_v56, %v1028_v39  ;;  %v1603_v12 = vpop.permute.xlu0 %1602  ;;  %v14722_v44 = vrot.slane %v10361_v60, 1  ;;  %v14764_v13 = vld [vmem:[#allocation46_spill] sm:$0xff] }
 0x1ac   : > { %vm10454_vm0 = vcmp.lt.s32.totalorder %v14715_v48, 16  ;;  %14721 = vst [vmem:[#allocation29_spill] sm:$0xff] %v10468_v42  ;;  %v1656_v27 = vadd.f32 %v1603_v12, %v14723_v38  ;;  %v10484_v4 = vpop.f32.mrf.mxu0  ;;  %v10486_v57 = vpop.f32.mrf.mxu1  ;;  %14725 = vst [vmem:[#allocation91_spill] sm:$0xff] %v10489_v59  ;;  %v10492_v56 = vmul.u32.u64.low 3817748708, %v10337_v18  ;;  %v10493_v39 = vmul.u32.u64.high 3817748708, %v10337_v18, %v10492_v56 }
 0x1ad   : > { %v3041_v48 = vsel %vm543_vm1, %v3038_v49, %v14722_v44  ;;  %14724 = vst [vmem:[#allocation93_spill] sm:$0xff] %v10486_v57  ;;  %v10501_v12 = vld [vmem:[%s13980_s2] ss:$0 sm:$0xff]  ;;  %v14727_v44 = vrot.slane %v10273_v5, 1  ;;  %v14731_v56 = vsel %vm9449_vm11, %v14729_v8, %v14730_v30  ;;  %v739_v32 = vadd.f32 %v14734_v33, %v646_v24  ;;  %v14748_v33 = vld [vmem:[#allocation107_spill] sm:$0xff]  ;;  %v14757_v57 = vld [vmem:[#allocation98_spill] sm:$0xff] }
 0x1ae   : > { %vm10511_vm6 = vcmp.lt.s32.totalorder %v14731_v56, 16  ;;  %v1748_v41 = vadd.f32 %v14735_v25, %v1656_v27  ;;  %3076 = vrot.lane.b32.xlu1 %v3041_v48, %s7942_s16  ;;  %v10519_v5 = vpop.f32.mrf.mxu0  ;;  %v10525_v8 = vadd.s32 128, %v9055_v37  ;;  %v14740_v30 = vld [vmem:[#allocation72_spill] sm:$0xff]  ;;  %v1605_v25 = vpop.permute.xlu1 %1604  ;;  %v14741_v48 = vrot.slane %v10407_v20, 1 }
 0x1af   : > { %v3039_v29 = vsel %vm543_vm1, %v14727_v44, %v3038_v49  ;;  %14736 = vst [vmem:[#allocation82_spill] sm:$0xff] %v10519_v5  ;;  %v10521_v49 = vpop.f32.mrf.mxu1  ;;  %v14738_v44 = vld [vmem:[#allocation69_spill] sm:$0xff]  ;;  %v1248_v56 = vadd.f32 %v14740_v30, %v1156_v9  ;;  %v10529_v24 = vpop.permute.xlu0 %613  ;;  %vm2040_vm11 = vcmp.ne.s32.totalorder %v10489_v59, 0  ;;  %v14745_v30 = vld [vmem:[#allocation28_spill] sm:$0xff]  ;;  %v3042_v27 = vrot.slane %v10405_v55, 1 }
 0x1b0   : > { %3074 = vrot.lane.b32.xlu0 %v3039_v29, %s7942_s16  ;;  %14737 = vst [vmem:[#allocation85_spill] sm:$0xff] %v10521_v49  ;;  %v1247_v38 = vadd.f32 %v14738_v44, %v1155_v61  ;;  %14739 = vst [vmem:[#allocation27_spill] sm:$0xff] %v10525_v8  ;;  %v3552_v29 = vsel %vm543_vm1, %v3549_v46, %v14741_v48  ;;  %v1773_v61 = vadd.f32 %v10501_v12, %v1748_v41  ;;  %v14742_v44 = vld [vmem:[#allocation42_spill] sm:$0xff]  ;;  %v10538_v11 = vpop.f32.mrf.mxu0  ;;  %v14749_v41 = vld [vmem:[#allocation96_spill] sm:$0xff] }
 0x1b1   : > { %v1657_v26 = vadd.f32 %v1605_v25, %v14742_v44  ;;  %14743 = vst [vmem:[#allocation40_spill] sm:$0xff] %v10538_v11  ;;  %v10540_v9 = vpop.f32.mrf.mxu1  ;;  %v1030_v63 = vadd.f32 %v14745_v30, %v740_v17  ;;  %v3550_v48 = vsel %vm543_vm1, %v14746_v2, %v3549_v46  ;;  %v14750_v51 = vsel %vm9467_vm12, %v14748_v33, %v14749_v41  ;;  %v14753_v44 = vld [vmem:[#allocation26_spill] sm:$0xff]  ;;  %v14754_v30 = vld [vmem:[#allocation115_spill] sm:$0xff] }
 0x1b2   : > { %14744 = vst [vmem:[#allocation77_spill] sm:$0xff] %v10540_v9  ;;  %vm10553_vm3 = vcmp.lt.s32.totalorder %v14750_v51, 16  ;;  %vm2058_vm8 = vcmp.lt.s32.totalorder %v10489_v59, 0  ;;  %v1029_v11 = vadd.f32 %v14753_v44, %v739_v32  ;;  %v1791_v17 = vmax.f32 %v1773_v61, 0.0  ;;  %3587 = vrot.lane.b32.xlu1 %v3552_v29, %s7942_s16  ;;  %v10562_v46 = vpop.f32.mrf.mxu0  ;;  %v10576_v61 = vpop.permute.xlu1 %1120 }
 0x1b3   : > { %v1749_v55 = vadd.f32 %v14754_v30, %v1657_v26  ;;  %14755 = vst [vmem:[#allocation106_spill] sm:$0xff] %v10562_v46  ;;  %v10564_v2 = vpop.f32.mrf.mxu1  ;;  %v10567_v51 = vadd.f32 %v14757_v57, %v1247_v38  ;;  %v14758_v33 = vrot.slane %v10162_v47, 2  ;;  %v14759_v41 = vrot.slane %v10102_v45, 2  ;;  %v1607_v26 = vpop.permute.xlu0 %1606  ;;  %v14767_v47 = vld [vmem:[#allocation103_spill] sm:$0xff]  ;;  %v14775_v45 = vld [vmem:[#allocation112_spill] sm:$0xff] }
 0x1b4   : > { %3585 = vrot.lane.b32.xlu0 %v3550_v48, %s7942_s16  ;;  %14756 = vst [vmem:[#allocation102_spill] sm:$0xff] %v10564_v2  ;;  %vm14760_vm12 = vcmask 1045504   ;;  %v14762_v29 = vrot.slane %v10466_v43, 1  ;;  %v10583_v30 = vadd.s32 18, %v10489_v59  ;;  %v2170_v38 = vsel %vm10454_vm0, %v1791_v17, 0.0  ;;  %v14804_v59 = vld [vmem:[#allocation141_spill] sm:$0xff] }
 0x1b5   : > { %v10574_v32 = vsel %vm14760_vm12, %v14759_v41, %v14758_v33  ;;  %v1774_v57 = vadd.f32 %v10501_v12, %v1749_v55  ;;  %v1658_v33 = vadd.f32 %v1607_v26, %v14764_v13  ;;  %v10589_v41 = vpop.f32.mrf.mxu0  ;;  %v10594_v48 = vadd.f32 %v14767_v47, %v1248_v56  ;;  %vm10600_vm12 = vmand %vm2058_vm8, %vm2040_vm11  ;;  %v14774_v26 = vld [vmem:[#allocation122_spill] sm:$0xff]  ;;  %v14779_v55 = vld [vmem:[#allocation5_spill] sm:$0xff] }
 0x1b6   : > { %14761 = vst [vmem:[#allocation92_spill] sm:$0xff] %v10574_v32  ;;  %v3045_v44 = vsel %vm543_vm1, %v3042_v27, %v14762_v29  ;;  %14763 = vst [vmem:[#allocation76_spill] sm:$0xff] %v10583_v30  ;;  %v10591_v32 = vpop.f32.mrf.mxu1  ;;  %v14768_v29 = vmov 0  ;;  %v1158_v14 = vadd.f32 %v10330_v1, %v1030_v63  ;;  %vm14771_vm0 = vcmask 523264  }
 0x1b7   : > { %14765 = vst [vmem:[#allocation114_spill] sm:$0xff] %v10589_v41  ;;  %14766 = vst [vmem:[#allocation69_spill] sm:$0xff] %v10591_v32  ;;  %v14769_v29 = vsel %vm10600_vm12, 4294967295, %v14768_v29  ;;  %v3553_v13 = vrot.slane %v10468_v42, 1  ;;  %v14772_v17 = vrot.slane %v10361_v60, 1  ;;  %v14776_v32 = vsel %vm9589_vm4, %v14774_v26, %v14775_v45  ;;  %3080 = vrot.lane.b32.xlu1 %v3045_v44, %s7942_s16  ;;  %v10624_v42 = vpop.f32.mrf.mxu0  ;;  %v14782_v45 = vld [vmem:[#allocation31_spill] sm:$0xff]  ;;  %v10631_v56 = vpop.permute.xlu0 %1122 }
 0x1b8   : > { %14770 = vst [vmem:[#allocation72_spill] sm:$0xff] %v14769_v29  ;;  %2188 = vst.msk [vmem:[#allocation2 + $0x13] sm:$0xff] %vm14771_vm0, %v2170_v38  ;;  %vm10616_vm8 = vcmp.lt.s32.totalorder %v14776_v32, 16  ;;  %v1792_v63 = vmax.f32 %v1774_v57, 0.0  ;;  %v1750_v38 = vadd.f32 %v14779_v55, %v1658_v33  ;;  %v648_v32 = vadd.f32 %v10384_v3, %v14782_v45  ;;  %v1609_v26 = vpop.permute.xlu1 %1608  ;;  %v14786_v57 = vld [vmem:[#allocation79_spill] sm:$0xff]  ;;  %v14787_v60 = vld [vmem:[#allocation33_spill] sm:$0xff] }
 0x1b9   : > { %v3043_v47 = vsel %vm543_vm1, %v14772_v17, %v3042_v27  ;;  %14780 = vst [vmem:[#allocation42_spill] sm:$0xff] %v10624_v42  ;;  %v10626_v27 = vpop.f32.mrf.mxu1  ;;  %v1157_v17 = vadd.f32 %v10226_v7, %v1029_v11  ;;  %v14783_v33 = vrot.slane %v10521_v49, 1  ;;  %v1659_v3 = vadd.f32 %v1609_v26, %v10278_v22  ;;  %vm14788_vm4 = vmmov %vm14771_vm0  ;;  %v14791_v26 = vld [vmem:[#allocation7_spill] sm:$0xff]  ;;  %v14792_v44 = vld [vmem:[#allocation116_spill] sm:$0xff] }
 0x1ba   : > { %3078 = vrot.lane.b32.xlu0 %v3043_v47, %s7942_s16  ;;  %14781 = vst [vmem:[#allocation28_spill] sm:$0xff] %v10626_v27  ;;  %v2171_v7 = vsel %vm10511_vm6, %v1792_v63, 0.0  ;;  %v1775_v11 = vadd.f32 %v10501_v12, %v1750_v38  ;;  %v10645_v47 = vpop.f32.mrf.mxu0  ;;  %v1999_v1 = vshrl.u32 %v10493_v39, 4  ;;  %v649_v40 = vadd.f32 %v10417_v28, %v14787_v60  ;;  %v14797_v60 = vld [vmem:[#allocation6_spill] sm:$0xff]  ;;  %v14800_v22 = vld [vmem:[#allocation87_spill] sm:$0xff]  ;;  %vm14810_vm11 = vmmov %vm14771_vm0 }
 0x1bb   : > { %v3556_v55 = vsel %vm543_vm1, %v3553_v13, %v14783_v33  ;;  %14784 = vst [vmem:[#allocation109_spill] sm:$0xff] %v10645_v47  ;;  %v10647_v45 = vpop.f32.mrf.mxu1  ;;  %v1250_v33 = vadd.f32 %v14786_v57, %v1158_v14  ;;  %2189 = vst.msk [vmem:[#allocation2 + $0x1b] sm:$0xff] %vm14788_vm4, %v2171_v7  ;;  %v3046_v62 = vrot.slane %v10519_v5, 1  ;;  %v14789_v63 = vrot.slane %v10407_v20, 1  ;;  %v14796_v14 = vld [vmem:[#allocation16_spill] sm:$0xff] }
 0x1bc   : > { %14785 = vst [vmem:[#allocation107_spill] sm:$0xff] %v10647_v45  ;;  %v14793_v45 = vsel %vm9653_vm5, %v14791_v26, %v14792_v44  ;;  %v1793_v28 = vmax.f32 %v1775_v11, 0.0  ;;  %v1751_v7 = vadd.f32 %v14797_v60, %v1659_v3  ;;  %3591 = vrot.lane.b32.xlu1 %v3556_v55, %s7942_s16  ;;  %v10671_v5 = vpop.f32.mrf.mxu0  ;;  %v741_v20 = vadd.f32 %v14800_v22, %v648_v32  ;;  %v10675_v44 = vpop.permute.xlu1 %615  ;;  %v14838_v41 = vld [vmem:[#allocation144_spill] sm:$0xff] }
 0x1bd   : > { %v3554_v38 = vsel %vm543_vm1, %v14789_v63, %v3553_v13  ;;  %vm10663_vm6 = vcmp.lt.s32.totalorder %v14793_v45, 16  ;;  %14798 = vst [vmem:[#allocation96_spill] sm:$0xff] %v10671_v5  ;;  %v14799_v13 = vld [vmem:[#allocation73_spill] sm:$0xff]  ;;  %v1611_v45 = vpop.permute.xlu0 %1610  ;;  %v14801_v26 = vrot.slane %v10562_v46, 1  ;;  %v10690_v22 = vpop.f32.mrf.mxu1  ;;  %v14805_v30 = vrot.slane %v14804_v59, 2 }
 0x1be   : > { %3589 = vrot.lane.b32.xlu0 %v3554_v38, %s7942_s16  ;;  %v1249_v63 = vadd.f32 %v14799_v13, %v1157_v17  ;;  %v10681_v11 = vmul.u32.u64.low 3817748708, %v10525_v8  ;;  %v10682_v3 = vmul.u32.u64.high 3817748708, %v10525_v8, %v10681_v11  ;;  %v2172_v55 = vsel %vm10553_vm3, %v1793_v28, 0.0  ;;  %v10688_v13 = vpop.f32.mrf.mxu0  ;;  %14803 = vst [vmem:[#allocation115_spill] sm:$0xff] %v10690_v22  ;;  %vm14811_vm3 = vmmov %vm14771_vm0 }
 0x1bf   : > { %v3049_v57 = vsel %vm543_vm1, %v3046_v62, %v14801_v26  ;;  %v1776_v38 = vadd.f32 %v10501_v12, %v1751_v7  ;;  %v1660_v17 = vadd.f32 %v1611_v45, %v10292_v58  ;;  %v4174_v60 = vld [vmem:[#allocation2 + $0x10] sm:$0xff]  ;;  %14802 = vst [vmem:[#allocation26_spill] sm:$0xff] %v10688_v13  ;;  %v14806_v26 = vrot.slane %v9712_v36, 2  ;;  %2190 = vst.msk [vmem:[#allocation2 + $0x23] sm:$0xff] %vm14810_vm11, %v2172_v55  ;;  %v14814_v45 = vld [vmem:[#allocation135_spill] sm:$0xff] }
 0x1c0   : > { %v4681_v32 = vld [vmem:[#allocation2 + $0x12] sm:$0xff]  ;;  %vm14807_vm5 = vcmask 1045504   ;;  %7666 = vmatmul.mubr.msk.f32.gmra.mxu0 %vm14811_vm3, %v4174_v60  ;;  %v14812_v58 = vrot.slane %v10466_v43, 1  ;;  %v14815_v13 = vld [vmem:[#allocation129_spill] sm:$0xff]  ;;  %v2000_v60 = vmul.u32 18, %v1999_v1  ;;  %3084 = vrot.lane.b32.xlu1 %v3049_v57, %s7942_s16  ;;  %v14825_v1 = vrot.slane %v14796_v14, 2  ;;  %vm14835_vm11 = vmmov %vm14771_vm0 }
 0x1c1   : > { %v10697_v29 = vsel %vm14807_vm5, %v14806_v26, %v14805_v30  ;;  %7699 = vmatmul.mubr.msk.f32.vlgmr.msra.gmra.mxu1 %vm14771_vm0, %v4681_v32  ;;  %v14816_v36 = vsel %vm9750_vm13, %v14814_v45, %v14815_v13  ;;  %v5831_v55 = vld [vmem:[%s13981_s3 + $0x70] sm:$0xff]  ;;  %v10719_v32 = vadd.s32 136, %v9055_v37  ;;  %v14820_v26 = vld [vmem:[#allocation88_spill] sm:$0xff]  ;;  %v10725_v13 = vpop.f32.mrf.mxu0  ;;  %vm14827_vm13 = vmmov %vm14807_vm5  ;;  %v14869_v30 = vrot.slane %v10564_v2, 1 }
 0x1c2   : > { %14808 = vst [vmem:[#allocation98_spill] sm:$0xff] %v10697_v29  ;;  %v3047_v28 = vsel %vm543_vm1, %v14812_v58, %v3046_v62  ;;  %vm10711_vm4 = vcmp.lt.s32.totalorder %v14816_v36, 16  ;;  %v742_v25 = vadd.f32 %v14820_v26, %v649_v40  ;;  %v1794_v62 = vmax.f32 %v1776_v38, 0.0  ;;  %v14821_v58 = vld [vmem:[#allocation143_spill] sm:$0xff]  ;;  %14822 = vst [vmem:[#allocation103_spill] sm:$0xff] %v10725_v13  ;;  %v14823_v45 = vld [vmem:[#allocation110_spill] sm:$0xff]  ;;  %v1613_v38 = vpop.permute.xlu1 %1612  ;;  %5907 = vmatpush1.msra.mxu1 %v5831_v55 }
 0x1c3   : > { %14819 = vst [vmem:[#allocation46_spill] sm:$0xff] %v10719_v32  ;;  %v1752_v7 = vadd.f32 %v14821_v58, %v1660_v17  ;;  %3082 = vrot.lane.b32.xlu0 %v3047_v28, %s7942_s16  ;;  %v10728_v36 = vadd.f32 %v14823_v45, %v1249_v63  ;;  %v14824_v43 = vld [vmem:[#allocation30_spill] sm:$0xff]  ;;  %v14826_v29 = vrot.slane %v10215_v53, 2  ;;  %v14829_v28 = vmov 0.0   ;;  %v14830_v57 = vld [vmem:[#allocation120_spill] sm:$0xff]  ;;  %v4175_v45 = vld [vmem:[#allocation2 + $0x18] sm:$0xff]  ;;  %v10750_v17 = vpop.f32.mrf.mxu1 }
 0x1c4   : > { %v1031_v11 = vadd.f32 %v14824_v43, %v741_v20  ;;  %4346 = vmatprep.mubr.f32.mxu0 %v14829_v28  ;;  %4844 = vmatprep.mubr.f32.mxu1 %v14829_v28  ;;  %v10742_v26 = vadd.f32 %v14830_v57, %v1250_v33  ;;  %v14831_v63 = vld [vmem:[#allocation34_spill] sm:$0xff]  ;;  %v2173_v43 = vsel %vm10616_vm8, %v1794_v62, 0.0  ;;  %14832 = vst [vmem:[#allocation122_spill] sm:$0xff] %v10750_v17  ;;  %vm14834_vm5 = vmmov %vm14771_vm0  ;;  %v3050_v33 = vrot.slane %v10624_v42, 1  ;;  %v14839_v62 = vld [vmem:[#allocation132_spill] sm:$0xff] }
 0x1c5   : > { %v10736_v40 = vsel %vm14827_vm13, %v14826_v29, %v14825_v1  ;;  %v650_v20 = vadd.f32 %v10477_v34, %v14831_v63  ;;  %v1777_v58 = vadd.f32 %v10501_v12, %v1752_v7  ;;  %v1661_v29 = vadd.f32 %v1613_v38, %v10391_v54  ;;  %v4682_v1 = vld [vmem:[#allocation2 + $0x1a] sm:$0xff]  ;;  %2191 = vst.msk [vmem:[#allocation2 + $0x2b] sm:$0xff] %vm14834_vm5, %v2173_v43  ;;  %vm14836_vm3 = vmmov %vm14771_vm0  ;;  %v5830_v55 = vld [vmem:[%s13981_s3 + $0x68] sm:$0xff] }
 0x1c6   : > { %14828 = vst [vmem:[#allocation124_spill] sm:$0xff] %v10736_v40  ;;  %v10752_v40 = vpop.f32.mrf.mxu0  ;;  %7667 = vmatmul.mubr.msk.f32.gmra.mxu0 %vm14835_vm11, %v4175_v45  ;;  %7700 = vmatmul.mubr.msk.f32.gmra.mxu1 %vm14836_vm3, %v4682_v1  ;;  %v14840_v54 = vsel %vm9801_vm14, %v14838_v41, %v14839_v62  ;;  %v10771_v38 = vsub.s32 %v10337_v18, %v2000_v60  ;;  %v10774_v57 = vmul.u32.u64.low 3817748708, %v10719_v32  ;;  %v10775_v63 = vmul.u32.u64.high 3817748708, %v10719_v32, %v10774_v57  ;;  %v14843_v45 = vld [vmem:[#allocation32_spill] sm:$0xff]  ;;  %v14844_v41 = vld [vmem:[#allocation153_spill] sm:$0xff]  ;;  %v10787_v18 = vpop.permute.xlu1 %1124  ;;  %vm14851_vm14 = vmmov %vm14771_vm0 }
 0x1c7   : > { %14833 = vst [vmem:[#allocation112_spill] sm:$0xff] %v10752_v40  ;;  %vm10763_vm8 = vcmp.lt.s32.totalorder %v14840_v54, 16  ;;  %v10779_v1 = vadd.f32 %v14843_v45, %v742_v25  ;;  %v1795_v34 = vmax.f32 %v1777_v58, 0.0  ;;  %v1753_v62 = vadd.f32 %v14844_v41, %v1661_v29  ;;  %v14845_v54 = vld [vmem:[#allocation194_spill] sm:$0xff]  ;;  %v14846_v42 = vld [vmem:[#allocation197_spill] sm:$0xff]  ;;  %v1615_v40 = vpop.permute.xlu0 %1614  ;;  %4352 = vmatprep.mubr.f32.mxu0 %v14829_v28  ;;  %4850 = vmatprep.mubr.f32.mxu1 %v14829_v28  ;;  %v10800_v60 = vpop.f32.mrf.mxu1  ;;  %vm14866_vm11 = vmmov %vm14771_vm0 }
 0x1c8   : > { %2579 = vrot.lane.b32.xlu0 %v14845_v54, %s7942_s16  ;;  %2581 = vrot.lane.b32.xlu1 %v14846_v42, %s7942_s16  ;;  %v14847_v25 = vrot.slane %v10671_v5, 1  ;;  %v1159_v57 = vadd.f32 %v10351_v16, %v1031_v11  ;;  %v1662_v41 = vadd.f32 %v1615_v40, %v10410_v10  ;;  %v4176_v54 = vld [vmem:[#allocation2 + $0x20] sm:$0xff]  ;;  %14848 = vst [vmem:[#allocation5_spill] sm:$0xff] %v10800_v60  ;;  %v10802_v14 = vpop.f32.mrf.mxu0  ;;  %v14853_v10 = vrot.slane %v10562_v46, 1  ;;  %v14855_v40 = vld [vmem:[#allocation162_spill] sm:$0xff]  ;;  %vm14867_vm3 = vmmov %vm14771_vm0 }
 0x1c9   : > { %v2174_v42 = vsel %vm10663_vm6, %v1795_v34, 0.0  ;;  %v1778_v45 = vadd.f32 %v10501_v12, %v1753_v62  ;;  %v4683_v43 = vld [vmem:[#allocation2 + $0x22] sm:$0xff]  ;;  %14849 = vst [vmem:[#allocation31_spill] sm:$0xff] %v10802_v14  ;;  %5908 = vmatprep.subr.mxu1 %v5830_v55  ;;  %v743_v29 = vadd.f32 %v14850_v19, %v650_v20  ;;  %vm14852_vm6 = vmmov %vm14771_vm0  ;;  %v14856_v55 = vld [vmem:[#allocation150_spill] sm:$0xff]  ;;  %vm2041_vm5 = vcmp.ne.s32.totalorder %v10771_v38, 0 }
 0x1ca   : > { %v3053_v58 = vsel %vm543_vm1, %v3050_v33, %v14847_v25  ;;  %v2010_v25 = vshrl.u32 %v10682_v3, 4  ;;  %2192 = vst.msk [vmem:[#allocation2 + $0x33] sm:$0xff] %vm14851_vm14, %v2174_v42  ;;  %7668 = vmatmul.mubr.msk.f32.gmra.mxu0 %vm14852_vm6, %v4176_v54  ;;  %7701 = vmatmul.mubr.msk.f32.gmra.mxu1 %vm14771_vm0, %v4683_v43  ;;  %v3051_v39 = vsel %vm543_vm1, %v14853_v10, %v3050_v33  ;;  %v5829_v19 = vld [vmem:[%s13981_s3 + $0x60] sm:$0xff]  ;;  %v14860_v43 = vld [vmem:[#allocation155_spill] sm:$0xff]  ;;  %v10829_v33 = vpop.f32.mrf.mxu1  ;;  %v10833_v42 = vadd.s32 18, %v10771_v38  ;;  %v1617_v11 = vpop.permute.xlu1 %1616  ;;  %vm14868_vm14 = vmmov %vm14771_vm0 }
 0x1cb   : > { %v14857_v34 = vsel %vm9909_vm9, %v14855_v40, %v14856_v55  ;;  %v1796_v20 = vmax.f32 %v1778_v45, 0.0  ;;  %v1754_v62 = vadd.f32 %v14860_v43, %v1662_v41  ;;  %14861 = vst [vmem:[#allocation79_spill] sm:$0xff] %v10829_v33  ;;  %vm2059_vm9 = vcmp.lt.s32.totalorder %v10771_v38, 0  ;;  %v10836_v10 = vpop.permute.xlu0 %1126  ;;  %4358 = vmatprep.mubr.f32.mxu0 %v14829_v28  ;;  %4856 = vmatprep.mubr.f32.mxu1 %v14829_v28  ;;  %v14864_v40 = vld [vmem:[#allocation80_spill] sm:$0xff]  ;;  %v10851_v46 = vpop.f32.mrf.mxu0 }
 0x1cc   : > { %vm10818_vm13 = vcmp.lt.s32.totalorder %v14857_v34, 16  ;;  %3086 = vrot.lane.b32.xlu0 %v3051_v39, %s7942_s16  ;;  %3088 = vrot.lane.b32.xlu1 %v3053_v58, %s7942_s16  ;;  %v14862_v58 = vrot.slane %v10725_v13, 1  ;;  %v14863_v41 = vrot.slane %v10671_v5, 1  ;;  %v1251_v55 = vadd.f32 %v14864_v40, %v1159_v57  ;;  %v4177_v16 = vld [vmem:[#allocation2 + $0x28] sm:$0xff]  ;;  %14865 = vst [vmem:[#allocation33_spill] sm:$0xff] %v10851_v46  ;;  %v10889_v5 = vpop.f32.mrf.mxu1 }
 0x1cd   : > { %v2175_v34 = vsel %vm10711_vm4, %v1796_v20, 0.0  ;;  %v1779_v43 = vadd.f32 %v10501_v12, %v1754_v62  ;;  %v1663_v54 = vadd.f32 %v1617_v11, %v10437_v21  ;;  %v4684_v33 = vld [vmem:[#allocation2 + $0x2a] sm:$0xff]  ;;  %5909 = vmatpush1.msra.mxu1 %v5829_v19  ;;  %v2011_v45 = vmul.u32 18, %v2010_v25  ;;  %v14872_v62 = vld [vmem:[#allocation167_spill] sm:$0xff]  ;;  %14883 = vst [vmem:[#allocation128_spill] sm:$0xff] %v10889_v5 }
 0x1ce   : > { %v3055_v39 = vsel %vm543_vm1, %v14863_v41, %v14862_v58  ;;  %2193 = vst.msk [vmem:[#allocation2 + $0x3b] sm:$0xff] %vm14866_vm11, %v2175_v34  ;;  %7669 = vmatmul.mubr.msk.f32.gmra.mxu0 %vm14867_vm3, %v4177_v16  ;;  %7702 = vmatmul.mubr.msk.f32.gmra.mxu1 %vm14868_vm14, %v4684_v33  ;;  %v14870_v57 = vrot.slane %v10521_v49, 1  ;;  %v14873_v11 = vld [vmem:[#allocation154_spill] sm:$0xff]  ;;  %v5828_v16 = vld [vmem:[%s13981_s3 + $0x58] sm:$0xff]  ;;  %v14879_v41 = vrot.slane %v14804_v59, 2  ;;  %vm14880_vm6 = vcmask 1045504   ;;  %v10891_v59 = vpop.f32.mrf.mxu0 }
 0x1cf   : > { %v14874_v19 = vsel %vm9939_vm10, %v14872_v62, %v14873_v11  ;;  %v14877_v33 = vld [vmem:[#allocation151_spill] sm:$0xff]  ;;  %v2021_v34 = vshrl.u32 %v10775_v63, 4  ;;  %v1797_v62 = vmax.f32 %v1779_v43, 0.0  ;;  %v14882_v11 = vld [vmem:[#allocation166_spill] sm:$0xff]  ;;  %vm10897_vm10 = vmand %vm2059_vm9, %vm2041_vm5  ;;  %v10902_v43 = vpop.permute.xlu1 %2551  ;;  %4364 = vmatprep.mubr.f32.mxu0 %v14829_v28  ;;  %4862 = vmatprep.mubr.f32.mxu1 %v14829_v28  ;;  %v10922_v53 = vsub.s32 %v10525_v8, %v2011_v45 }
 0x1d0   : > { %v3558_v21 = vsel %vm543_vm1, %v14870_v57, %v14869_v30  ;;  %vm10867_vm4 = vcmp.lt.s32.totalorder %v14874_v19, 16  ;;  %v14878_v58 = vrot.slane %v14877_v33, 2  ;;  %v14881_v57 = vld [vmem:[#allocation35_spill] sm:$0xff]  ;;  %v1755_v19 = vadd.f32 %v14882_v11, %v1663_v54  ;;  %3090 = vrot.lane.b32.xlu1 %v3055_v39, %s7942_s16  ;;  %v1619_v54 = vpop.permute.xlu0 %1618  ;;  %5910 = vmatprep.subr.mxu1 %v5828_v16  ;;  %vm14889_vm5 = vmmov %vm14771_vm0  ;;  %v14931_v8 = vld [vmem:[#allocation170_spill] sm:$0xff] }
 0x1d1   : > { %v10884_v20 = vadd.f32 %v14881_v57, %v743_v29  ;;  %3593 = vrot.lane.b32.xlu0 %v3558_v21, %s7942_s16  ;;  %v14886_v39 = vrot.slane %v10800_v60, 1  ;;  %v14887_v21 = vrot.slane %v10690_v22, 1  ;;  %v10915_v11 = vadd.s32 144, %v9055_v37  ;;  %v4178_v49 = vld [vmem:[#allocation2 + $0x30] sm:$0xff]  ;;  %vm14890_vm9 = vmmov %vm14771_vm0  ;;  %v14983_v45 = vld [vmem:[#allocation185_spill] sm:$0xff] }
 0x1d2   : > { %v10879_v40 = vsel %vm14880_vm6, %v14879_v41, %v14878_v58  ;;  %v14888_v41 = vld [vmem:[#allocation4_spill] sm:$0xff]  ;;  %v2176_v29 = vsel %vm10763_vm8, %v1797_v62, 0.0  ;;  %v1780_v30 = vadd.f32 %v10501_v12, %v1755_v19  ;;  %v1664_v46 = vadd.f32 %v1619_v54, %v10459_v6  ;;  %v4685_v31 = vld [vmem:[#allocation2 + $0x32] sm:$0xff]  ;;  %7670 = vmatmul.mubr.msk.f32.gmra.mxu0 %vm14889_vm5, %v4178_v49  ;;  %v14895_v19 = vld [vmem:[#allocation161_spill] sm:$0xff] }
 0x1d3   : > { %v3564_v58 = vsel %vm543_vm1, %v14887_v21, %v14886_v39  ;;  %v10912_v57 = vadd.f32 %v14888_v41, %v1251_v55  ;;  %2194 = vst.msk [vmem:[#allocation2 + $0x43] sm:$0xff] %vm14771_vm0, %v2176_v29  ;;  %7703 = vmatmul.mubr.msk.f32.gmra.mxu1 %vm14890_vm9, %v4685_v31  ;;  %v14891_v37 = vrot.slane %v10626_v27, 1  ;;  %v14892_v7 = vrot.slane %v10564_v2, 1  ;;  %v14894_v6 = vld [vmem:[#allocation174_spill] sm:$0xff]  ;;  %v14899_v54 = vld [vmem:[#allocation159_spill] sm:$0xff]  ;;  %vm14902_vm11 = vmmov %vm14880_vm6  ;;  %4370 = vmatprep.mubr.f32.mxu0 %v14829_v28 }
 0x1d4   : > { %v14896_v16 = vsel %vm9989_vm7, %v14894_v6, %v14895_v19  ;;  %v5827_v49 = vld [vmem:[%s13981_s3 + $0x50] sm:$0xff]  ;;  %v2022_v29 = vmul.u32 18, %v2021_v34  ;;  %v14900_v39 = vrot.slane %v14899_v54, 2  ;;  %v14901_v21 = vrot.slane %v14877_v33, 2  ;;  %vm14906_vm7 = vmmov %vm14880_vm6  ;;  %3599 = vrot.lane.b32.xlu1 %v3564_v58, %s7942_s16  ;;  %v10967_v33 = vpop.f32.mrf.mxu1  ;;  %4868 = vmatprep.mubr.f32.mxu1 %v14829_v28 }
 0x1d5   : > { %v3560_v55 = vsel %vm543_vm1, %v14892_v7, %v14891_v37  ;;  %vm10937_vm8 = vcmp.lt.s32.totalorder %v14896_v16, 16  ;;  %v10955_v37 = vpop.f32.mrf.mxu0  ;;  %v14904_v7 = vrot.slane %v10342_v0, 2  ;;  %v14905_v62 = vrot.slane %v10298_v23, 2  ;;  %v14908_v16 = vld [vmem:[#allocation171_spill] sm:$0xff]  ;;  %14909 = vst [vmem:[#allocation6_spill] sm:$0xff] %v10967_v33  ;;  %vm14912_vm3 = vmmov %vm14880_vm6  ;;  %5911 = vmatpush1.msra.mxu1 %v5827_v49  ;;  %v5826_v49 = vld [vmem:[%s13981_s3 + $0x48] sm:$0xff] }
 0x1d6   : > { %v10953_v41 = vsel %vm14902_vm11, %v14901_v21, %v14900_v39  ;;  %14903 = vst [vmem:[#allocation7_spill] sm:$0xff] %v10955_v37  ;;  %v1798_v19 = vmax.f32 %v1780_v30, 0.0  ;;  %v1756_v31 = vadd.f32 %v14908_v16, %v1664_v46  ;;  %3595 = vrot.lane.b32.xlu0 %v3560_v55, %s7942_s16  ;;  %v14910_v34 = vrot.slane %v9994_v52, 2  ;;  %v1621_v30 = vpop.permute.xlu1 %1620  ;;  %vm14913_vm6 = vmmov %vm14771_vm0  ;;  %v14920_v33 = vld [vmem:[#allocation175_spill] sm:$0xff]  ;;  %5912 = vmatprep.subr.mxu1 %v5826_v49  ;;  %v14945_v49 = vld [vmem:[#allocation188_spill] sm:$0xff] }
 0x1d7   : > { %v10962_v6 = vsel %vm14906_vm7, %v14905_v62, %v14904_v7  ;;  %v14911_v54 = vrot.slane %v9945_v15, 2  ;;  %v10977_v7 = vpop.permute.xlu0 %2555  ;;  %v3058_v46 = vrot.slane %v10891_v59, 1  ;;  %v1665_v16 = vadd.f32 %v1621_v30, %v10567_v51  ;;  %vm14914_vm5 = vmmov %vm14771_vm0  ;;  %v3490_v51 = vpop.f32.mrf.mxu1 }
 0x1d8   : > { %14907 = vst [vmem:[#allocation116_spill] sm:$0xff] %v10962_v6  ;;  %v10983_v58 = vmul.u32.u64.low 3817748708, %v10915_v11  ;;  %v10984_v55 = vmul.u32.u64.high 3817748708, %v10915_v11, %v10983_v58  ;;  %v2177_v15 = vsel %vm10818_vm13, %v1798_v19, 0.0  ;;  %v1781_v62 = vadd.f32 %v10501_v12, %v1756_v31  ;;  %vm14927_vm9 = vmmov %vm14912_vm3 }
 0x1d9   : > { %v10974_v39 = vsel %vm14912_vm3, %v14911_v54, %v14910_v34  ;;  %v4179_v34 = vld [vmem:[#allocation2 + $0x38] sm:$0xff]  ;;  %vm2042_vm14 = vcmp.ne.s32.totalorder %v10922_v53, 0  ;;  %2195 = vst.msk [vmem:[#allocation2 + $0x4b] sm:$0xff] %vm14913_vm6, %v2177_v15  ;;  %v14915_v3 = vrot.slane %v10690_v22, 1  ;;  %v14916_v19 = vrot.slane %v10626_v27, 1  ;;  %v11007_v58 = vpop.f32.mrf.mxu0  ;;  %v14929_v22 = vld [vmem:[#allocation178_spill] sm:$0xff]  ;;  %vm14933_vm11 = vmmov %vm14912_vm3 }
 0x1da   : > { %v4686_v54 = vld [vmem:[#allocation2 + $0x3a] sm:$0xff]  ;;  %7671 = vmatmul.mubr.msk.f32.gmra.mxu0 %vm14771_vm0, %v4179_v34  ;;  %vm2060_vm13 = vcmp.lt.s32.totalorder %v10922_v53, 0  ;;  %v11005_v30 = vsub.s32 %v10719_v32, %v2022_v29  ;;  %14917 = vst [vmem:[#allocation73_spill] sm:$0xff] %v11007_v58  ;;  %v1799_v59 = vmax.f32 %v1781_v62, 0.0  ;;  %v1757_v37 = vadd.f32 %v14920_v33, %v1665_v16  ;;  %v11017_v27 = vpop.permute.xlu1 %2553  ;;  %v14923_v33 = vld [vmem:[#allocation45_spill] sm:$0xff]  ;;  %vm14943_vm6 = vmmov %vm14771_vm0 }
 0x1db   : > { %7704 = vmatmul.mubr.msk.f32.gmra.mxu1 %vm14914_vm5, %v4686_v54  ;;  %v3562_v31 = vsel %vm543_vm1, %v14916_v19, %v14915_v3  ;;  %v14918_v15 = vld [vmem:[#allocation203_spill] sm:$0xff]  ;;  %v14919_v54 = vld [vmem:[#allocation204_spill] sm:$0xff]  ;;  %v14921_v3 = vld [vmem:[#allocation18_spill] sm:$0xff]  ;;  %v11015_v19 = vpop.permute.xlu0 %2557  ;;  %4376 = vmatprep.mubr.f32.mxu0 %v14829_v28  ;;  %v14922_v29 = vrot.slane %v10802_v14, 1  ;;  %v11025_v62 = vadd.s32 18, %v10922_v53  ;;  %v14924_v16 = vrot.slane %v14923_v33, 2 }
 0x1dc   : > { %3597 = vrot.lane.b32.xlu0 %v3562_v31, %s7942_s16  ;;  %2585 = vrot.lane.b32.xlu1 %v14921_v3, %s7942_s16  ;;  %v14925_v31 = vld [vmem:[#allocation44_spill] sm:$0xff]  ;;  %v14930_v2 = vrot.slane %v14929_v22, 2  ;;  %v14932_v32 = vrot.slane %v14931_v8, 2  ;;  %v3567_v33 = vrot.slane %v3490_v51, 1  ;;  %vm11048_vm7 = vmand %vm2060_vm13, %vm2042_vm14 }
 0x1dd   : > { %4874 = vmatprep.mubr.f32.mxu1 %v14829_v28  ;;  %v3059_v34 = vsel %vm543_vm1, %v14922_v29, %v3058_v46  ;;  %v14926_v21 = vrot.slane %v14925_v31, 2  ;;  %v2178_v46 = vsel %vm10867_vm4, %v1799_v59, 0.0  ;;  %v1782_v29 = vadd.f32 %v10501_v12, %v1757_v37  ;;  %v4180_v0 = vld [vmem:[#allocation2 + $0x40] sm:$0xff]  ;;  %vm14942_vm4 = vmmov %vm14771_vm0 }
 0x1de   : > { %v11039_v6 = vsel %vm14933_vm11, %v14932_v32, %v14930_v2  ;;  %v4687_v50 = vld [vmem:[#allocation2 + $0x42] sm:$0xff]  ;;  %v14939_v32 = vrot.slane %v9994_v52, 2  ;;  %2196 = vst.msk [vmem:[#allocation2 + $0x53] sm:$0xff] %vm14942_vm4, %v2178_v46  ;;  %7672 = vmatmul.mubr.msk.f32.gmra.mxu0 %vm14943_vm6, %v4180_v0  ;;  %vm14962_vm11 = vmmov %vm14912_vm3 }
 0x1df   : > { %v11032_v3 = vsel %vm14927_vm9, %v14926_v21, %v14924_v16  ;;  %14934 = vst [vmem:[#allocation141_spill] sm:$0xff] %v11039_v6  ;;  %v14937_v8 = vld [vmem:[#allocation184_spill] sm:$0xff]  ;;  %7705 = vmatmul.mubr.msk.f32.gmra.mxu1 %vm14771_vm0, %v4687_v50  ;;  %v14946_v16 = vld [vmem:[#allocation179_spill] sm:$0xff]  ;;  %v14950_v52 = vld [vmem:[#allocation193_spill] sm:$0xff]  ;;  %vm2043_vm9 = vcmp.ne.s32.totalorder %v11005_v30, 0  ;;  %v11086_v50 = vpop.f32.mrf.mxu0  ;;  %v1800_v23 = vmax.f32 %v1782_v29, 0.0  ;;  %4382 = vmatprep.mubr.f32.mxu0 %v14829_v28  ;;  %v1161_v6 = vadd.f32 %v10631_v56, %v10884_v20 }
 0x1e0   : > { %14928 = vst [vmem:[#allocation87_spill] sm:$0xff] %v11032_v3  ;;  %v14938_v2 = vrot.slane %v14937_v8, 2  ;;  %v14947_v3 = vsel %vm10111_vm2, %v14945_v49, %v14946_v16  ;;  %vm14951_vm5 = vnez %v14950_v52  ;;  %v5825_v0 = vld [vmem:[%s13981_s3 + $0x40] sm:$0xff]  ;;  %vm2061_vm2 = vcmp.lt.s32.totalorder %v11005_v30, 0  ;;  %14957 = vst [vmem:[#allocation135_spill] sm:$0xff] %v11086_v50  ;;  %3094 = vrot.lane.b32.xlu1 %v3059_v34, %s7942_s16  ;;  %4880 = vmatprep.mubr.f32.mxu1 %v14829_v28 }
 0x1e1   : > { %vm11068_vm14 = vcmp.lt.s32.totalorder %v14947_v3, 16  ;;  %v14958_v3 = vld [vmem:[#allocation119_spill] sm:$0xff]  ;;  %v14960_v49 = vld [vmem:[#allocation108_spill] sm:$0xff]  ;;  %v3565_v50 = vrot.slane %v10889_v5, 1  ;;  %v3800_v29 = vshrl.u32 %v10984_v55, 4  ;;  %v14970_v34 = vrot.slane %v14929_v22, 2  ;;  %vm14971_vm4 = vmmov %vm14912_vm3  ;;  %5913 = vmatpush1.msra.mxu1 %v5825_v0 }
 0x1e2   : > { %v11057_v25 = vsel %vm14912_vm3, %v14939_v32, %v14938_v2  ;;  %v14952_v2 = vld [vmem:[#allocation192_spill] sm:$0xff]  ;;  %v14953_v32 = vld [vmem:[#allocation182_spill] sm:$0xff]  ;;  %v14959_v51 = vrot.slane %v14958_v3, 2  ;;  %v14961_v16 = vrot.slane %v14960_v49, 2  ;;  %v14968_v3 = vld [vmem:[#allocation49_spill] sm:$0xff]  ;;  %v1625_v49 = vpop.permute.xlu1 %1624  ;;  %v14977_v55 = vrot.slane %v10802_v14, 1 }
 0x1e3   : > { %14940 = vst [vmem:[#allocation139_spill] sm:$0xff] %v11057_v25  ;;  %v14954_v59 = vsel %vm14951_vm5, %v14952_v2, %v14953_v32  ;;  %v14965_v2 = vrot.slane %v14918_v15, 2  ;;  %v14967_v37 = vld [vmem:[#allocation36_spill] sm:$0xff]  ;;  %2583 = vrot.lane.b32.xlu0 %v14968_v3, %s7942_s16  ;;  %v1667_v5 = vadd.f32 %v1625_v49, %v10728_v36  ;;  %vm11134_vm6 = vmand %vm2061_vm2, %vm2043_vm9  ;;  %v11153_v49 = vpop.f32.mrf.mxu0  ;;  %v15054_v21 = vrot.slane %v14937_v8, 2 }
 0x1e4   : > { %vm11077_vm13 = vcmp.lt.s32.totalorder %v14954_v59, 16  ;;  %v11093_v52 = vsel %vm14962_vm11, %v14961_v16, %v14959_v51  ;;  %v14964_v59 = vrot.slane %v14919_v54, 2  ;;  %v651_v25 = vadd.f32 %v10529_v24, %v14967_v37  ;;  %v1623_v51 = vpop.permute.xlu0 %1622  ;;  %v4181_v16 = vld [vmem:[#allocation2 + $0x48] sm:$0xff]  ;;  %vm14976_vm5 = vmmov %vm14771_vm0  ;;  %14979 = vst [vmem:[#allocation143_spill] sm:$0xff] %v11153_v49  ;;  %v15043_v54 = vld [vmem:[#allocation130_spill] sm:$0xff] }
 0x1e5   : > { %14963 = vst [vmem:[#allocation129_spill] sm:$0xff] %v11093_v52  ;;  %v11115_v24 = vadd.s32 18, %v11005_v30  ;;  %v14969_v37 = vrot.slane %v10046_v35, 2  ;;  %v1666_v3 = vadd.f32 %v1623_v51, %v10594_v48  ;;  %v3568_v52 = vsel %vm543_vm1, %v3565_v50, %v3567_v33  ;;  %v14974_v48 = vld [vmem:[#allocation38_spill] sm:$0xff]  ;;  %7673 = vmatmul.mubr.msk.f32.gmra.mxu0 %vm14771_vm0, %v4181_v16  ;;  %v5824_v51 = vld [vmem:[%s13981_s3 + $0x38] sm:$0xff]  ;;  %vm14988_vm9 = vmmov %vm14912_vm3 }
 0x1e6   : > { %v11100_v32 = vsel %vm14912_vm3, %v14965_v2, %v14964_v59  ;;  %v2179_v2 = vsel %vm10937_vm8, %v1800_v23, 0.0  ;;  %v652_v36 = vadd.f32 %v10675_v44, %v14974_v48  ;;  %vm14975_vm8 = vmmov %vm14771_vm0  ;;  %v14978_v33 = vrot.slane %v10725_v13, 1  ;;  %v14982_v48 = vld [vmem:[#allocation181_spill] sm:$0xff]  ;;  %4388 = vmatprep.mubr.f32.mxu0 %v14829_v28  ;;  %v11165_v23 = vpop.permute.xlu1 %2561  ;;  %3603 = vrot.lane.b32.xlu1 %v3568_v52, %s7942_s16  ;;  %v5823_v52 = vld [vmem:[%s13981_s3 + $0x30] sm:$0xff] }
 0x1e7   : > { %14966 = vst [vmem:[#allocation88_spill] sm:$0xff] %v11100_v32  ;;  %v11123_v59 = vsel %vm14971_vm4, %v14970_v34, %v14969_v37  ;;  %v4688_v32 = vld [vmem:[#allocation2 + $0x4a] sm:$0xff]  ;;  %2197 = vst.msk [vmem:[#allocation2 + $0x5b] sm:$0xff] %vm14975_vm8, %v2179_v2  ;;  %v1758_v16 = vadd.f32 %v14982_v48, %v1666_v3  ;;  %v14984_v3 = vld [vmem:[#allocation56_spill] sm:$0xff]  ;;  %5914 = vmatprep.subr.mxu1 %v5824_v51  ;;  %v4480_v48 = vrot.slane %v11007_v58, 1  ;;  %v14993_v51 = vrot.slane %v10800_v60, 1 }
 0x1e8   : > { %7706 = vmatmul.mubr.msk.f32.gmra.mxu1 %vm14976_vm5, %v4688_v32  ;;  %v3057_v0 = vsel %vm543_vm1, %v14978_v33, %v14977_v55  ;;  %v14980_v37 = vld [vmem:[#allocation94_spill] sm:$0xff]  ;;  %v14981_v34 = vld [vmem:[#allocation93_spill] sm:$0xff]  ;;  %v1759_v32 = vadd.f32 %v14983_v45, %v1667_v5  ;;  %v1160_v55 = vadd.f32 %v10576_v61, %v10779_v1  ;;  %v11163_v33 = vpop.permute.xlu0 %2559  ;;  %v11174_v45 = vadd.s32 144, %v14984_v3  ;;  %vm14991_vm2 = vmmov %vm14771_vm0 }
 0x1e9   : > { %v744_v44 = vadd.f32 %v14980_v37, %v651_v25  ;;  %3092 = vrot.lane.b32.xlu0 %v3057_v0, %s7942_s16  ;;  %4886 = vmatprep.mubr.f32.mxu1 %v14829_v28  ;;  %v3801_v25 = vmul.u32 18, %v3800_v29  ;;  %v1783_v0 = vadd.f32 %v10501_v12, %v1758_v16  ;;  %v4182_v1 = vld [vmem:[#allocation2 + $0x50] sm:$0xff]  ;;  %v14986_v3 = vrot.slane %v10540_v9, 2  ;;  %vm14992_vm11 = vmmov %vm14771_vm0  ;;  %v14995_v29 = vld [vmem:[#allocation71_spill] sm:$0xff] }
 0x1ea   : > { %v1784_v61 = vadd.f32 %v10501_v12, %v1759_v32  ;;  %v4689_v37 = vld [vmem:[#allocation2 + $0x52] sm:$0xff]  ;;  %v14987_v13 = vrot.slane %v14981_v34, 2  ;;  %v14990_v32 = vld [vmem:[#allocation100_spill] sm:$0xff]  ;;  %7674 = vmatmul.mubr.msk.f32.gmra.mxu0 %vm14991_vm2, %v4182_v1  ;;  %v3566_v58 = vsel %vm543_vm1, %v14993_v51, %v3565_v50  ;;  %v15009_v60 = vld [vmem:[#allocation89_spill] sm:$0xff]  ;;  %5915 = vmatpush1.msra.mxu1 %v5823_v52  ;;  %vm15023_vm2 = vcmask 1045504  }
 0x1eb   : > { %v745_v14 = vadd.f32 %v14990_v32, %v652_v36  ;;  %v14996_v5 = vld [vmem:[#allocation23_spill] sm:$0xff]  ;;  %v15000_v36 = vld [vmem:[#allocation37_spill] sm:$0xff]  ;;  %v15001_v50 = vld [vmem:[#allocation74_spill] sm:$0xff]  ;;  %4394 = vmatprep.mubr.f32.mxu0 %v14829_v28 }
 0x1ec   : > { %v11189_v16 = vsel %vm14988_vm9, %v14987_v13, %v14986_v3  ;;  %7707 = vmatmul.mubr.msk.f32.gmra.mxu1 %vm14992_vm11, %v4689_v37  ;;  %v14997_v9 = vsel %vm10397_vm15, %v14995_v29, %v14996_v5  ;;  %v5822_v13 = vld [vmem:[%s13981_s3 + $0x28] sm:$0xff]  ;;  %v1034_v1 = vadd.f32 %v15000_v36, %v744_v44  ;;  %v1801_v37 = vmax.f32 %v1783_v0, 0.0  ;;  %v15003_v2 = vld [vmem:[#allocation22_spill] sm:$0xff]  ;;  %v15008_v5 = vld [vmem:[#allocation60_spill] sm:$0xff]  ;;  %v1627_v0 = vpop.permute.xlu0 %1626 }
 0x1ed   : > { %14989 = vst [vmem:[#allocation110_spill] sm:$0xff] %v11189_v16  ;;  %vm11202_vm3 = vcmp.lt.s32.totalorder %v14997_v9, 16  ;;  %v1802_v3 = vmax.f32 %v1784_v61, 0.0  ;;  %3601 = vrot.lane.b32.xlu0 %v3566_v58, %s7942_s16  ;;  %vm15002_vm4 = vnez %v15001_v50  ;;  %v15004_v32 = vld [vmem:[#allocation54_spill] sm:$0xff]  ;;  %v11222_v29 = vadd.s32 144, %v15008_v5  ;;  %4892 = vmatprep.mubr.f32.mxu1 %v14829_v28  ;;  %vm15015_vm8 = vmmov %vm14771_vm0 }
 0x1ee   : > { %v15005_v51 = vsel %vm15002_vm4, %v15003_v2, %v15004_v32  ;;  %v1252_v44 = vadd.f32 %v15009_v60, %v1160_v55  ;;  %v11227_v58 = vsub.s32 %v10915_v11, %v3801_v25  ;;  %v2180_v50 = vsel %vm11068_vm14, %v1801_v37, 0.0  ;;  %v1629_v60 = vpop.permute.xlu1 %1628  ;;  %v4183_v55 = vld [vmem:[#allocation2 + $0x58] sm:$0xff]  ;;  %5916 = vmatprep.subr.mxu1 %v5822_v13  ;;  %v5821_v11 = vld [vmem:[%s13981_s3 + $0x20] sm:$0xff]  ;;  %v15011_v37 = vld [vmem:[#allocation114_spill] sm:$0xff] }
 0x1ef   : > { %vm11216_vm15 = vcmp.lt.s32.totalorder %v15005_v51, 16  ;;  %v11230_v61 = vmul.u32.u64.low 3817748708, %v11174_v45  ;;  %v11231_v36 = vmul.u32.u64.high 3817748708, %v11174_v45, %v11230_v61  ;;  %v2181_v2 = vsel %vm11077_vm13, %v1802_v3, 0.0  ;;  %v4690_v51 = vld [vmem:[#allocation2 + $0x5a] sm:$0xff]  ;;  %vm15013_vm14 = vmmov %vm14771_vm0  ;;  %7675 = vmatmul.mubr.msk.f32.gmra.mxu0 %vm15015_vm8, %v4183_v55  ;;  %5917 = vmatpush1.msra.mxu1 %v5821_v11 }
 0x1f0   : > { %v1668_v32 = vadd.f32 %v1627_v0, %v10742_v26  ;;  %v15010_v25 = vrot.slane %v11153_v49, 1  ;;  %v15012_v3 = vld [vmem:[#allocation39_spill] sm:$0xff]  ;;  %2198 = vst.msk [vmem:[#allocation2 + $0x63] sm:$0xff] %vm15013_vm14, %v2180_v50  ;;  %vm15014_vm13 = vmmov %vm14771_vm0  ;;  %v1669_v26 = vadd.f32 %v1629_v60, %v10912_v57  ;;  %7708 = vmatmul.mubr.msk.f32.gmra.mxu1 %vm14771_vm0, %v4690_v51  ;;  %4400 = vmatprep.mubr.f32.mxu0 %v14829_v28  ;;  %v15017_v0 = vld [vmem:[#allocation78_spill] sm:$0xff]  ;;  %vm3992_vm5 = vcmp.ne.s32.totalorder %v11227_v58, 0 }
 0x1f1   : > { %v1035_v5 = vadd.f32 %v15012_v3, %v745_v14  ;;  %2199 = vst.msk [vmem:[#allocation2 + $0x6b] sm:$0xff] %vm15014_vm13, %v2181_v2  ;;  %v15016_v13 = vld [vmem:[#allocation127_spill] sm:$0xff]  ;;  %4898 = vmatprep.mubr.f32.mxu1 %v14829_v28  ;;  %v5819_v14 = vld [vmem:[%s13981_s3 + $0x10] sm:$0xff]  ;;  %v11263_v20 = vmul.u32.u64.low 3817748708, %v11222_v29  ;;  %v11264_v57 = vmul.u32.u64.high 3817748708, %v11222_v29, %v11263_v20  ;;  %v11267_v61 = vadd.s32 144, %v15017_v0  ;;  %vm15040_vm4 = vmmov %vm14771_vm0 }
 0x1f2   : > { %v4482_v52 = vsel %vm543_vm1, %v4480_v48, %v15010_v25  ;;  %v5820_v48 = vld [vmem:[%s13981_s3 + $0x18] sm:$0xff]  ;;  %v1760_v56 = vadd.f32 %v15016_v13, %v1668_v32  ;;  %v1162_v60 = vadd.f32 %v10787_v18, %v1034_v1  ;;  %v11273_v25 = vpop.permute.xlu0 %2563  ;;  %v5818_v3 = vld [vmem:[%s13981_s3 + $0x8] sm:$0xff]  ;;  %vm4010_vm9 = vcmp.lt.s32.totalorder %v11227_v58, 0  ;;  %v5817_v11 = vld [vmem:[%s13981_s3] sm:$0xff] }
 0x1f3   : > { %v1163_v32 = vadd.f32 %v10836_v10, %v1035_v5  ;;  %v15019_v55 = vld [vmem:[#allocation19_spill] sm:$0xff]  ;;  %4517 = vrot.lane.b32.xlu0 %v4482_v52, %s7942_s16  ;;  %5918 = vmatprep.subr.mxu1 %v5820_v48  ;;  %v15020_v18 = vrot.slane %v14925_v31, 2  ;;  %v15026_v0 = vld [vmem:[#allocation48_spill] sm:$0xff]  ;;  %v15034_v48 = vld [vmem:[#allocation113_spill] sm:$0xff] }
 0x1f4   : > { %v1761_v51 = vadd.f32 %v15019_v55, %v1669_v26  ;;  %v1785_v13 = vadd.f32 %v10501_v12, %v1760_v56  ;;  %v15021_v10 = vld [vmem:[#allocation3_spill] sm:$0xff]  ;;  %v1542_v55 = vadd.f32 %v15026_v0, %v1252_v44  ;;  %v15028_v31 = vld [vmem:[#allocation76_spill] sm:$0xff]  ;;  %5919 = vmatpush1.msra.mxu1 %v5819_v14  ;;  %v15033_v0 = vld [vmem:[#allocation97_spill] sm:$0xff] }
 0x1f5   : > { %v15022_v1 = vrot.slane %v15021_v10, 2  ;;  %v15025_v52 = vld [vmem:[#allocation95_spill] sm:$0xff]  ;;  %5920 = vmatprep.subr.mxu1 %v5818_v3  ;;  %v3811_v3 = vshrl.u32 %v11231_v36, 4  ;;  %v15039_v50 = vld [vmem:[#allocation41_spill] sm:$0xff]  ;;  %vm15041_vm14 = vmmov %vm14771_vm0 }
 0x1f6   : > { %v1253_v26 = vadd.f32 %v15025_v52, %v1161_v6  ;;  %v1786_v20 = vadd.f32 %v10501_v12, %v1761_v51  ;;  %v15029_v2 = vld [vmem:[#allocation91_spill] sm:$0xff]  ;;  %v11309_v52 = vadd.s32 18, %v11227_v58  ;;  %v1631_v56 = vpop.permute.xlu0 %1630  ;;  %5921 = vmatpush1.msra.mxu1 %v5817_v11  ;;  %v2605_v47 = vadd.f32 %v10902_v43, %v15039_v50  ;;  %vm15042_vm13 = vmmov %vm14771_vm0  ;;  %v11632_v14 = vld [vmem:[%s13980_s2] ss:$0 sm:$0xff] }
 0x1f7   : > { %v11287_v5 = vsel %vm15023_vm2, %v15022_v1, %v15020_v18  ;;  %v15030_v10 = vsel %vm10600_vm12, %v15028_v31, %v15029_v2  ;;  %v7823_v6 = vld [vmem:[%s13981_s3 + $0x178] sm:$0xff]  ;;  %v1803_v1 = vmax.f32 %v1785_v13, 0.0  ;;  %v1254_v2 = vadd.f32 %v15033_v0, %v1162_v60  ;;  %vm11321_vm12 = vmand %vm4010_vm9, %vm3992_vm5  ;;  %v4184_v0 = vld [vmem:[#allocation2 + $0x60] sm:$0xff] }
 0x1f8   : > { %15024 = vst [vmem:[#allocation30_spill] sm:$0xff] %v11287_v5  ;;  %vm11301_vm11 = vcmp.lt.s32.totalorder %v15030_v10, 16  ;;  %v11312_v44 = vmul.u32.u64.low 3817748708, %v11267_v61  ;;  %v11313_v51 = vmul.u32.u64.high 3817748708, %v11267_v61, %v11312_v44  ;;  %v1255_v31 = vadd.f32 %v15034_v48, %v1163_v32  ;;  %v11330_v32 = vpop.permute.xlu1 %2565  ;;  %v4691_v48 = vld [vmem:[#allocation2 + $0x62] sm:$0xff]  ;;  %6924 = vmatprep.subr.mxu1 %v7823_v6  ;;  %7676 = vmatmul.mubr.msk.f32.gmra.mxu0 %vm15041_vm14, %v4184_v0  ;;  %vm15047_vm8 = vmmov %vm14771_vm0  ;;  %v15048_v43 = vld [vmem:[#allocation199_spill] sm:$0xff] }
 0x1f9   : > { %v1804_v10 = vmax.f32 %v1786_v20, 0.0  ;;  %v2182_v60 = vsel %vm11202_vm3, %v1803_v1, 0.0  ;;  %v1670_v20 = vadd.f32 %v1631_v56, %v1542_v55  ;;  %7709 = vmatmul.mubr.msk.f32.gmra.mxu1 %vm15042_vm13, %v4691_v48  ;;  %v1543_v11 = vadd.f32 %v15043_v54, %v1253_v26  ;;  %4406 = vmatprep.mubr.f32.mxu0 %v14829_v28  ;;  %v15056_v1 = vld [vmem:[#allocation136_spill] sm:$0xff]  ;;  %v15058_v48 = vld [vmem:[#allocation190_spill] sm:$0xff]  ;;  %vm15065_vm0 = vmmov %vm15023_vm2 }
 0x1fa   : > { %2200 = vst.msk [vmem:[#allocation2 + $0x73] sm:$0xff] %vm15040_vm4, %v2182_v60  ;;  %v15044_v56 = vsel %vm10897_vm10, %v10833_v42, %v10771_v38  ;;  %v15049_v50 = vsel %vm11048_vm7, %v11025_v62, %v10922_v53  ;;  %4904 = vmatprep.mubr.f32.mxu1 %v14829_v28  ;;  %v4064_v38 = vsel %vm11321_vm12, %v11309_v52, %v11227_v58  ;;  %v15052_v42 = vld [vmem:[#allocation189_spill] sm:$0xff]  ;;  %vm15055_vm10 = vmmov %vm15023_vm2  ;;  %v3822_v53 = vshrl.u32 %v11264_v57, 4  ;;  %v1633_v62 = vpop.permute.xlu0 %1632  ;;  %v15057_v60 = vld [vmem:[#allocation146_spill] sm:$0xff] }
 0x1fb   : > { %v2183_v36 = vsel %vm11216_vm15, %v1804_v10, 0.0  ;;  %vm11346_vm3 = vcmp.lt.s32.totalorder %v15044_v56, 16  ;;  %v1762_v9 = vadd.f32 %v15048_v43, %v1670_v20  ;;  %vm11357_vm15 = vcmp.lt.s32.totalorder %v15049_v50, 16  ;;  %vm15061_vm7 = vmmov %vm15023_vm2  ;;  %v15062_v57 = vld [vmem:[#allocation15_spill] sm:$0xff]  ;;  %v15138_v58 = vld [vmem:[#allocation9_spill] sm:$0xff] }
 0x1fc   : > { %2201 = vst.msk [vmem:[#allocation2 + $0x7b] sm:$0xff] %vm15047_vm8, %v2183_v36  ;;  %v15053_v63 = vrot.slane %v15052_v42, 2  ;;  %v1544_v10 = vadd.f32 %v15056_v1, %v1254_v2  ;;  %v1545_v20 = vadd.f32 %v15057_v60, %v1255_v31  ;;  %v3812_v0 = vmul.u32 18, %v3811_v3  ;;  %v1635_v50 = vpop.permute.xlu1 %1634  ;;  %v15066_v3 = vld [vmem:[#allocation81_spill] sm:$0xff]  ;;  %vm15068_vm5 = vmmov %vm15040_vm4  ;;  %v15128_v49 = vld [vmem:[#allocation75_spill] sm:$0xff] }
 0x1fd   : > { %v15059_v36 = vrot.slane %v15058_v48, 2  ;;  %v15060_v54 = vrot.slane %v10046_v35, 2  ;;  %v1787_v8 = vadd.f32 %v10501_v12, %v1762_v9  ;;  %v1671_v43 = vadd.f32 %v1633_v62, %v1543_v11  ;;  %v15067_v35 = vld [vmem:[#allocation117_spill] sm:$0xff]  ;;  %vm15069_vm9 = vmmov %vm15040_vm4 }
 0x1fe   : > { %v11372_v6 = vsel %vm15055_vm10, %v15054_v21, %v15053_v63  ;;  %v4185_v63 = vld [vmem:[#allocation2 + $0x68] sm:$0xff]  ;;  %v15063_v16 = vrot.slane %v15062_v57, 2  ;;  %v15064_v2 = vrot.slane %v15052_v42, 2  ;;  %v11393_v1 = vadd.s32 144, %v15066_v3  ;;  %vm15073_vm2 = vmmov %vm15065_vm0 }
 0x1ff   : > { %v11382_v56 = vsel %vm15061_vm7, %v15060_v54, %v15059_v36  ;;  %v4692_v21 = vld [vmem:[#allocation2 + $0x6a] sm:$0xff]  ;;  %v2697_v60 = vadd.f32 %v15067_v35, %v2605_v47  ;;  %v1672_v48 = vadd.f32 %v1635_v50, %v1544_v10  ;;  %7677 = vmatmul.mubr.msk.f32.gmra.mxu0 %vm15068_vm5, %v4185_v63  ;;  %v1805_v54 = vmax.f32 %v1787_v8, 0.0  ;;  %vm15082_vm14 = vmmov %vm15068_vm5  ;;  %v15104_v10 = vld [vmem:[#allocation123_spill] sm:$0xff] }
 0x200   : > { %v11390_v31 = vsel %vm15065_vm0, %v15064_v2, %v15063_v16  ;;  %7710 = vmatmul.mubr.msk.f32.gmra.mxu1 %vm15069_vm9, %v4692_v21  ;;  %v15070_v11 = vld [vmem:[#allocation57_spill] sm:$0xff]  ;;  %v15072_v62 = vmov %v15063_v16  ;;  %v15075_v2 = vld [vmem:[#allocation98_spill] sm:$0xff]  ;;  %v15076_v47 = vsel %vm11134_vm6, %v11115_v24, %v11005_v30  ;;  %4412 = vmatprep.mubr.f32.mxu0 %v14829_v28  ;;  %v3823_v50 = vmul.u32 18, %v3822_v53  ;;  %v15079_v21 = vld [vmem:[#allocation47_spill] sm:$0xff] }
 0x201   : > { %v15071_v9 = vrot.slane %v15070_v11, 2  ;;  %v15074_v42 = vld [vmem:[#allocation101_spill] sm:$0xff]  ;;  %v1763_v3 = vadd.f32 %v15075_v2, %v1671_v43  ;;  %vm11414_vm4 = vcmp.lt.s32.totalorder %v15076_v47, 16  ;;  %4910 = vmatprep.mubr.f32.mxu1 %v14829_v28  ;;  %v3833_v63 = vshrl.u32 %v11313_v51, 4  ;;  %v4186_v53 = vld [vmem:[#allocation2 + $0x70] sm:$0xff]  ;;  %vm15081_vm6 = vmmov %vm15068_vm5 }
 0x202   : > { %v11406_v16 = vadd.s32 144, %v15074_v42  ;;  %v2607_v8 = vadd.f32 %v10977_v7, %v15079_v21  ;;  %v1764_v43 = vadd.f32 %v10879_v40, %v1672_v48  ;;  %v11425_v22 = vsub.s32 %v11174_v45, %v3812_v0  ;;  %v15080_v30 = vld [vmem:[#allocation105_spill] sm:$0xff]  ;;  %vm15083_vm13 = vmmov %vm15068_vm5 }
 0x203   : > { %v11403_v36 = vsel %vm15073_vm2, %v15072_v62, %v15071_v9  ;;  %v11428_v24 = vadd.s32 144, %v15080_v30  ;;  %v2184_v57 = vsel %vm11301_vm11, %v1805_v54, 0.0  ;;  %v1788_v35 = vadd.f32 %v10501_v12, %v1763_v3  ;;  %v1637_v9 = vpop.permute.xlu1 %1636  ;;  %v4693_v62 = vld [vmem:[#allocation2 + $0x72] sm:$0xff]  ;;  %7678 = vmatmul.mubr.msk.f32.gmra.mxu0 %vm15082_vm14, %v4186_v53  ;;  %v15084_v2 = vld [vmem:[#allocation121_spill] sm:$0xff]  ;;  %vm15088_vm11 = vmmov %vm15068_vm5 }
 0x204   : > { %v11434_v51 = vmul.u32.u64.low 3817748708, %v11393_v1  ;;  %v11435_v42 = vmul.u32.u64.high 3817748708, %v11393_v1, %v11434_v51  ;;  %2202 = vst.msk [vmem:[#allocation2 + $0x83] sm:$0xff] %vm15081_vm6, %v2184_v57  ;;  %v1789_v40 = vadd.f32 %v10501_v12, %v1764_v43  ;;  %v1673_v7 = vadd.f32 %v1637_v9, %v1545_v20  ;;  %7711 = vmatmul.mubr.msk.f32.gmra.mxu1 %vm15083_vm13, %v4693_v62  ;;  %4418 = vmatprep.mubr.f32.mxu0 %v14829_v28  ;;  %v15085_v43 = vld [vmem:[#allocation51_spill] sm:$0xff]  ;;  %vm15089_vm8 = vmmov %vm15068_vm5 }
 0x205   : > { %v11442_v45 = vmul.u32.u64.low 3817748708, %v11406_v16  ;;  %v11443_v18 = vmul.u32.u64.high 3817748708, %v11406_v16, %v11442_v45  ;;  %v1806_v0 = vmax.f32 %v1788_v35, 0.0  ;;  %4916 = vmatprep.mubr.f32.mxu1 %v14829_v28  ;;  %v11448_v48 = vsub.s32 %v11222_v29, %v3823_v50  ;;  %v15086_v57 = vld [vmem:[#allocation43_spill] sm:$0xff]  ;;  %vm15090_vm10 = vmmov %vm15068_vm5 }
 0x206   : > { %v3834_v54 = vmul.u32 18, %v3833_v63  ;;  %v11451_v12 = vadd.s32 144, %v15084_v2  ;;  %v1807_v20 = vmax.f32 %v1789_v40, 0.0  ;;  %v1765_v3 = vadd.f32 %v10953_v41, %v1673_v7  ;;  %v4187_v63 = vld [vmem:[#allocation2 + $0x78] sm:$0xff]  ;;  %vm15091_vm0 = vmmov %vm15068_vm5  ;;  %v15092_v40 = vld [vmem:[#allocation145_spill] sm:$0xff] }
 0x207   : > { %v11455_v47 = vmul.u32.u64.low 3817748708, %v11428_v24  ;;  %v11456_v21 = vmul.u32.u64.high 3817748708, %v11428_v24, %v11455_v47  ;;  %v2608_v30 = vadd.f32 %v11015_v19, %v15085_v43  ;;  %v2606_v35 = vadd.f32 %v11017_v27, %v15086_v57  ;;  %v11464_v50 = vpop.permute.xlu1 %2569  ;;  %v4694_v9 = vld [vmem:[#allocation2 + $0x7a] sm:$0xff]  ;;  %7679 = vmatmul.mubr.msk.f32.gmra.mxu0 %vm15089_vm8, %v4187_v63  ;;  %v3061_v43 = vpop.permute.xlu0 %3060  ;;  %vm15098_vm2 = vmmov %vm15091_vm0 }
 0x208   : > { %v2185_v29 = vsel %vm11346_vm3, %v1806_v0, 0.0  ;;  %v15087_v53 = vld [vmem:[#allocation163_spill] sm:$0xff]  ;;  %v2186_v41 = vsel %vm11357_vm15, %v1807_v20, 0.0  ;;  %v7930_v19 = vld [vmem:[%s13980_s2] ss:$0 sm:$0xff]  ;;  %7712 = vmatmul.mubr.msk.f32.gmra.mxu1 %vm15090_vm10, %v4694_v9  ;;  %vm3993_vm3 = vcmp.ne.s32.totalorder %v11425_v22, 0  ;;  %4424 = vmatprep.mubr.f32.mxu0 %v14829_v28  ;;  %v11484_v55 = vsub.s32 %v11267_v61, %v3834_v54  ;;  %vm15099_vm6 = vmmov %vm15091_vm0 }
 0x209   : > { %v2986_v62 = vadd.f32 %v15087_v53, %v2697_v60  ;;  %2203 = vst.msk [vmem:[#allocation2 + $0x8b] sm:$0xff] %vm15088_vm11, %v2185_v29  ;;  %v1790_v51 = vadd.f32 %v7930_v19, %v1765_v3  ;;  %vm4011_vm7 = vcmp.lt.s32.totalorder %v11425_v22, 0  ;;  %4922 = vmatprep.mubr.f32.mxu1 %v14829_v28  ;;  %v11481_v27 = vadd.s32 18, %v11425_v22  ;;  %v15093_v0 = vld [vmem:[#allocation149_spill] sm:$0xff]  ;;  %v15094_v20 = vld [vmem:[#allocation118_spill] sm:$0xff]  ;;  %v15097_v29 = vld [vmem:[#allocation63_spill] sm:$0xff] }
 0x20a   : > { %2204 = vst.msk [vmem:[#allocation2 + $0x93] sm:$0xff] %vm15091_vm0, %v2186_v41  ;;  %v11487_v26 = vmul.u32.u64.low 3817748708, %v11451_v12  ;;  %v11488_v60 = vmul.u32.u64.high 3817748708, %v11451_v12, %v11487_v26  ;;  %v2699_v7 = vadd.f32 %v15092_v40, %v2607_v8  ;;  %vm3994_vm15 = vcmp.ne.s32.totalorder %v11448_v48, 0  ;;  %vm11501_vm9 = vmand %vm4011_vm7, %vm3993_vm3  ;;  %v15100_v41 = vld [vmem:[#allocation65_spill] sm:$0xff] }
 0x20b   : > { %v1808_v45 = vmax.f32 %v1790_v51, 0.0  ;;  %vm4012_vm5 = vcmp.lt.s32.totalorder %v11448_v48, 0  ;;  %v2700_v2 = vadd.f32 %v15093_v0, %v2608_v30  ;;  %v2698_v3 = vadd.f32 %v15094_v20, %v2606_v35  ;;  %v11495_v47 = vpop.permute.xlu1 %2573  ;;  %v4188_v61 = vld [vmem:[#allocation2 + $0x80] sm:$0xff]  ;;  %vm15101_vm14 = vmmov %vm15091_vm0  ;;  %v15107_v26 = vld [vmem:[#allocation17_spill] sm:$0xff] }
 0x20c   : > { %v4695_v54 = vld [vmem:[#allocation2 + $0x82] sm:$0xff]  ;;  %v11506_v57 = vadd.s32 18, %v11448_v48  ;;  %v3844_v30 = vshrl.u32 %v11435_v42, 4  ;;  %v2609_v35 = vadd.f32 %v11163_v33, %v15097_v29  ;;  %v3114_v9 = vadd.f32 %v3061_v43, %v2986_v62  ;;  %7680 = vmatmul.mubr.msk.f32.gmra.mxu0 %vm15098_vm2, %v4188_v61  ;;  %v15105_v62 = vld [vmem:[#allocation58_spill] sm:$0xff]  ;;  %v11549_v43 = vpop.permute.xlu0 %2567  ;;  %vm15113_vm10 = vmmov %vm15091_vm0 }
 0x20d   : > { %v2187_v63 = vsel %vm11414_vm4, %v1808_v45, 0.0  ;;  %7713 = vmatmul.mubr.msk.f32.gmra.mxu1 %vm15099_vm6, %v4695_v54  ;;  %v3855_v53 = vshrl.u32 %v11443_v18, 4  ;;  %v2610_v19 = vadd.f32 %v11165_v23, %v15100_v41  ;;  %4430 = vmatprep.mubr.f32.mxu0 %v14829_v28  ;;  %vm11525_vm4 = vmand %vm4012_vm5, %vm3994_vm15  ;;  %vm3995_vm13 = vcmp.ne.s32.totalorder %v11484_v55, 0  ;;  %v15110_v54 = vld [vmem:[#allocation172_spill] sm:$0xff] }
 0x20e   : > { %2205 = vst.msk [vmem:[#allocation2 + $0x9b] sm:$0xff] %vm15101_vm14, %v2187_v63  ;;  %4928 = vmatprep.mubr.f32.mxu1 %v14829_v28  ;;  %vm4013_vm11 = vcmp.lt.s32.totalorder %v11484_v55, 0  ;;  %v11532_v23 = vadd.s32 144, %v15104_v10  ;;  %v3206_v42 = vadd.f32 %v10974_v39, %v3114_v9  ;;  %v4065_v18 = vsel %vm11501_vm9, %v11481_v27, %v11425_v22  ;;  %v15111_v63 = vld [vmem:[#allocation10_spill] sm:$0xff]  ;;  %v15112_v9 = vld [vmem:[#allocation156_spill] sm:$0xff]  ;;  %vm15114_vm3 = vmmov %vm15091_vm0 }
 0x20f   : > { %v15106_v51 = vrot.slane %v15105_v62, 2  ;;  %v15108_v40 = vrot.slane %v15107_v26, 2  ;;  %vm15109_vm8 = vcmask 1045504   ;;  %v3866_v0 = vshrl.u32 %v11456_v21, 4  ;;  %v11547_v20 = vpop.permute.xlu1 %2577  ;;  %v15115_v10 = vld [vmem:[#allocation52_spill] sm:$0xff]  ;;  %vm11572_vm7 = vmand %vm4013_vm11, %vm3995_vm13 }
 0x210   : > { %v4189_v61 = vld [vmem:[#allocation2 + $0x88] sm:$0xff]  ;;  %v2987_v29 = vadd.f32 %v15110_v54, %v2698_v3  ;;  %v11553_v8 = vadd.f32 %v15111_v63, %v2699_v7  ;;  %v11556_v22 = vadd.s32 18, %v11484_v55  ;;  %v3845_v27 = vmul.u32 18, %v3844_v30  ;;  %vm15123_vm0 = vmmov %vm15109_vm8  ;;  %v3570_v46 = vpop.permute.xlu0 %3569 }
 0x211   : > { %v11544_v45 = vsel %vm15109_vm8, %v15108_v40, %v15106_v51  ;;  %v4696_v39 = vld [vmem:[#allocation2 + $0x8a] sm:$0xff]  ;;  %v2701_v41 = vadd.f32 %v15112_v9, %v2609_v35  ;;  %7681 = vmatmul.mubr.msk.f32.gmra.mxu0 %vm15113_vm10, %v4189_v61  ;;  %v11566_v3 = vadd.f32 %v15115_v10, %v2700_v2  ;;  %v3856_v30 = vmul.u32 18, %v3855_v53  ;;  %v15119_v40 = vld [vmem:[#allocation164_spill] sm:$0xff]  ;;  %vm15127_vm15 = vmmov %vm15123_vm0 }
 0x212   : > { %7714 = vmatmul.mubr.msk.f32.gmra.mxu1 %vm15114_vm3, %v4696_v39  ;;  %v15118_v35 = vld [vmem:[#allocation157_spill] sm:$0xff]  ;;  %4436 = vmatprep.mubr.f32.mxu0 %v14829_v28  ;;  %v3877_v51 = vshrl.u32 %v11488_v60, 4  ;;  %v11581_v2 = vmul.u32.u64.low 3817748708, %v11532_v23  ;;  %v11582_v26 = vmul.u32.u64.high 3817748708, %v11532_v23, %v11581_v2  ;;  %v3495_v61 = vadd.f32 %v15119_v40, %v3206_v42  ;;  %v15120_v39 = vld [vmem:[#allocation14_spill] sm:$0xff]  ;;  %vm15133_vm5 = vmmov %vm15123_vm0 }
 0x213   : > { %v2702_v62 = vadd.f32 %v15118_v35, %v2610_v19  ;;  %4934 = vmatprep.mubr.f32.mxu1 %v14829_v28  ;;  %v15121_v54 = vrot.slane %v15120_v39, 2  ;;  %v15122_v63 = vrot.slane %v15070_v11, 2  ;;  %v15124_v19 = vld [vmem:[#allocation50_spill] sm:$0xff]  ;;  %v3867_v60 = vmul.u32 18, %v3866_v0  ;;  %v3063_v42 = vpop.permute.xlu1 %3062  ;;  %vm15137_vm6 = vmmov %vm15098_vm2 }
 0x214   : > { %v15125_v9 = vrot.slane %v15124_v19, 2  ;;  %v2611_v2 = vadd.f32 %v11273_v25, %v15128_v49  ;;  %v4190_v40 = vld [vmem:[#allocation2 + $0x90] sm:$0x3]  ;;  %v4697_v21 = vld [vmem:[#allocation2 + $0x92] sm:$0xff]  ;;  %vm11620_vm9 = vcmp.lt.s32.totalorder %v4064_v38, 16  ;;  %v3623_v25 = vadd.f32 %v3570_v46, %v3495_v61  ;;  %v15142_v61 = vld [vmem:[#allocation141_spill] sm:$0xff] }
 0x215   : > { %v11590_v53 = vsel %vm15123_vm0, %v15122_v63, %v15121_v54  ;;  %v15126_v10 = vmov %v15121_v54  ;;  %v11606_v54 = vsub.s32 %v11393_v1, %v3845_v27  ;;  %v15129_v39 = vld [vmem:[#allocation62_spill] sm:$0xff]  ;;  %v3115_v11 = vadd.f32 %v3063_v42, %v2987_v29  ;;  %7682 = vmatmul.mubr.msk.f32.gmra.mxu0 %vm15098_vm2, %v4190_v40  ;;  %v15139_v46 = vld [vmem:[#allocation195_spill] sm:$0xff]  ;;  %v15140_v27 = vld [vmem:[#allocation125_spill] sm:$0xff] }
 0x216   : > { %v11597_v35 = vsel %vm15127_vm15, %v15126_v10, %v15125_v9  ;;  %v15130_v63 = vrot.slane %v15129_v39, 2  ;;  %v15131_v9 = vld [vmem:[#allocation16_spill] sm:$0xff]  ;;  %7715 = vmatmul.mubr.msk.f32.gmra.mxu1 %vm15137_vm6, %v4697_v21  ;;  %v11627_v1 = vsub.s32 %v11406_v16, %v3856_v30  ;;  %5348 = vmatprep.mubr.f32.mxu0 %v14829_v28  ;;  %v11637_v52 = vadd.f32 %v15138_v58, %v2701_v41  ;;  %v15143_v40 = vld [vmem:[#allocation139_spill] sm:$0xff]  ;;  %vm15148_vm11 = vmmov %vm15098_vm2 }
 0x217   : > { %v15132_v10 = vrot.slane %v15131_v9, 2  ;;  %4940 = vmatprep.mubr.f32.mxu1 %v14829_v28  ;;  %v11640_v38 = vadd.f32 %v15139_v46, %v2702_v62  ;;  %v3878_v29 = vmul.u32 18, %v3877_v51  ;;  %v11643_v21 = vadd.s32 144, %v15140_v27  ;;  %v15141_v16 = vld [vmem:[#allocation84_spill] sm:$0xff]  ;;  %v15144_v62 = vld [vmem:[#allocation158_spill] sm:$0xff]  ;;  %v11656_v51 = vpop.permute.xlu0 %2571  ;;  %vm15149_vm8 = vmmov %vm15098_vm2 }
 0x218   : > { %v2612_v30 = vadd.f32 %v11330_v32, %v15141_v16  ;;  %v3715_v42 = vadd.f32 %v15142_v61, %v3623_v25  ;;  %v3207_v39 = vadd.f32 %v15143_v40, %v3115_v11  ;;  %v11653_v41 = vsub.s32 %v11428_v24, %v3867_v60  ;;  %v3572_v32 = vpop.permute.xlu1 %3571  ;;  %v4698_v58 = vld [vmem:[#allocation2 + $0x9a] sm:$0xff]  ;;  %v5191_v25 = vld [vmem:[#allocation2 + $0x24] sm:$0xff] }
 0x219   : > { %v11613_v0 = vsel %vm15133_vm5, %v15132_v10, %v15130_v63  ;;  %v7787_v63 = vld [vmem:[%s13981_s3 + $0xf0] sm:$0xff]  ;;  %v2703_v9 = vadd.f32 %v15144_v62, %v2611_v2  ;;  %vm11658_vm12 = vcmp.lt.s32.totalorder %v4065_v18, 16  ;;  %v7786_v11 = vld [vmem:[%s13981_s3 + $0xe8] sm:$0xff]  ;;  %vm3996_vm14 = vcmp.ne.s32.totalorder %v11606_v54, 0  ;;  %7734 = vmatmul.mubr.msk.f32.vlgmr.msra.gmra.mxu0 %vm15149_vm8, %v5191_v25  ;;  %v7785_v46 = vld [vmem:[%s13981_s3 + $0xe0] sm:$0xff] }
 0x21a   : > { %15134 = vst [vmem:[#allocation120_spill] sm:$0xff] %v11613_v0  ;;  %vm4014_vm13 = vcmp.lt.s32.totalorder %v11606_v54, 0  ;;  %v11668_v24 = vadd.s32 18, %v11606_v54  ;;  %v3740_v60 = vadd.f32 %v11632_v14, %v3715_v42  ;;  %v15147_v18 = vld [vmem:[#allocation173_spill] sm:$0xff]  ;;  %7716 = vmatmul.mubr.msk.f32.gmra.mxu1 %vm15148_vm11, %v4698_v58  ;;  %vm3997_vm10 = vcmp.ne.s32.totalorder %v11627_v1, 0  ;;  %5354 = vmatprep.mubr.f32.mxu0 %v14829_v28  ;;  %v7784_v27 = vld [vmem:[%s13981_s3 + $0xd8] sm:$0xff] }
 0x21b   : > { %v3496_v2 = vadd.f32 %v15147_v18, %v3207_v39  ;;  %vm4015_vm3 = vcmp.lt.s32.totalorder %v11627_v1, 0  ;;  %6416 = vmatpush1.msra.mxu0 %v7787_v63  ;;  %v11684_v16 = vsub.s32 %v11451_v12, %v3878_v29  ;;  %v3888_v61 = vshrl.u32 %v11582_v26, 4  ;;  %4946 = vmatprep.mubr.f32.mxu1 %v14829_v28  ;;  %v7783_v12 = vld [vmem:[%s13981_s3 + $0xd0] sm:$0xff]  ;;  %v15150_v29 = vld [vmem:[#allocation168_spill] sm:$0xff]  ;;  %v11698_v26 = vpop.permute.xlu0 %2575  ;;  %vm11704_vm5 = vmand %vm4014_vm13, %vm3996_vm14 }
 0x21c   : > { %v11688_v42 = vmul.u32.u64.low 3817748708, %v11643_v21  ;;  %v11689_v40 = vmul.u32.u64.high 3817748708, %v11643_v21, %v11688_v42  ;;  %v3758_v39 = vmax.f32 %v3740_v60, 0.0  ;;  %6417 = vmatprep.subr.mxu0 %v7786_v11  ;;  %vm3998_vm0 = vcmp.ne.s32.totalorder %v11653_v41, 0  ;;  %15151 = vst [vmem:[#allocation34_spill] sm:$0xff] %v11698_v26  ;;  %v3065_v58 = vpop.permute.xlu1 %3064  ;;  %v5192_v25 = vld [vmem:[#allocation2 + $0x2c] sm:$0xff]  ;;  %vm15164_vm14 = vmmov %vm15149_vm8 }
 0x21d   : > { %v3624_v62 = vadd.f32 %v3572_v32, %v3496_v2  ;;  %vm4016_vm15 = vcmp.lt.s32.totalorder %v11653_v41, 0  ;;  %v2704_v63 = vadd.f32 %v15150_v29, %v2612_v30  ;;  %6418 = vmatpush1.msra.mxu0 %v7785_v46  ;;  %v11709_v11 = vadd.s32 18, %v11627_v1  ;;  %v15154_v60 = vld [vmem:[#allocation59_spill] sm:$0xff]  ;;  %v15159_v42 = vld [vmem:[#allocation202_spill] sm:$0xff]  ;;  %v7782_v46 = vld [vmem:[%s13981_s3 + $0xc8] sm:$0xff] }
 0x21e   : > { %v15155_v18 = vrot.slane %v15154_v60, 2  ;;  %v15156_v30 = vrot.slane %v15124_v19, 2  ;;  %vm15157_vm2 = vcmask 1045504   ;;  %v15160_v29 = vrot.slane %v15159_v42, 2  ;;  %7735 = vmatmul.mubr.msk.f32.gmra.mxu0 %vm15164_vm14, %v5192_v25  ;;  %vm11737_vm13 = vmand %vm4015_vm3, %vm3997_vm10  ;;  %6419 = vmatprep.subr.mxu0 %v7784_v27  ;;  %v15170_v27 = vld [vmem:[#allocation134_spill] sm:$0xff]  ;;  %v15171_v25 = vld [vmem:[#allocation55_spill] sm:$0xff] }
 0x21f   : > { %vm15162_vm6 = vmmov %vm15157_vm2  ;;  %v4136_v13 = vsel %vm11620_vm9, %v3758_v39, 0.0  ;;  %v3716_v5 = vadd.f32 %v11123_v59, %v3624_v62  ;;  %v3116_v19 = vadd.f32 %v3065_v58, %v11553_v8  ;;  %v11742_v60 = vadd.s32 18, %v11653_v41  ;;  %v7781_v59 = vld [vmem:[%s13981_s3 + $0xc0] sm:$0xff]  ;;  %5360 = vmatprep.mubr.f32.mxu0 %v14829_v28  ;;  %6420 = vmatpush1.msra.mxu0 %v7783_v12 }
 0x220   : > { %v11716_v2 = vsel %vm15157_vm2, %v15156_v30, %v15155_v18  ;;  %v15161_v17 = vmov %v15155_v18  ;;  %vm15167_vm9 = vmmov %vm15149_vm8  ;;  %vm3999_vm8 = vcmp.ne.s32.totalorder %v11684_v16, 0  ;;  %vm4017_vm10 = vcmp.lt.s32.totalorder %v11684_v16, 0  ;;  %6421 = vmatprep.subr.mxu0 %v7782_v46  ;;  %v15172_v30 = vld [vmem:[#allocation99_spill] sm:$0xff]  ;;  %v15175_v46 = vld [vmem:[#allocation200_spill] sm:$0xff] }
 0x221   : > { %15158 = vst [vmem:[#allocation148_spill] sm:$0xff] %v11716_v2  ;;  %v11723_v44 = vsel %vm15162_vm6, %v15161_v17, %v15160_v29  ;;  %4154 = vst.msk [vmem:[#allocation2 + $0xa3] sm:$0xff] %vm15167_vm9, %v4136_v13  ;;  %v3889_v49 = vmul.u32 18, %v3888_v61  ;;  %v11760_v39 = vadd.s32 144, %v15170_v27  ;;  %v7780_v13 = vld [vmem:[%s13981_s3 + $0xb8] sm:$0xff]  ;;  %v3741_v62 = vadd.f32 %v11632_v14, %v3716_v5  ;;  %v7779_v61 = vld [vmem:[%s13981_s3 + $0xb0] sm:$0xff]  ;;  %v3574_v27 = vpop.permute.xlu0 %3573  ;;  %v11779_v5 = vpop.permute.xlu1 %3575  ;;  %6422 = vmatpush1.msra.mxu0 %v7781_v59 }
 0x222   : > { %15163 = vst [vmem:[#allocation144_spill] sm:$0xff] %v11723_v44  ;;  %vm11753_vm11 = vmand %vm4016_vm15, %vm3998_vm0  ;;  %v3208_v58 = vadd.f32 %v11372_v6, %v3116_v19  ;;  %v11772_v18 = vadd.f32 %v15171_v25, %v2703_v9  ;;  %v2614_v29 = vadd.f32 %v11464_v50, %v15172_v30  ;;  %v5193_v6 = vld [vmem:[#allocation2 + $0x34] sm:$0xff]  ;;  %v11785_v12 = vadd.s32 18, %v11684_v16  ;;  %v7778_v50 = vld [vmem:[%s13981_s3 + $0xa8] sm:$0xff]  ;;  %6423 = vmatprep.subr.mxu0 %v7780_v13 }
 0x223   : > { %v15173_v19 = vld [vmem:[#allocation66_spill] sm:$0xff]  ;;  %v15174_v9 = vrot.slane %v14918_v15, 2  ;;  %v15176_v25 = vrot.slane %v15175_v46, 2  ;;  %vm15177_vm3 = vmmov %vm15157_vm2  ;;  %v3759_v30 = vmax.f32 %v3741_v62, 0.0  ;;  %v15179_v2 = vld [vmem:[#allocation13_spill] sm:$0xff]  ;;  %v11820_v62 = vsub.s32 %v11532_v23, %v3889_v49  ;;  %6424 = vmatpush1.msra.mxu0 %v7779_v61 }
 0x224   : > { %v11782_v26 = vadd.f32 %v15173_v19, %v2704_v63  ;;  %v3497_v0 = vadd.f32 %v15179_v2, %v3208_v58  ;;  %vm15180_vm0 = vmmov %vm15167_vm9  ;;  %v7777_v2 = vld [vmem:[%s13981_s3 + $0xa0] sm:$0xff]  ;;  %v3899_v58 = vshrl.u32 %v11689_v40, 4  ;;  %v7776_v13 = vld [vmem:[%s13981_s3 + $0x98] sm:$0xff]  ;;  %v15185_v23 = vrot.slane %v15159_v42, 2  ;;  %6425 = vmatprep.subr.mxu0 %v7778_v50 }
 0x225   : > { %v11792_v44 = vsel %vm15177_vm3, %v15176_v25, %v15174_v9  ;;  %7736 = vmatmul.mubr.msk.f32.gmra.mxu0 %vm15180_vm0, %v5193_v6  ;;  %vm11811_vm15 = vmand %vm4017_vm10, %vm3999_vm8  ;;  %v11824_v6 = vmul.u32.u64.low 3817748708, %v11760_v39  ;;  %v11825_v19 = vmul.u32.u64.high 3817748708, %v11760_v39, %v11824_v6  ;;  %v4137_v9 = vsel %vm11658_vm12, %v3759_v30, 0.0  ;;  %v15183_v25 = vld [vmem:[#allocation24_spill] sm:$0xff]  ;;  %v3069_v10 = vpop.permute.xlu1 %3068  ;;  %v5197_v17 = vld [vmem:[#allocation2 + $0x54] sm:$0xff] }
 0x226   : > { %15178 = vst [vmem:[#allocation132_spill] sm:$0xff] %v11792_v44  ;;  %5366 = vmatprep.mubr.f32.mxu0 %v14829_v28  ;;  %v3625_v46 = vadd.f32 %v3574_v27, %v3497_v0  ;;  %v15184_v63 = vrot.slane %v15183_v25, 2  ;;  %v15186_v40 = vrot.slane %v10484_v4, 2  ;;  %vm15188_vm6 = vmmov %vm15157_vm2  ;;  %v15189_v15 = vld [vmem:[#allocation180_spill] sm:$0xff]  ;;  %v3067_v0 = vpop.permute.xlu0 %3066  ;;  %v15191_v30 = vrot.slane %v14981_v34, 2  ;;  %6426 = vmatpush1.msra.mxu0 %v7777_v2  ;;  %v7774_v2 = vld [vmem:[%s13981_s3 + $0x88] sm:$0xff] }
 0x227   : > { %v2706_v44 = vadd.f32 %v15189_v15, %v2614_v29  ;;  %vm15190_vm14 = vmmov %vm15180_vm0  ;;  %v5194_v27 = vld [vmem:[#allocation2 + $0x3c] sm:$0xff]  ;;  %v7775_v29 = vld [vmem:[%s13981_s3 + $0x90] sm:$0xff]  ;;  %v3117_v42 = vadd.f32 %v3067_v0, %v11566_v3  ;;  %v3118_v34 = vadd.f32 %v3069_v10, %v11637_v52  ;;  %6427 = vmatprep.subr.mxu0 %v7776_v13  ;;  %vm4000_vm10 = vcmp.ne.s32.totalorder %v11820_v62, 0 }
 0x228   : > { %v11837_v49 = vsel %vm15157_vm2, %v15185_v23, %v15184_v63  ;;  %v15187_v6 = vmov %v15184_v63  ;;  %4155 = vst.msk [vmem:[#allocation2 + $0xab] sm:$0xff] %vm15190_vm14, %v4137_v9  ;;  %v15192_v63 = vld [vmem:[#allocation204_spill] sm:$0xff]  ;;  %vm15194_vm12 = vmmov %vm15157_vm2  ;;  %vm4018_vm3 = vcmp.lt.s32.totalorder %v11820_v62, 0  ;;  %v15200_v3 = vsel %vm11525_vm4, %v11506_v57, %v11448_v48  ;;  %6428 = vmatpush1.msra.mxu0 %v7775_v29  ;;  %v15227_v52 = vld [vmem:[#allocation133_spill] sm:$0xff] }
 0x229   : > { %v11844_v61 = vsel %vm15188_vm6, %v15187_v6, %v15186_v40  ;;  %v15193_v25 = vrot.slane %v15192_v63, 2  ;;  %v15195_v50 = vld [vmem:[#allocation140_spill] sm:$0xff]  ;;  %v3717_v6 = vadd.f32 %v11382_v56, %v3625_v46  ;;  %vm15197_vm9 = vmmov %vm15180_vm0  ;;  %v3900_v56 = vmul.u32 18, %v3899_v58  ;;  %v11901_v58 = vpop.permute.xlu1 %3579  ;;  %6429 = vmatprep.subr.mxu0 %v7774_v2 }
 0x22a   : > { %v11860_v40 = vadd.s32 144, %v15195_v50  ;;  %v15196_v15 = vld [vmem:[#allocation112_spill] sm:$0xff]  ;;  %7737 = vmatmul.mubr.msk.f32.gmra.mxu0 %vm15197_vm9, %v5194_v27  ;;  %vm15199_vm8 = vmmov %vm15180_vm0  ;;  %vm11884_vm0 = vcmp.lt.s32.totalorder %v15200_v3, 16  ;;  %v3209_v13 = vadd.f32 %v11390_v31, %v3117_v42  ;;  %v3210_v46 = vadd.f32 %v11403_v36, %v3118_v34  ;;  %v3578_v57 = vpop.permute.xlu0 %3577  ;;  %v7822_v31 = vld [vmem:[%s13981_s3 + $0x170] sm:$0xff] }
 0x22b   : > { %v11857_v23 = vsel %vm15194_vm12, %v15193_v25, %v15191_v30  ;;  %v3182_v9 = vrot.slane %v15196_v15, 2  ;;  %v4699_v63 = vld [vmem:[#allocation2 + $0xa2] sm:$0x3]  ;;  %v15198_v30 = vld [vmem:[#allocation111_spill] sm:$0xff]  ;;  %5372 = vmatprep.mubr.f32.mxu0 %v14829_v28  ;;  %v15203_v33 = vsel %vm11572_vm7, %v11556_v22, %v11484_v55  ;;  %v5195_v0 = vld [vmem:[#allocation2 + $0x44] sm:$0xff]  ;;  %v11910_v7 = vadd.s32 18, %v11820_v62 }
 0x22c   : > { %v2616_v25 = vadd.f32 %v11495_v47, %v15198_v30  ;;  %7717 = vmatmul.mubr.msk.f32.gmra.mxu1 %vm15199_vm8, %v4699_v63  ;;  %v3742_v47 = vadd.f32 %v11632_v14, %v3717_v6  ;;  %vm11897_vm2 = vcmp.lt.s32.totalorder %v15203_v33, 16  ;;  %v7821_v36 = vld [vmem:[%s13981_s3 + $0x168] sm:$0xff]  ;;  %v15206_v10 = vld [vmem:[#allocation40_spill] sm:$0xff]  ;;  %v15208_v42 = vrot.slane %v10484_v4, 2  ;;  %vm15209_vm4 = vmmov %vm15188_vm6 }
 0x22d   : > { %5954 = vmatprep.mubr.f32.mxu1 %v14829_v28  ;;  %v11913_v55 = vmul.u32.u64.low 3817748708, %v11860_v40  ;;  %v11914_v22 = vmul.u32.u64.high 3817748708, %v11860_v40, %v11913_v55  ;;  %v15207_v27 = vrot.slane %v15206_v10, 2  ;;  %v15210_v6 = vld [vmem:[#allocation53_spill] sm:$0xff]  ;;  %v15211_v63 = vld [vmem:[#allocation12_spill] sm:$0xff]  ;;  %vm15212_vm7 = vmmov %vm15199_vm8  ;;  %v15215_v4 = vrot.slane %v15011_v37, 2 }
 0x22e   : > { %v3760_v29 = vmax.f32 %v3742_v47, 0.0  ;;  %v3498_v34 = vadd.f32 %v15210_v6, %v3209_v13  ;;  %v3499_v30 = vadd.f32 %v15211_v63, %v3210_v46  ;;  %7738 = vmatmul.mubr.msk.f32.gmra.mxu0 %vm15212_vm7, %v5195_v0  ;;  %v5798_v3 = vld [vmem:[#allocation2 + $0x90] sm:$0xff]  ;;  %vm11930_vm6 = vmand %vm4018_vm3, %vm4000_vm10  ;;  %v7773_v13 = vld [vmem:[%s13981_s3 + $0x80] sm:$0xff]  ;;  %v3910_v10 = vshrl.u32 %v11825_v19, 4 }
 0x22f   : > { %v11921_v50 = vsel %vm15209_vm4, %v15208_v42, %v15207_v27  ;;  %v15216_v2 = vmov %v15207_v27  ;;  %vm15217_vm14 = vmmov %vm15209_vm4  ;;  %v15218_v46 = vld [vmem:[#allocation86_spill] sm:$0xff]  ;;  %5378 = vmatprep.mubr.f32.mxu0 %v14829_v28  ;;  %v11952_v42 = vsub.s32 %v11643_v21, %v3900_v56  ;;  %v15221_v6 = vld [vmem:[#allocation187_spill] sm:$0xff]  ;;  %v15224_v21 = vsel %vm11704_vm5, %v11668_v24, %v11606_v54  ;;  %6430 = vmatpush1.msra.mxu0 %v7773_v13 }
 0x230   : > { %v11939_v47 = vsel %vm15217_vm14, %v15216_v2, %v15215_v4  ;;  %v2613_v0 = vadd.f32 %v11549_v43, %v15218_v46  ;;  %vm15219_vm12 = vmmov %vm15212_vm7  ;;  %v15220_v55 = vld [vmem:[#allocation70_spill] sm:$0xff]  ;;  %v2708_v63 = vadd.f32 %v15221_v6, %v2616_v25  ;;  %v4138_v4 = vsel %vm11884_vm0, %v3760_v29, 0.0  ;;  %v3071_v25 = vpop.permute.xlu0 %3070  ;;  %v15232_v54 = vld [vmem:[#allocation92_spill] sm:$0xff] }
 0x231   : > { %7754 = vmatmul.mubr.msk.f32.vlgmr.msra.gmra.mxu1 %vm15219_vm12, %v5798_v3  ;;  %v11949_v27 = vadd.f32 %v15220_v55, %v2706_v44  ;;  %v3626_v2 = vadd.f32 %v11779_v5, %v3498_v34  ;;  %v3627_v43 = vadd.f32 %v3578_v57, %v3499_v30  ;;  %v15222_v3 = vld [vmem:[#allocation11_spill] sm:$0xff]  ;;  %vm15223_vm9 = vmmov %vm15212_vm7  ;;  %vm11968_vm8 = vcmp.lt.s32.totalorder %v15224_v21, 16  ;;  %v3073_v5 = vpop.permute.xlu1 %3072  ;;  %v5196_v56 = vld [vmem:[#allocation2 + $0x4c] sm:$0xff] }
 0x232   : > { %6925 = vmatpush1.msra.mxu1 %v7822_v31  ;;  %5960 = vmatprep.mubr.f32.mxu1 %v14829_v28  ;;  %v2618_v44 = vadd.f32 %v11547_v20, %v15222_v3  ;;  %4156 = vst.msk [vmem:[#allocation2 + $0xb3] sm:$0xff] %vm15223_vm9, %v4138_v4  ;;  %v4072_v20 = vsel %vm11930_vm6, %v11910_v7, %v11820_v62  ;;  %v15228_v57 = vrot.slane %v15227_v52, 2  ;;  %v15229_v31 = vld [vmem:[#allocation45_spill] sm:$0xff]  ;;  %vm15231_vm10 = vmmov %vm15209_vm4  ;;  %v5799_v46 = vld [vmem:[#allocation2 + $0x98] sm:$0xff]  ;;  %vm4001_vm0 = vcmp.ne.s32.totalorder %v11952_v42, 0 }
 0x233   : > { %6926 = vmatprep.subr.mxu1 %v7821_v36  ;;  %v15230_v32 = vrot.slane %v15229_v31, 2  ;;  %v3718_v24 = vadd.f32 %v15232_v54, %v3626_v2  ;;  %v3719_v34 = vadd.f32 %v11544_v45, %v3627_v43  ;;  %v3119_v30 = vadd.f32 %v3071_v25, %v11640_v38  ;;  %vm15233_vm5 = vmmov %vm15212_vm7  ;;  %v7820_v55 = vld [vmem:[%s13981_s3 + $0x160] sm:$0xff]  ;;  %v15234_v6 = vld [vmem:[#allocation186_spill] sm:$0xff] }
 0x234   : > { %v3120_v36 = vadd.f32 %v3073_v5, %v11772_v18  ;;  %7739 = vmatmul.mubr.msk.f32.gmra.mxu0 %vm15233_vm5, %v5196_v56  ;;  %v2705_v4 = vadd.f32 %v15234_v6, %v2613_v0  ;;  %vm15235_vm3 = vmmov %vm15233_vm5  ;;  %vm4019_vm4 = vcmp.lt.s32.totalorder %v11952_v42, 0  ;;  %v7819_v45 = vld [vmem:[%s13981_s3 + $0x158] sm:$0xff]  ;;  %v3911_v38 = vmul.u32 18, %v3910_v10  ;;  %6927 = vmatpush1.msra.mxu1 %v7820_v55  ;;  %v15244_v56 = vld [vmem:[#allocation176_spill] sm:$0xff] }
 0x235   : > { %v11981_v29 = vsel %vm15231_vm10, %v15230_v32, %v15228_v57  ;;  %7755 = vmatmul.mubr.msk.f32.gmra.mxu1 %vm15235_vm3, %v5799_v46  ;;  %5384 = vmatprep.mubr.f32.mxu0 %v14829_v28  ;;  %v3743_v18 = vadd.f32 %v11632_v14, %v3718_v24  ;;  %v3744_v13 = vadd.f32 %v11632_v14, %v3719_v34  ;;  %v15236_v43 = vld [vmem:[#allocation87_spill] sm:$0xff]  ;;  %v12025_v25 = vpop.permute.xlu1 %3583  ;;  %v3921_v8 = vshrl.u32 %v11914_v22, 4  ;;  %v15245_v31 = vld [vmem:[#allocation196_spill] sm:$0xff]  ;;  %v15246_v54 = vld [vmem:[#allocation198_spill] sm:$0xff] }
 0x236   : > { %v3211_v2 = vadd.f32 %v11590_v53, %v3119_v30  ;;  %v3212_v0 = vadd.f32 %v11597_v35, %v3120_v36  ;;  %5966 = vmatprep.mubr.f32.mxu1 %v14829_v28  ;;  %v12005_v3 = vadd.f32 %v15236_v43, %v2618_v44  ;;  %v15237_v21 = vsel %vm11737_vm13, %v11709_v11, %v11627_v1  ;;  %v3582_v44 = vpop.permute.xlu0 %3581  ;;  %v7818_v1 = vld [vmem:[%s13981_s3 + $0x150] sm:$0xff]  ;;  %v15243_v11 = vld [vmem:[#allocation83_spill] sm:$0xff]  ;;  %vm15247_vm13 = vmmov %vm15235_vm3 }
 0x237   : > { %vm12012_vm7 = vcmp.lt.s32.totalorder %v15237_v21, 16  ;;  %v15240_v53 = vsel %vm11753_vm11, %v11742_v60, %v11653_v41  ;;  %v12031_v5 = vadd.f32 %v15243_v11, %v2708_v63  ;;  %v12035_v41 = vadd.s32 144, %v15244_v56  ;;  %v5800_v34 = vld [vmem:[#allocation2 + $0xa0] sm:$0xff]  ;;  %6928 = vmatprep.subr.mxu1 %v7819_v45  ;;  %v7817_v63 = vld [vmem:[%s13981_s3 + $0x148] sm:$0xff]  ;;  %vm15249_vm11 = vmmov %vm15235_vm3 }
 0x238   : > { %vm12021_vm14 = vcmp.lt.s32.totalorder %v15240_v53, 16  ;;  %v3761_v60 = vmax.f32 %v3743_v18, 0.0  ;;  %v3762_v57 = vmax.f32 %v3744_v13, 0.0  ;;  %v3500_v32 = vadd.f32 %v15245_v31, %v3211_v2  ;;  %7740 = vmatmul.mubr.msk.f32.gmra.mxu0 %vm15247_vm13, %v5197_v17  ;;  %v15248_v30 = vld [vmem:[#allocation104_spill] sm:$0xff]  ;;  %v15250_v36 = vld [vmem:[#allocation138_spill] sm:$0xff]  ;;  %vm12064_vm12 = vmand %vm4019_vm4, %vm4001_vm0  ;;  %6929 = vmatpush1.msra.mxu1 %v7818_v1 }
 0x239   : > { %v3501_v24 = vadd.f32 %v15246_v54, %v3212_v0  ;;  %v2615_v22 = vadd.f32 %v11656_v51, %v15248_v30  ;;  %7756 = vmatmul.mubr.msk.f32.gmra.mxu1 %vm15249_vm11, %v5800_v34  ;;  %v2994_v46 = vadd.f32 %v15250_v36, %v2705_v4  ;;  %5390 = vmatprep.mubr.f32.mxu0 %v14829_v28  ;;  %v12049_v55 = vadd.s32 18, %v11952_v42  ;;  %vm15253_vm9 = vmmov %vm15235_vm3  ;;  %v3077_v48 = vpop.permute.xlu1 %3076  ;;  %v5198_v19 = vld [vmem:[#allocation2 + $0x5c] sm:$0xff]  ;;  %v5801_v56 = vld [vmem:[#allocation2 + $0xa8] sm:$0xff] }
 0x23a   : > { %v12052_v6 = vsub.s32 %v11760_v39, %v3911_v38  ;;  %v4139_v45 = vsel %vm11897_vm2, %v3761_v60, 0.0  ;;  %v4140_v18 = vsel %vm11968_vm8, %v3762_v57, 0.0  ;;  %v3628_v51 = vadd.f32 %v11901_v58, %v3500_v32  ;;  %5972 = vmatprep.mubr.f32.mxu1 %v14829_v28  ;;  %vm15254_vm2 = vmmov %vm15235_vm3  ;;  %v3075_v39 = vpop.permute.xlu0 %3074  ;;  %6930 = vmatprep.subr.mxu1 %v7817_v63  ;;  %v15255_v0 = vld [vmem:[#allocation183_spill] sm:$0xff]  ;;  %v15256_v21 = vld [vmem:[#allocation124_spill] sm:$0xff] }
 0x23b   : > { %v3629_v13 = vadd.f32 %v3582_v44, %v3501_v24  ;;  %4157 = vst.msk [vmem:[#allocation2 + $0xbb] sm:$0xff] %vm15253_vm9, %v4139_v45  ;;  %v3922_v58 = vmul.u32 18, %v3921_v8  ;;  %v12071_v38 = vmul.u32.u64.low 3817748708, %v12035_v41  ;;  %v12072_v2 = vmul.u32.u64.high 3817748708, %v12035_v41, %v12071_v38  ;;  %v15257_v44 = vld [vmem:[#allocation120_spill] sm:$0xff]  ;;  %vm15258_vm8 = vmmov %vm15254_vm2  ;;  %v15259_v60 = vld [vmem:[#allocation129_spill] sm:$0xff] }
 0x23c   : > { %4158 = vst.msk [vmem:[#allocation2 + $0xc3] sm:$0xff] %vm15254_vm2, %v4140_v18  ;;  %v12075_v43 = vadd.s32 144, %v15255_v0  ;;  %v3720_v53 = vadd.f32 %v15256_v21, %v3628_v51  ;;  %v3121_v1 = vadd.f32 %v3075_v39, %v11782_v26  ;;  %v3122_v11 = vadd.f32 %v3077_v48, %v2994_v46  ;;  %7741 = vmatmul.mubr.msk.f32.gmra.mxu0 %vm15258_vm8, %v5198_v19  ;;  %v7816_v8 = vld [vmem:[%s13981_s3 + $0x140] sm:$0xff]  ;;  %vm15260_vm10 = vmmov %vm15254_vm2  ;;  %v15261_v26 = vld [vmem:[#allocation142_spill] sm:$0xff] }
 0x23d   : > { %v3721_v17 = vadd.f32 %v15257_v44, %v3629_v13  ;;  %v2707_v57 = vadd.f32 %v15259_v60, %v2615_v22  ;;  %7757 = vmatmul.mubr.msk.f32.gmra.mxu1 %vm15260_vm10, %v5801_v56  ;;  %5396 = vmatprep.mubr.f32.mxu0 %v14829_v28  ;;  %v4073_v31 = vsel %vm12064_vm12, %v12049_v55, %v11952_v42  ;;  %vm4002_vm5 = vcmp.ne.s32.totalorder %v12052_v6, 0  ;;  %v7815_v34 = vld [vmem:[%s13981_s3 + $0x138] sm:$0xff]  ;;  %v15265_v22 = vld [vmem:[#allocation148_spill] sm:$0xff]  ;;  %v12125_v39 = vpop.permute.xlu1 %3587  ;;  %v5802_v21 = vld [vmem:[#allocation2 + $0xb0] sm:$0xff] }
 0x23e   : > { %v15262_v32 = vrot.slane %v15261_v26, 2  ;;  %v15263_v54 = vrot.slane %v15227_v52, 2  ;;  %vm15264_vm3 = vcmask 1045504   ;;  %v3745_v63 = vadd.f32 %v11632_v14, %v3720_v53  ;;  %v15266_v46 = vld [vmem:[#allocation144_spill] sm:$0xff]  ;;  %5978 = vmatprep.mubr.f32.mxu1 %v14829_v28  ;;  %v3586_v13 = vpop.permute.xlu0 %3585  ;;  %6931 = vmatpush1.msra.mxu1 %v7816_v8  ;;  %v15272_v48 = vld [vmem:[#allocation67_spill] sm:$0xff]  ;;  %v15276_v53 = vld [vmem:[#allocation34_spill] sm:$0xff] }
 0x23f   : > { %v3746_v30 = vadd.f32 %v11632_v14, %v3721_v17  ;;  %v3213_v36 = vadd.f32 %v15265_v22, %v3121_v1  ;;  %v3214_v45 = vadd.f32 %v15266_v46, %v3122_v11  ;;  %v15267_v52 = vsel %vm11811_vm15, %v11785_v12, %v11684_v16  ;;  %v5199_v59 = vld [vmem:[#allocation2 + $0x64] sm:$0xff]  ;;  %v7814_v12 = vld [vmem:[%s13981_s3 + $0x130] sm:$0xff]  ;;  %vm15274_vm15 = vmmov %vm15254_vm2  ;;  %6932 = vmatprep.subr.mxu1 %v7815_v34 }
 0x240   : > { %v12097_v24 = vsel %vm15264_vm3, %v15263_v54, %v15262_v32  ;;  %vm12112_vm0 = vcmp.lt.s32.totalorder %v15267_v52, 16  ;;  %vm12121_vm4 = vcmp.lt.s32.totalorder %v4072_v20, 16  ;;  %vm4020_vm13 = vcmp.lt.s32.totalorder %v12052_v6, 0  ;;  %v15273_v38 = vld [vmem:[#allocation20_spill] sm:$0xff]  ;;  %7742 = vmatmul.mubr.msk.f32.gmra.mxu0 %vm15274_vm15, %v5199_v59  ;;  %vm15277_vm6 = vmmov %vm15254_vm2  ;;  %v15279_v56 = vld [vmem:[#allocation25_spill] sm:$0xff]  ;;  %6933 = vmatpush1.msra.mxu1 %v7814_v12 }
 0x241   : > { %v12129_v16 = vsub.s32 %v11860_v40, %v3922_v58  ;;  %v12135_v62 = vmul.u32.u64.low 3817748708, %v12075_v43  ;;  %v12136_v7 = vmul.u32.u64.high 3817748708, %v12075_v43, %v12135_v62  ;;  %v3763_v33 = vmax.f32 %v3745_v63, 0.0  ;;  %v7813_v40 = vld [vmem:[%s13981_s3 + $0x128] sm:$0xff]  ;;  %v15275_v58 = vld [vmem:[#allocation8_spill] sm:$0xff]  ;;  %7758 = vmatmul.mubr.msk.f32.gmra.mxu1 %vm15277_vm6, %v5802_v21  ;;  %5402 = vmatprep.mubr.f32.mxu0 %v14829_v28  ;;  %vm15280_vm11 = vmmov %vm15254_vm2  ;;  %v3081_v63 = vpop.permute.xlu1 %3080 }
 0x242   : > { %v3764_v20 = vmax.f32 %v3746_v30, 0.0  ;;  %v3502_v19 = vadd.f32 %v15272_v48, %v3213_v36  ;;  %v3503_v0 = vadd.f32 %v15273_v38, %v3214_v45  ;;  %v2617_v44 = vadd.f32 %v15276_v53, %v15275_v58  ;;  %v15278_v17 = vld [vmem:[#allocation68_spill] sm:$0xff]  ;;  %5984 = vmatprep.mubr.f32.mxu1 %v14829_v28  ;;  %vm15281_vm9 = vmmov %vm15254_vm2  ;;  %v5200_v30 = vld [vmem:[#allocation2 + $0x6c] sm:$0xff]  ;;  %6934 = vmatprep.subr.mxu1 %v7813_v40 }
 0x243   : > { %v2996_v1 = vadd.f32 %v15278_v17, %v2707_v57  ;;  %v12150_v11 = vadd.s32 18, %v12052_v6  ;;  %v12153_v8 = vadd.s32 144, %v15279_v56  ;;  %v4141_v60 = vsel %vm12012_vm7, %v3763_v33, 0.0  ;;  %v3079_v57 = vpop.permute.xlu0 %3078  ;;  %v15282_v35 = vld [vmem:[#allocation21_spill] sm:$0xff]  ;;  %v15284_v46 = vld [vmem:[#allocation132_spill] sm:$0xff]  ;;  %v5803_v59 = vld [vmem:[#allocation2 + $0xb8] sm:$0xff] }
 0x244   : > { %v4142_v32 = vsel %vm12021_vm14, %v3764_v20, 0.0  ;;  %v3630_v54 = vadd.f32 %v12025_v25, %v3502_v19  ;;  %v3631_v34 = vadd.f32 %v3586_v13, %v3503_v0  ;;  %4159 = vst.msk [vmem:[#allocation2 + $0xcb] sm:$0xff] %vm15280_vm11, %v4141_v60  ;;  %vm4003_vm2 = vcmp.ne.s32.totalorder %v12129_v16, 0  ;;  %v15283_v25 = vld [vmem:[#allocation116_spill] sm:$0xff]  ;;  %vm15285_vm14 = vmmov %vm15277_vm6  ;;  %v15286_v62 = vld [vmem:[#allocation30_spill] sm:$0xff] }
 0x245   : > { %4160 = vst.msk [vmem:[#allocation2 + $0xd3] sm:$0xff] %vm15281_vm9, %v4142_v32  ;;  %vm4021_vm7 = vcmp.lt.s32.totalorder %v12129_v16, 0  ;;  %v3932_v10 = vshrl.u32 %v12072_v2, 4  ;;  %v12167_v22 = vadd.s32 144, %v15282_v35  ;;  %v3123_v52 = vadd.f32 %v3079_v57, %v11949_v27  ;;  %7743 = vmatmul.mubr.msk.f32.gmra.mxu0 %vm15285_vm14, %v5200_v30  ;;  %v7812_v12 = vld [vmem:[%s13981_s3 + $0x120] sm:$0xff]  ;;  %vm15287_vm8 = vmmov %vm15277_vm6  ;;  %v7811_v48 = vld [vmem:[%s13981_s3 + $0x118] sm:$0xff]  ;;  %v12202_v53 = vpop.permute.xlu1 %3591 }
 0x246   : > { %v3722_v36 = vadd.f32 %v15283_v25, %v3630_v54  ;;  %v3723_v45 = vadd.f32 %v15284_v46, %v3631_v34  ;;  %v3124_v13 = vadd.f32 %v3081_v63, %v2996_v1  ;;  %v2709_v2 = vadd.f32 %v15286_v62, %v2617_v44  ;;  %7759 = vmatmul.mubr.msk.f32.gmra.mxu1 %vm15287_vm8, %v5803_v59  ;;  %vm12197_vm10 = vmand %vm4020_vm13, %vm4002_vm5  ;;  %v5201_v44 = vld [vmem:[#allocation2 + $0x74] sm:$0xff]  ;;  %v15290_v54 = vld [vmem:[#allocation201_spill] sm:$0xff] }
 0x247   : > { %5408 = vmatprep.mubr.f32.mxu0 %v14829_v28  ;;  %v12180_v33 = vadd.s32 18, %v12129_v16  ;;  %v12183_v20 = vmul.u32.u64.low 3817748708, %v12153_v8  ;;  %v12184_v27 = vmul.u32.u64.high 3817748708, %v12153_v8, %v12183_v20  ;;  %v3215_v0 = vadd.f32 %v11837_v49, %v3123_v52  ;;  %5990 = vmatprep.mubr.f32.mxu1 %v14829_v28  ;;  %v3590_v58 = vpop.permute.xlu0 %3589  ;;  %v7810_v56 = vld [vmem:[%s13981_s3 + $0x110] sm:$0xff]  ;;  %v15291_v57 = vld [vmem:[#allocation64_spill] sm:$0xff]  ;;  %vm15292_vm5 = vmmov %vm15277_vm6 }
 0x248   : > { %v3747_v19 = vadd.f32 %v11632_v14, %v3722_v36  ;;  %v3748_v38 = vadd.f32 %v11632_v14, %v3723_v45  ;;  %v3216_v21 = vadd.f32 %v11844_v61, %v3124_v13  ;;  %v3933_v17 = vmul.u32 18, %v3932_v10  ;;  %6935 = vmatpush1.msra.mxu1 %v7812_v12  ;;  %v5804_v30 = vld [vmem:[#allocation2 + $0xc0] sm:$0xff]  ;;  %vm15295_vm13 = vmmov %vm15292_vm5  ;;  %v15298_v42 = vld [vmem:[#allocation106_spill] sm:$0xff] }
 0x249   : > { %v3943_v1 = vshrl.u32 %v12136_v7, 4  ;;  %v12206_v49 = vmul.u32.u64.low 3817748708, %v12167_v22  ;;  %v12207_v61 = vmul.u32.u64.high 3817748708, %v12167_v22, %v12206_v49  ;;  %v3504_v34 = vadd.f32 %v15290_v54, %v3215_v0  ;;  %7744 = vmatmul.mubr.msk.f32.gmra.mxu0 %vm15292_vm5, %v5201_v44  ;;  %6936 = vmatprep.subr.mxu1 %v7811_v48  ;;  %v7809_v7 = vld [vmem:[%s13981_s3 + $0x108] sm:$0xff]  ;;  %vm12236_vm15 = vmand %vm4021_vm7, %vm4003_vm2  ;;  %v3085_v59 = vpop.permute.xlu1 %3084  ;;  %v5202_v12 = vld [vmem:[#allocation2 + $0x7c] sm:$0xff] }
 0x24a   : > { %v3765_v60 = vmax.f32 %v3747_v19, 0.0  ;;  %v3766_v32 = vmax.f32 %v3748_v38, 0.0  ;;  %v3505_v63 = vadd.f32 %v15291_v57, %v3216_v21  ;;  %vm12223_vm3 = vcmp.lt.s32.totalorder %v4073_v31, 16  ;;  %7760 = vmatmul.mubr.msk.f32.gmra.mxu1 %vm15295_vm13, %v5804_v30  ;;  %5414 = vmatprep.mubr.f32.mxu0 %v14829_v28  ;;  %v15299_v31 = vld [vmem:[#allocation109_spill] sm:$0xff]  ;;  %vm15303_vm6 = vmmov %vm15292_vm5  ;;  %v15306_v18 = vld [vmem:[#allocation26_spill] sm:$0xff] }
 0x24b   : > { %v4074_v35 = vsel %vm12197_vm10, %v12150_v11, %v12052_v6  ;;  %v12243_v55 = vadd.f32 %v15298_v42, %v12005_v3  ;;  %v15300_v25 = vrot.slane %v15299_v31, 2  ;;  %v15301_v6 = vrot.slane %v15011_v37, 2  ;;  %5996 = vmatprep.mubr.f32.mxu1 %v14829_v28  ;;  %6937 = vmatpush1.msra.mxu1 %v7810_v56  ;;  %vm15304_vm11 = vmmov %vm15292_vm5  ;;  %v3083_v37 = vpop.permute.xlu0 %3082  ;;  %v15305_v3 = vld [vmem:[#allocation82_spill] sm:$0xff]  ;;  %v15310_v19 = vld [vmem:[#allocation88_spill] sm:$0xff] }
 0x24c   : > { %vm15302_vm12 = vcmask 1045504   ;;  %v4143_v36 = vsel %vm12112_vm0, %v3765_v60, 0.0  ;;  %v4144_v46 = vsel %vm12121_vm4, %v3766_v32, 0.0  ;;  %v3632_v45 = vadd.f32 %v12125_v39, %v3504_v34  ;;  %6938 = vmatprep.subr.mxu1 %v7809_v7  ;;  %vm15311_vm4 = vmmov %vm15292_vm5  ;;  %v5805_v40 = vld [vmem:[#allocation2 + $0xc8] sm:$0xff]  ;;  %v15325_v31 = vld [vmem:[#allocation126_spill] sm:$0xff] }
 0x24d   : > { %v12250_v11 = vsel %vm15302_vm12, %v15301_v6, %v15300_v25  ;;  %v3633_v52 = vadd.f32 %v3590_v58, %v3505_v63  ;;  %4161 = vst.msk [vmem:[#allocation2 + $0xdb] sm:$0xff] %vm15303_vm6, %v4143_v36  ;;  %v2998_v13 = vadd.f32 %v15305_v3, %v2709_v2  ;;  %v15307_v62 = vrot.slane %v15306_v18, 2  ;;  %vm15309_vm0 = vmmov %vm15302_vm12  ;;  %7745 = vmatmul.mubr.msk.f32.gmra.mxu0 %vm15311_vm4, %v5202_v12  ;;  %v2582_v57 = vpop.permute.xlu1 %2581  ;;  %v5203_v63 = vld [vmem:[#allocation2 + $0x84] sm:$0xff]  ;;  %v5806_v6 = vld [vmem:[#allocation2 + $0xd0] sm:$0xff] }
 0x24e   : > { %4162 = vst.msk [vmem:[#allocation2 + $0xe3] sm:$0xff] %vm15304_vm11, %v4144_v46  ;;  %v15308_v51 = vmov %v15300_v25  ;;  %v12269_v39 = vsub.s32 %v12035_v41, %v3933_v17  ;;  %v3944_v48 = vmul.u32 18, %v3943_v1  ;;  %v3724_v38 = vadd.f32 %v15310_v19, %v3632_v45  ;;  %v7808_v41 = vld [vmem:[%s13981_s3 + $0x100] sm:$0xff]  ;;  %vm15314_vm2 = vmmov %vm15311_vm4  ;;  %5420 = vmatprep.mubr.f32.mxu0 %v14829_v28  ;;  %v15324_v4 = vld [vmem:[#allocation29_spill] sm:$0xff] }
 0x24f   : > { %v12266_v20 = vsel %vm15309_vm0, %v15308_v51, %v15307_v62  ;;  %v3725_v0 = vadd.f32 %v11857_v23, %v3633_v52  ;;  %v4075_v2 = vsel %vm12236_vm15, %v12180_v33, %v12129_v16  ;;  %v3125_v21 = vadd.f32 %v3083_v37, %v12031_v5  ;;  %7761 = vmatmul.mubr.msk.f32.gmra.mxu1 %vm15314_vm2, %v5805_v40  ;;  %v15315_v23 = vld [vmem:[#allocation69_spill] sm:$0xff]  ;;  %vm15319_vm7 = vmmov %vm15309_vm0  ;;  %v15327_v46 = vld [vmem:[#allocation131_spill] sm:$0xff] }
 0x250   : > { %vm12282_vm9 = vcmp.lt.s32.totalorder %v4074_v35, 16  ;;  %v3126_v44 = vadd.f32 %v3085_v59, %v2998_v13  ;;  %v15316_v16 = vrot.slane %v15315_v23, 2  ;;  %v15317_v33 = vld [vmem:[#allocation77_spill] sm:$0xff]  ;;  %v3965_v1 = vshrl.u32 %v12184_v27, 4  ;;  %6002 = vmatprep.mubr.f32.mxu1 %v14829_v28  ;;  %vm15321_vm14 = vmmov %vm15309_vm0  ;;  %v2580_v27 = vpop.permute.xlu0 %2579  ;;  %6939 = vmatpush1.msra.mxu1 %v7808_v41  ;;  %v15348_v34 = vld [vmem:[#allocation107_spill] sm:$0xff] }
 0x251   : > { %v15318_v5 = vrot.slane %v15317_v33, 2  ;;  %v3749_v49 = vadd.f32 %v11632_v14, %v3724_v38  ;;  %v3750_v56 = vadd.f32 %v11632_v14, %v3725_v0  ;;  %v3217_v60 = vadd.f32 %v11921_v50, %v3125_v21  ;;  %vm15326_vm13 = vmmov %vm15314_vm2  ;;  %v3089_v18 = vpop.permute.xlu1 %3088  ;;  %v15334_v0 = vld [vmem:[#allocation42_spill] sm:$0xff] }
 0x252   : > { %v15320_v32 = vmov %v15307_v62  ;;  %vm12307_vm8 = vcmp.lt.s32.totalorder %v4075_v2, 16  ;;  %vm4004_vm10 = vcmp.ne.s32.totalorder %v12269_v39, 0  ;;  %vm4022_vm5 = vcmp.lt.s32.totalorder %v12269_v39, 0  ;;  %7746 = vmatmul.mubr.msk.f32.gmra.mxu0 %vm15326_vm13, %v5203_v63  ;;  %vm15328_vm15 = vmmov %vm15314_vm2  ;;  %v5204_v62 = vld [vmem:[#allocation2 + $0x8c] sm:$0xff] }
 0x253   : > { %v12293_v17 = vsel %vm15319_vm7, %v15318_v5, %v15316_v16  ;;  %v12305_v54 = vsel %vm15321_vm14, %v15320_v32, %v3182_v9  ;;  %v12314_v50 = vsub.s32 %v12075_v43, %v3944_v48  ;;  %v3954_v30 = vshrl.u32 %v12207_v61, 4  ;;  %7762 = vmatmul.mubr.msk.f32.gmra.mxu1 %vm15328_vm15, %v5806_v6  ;;  %5426 = vmatprep.mubr.f32.mxu0 %v14829_v28  ;;  %v15329_v61 = vld [vmem:[#allocation46_spill] sm:$0xff]  ;;  %vm15330_vm12 = vmmov %vm15314_vm2  ;;  %v15332_v48 = vld [vmem:[#allocation27_spill] sm:$0xff] }
 0x254   : > { %v3767_v7 = vmax.f32 %v3749_v49, 0.0  ;;  %v3768_v35 = vmax.f32 %v3750_v56, 0.0  ;;  %v3506_v42 = vadd.f32 %v15324_v4, %v3217_v60  ;;  %v2619_v25 = vadd.f32 %v2580_v27, %v15325_v31  ;;  %6008 = vmatprep.mubr.f32.mxu1 %v14829_v28  ;;  %vm15331_vm6 = vmmov %vm15314_vm2  ;;  %v3087_v12 = vpop.permute.xlu0 %3086  ;;  %v5807_v21 = vld [vmem:[#allocation2 + $0xd8] sm:$0xff] }
 0x255   : > { %v3218_v36 = vadd.f32 %v11939_v47, %v3126_v44  ;;  %v2620_v45 = vadd.f32 %v2582_v57, %v15327_v46  ;;  %v3966_v43 = vmul.u32 18, %v3965_v1  ;;  %v12325_v52 = vadd.s32 144, %v15329_v61  ;;  %vm15336_vm0 = vmmov %vm15314_vm2  ;;  %v15340_v1 = vld [vmem:[#allocation96_spill] sm:$0xff]  ;;  %v3091_v60 = vpop.permute.xlu1 %3090  ;;  %v5205_v32 = vld [vmem:[#allocation2 + $0x94] sm:$0xff] }
 0x256   : > { %v4145_v37 = vsel %vm12223_vm3, %v3767_v7, 0.0  ;;  %v4146_v3 = vsel %vm12282_vm9, %v3768_v35, 0.0  ;;  %v3634_v13 = vadd.f32 %v12202_v53, %v3506_v42  ;;  %v2711_v47 = vadd.f32 %v11981_v29, %v2619_v25  ;;  %v15333_v53 = vld [vmem:[#allocation110_spill] sm:$0xff]  ;;  %vm15335_vm3 = vmmov %vm15314_vm2  ;;  %v5808_v35 = vld [vmem:[#allocation2 + $0xe0] sm:$0xff] }
 0x257   : > { %4163 = vst.msk [vmem:[#allocation2 + $0xeb] sm:$0xff] %vm15330_vm12, %v4145_v37  ;;  %v2712_v59 = vadd.f32 %v12097_v24, %v2620_v45  ;;  %v4058_v10 = vadd.s32 18, %v12269_v39  ;;  %v3955_v51 = vmul.u32 18, %v3954_v30  ;;  %v12339_v19 = vadd.s32 144, %v15332_v48  ;;  %7747 = vmatmul.mubr.msk.f32.gmra.mxu0 %vm15335_vm3, %v5204_v62  ;;  %7763 = vmatmul.mubr.msk.f32.gmra.mxu1 %vm15336_vm0, %v5807_v21  ;;  %v15337_v24 = vld [vmem:[#allocation85_spill] sm:$0xff]  ;;  %vm12352_vm4 = vmand %vm4022_vm5, %vm4004_vm10  ;;  %v15345_v25 = vld [vmem:[#allocation102_spill] sm:$0xff] }
 0x258   : > { %4164 = vst.msk [vmem:[#allocation2 + $0xf3] sm:$0xff] %vm15331_vm6, %v4146_v3  ;;  %v3726_v38 = vadd.f32 %v15333_v53, %v3634_v13  ;;  %v3127_v29 = vadd.f32 %v3087_v12, %v12243_v55  ;;  %v3000_v2 = vadd.f32 %v15334_v0, %v2711_v47  ;;  %vm4005_vm11 = vcmp.ne.s32.totalorder %v12314_v50, 0  ;;  %5432 = vmatprep.mubr.f32.mxu0 %v14829_v28  ;;  %v3594_v56 = vpop.permute.xlu0 %3593  ;;  %vm15341_vm2 = vmmov %vm15336_vm0  ;;  %v5206_v3 = vld [vmem:[#allocation2 + $0x9c] sm:$0xff]  ;;  %v15359_v21 = vld [vmem:[#allocation122_spill] sm:$0xff] }
 0x259   : > { %v3507_v40 = vadd.f32 %v15337_v24, %v3218_v36  ;;  %v12358_v55 = vsub.s32 %v12153_v8, %v3966_v43  ;;  %v12361_v58 = vmul.u32.u64.low 3817748708, %v12325_v52  ;;  %v12362_v44 = vmul.u32.u64.high 3817748708, %v12325_v52, %v12361_v58  ;;  %6014 = vmatprep.mubr.f32.mxu1 %v14829_v28  ;;  %vm15342_vm7 = vmmov %vm15336_vm0  ;;  %v15346_v36 = vld [vmem:[#allocation79_spill] sm:$0xff]  ;;  %v3600_v37 = vpop.permute.xlu1 %3599  ;;  %v15358_v0 = vld [vmem:[#allocation28_spill] sm:$0xff] }
 0x25a   : > { %v3751_v16 = vadd.f32 %v11632_v14, %v3726_v38  ;;  %v3219_v33 = vadd.f32 %v12250_v11, %v3127_v29  ;;  %v3128_v5 = vadd.f32 %v3089_v18, %v3000_v2  ;;  %v3001_v49 = vadd.f32 %v15340_v1, %v2712_v59  ;;  %vm15347_vm13 = vmmov %vm15336_vm0  ;;  %v5207_v1 = vld [vmem:[#allocation2 + $0xa4] sm:$0xff] }
 0x25b   : > { %vm4023_vm9 = vcmp.lt.s32.totalorder %v12314_v50, 0  ;;  %v12370_v8 = vsub.s32 %v12167_v22, %v3955_v51  ;;  %v12373_v27 = vmul.u32.u64.low 3817748708, %v12339_v19  ;;  %v12374_v57 = vmul.u32.u64.high 3817748708, %v12339_v19, %v12373_v27  ;;  %7748 = vmatmul.mubr.msk.f32.gmra.mxu0 %vm15341_vm2, %v5205_v32  ;;  %7764 = vmatmul.mubr.msk.f32.gmra.mxu1 %vm15342_vm7, %v5808_v35  ;;  %vm15355_vm6 = vmmov %vm15336_vm0 }
 0x25c   : > { %v3769_v63 = vmax.f32 %v3751_v16, 0.0  ;;  %v4076_v11 = vsel %vm12352_vm4, %v4058_v10, %v12269_v39  ;;  %v3635_v30 = vadd.f32 %v3594_v56, %v3507_v40  ;;  %v3129_v7 = vadd.f32 %v3091_v60, %v3001_v49  ;;  %5438 = vmatprep.mubr.f32.mxu0 %v14829_v28  ;;  %vm12394_vm5 = vmand %vm4023_vm9, %vm4005_vm11  ;;  %6020 = vmatprep.mubr.f32.mxu1 %v14829_v28  ;;  %v3596_v43 = vpop.permute.xlu0 %3595 }
 0x25d   : > { %v3220_v4 = vadd.f32 %v12266_v20, %v3128_v5  ;;  %v4059_v22 = vadd.s32 18, %v12314_v50  ;;  %vm4007_vm14 = vcmp.ne.s32.totalorder %v12358_v55, 0  ;;  %vm4025_vm10 = vcmp.lt.s32.totalorder %v12358_v55, 0  ;;  %v2586_v5 = vpop.permute.xlu1 %2585  ;;  %vm15367_vm7 = vmmov %vm15336_vm0 }
 0x25e   : > { %v4147_v39 = vsel %vm12307_vm8, %v3769_v63, 0.0  ;;  %v3727_v42 = vadd.f32 %v12293_v17, %v3635_v30  ;;  %v3221_v31 = vadd.f32 %v12305_v54, %v3129_v7  ;;  %v3508_v6 = vadd.f32 %v15345_v25, %v3219_v33  ;;  %vm12414_vm12 = vmand %vm4025_vm10, %vm4007_vm14  ;;  %v5809_v18 = vld [vmem:[#allocation2 + $0xe8] sm:$0xff]  ;;  %v15373_v7 = vld [vmem:[#allocation152_spill] sm:$0xff] }
 0x25f   : > { %v3691_v46 = vrot.slane %v15346_v36, 2  ;;  %4165 = vst.msk [vmem:[#allocation2 + $0xfb] sm:$0xff] %vm15347_vm13, %v4147_v39  ;;  %v15349_v17 = vrot.slane %v15348_v34, 2  ;;  %v15350_v54 = vrot.slane %v15315_v23, 2  ;;  %vm15351_vm8 = vcmask 1045504   ;;  %v15354_v23 = vld [vmem:[#allocation115_spill] sm:$0xff]  ;;  %7749 = vmatmul.mubr.msk.f32.gmra.mxu0 %vm15355_vm6, %v5206_v3  ;;  %7765 = vmatmul.mubr.msk.f32.gmra.mxu1 %vm15336_vm0, %v5809_v18  ;;  %vm15368_vm14 = vmmov %vm15336_vm0 }
 0x260   : > { %v4061_v61 = vadd.s32 18, %v12358_v55  ;;  %vm4006_vm15 = vcmp.ne.s32.totalorder %v12370_v8, 0  ;;  %v3752_v13 = vadd.f32 %v11632_v14, %v3727_v42  ;;  %v3636_v47 = vadd.f32 %v3596_v43, %v3508_v6  ;;  %5444 = vmatprep.mubr.f32.mxu0 %v14829_v28  ;;  %6026 = vmatprep.mubr.f32.mxu1 %v14829_v28  ;;  %vm15361_vm4 = vmmov %vm15351_vm8  ;;  %v3598_v33 = vpop.permute.xlu0 %3597  ;;  %v5810_v27 = vld [vmem:[#allocation2 + $0xf0] sm:$0xff]  ;;  %v15378_v6 = vld [vmem:[#allocation7_spill] sm:$0xff] }
 0x261   : > { %v3688_v45 = vsel %vm15351_vm8, %v15350_v54, %v15349_v17  ;;  %v3510_v12 = vadd.f32 %v15354_v23, %v3221_v31  ;;  %vm4024_vm3 = vcmp.lt.s32.totalorder %v12370_v8, 0  ;;  %vm12421_vm11 = vcmp.lt.s32.totalorder %v4076_v11, 16  ;;  %vm15364_vm9 = vmmov %vm15361_vm4  ;;  %v15371_v11 = vld [vmem:[#allocation160_spill] sm:$0xff]  ;;  %v5208_v43 = vld [vmem:[#allocation2 + $0xac] sm:$0xff]  ;;  %v3095_v59 = vpop.permute.xlu1 %3094 }
 0x262   : > { %v4077_v10 = vsel %vm12394_vm5, %v4059_v22, %v12314_v50  ;;  %v4060_v51 = vadd.s32 18, %v12370_v8  ;;  %v3987_v48 = vshrl.u32 %v12362_v44, 4  ;;  %v3770_v53 = vmax.f32 %v3752_v13, 0.0  ;;  %vm12451_vm2 = vmand %vm4024_vm3, %vm4006_vm15  ;;  %v15381_v13 = vld [vmem:[#allocation137_spill] sm:$0xff] }
 0x263   : > { %v3728_v38 = vadd.f32 %v3688_v45, %v3636_v47  ;;  %v3638_v29 = vadd.f32 %v3600_v37, %v3510_v12  ;;  %v3509_v2 = vadd.f32 %v15358_v0, %v3220_v4  ;;  %v15360_v24 = vrot.slane %v15359_v21, 2  ;;  %7750 = vmatmul.mubr.msk.f32.gmra.mxu0 %vm15367_vm7, %v5207_v1  ;;  %vm15375_vm5 = vmmov %vm15361_vm4  ;;  %v15376_v4 = vld [vmem:[#allocation147_spill] sm:$0xff] }
 0x264   : > { %v4079_v40 = vsel %vm12414_vm12, %v4061_v61, %v12358_v55  ;;  %v15363_v58 = vmov %v15349_v17  ;;  %v3976_v49 = vshrl.u32 %v12374_v57, 4  ;;  %v4148_v55 = vsel %vm12421_vm11, %v3770_v53, 0.0  ;;  %vm15377_vm13 = vmmov %vm15336_vm0  ;;  %5450 = vmatprep.mubr.f32.mxu0 %v14829_v28  ;;  %v2584_v45 = vpop.permute.xlu0 %2583  ;;  %v15389_v53 = vld [vmem:[#allocation33_spill] sm:$0xff] }
 0x265   : > { %v3692_v50 = vsel %vm15361_vm4, %v15360_v24, %v3691_v46  ;;  %v15362_v41 = vmov %v15360_v24  ;;  %v3753_v56 = vadd.f32 %v11632_v14, %v3728_v38  ;;  %v3637_v32 = vadd.f32 %v3598_v33, %v3509_v2  ;;  %4166 = vst.msk [vmem:[#allocation2 + $0x103] sm:$0xff] %vm15368_vm14, %v4148_v55  ;;  %7766 = vmatmul.mubr.msk.f32.gmra.mxu1 %vm15377_vm13, %v5810_v27  ;;  %vm15382_vm15 = vmmov %vm15336_vm0  ;;  %v5209_v24 = vld [vmem:[#allocation2 + $0xb4] sm:$0x3] }
 0x266   : > { %v3690_v44 = vsel %vm15364_vm9, %v15363_v58, %v15362_v41  ;;  %v3730_v60 = vadd.f32 %v3692_v50, %v3638_v29  ;;  %vm12461_vm10 = vcmp.lt.s32.totalorder %v4077_v10, 16  ;;  %v15372_v30 = vrot.slane %v15371_v11, 2  ;;  %6032 = vmatprep.mubr.f32.mxu1 %v14829_v28  ;;  %v5811_v23 = vld [vmem:[#allocation2 + $0xf8] sm:$0xff]  ;;  %vm15383_vm12 = vmmov %vm15336_vm0  ;;  %v15397_v27 = vld [vmem:[#allocation6_spill] sm:$0xff] }
 0x267   : > { %v15374_v57 = vrot.slane %v15373_v7, 2  ;;  %v2622_v22 = vadd.f32 %v2586_v5, %v15376_v4  ;;  %v3988_v39 = vmul.u32 18, %v3987_v48  ;;  %v3771_v42 = vmax.f32 %v3753_v56, 0.0  ;;  %7751 = vmatmul.mubr.msk.f32.gmra.mxu0 %vm15382_vm15, %v5208_v43  ;;  %vm15386_vm3 = vmmov %vm15361_vm4  ;;  %v15387_v10 = vld [vmem:[#allocation31_spill] sm:$0xff]  ;;  %v15396_v56 = vld [vmem:[#allocation128_spill] sm:$0xff] }
 0x268   : > { %v3755_v31 = vadd.f32 %v11632_v14, %v3730_v60  ;;  %v4078_v20 = vsel %vm12451_vm2, %v4060_v51, %v12370_v8  ;;  %v3729_v25 = vadd.f32 %v3690_v44, %v3637_v32  ;;  %v3186_v34 = vrot.slane %v15378_v6, 2  ;;  %v12488_v8 = vld [vmem:[%s13980_s2] ss:$0 sm:$0xff]  ;;  %vm15388_vm11 = vmmov %vm15336_vm0  ;;  %5456 = vmatprep.mubr.f32.mxu0 %v14829_v28  ;;  %v15391_v41 = vld [vmem:[#allocation103_spill] sm:$0xff]  ;;  %v3093_v33 = vpop.permute.xlu0 %3092 }
 0x269   : > { %v2678_v35 = vsel %vm15375_vm5, %v15374_v57, %v15372_v30  ;;  %vm12479_vm8 = vcmp.lt.s32.totalorder %v4079_v40, 16  ;;  %v3977_v61 = vmul.u32 18, %v3976_v49  ;;  %v4149_v14 = vsel %vm12461_vm10, %v3771_v42, 0.0  ;;  %7767 = vmatmul.mubr.msk.f32.gmra.mxu1 %vm15388_vm11, %v5811_v23  ;;  %vm15390_vm4 = vmmov %vm15386_vm3  ;;  %v3604_v49 = vpop.permute.xlu1 %3603  ;;  %v6307_v32 = vld [vmem:[#allocation2 + $0xa2] sm:$0xff]  ;;  %v6312_v23 = vld [vmem:[#allocation2 + $0xca] sm:$0xff] }
 0x26a   : > { %v2714_v54 = vadd.f32 %v2678_v35, %v2622_v22  ;;  %v3773_v37 = vmax.f32 %v3755_v31, 0.0  ;;  %v3754_v3 = vadd.f32 %v12488_v8, %v3729_v25  ;;  %v2621_v47 = vadd.f32 %v2584_v45, %v15381_v13  ;;  %4167 = vst.msk [vmem:[#allocation2 + $0x10b] sm:$0xff] %vm15383_vm12, %v4149_v14  ;;  %6038 = vmatprep.mubr.f32.mxu1 %v14829_v28  ;;  %vm15392_vm9 = vmmov %vm15336_vm0 }
 0x26b   : > { %vm4096_vm6 = vcmp.lt.s32.totalorder %v4078_v20, 16  ;;  %v15384_v12 = vmov %v15374_v57  ;;  %v15385_v18 = vrot.slane %v15261_v26, 2  ;;  %v3989_v48 = vsub.s32 %v12325_v52, %v3988_v39  ;;  %v3492_v26 = vpop.f32.mrf.mxu1  ;;  %7752 = vmatmul.mubr.msk.f32.gmra.mxu0 %vm15392_vm9, %v5209_v24  ;;  %vm15393_vm2 = vmmov %vm15336_vm0  ;;  %v15402_v57 = vld [vmem:[#allocation5_spill] sm:$0xff] }
 0x26c   : > { %v3003_v51 = vadd.f32 %v15387_v10, %v2714_v54  ;;  %v3184_v38 = vrot.slane %v15389_v53, 2  ;;  %v4151_v29 = vsel %vm12479_vm8, %v3773_v37, 0.0  ;;  %v3772_v0 = vmax.f32 %v3754_v3, 0.0  ;;  %v5812_v52 = vld [vmem:[#allocation2 + $0x100] sm:$0xff]  ;;  %vm15394_vm7 = vmmov %vm15336_vm0  ;;  %6463 = vmatprep.mubr.f32.mxu0 %v14829_v28  ;;  %v3602_v39 = vpop.permute.xlu0 %3601  ;;  %v6308_v20 = vld [vmem:[#allocation2 + $0xaa] sm:$0xff] }
 0x26d   : > { %v2676_v62 = vsel %vm15386_vm3, %v15385_v18, %v15384_v12  ;;  %4169 = vst.msk [vmem:[#allocation2 + $0x11b] sm:$0xff] %vm15336_vm0, %v4151_v29  ;;  %v3978_v44 = vsub.s32 %v12339_v19, %v3977_v61  ;;  %7768 = vmatmul.mubr.msk.f32.gmra.mxu1 %vm15394_vm7, %v5812_v52  ;;  %vm4009_vm14 = vcmp.ne.s32.totalorder %v3989_v48, 0  ;;  %vm4027_vm10 = vcmp.lt.s32.totalorder %v3989_v48, 0  ;;  %vm15395_vm5 = vmmov %vm15386_vm3  ;;  %v6309_v61 = vld [vmem:[#allocation2 + $0xb2] sm:$0xff]  ;;  %v6310_v3 = vld [vmem:[#allocation2 + $0xba] sm:$0xff] }
 0x26e   : > { %v2713_v2 = vadd.f32 %v2676_v62, %v2621_v47  ;;  %v3131_v21 = vadd.f32 %v3095_v59, %v3003_v51  ;;  %v4150_v50 = vsel %vm4096_vm6, %v3772_v0, 0.0  ;;  %v3187_v40 = vsel %vm15390_vm4, %v3184_v38, %v3186_v34  ;;  %6044 = vmatprep.mubr.f32.mxu1 %v14829_v28  ;;  %vm12522_vm15 = vmand %vm4027_vm10, %vm4009_vm14  ;;  %v6816_v59 = vld [vmem:[#allocation2 + $0xb4] sm:$0xff]  ;;  %v6817_v12 = vld [vmem:[#allocation2 + $0xbc] sm:$0xff] }
 0x26f   : > { %4168 = vst.msk [vmem:[#allocation2 + $0x113] sm:$0xff] %vm15393_vm2, %v4150_v50  ;;  %v3695_v5 = vrot.slane %v3492_v26, 2  ;;  %v3185_v55 = vsel %vm15395_vm5, %v3182_v9, %v3184_v38  ;;  %v4063_v19 = vadd.s32 18, %v3989_v48  ;;  %v3693_v63 = vrot.slane %v15397_v27, 2  ;;  %vm15400_vm12 = vmmov %vm15336_vm0  ;;  %v6313_v18 = vld [vmem:[#allocation2 + $0xd2] sm:$0xff]  ;;  %v6818_v62 = vld [vmem:[#allocation2 + $0xc4] sm:$0xff]  ;;  %v12586_v26 = vpop.f32.mrf.mxu0 }
 0x270   : > { %v3002_v58 = vadd.f32 %v15391_v41, %v2713_v2  ;;  %v3223_v16 = vadd.f32 %v3187_v40, %v3131_v21  ;;  %vm4008_vm13 = vcmp.ne.s32.totalorder %v3978_v44, 0  ;;  %vm4026_vm8 = vcmp.lt.s32.totalorder %v3978_v44, 0  ;;  %7789 = vmatmul.mubr.msk.f32.vlgmr.msra.gmra.mxu0 %vm15400_vm12, %v6307_v32  ;;  %vm15401_vm6 = vmmov %vm15336_vm0  ;;  %v6314_v10 = vld [vmem:[#allocation2 + $0xda] sm:$0xff]  ;;  %v6819_v51 = vld [vmem:[#allocation2 + $0xcc] sm:$0xff] }
 0x271   : > { %v5813_v7 = vld [vmem:[#allocation2 + $0x108] sm:$0xff]  ;;  %6469 = vmatprep.mubr.f32.mxu0 %v14829_v28  ;;  %v4062_v9 = vadd.s32 18, %v3978_v44  ;;  %v3696_v4 = vsel %vm15386_vm3, %v3693_v63, %v3695_v5  ;;  %vm12532_vm11 = vmand %vm4026_vm8, %vm4008_vm13  ;;  %v4081_v42 = vsel %vm12522_vm15, %v4063_v19, %v3989_v48  ;;  %v6820_v53 = vld [vmem:[#allocation2 + $0xd4] sm:$0xff] }
 0x272   : > { %v3130_v1 = vadd.f32 %v3093_v33, %v3002_v58  ;;  %v3512_v60 = vadd.f32 %v15396_v56, %v3223_v16  ;;  %7769 = vmatmul.mubr.msk.f32.gmra.mxu1 %vm15401_vm6, %v5813_v7  ;;  %vm15405_vm4 = vmmov %vm15386_vm3  ;;  %vm4099_vm2 = vcmp.lt.s32.totalorder %v4081_v42, 16  ;;  %v6315_v48 = vld [vmem:[#allocation2 + $0xe2] sm:$0xff]  ;;  %v6316_v38 = vld [vmem:[#allocation2 + $0xea] sm:$0xff] }
 0x273   : > { %6050 = vmatprep.mubr.f32.mxu1 %v14829_v28  ;;  %v3694_v34 = vsel %vm15405_vm4, %v3691_v46, %v3693_v63  ;;  %vm15406_vm9 = vmmov %vm15336_vm0  ;;  %v4080_v54 = vsel %vm12532_vm11, %v4062_v9, %v3978_v44  ;;  %v6821_v29 = vld [vmem:[#allocation2 + $0xdc] sm:$0xff]  ;;  %v6317_v0 = vld [vmem:[#allocation2 + $0xf2] sm:$0xff] }
 0x274   : > { %v3222_v11 = vadd.f32 %v3185_v55, %v3130_v1  ;;  %v3640_v15 = vadd.f32 %v3604_v49, %v3512_v60  ;;  %7790 = vmatmul.mubr.msk.f32.gmra.mxu0 %vm15336_vm0, %v6308_v20  ;;  %vm15407_vm7 = vmmov %vm15336_vm0  ;;  %vm4098_vm14 = vcmp.lt.s32.totalorder %v4080_v54, 16  ;;  %v5816_v47 = vld [vmem:[#allocation2 + $0x120] sm:$0x3]  ;;  %v6822_v2 = vld [vmem:[#allocation2 + $0xe4] sm:$0xff] }
 0x275   : > { %6475 = vmatprep.mubr.f32.mxu0 %v14829_v28  ;;  %vm15408_vm10 = vmmov %vm15336_vm0  ;;  %v6318_v21 = vld [vmem:[#allocation2 + $0xfa] sm:$0xff]  ;;  %v6823_v40 = vld [vmem:[#allocation2 + $0xec] sm:$0xff] }
 0x276   : > { %v3511_v35 = vadd.f32 %v15402_v57, %v3222_v11  ;;  %v3732_v31 = vadd.f32 %v3696_v4, %v3640_v15  ;;  %v5814_v6 = vld [vmem:[#allocation2 + $0x110] sm:$0xff]  ;;  %v5815_v36 = vld [vmem:[#allocation2 + $0x118] sm:$0xff]  ;;  %vm15409_vm5 = vmmov %vm15336_vm0 }
 0x277   : > { %7770 = vmatmul.mubr.msk.f32.gmra.mxu1 %vm15406_vm9, %v5814_v6  ;;  %vm15410_vm13 = vmmov %vm15336_vm0  ;;  %v15428_v44 = vld [vmem:[#allocation143_spill] sm:$0xff]  ;;  %v6319_v5 = vld [vmem:[#allocation2 + $0x102] sm:$0xff] }
 0x278   : > { %v3639_v25 = vadd.f32 %v3602_v39, %v3511_v35  ;;  %v3757_v17 = vadd.f32 %v12488_v8, %v3732_v31  ;;  %6056 = vmatprep.mubr.f32.mxu1 %v14829_v28  ;;  %7791 = vmatmul.mubr.msk.f32.gmra.mxu0 %vm15407_vm7, %v6309_v61  ;;  %vm15411_vm8 = vmmov %vm15336_vm0  ;;  %v15429_v16 = vrot.slane %v15428_v44, 1  ;;  %v6824_v55 = vld [vmem:[#allocation2 + $0xf4] sm:$0xff]  ;;  %v6320_v15 = vld [vmem:[#allocation2 + $0x10a] sm:$0xff] }
 0x279   : > { %6481 = vmatprep.mubr.f32.mxu0 %v14829_v28  ;;  %vm15412_vm15 = vmmov %vm15336_vm0  ;;  %v6825_v35 = vld [vmem:[#allocation2 + $0xfc] sm:$0xff]  ;;  %v6321_v61 = vld [vmem:[#allocation2 + $0x112] sm:$0xff] }
 0x27a   : > { %v3731_v45 = vadd.f32 %v3694_v34, %v3639_v25  ;;  %v3775_v43 = vmax.f32 %v3757_v17, 0.0  ;;  %vm15413_vm12 = vmmov %vm15336_vm0 }
 0x27b   : > { %7771 = vmatmul.mubr.msk.f32.gmra.mxu1 %vm15408_vm10, %v5815_v36  ;;  %vm15414_vm6 = vmmov %vm15336_vm0 }
 0x27c   : > { %v3756_v14 = vadd.f32 %v12488_v8, %v3731_v45  ;;  %v4153_v46 = vsel %vm4099_vm2, %v3775_v43, 0.0  ;;  %6062 = vmatprep.mubr.f32.mxu1 %v14829_v28  ;;  %7792 = vmatmul.mubr.msk.f32.gmra.mxu0 %vm15410_vm13, %v6310_v3  ;;  %v6311_v8 = vld [vmem:[#allocation2 + $0xc2] sm:$0xff]  ;;  %vm15415_vm3 = vmmov %vm15336_vm0 }
 0x27d   : > { %4171 = vst.msk [vmem:[#allocation2 + $0x12b] sm:$0xff] %vm15409_vm5, %v4153_v46  ;;  %6487 = vmatprep.mubr.f32.mxu0 %v14829_v28  ;;  %vm15416_vm11 = vmmov %vm15336_vm0 }
 0x27e   : > { %v3774_v37 = vmax.f32 %v3756_v14, 0.0  ;;  %vm15417_vm4 = vmmov %vm15336_vm0  ;;  %v6826_v14 = vld [vmem:[#allocation2 + $0x104] sm:$0xff] }
 0x27f   : > { %7772 = vmatmul.mubr.msk.f32.gmra.mxu1 %vm15412_vm15, %v5816_v47  ;;  %vm15418_vm9 = vmmov %vm15336_vm0 }
 0x280   : > { %v4152_v13 = vsel %vm4098_vm14, %v3774_v37, 0.0  ;;  %6972 = vmatprep.mubr.f32.mxu1 %v14829_v28  ;;  %7793 = vmatmul.mubr.msk.f32.gmra.mxu0 %vm15413_vm12, %v6311_v8  ;;  %vm15419_vm2 = vmmov %vm15336_vm0  ;;  %v12589_v24 = vpop.f32.mrf.mxu0 }
 0x281   : > { %4170 = vst.msk [vmem:[#allocation2 + $0x123] sm:$0xff] %vm15411_vm8, %v4152_v13  ;;  %6493 = vmatprep.mubr.f32.mxu0 %v14829_v28  ;;  %vm15420_vm7 = vmmov %vm15336_vm0  ;;  %v12591_v50 = vpop.f32.mrf.mxu1  ;;  %v4483_v41 = vrot.slane %v12589_v24, 1 }
 0x282   : > { %vm15421_vm14 = vmmov %vm15336_vm0  ;;  %v12597_v58 = vpop.f32.mrf.mxu0  ;;  %v4990_v4 = vrot.slane %v12591_v50, 1 }
 0x283   : > { %7824 = vmatmul.mubr.msk.f32.vlgmr.msra.gmra.mxu1 %vm15414_vm6, %v6816_v59  ;;  %vm15422_vm10 = vmmov %vm15336_vm0  ;;  %v4842_v52 = vpop.f32.mrf.mxu1  ;;  %v4484_v33 = vsel %vm543_vm1, %v15429_v16, %v4483_v41  ;;  %v14225_v56 = vrot.slane %v12597_v58, 2 }
 0x284   : > { %6978 = vmatprep.mubr.f32.mxu1 %v14829_v28  ;;  %7794 = vmatmul.mubr.msk.f32.gmra.mxu0 %vm15415_vm3, %v6312_v23  ;;  %vm15423_vm5 = vmmov %vm15336_vm0  ;;  %v5118_v60 = vrot.slane %v4842_v52, 2 }
 0x285   : > { %6499 = vmatprep.mubr.f32.mxu0 %v14829_v28  ;;  %vm15424_vm13 = vmmov %vm15336_vm0  ;;  %4519 = vrot.lane.b32.xlu1 %v4484_v33, %s7942_s16 }
 0x286   : > { %vm15425_vm8 = vmmov %vm15336_vm0  ;;  %v12603_v1 = vpop.f32.mrf.mxu1  ;;  %v12606_v49 = vpop.f32.mrf.mxu0 }
 0x287   : > { %7825 = vmatmul.mubr.msk.f32.gmra.mxu1 %vm15416_vm11, %v6817_v12  ;;  %vm15426_vm15 = vmmov %vm15336_vm0  ;;  %v4485_v19 = vrot.slane %v12606_v49, 1  ;;  %v4991_v63 = vrot.slane %v12603_v1, 1 }
 0x288   : > { %6984 = vmatprep.mubr.f32.mxu1 %v14829_v28  ;;  %7795 = vmatmul.mubr.msk.f32.gmra.mxu0 %vm15336_vm0, %v6313_v18  ;;  %vm15427_vm12 = vmmov %vm15336_vm0  ;;  %v4350_v32 = vpop.f32.mrf.mxu0  ;;  %v4848_v27 = vpop.f32.mrf.mxu1 }
 0x289   : > { %6505 = vmatprep.mubr.f32.mxu0 %v14829_v28  ;;  %vm15430_vm6 = vmmov %vm15336_vm0  ;;  %v4613_v11 = vrot.slane %v4350_v32, 2  ;;  %v5119_v30 = vrot.slane %v4848_v27, 2  ;;  %v4486_v7 = vsel %vm543_vm1, %v4483_v41, %v4485_v19  ;;  %v4992_v17 = vsel %vm543_vm1, %v4990_v4, %v4991_v63 }
 0x28a   : > { %vm15431_vm3 = vmmov %vm15336_vm0  ;;  %v12616_v9 = vpop.f32.mrf.mxu1  ;;  %4521 = vrot.lane.b32.xlu0 %v4486_v7, %s7942_s16  ;;  %v12619_v57 = vpop.f32.mrf.mxu0 }
 0x28b   : > { %7826 = vmatmul.mubr.msk.f32.gmra.mxu1 %vm15417_vm4, %v6818_v62  ;;  %vm15432_vm11 = vmmov %vm15336_vm0  ;;  %v4487_v22 = vrot.slane %v12619_v57, 1  ;;  %vm15433_vm4 = vcmask 1045504   ;;  %v4993_v31 = vrot.slane %v12616_v9, 1 }
 0x28c   : > { %6990 = vmatprep.mubr.f32.mxu1 %v14829_v28  ;;  %7796 = vmatmul.mubr.msk.f32.gmra.mxu0 %vm15418_vm9, %v6314_v10  ;;  %v12629_v39 = vsel %vm15433_vm4, %v14225_v56, %v4613_v11  ;;  %vm15434_vm9 = vmmov %vm15433_vm4  ;;  %v4356_v20 = vpop.f32.mrf.mxu0  ;;  %v4854_v25 = vpop.f32.mrf.mxu1  ;;  %v6322_v10 = vld [vmem:[#allocation2 + $0x11a] sm:$0xff] }
 0x28d   : > { %6511 = vmatprep.mubr.f32.mxu0 %v14829_v28  ;;  %v12632_v42 = vsel %vm15434_vm9, %v5118_v60, %v5119_v30  ;;  %v4615_v6 = vrot.slane %v4356_v20, 2  ;;  %v5121_v34 = vrot.slane %v4854_v25, 2  ;;  %v4488_v54 = vsel %vm543_vm1, %v4485_v19, %v4487_v22  ;;  %v6829_v20 = vld [vmem:[#allocation2 + $0x11c] sm:$0xff] }
 0x28e   : > { %v12638_v45 = vpop.f32.mrf.mxu1  ;;  %5027 = vrot.lane.b32.xlu0 %v4992_v17, %s7942_s16  ;;  %4523 = vrot.lane.b32.xlu1 %v4488_v54, %s7942_s16  ;;  %v12642_v43 = vpop.f32.mrf.mxu0  ;;  %v4994_v47 = vsel %vm543_vm1, %v4991_v63, %v4993_v31 }
 0x28f   : > { %7827 = vmatmul.mubr.msk.f32.gmra.mxu1 %vm15419_vm2, %v6819_v51  ;;  %v4489_v36 = vrot.slane %v12642_v43, 1  ;;  %vm15435_vm2 = vmmov %vm15336_vm0  ;;  %v4995_v8 = vrot.slane %v12638_v45, 1  ;;  %v6827_v51 = vld [vmem:[#allocation2 + $0x10c] sm:$0xff] }
 0x290   : > { %6996 = vmatprep.mubr.f32.mxu1 %v14829_v28  ;;  %7797 = vmatmul.mubr.msk.f32.gmra.mxu0 %vm15420_vm7, %v6315_v48  ;;  %vm15436_vm7 = vmmov %vm15336_vm0  ;;  %v4362_v3 = vpop.f32.mrf.mxu0  ;;  %v4860_v13 = vpop.f32.mrf.mxu1 }
 0x291   : > { %6517 = vmatprep.mubr.f32.mxu0 %v14829_v28  ;;  %v4617_v59 = vrot.slane %v4362_v3, 2  ;;  %v5123_v23 = vrot.slane %v4860_v13, 2  ;;  %v4490_v12 = vsel %vm543_vm1, %v4487_v22, %v4489_v36  ;;  %v4996_v41 = vsel %vm543_vm1, %v4993_v31, %v4995_v8  ;;  %v6324_v31 = vld [vmem:[#allocation2 + $0x12a] sm:$0xff] }
 0x292   : > { %5029 = vrot.lane.b32.xlu1 %v4994_v47, %s7942_s16  ;;  %4525 = vrot.lane.b32.xlu0 %v4490_v12, %s7942_s16  ;;  %v12662_v62 = vpop.f32.mrf.mxu0 }
 0x293   : > { %7828 = vmatmul.mubr.msk.f32.gmra.mxu1 %vm15421_vm14, %v6820_v53  ;;  %vm15437_vm14 = vmmov %vm15433_vm4  ;;  %v12658_v18 = vpop.f32.mrf.mxu1  ;;  %v4491_v48 = vrot.slane %v12662_v62, 1 }
 0x294   : > { %7002 = vmatprep.mubr.f32.mxu1 %v14829_v28  ;;  %7798 = vmatmul.mubr.msk.f32.gmra.mxu0 %vm15422_vm10, %v6316_v38  ;;  %v12648_v46 = vsel %vm15437_vm14, %v4613_v11, %v4615_v6  ;;  %vm15438_vm10 = vmmov %vm15433_vm4 }
 0x295   : > { %6523 = vmatprep.mubr.f32.mxu0 %v14829_v28  ;;  %v12651_v37 = vsel %vm15438_vm10, %v5119_v30, %v5121_v34  ;;  %v4492_v52 = vsel %vm543_vm1, %v4489_v36, %v4491_v48  ;;  %vm15451_vm14 = vmmov %vm15336_vm0 }
 0x296   : > { %5031 = vrot.lane.b32.xlu0 %v4996_v41, %s7942_s16  ;;  %4527 = vrot.lane.b32.xlu1 %v4492_v52, %s7942_s16 }
 0x297   : > { %7829 = vmatmul.mubr.msk.f32.gmra.mxu1 %vm15423_vm5, %v6821_v29  ;;  %vm15439_vm5 = vmmov %vm15336_vm0  ;;  %v4997_v29 = vrot.slane %v12658_v18, 1 }
 0x298   : > { %7008 = vmatprep.mubr.f32.mxu1 %v14829_v28  ;;  %7799 = vmatmul.mubr.msk.f32.gmra.mxu0 %vm15424_vm13, %v6317_v0  ;;  %vm15440_vm13 = vmmov %vm15336_vm0  ;;  %v4368_v0 = vpop.f32.mrf.mxu0 }
 0x299   : > { %6529 = vmatprep.mubr.f32.mxu0 %v14829_v28  ;;  %v4998_v11 = vsel %vm543_vm1, %v4995_v8, %v4997_v29 }
 0x29a   : > { %v12682_v33 = vpop.f32.mrf.mxu0  ;;  %5033 = vrot.lane.b32.xlu1 %v4998_v11, %s7942_s16 }
 0x29b   : > { %7830 = vmatmul.mubr.msk.f32.gmra.mxu1 %vm15425_vm8, %v6822_v2  ;;  %vm15441_vm8 = vmmov %vm15433_vm4  ;;  %v4866_v2 = vpop.f32.mrf.mxu1  ;;  %v4493_v19 = vrot.slane %v12682_v33, 1 }
 0x29c   : > { %7014 = vmatprep.mubr.f32.mxu1 %v14829_v28  ;;  %7800 = vmatmul.mubr.msk.f32.gmra.mxu0 %vm15426_vm15, %v6318_v21  ;;  %v12668_v53 = vsel %vm15441_vm8, %v4615_v6, %v4617_v59  ;;  %vm15442_vm15 = vmmov %vm15433_vm4  ;;  %v4619_v21 = vrot.slane %v4368_v0, 2  ;;  %v4374_v27 = vpop.f32.mrf.mxu0 }
 0x29d   : > { %6535 = vmatprep.mubr.f32.mxu0 %v14829_v28  ;;  %v12671_v38 = vsel %vm15442_vm15, %v5121_v34, %v5123_v23  ;;  %v12678_v16 = vpop.f32.mrf.mxu1  ;;  %v4621_v7 = vrot.slane %v4374_v27, 2 }
 0x29e   : > { %v4999_v30 = vrot.slane %v12678_v16, 1  ;;  %v12702_v22 = vpop.f32.mrf.mxu0 }
 0x29f   : > { %7831 = vmatmul.mubr.msk.f32.gmra.mxu1 %vm15427_vm12, %v6823_v40  ;;  %v5125_v40 = vrot.slane %v4866_v2, 2  ;;  %vm15443_vm12 = vmmov %vm15336_vm0  ;;  %v4872_v63 = vpop.f32.mrf.mxu1  ;;  %v4495_v25 = vrot.slane %v12702_v22, 1 }
 0x2a0   : > { %7020 = vmatprep.mubr.f32.mxu1 %v14829_v28  ;;  %7801 = vmatmul.mubr.msk.f32.gmra.mxu0 %vm15430_vm6, %v6319_v5  ;;  %v6323_v5 = vld [vmem:[#allocation2 + $0x122] sm:$0xff]  ;;  %vm15444_vm6 = vmmov %vm15336_vm0  ;;  %v4380_v54 = vpop.f32.mrf.mxu0  ;;  %v5000_v3 = vsel %vm543_vm1, %v4997_v29, %v4999_v30 }
 0x2a1   : > { %6541 = vmatprep.mubr.f32.mxu0 %v14829_v28  ;;  %v12698_v4 = vpop.f32.mrf.mxu1  ;;  %v4496_v13 = vsel %vm543_vm1, %v4493_v19, %v4495_v25 }
 0x2a2   : > { %v5001_v17 = vrot.slane %v12698_v4, 1  ;;  %4531 = vrot.lane.b32.xlu1 %v4496_v13, %s7942_s16 }
 0x2a3   : > { %7832 = vmatmul.mubr.msk.f32.gmra.mxu1 %vm15431_vm3, %v6824_v55  ;;  %v6828_v55 = vld [vmem:[#allocation2 + $0x114] sm:$0xff]  ;;  %vm15445_vm3 = vmmov %vm15433_vm4 }
 0x2a4   : > { %7026 = vmatprep.mubr.f32.mxu1 %v14829_v28  ;;  %7802 = vmatmul.mubr.msk.f32.gmra.mxu0 %vm15432_vm11, %v6320_v15  ;;  %v12688_v60 = vsel %vm15445_vm3, %v4617_v59, %v4619_v21  ;;  %vm15446_vm11 = vmmov %vm15445_vm3  ;;  %v5127_v15 = vrot.slane %v4872_v63, 2  ;;  %v6325_v59 = vld [vmem:[#allocation2 + $0x132] sm:$0x3]  ;;  %v5002_v0 = vsel %vm543_vm1, %v4999_v30, %v5001_v17 }
 0x2a5   : > { %6547 = vmatprep.mubr.f32.mxu0 %v14829_v28  ;;  %v12691_v32 = vsel %vm15446_vm11, %v5123_v23, %v5125_v40  ;;  %vm15447_vm4 = vmmov %vm15336_vm0  ;;  %v12722_v8 = vpop.f32.mrf.mxu0  ;;  %v6830_v23 = vld [vmem:[#allocation2 + $0x124] sm:$0xff] }
 0x2a6   : > { %vm15448_vm9 = vmmov %vm15445_vm3  ;;  %v4497_v12 = vrot.slane %v12722_v8, 1  ;;  %5037 = vrot.lane.b32.xlu1 %v5002_v0, %s7942_s16 }
 0x2a7   : > { %7833 = vmatmul.mubr.msk.f32.gmra.mxu1 %vm15336_vm0, %v6825_v35  ;;  %v4494_v35 = vsel %vm543_vm1, %v4491_v48, %v4493_v19  ;;  %v12708_v6 = vsel %vm15448_vm9, %v4619_v21, %v4621_v7  ;;  %v4386_v48 = vpop.f32.mrf.mxu0  ;;  %vm15465_vm11 = vmmov %vm15336_vm0 }
 0x2a8   : > { %7032 = vmatprep.mubr.f32.mxu1 %v14829_v28  ;;  %7803 = vmatmul.mubr.msk.f32.gmra.mxu0 %vm15435_vm2, %v6321_v61  ;;  %vm15449_vm2 = vmmov %vm15445_vm3  ;;  %v4878_v61 = vpop.f32.mrf.mxu1  ;;  %v4625_v21 = vrot.slane %v4386_v48, 2  ;;  %v4498_v41 = vsel %vm543_vm1, %v4495_v25, %v4497_v12 }
 0x2a9   : > { %6553 = vmatprep.mubr.f32.mxu0 %v14829_v28  ;;  %4529 = vrot.lane.b32.xlu0 %v4494_v35, %s7942_s16  ;;  %v12711_v34 = vsel %vm15449_vm2, %v5125_v40, %v5127_v15  ;;  %v5129_v36 = vrot.slane %v4878_v61, 2  ;;  %vm15452_vm10 = vmmov %vm15449_vm2 }
 0x2aa   : > { %v12718_v47 = vpop.f32.mrf.mxu1  ;;  %vm15456_vm8 = vmmov %vm15449_vm2 }
 0x2ab   : > { %7834 = vmatmul.mubr.msk.f32.gmra.mxu1 %vm15436_vm7, %v6826_v14  ;;  %v4623_v14 = vrot.slane %v4380_v54, 2  ;;  %vm15450_vm7 = vmmov %vm15336_vm0  ;;  %v5003_v2 = vrot.slane %v12718_v47, 1 }
 0x2ac   : > { %7038 = vmatprep.mubr.f32.mxu1 %v14829_v28  ;;  %7804 = vmatmul.mubr.msk.f32.gmra.mxu0 %vm15439_vm5, %v6322_v10  ;;  %vm15453_vm5 = vmmov %vm15449_vm2  ;;  %v4884_v29 = vpop.f32.mrf.mxu1 }
 0x2ad   : > { %6559 = vmatprep.mubr.f32.mxu0 %v14829_v28  ;;  %5035 = vrot.lane.b32.xlu0 %v5000_v3, %s7942_s16  ;;  %v12728_v10 = vsel %vm15452_vm10, %v4621_v7, %v4623_v14  ;;  %v5131_v40 = vrot.slane %v4884_v29, 2  ;;  %v12746_v27 = vsel %vm15456_vm8, %v4623_v14, %v4625_v21  ;;  %vm15457_vm15 = vmmov %vm15449_vm2 }
 0x2ae   : > { %v12737_v52 = vpop.f32.mrf.mxu1  ;;  %vm15463_vm3 = vmmov %vm15449_vm2 }
 0x2af   : > { %7835 = vmatmul.mubr.msk.f32.gmra.mxu1 %vm15440_vm13, %v6827_v51  ;;  %v12731_v51 = vsel %vm15453_vm5, %v5127_v15, %v5129_v36  ;;  %15454 = vst [vmem:[#allocation32_spill] sm:$0xff] %v12737_v52  ;;  %vm15455_vm13 = vmmov %vm15336_vm0  ;;  %v12749_v63 = vsel %vm15457_vm15, %v5129_v36, %v5131_v40  ;;  %v5005_v11 = vrot.slane %v12737_v52, 1  ;;  %v6832_v15 = vld [vmem:[#allocation2 + $0x134] sm:$0xff]  ;;  %v15555_v52 = vld [vmem:[#allocation73_spill] sm:$0xff] }
 0x2b0   : > { %7044 = vmatprep.mubr.f32.mxu1 %v14829_v28  ;;  %7805 = vmatmul.mubr.msk.f32.gmra.mxu0 %vm15443_vm12, %v6323_v5  ;;  %v12741_v5 = vpop.f32.mrf.mxu0  ;;  %v4890_v7 = vpop.f32.mrf.mxu1  ;;  %vm15460_vm12 = vmmov %vm15336_vm0 }
 0x2b1   : > { %6565 = vmatprep.mubr.f32.mxu0 %v14829_v28  ;;  %4533 = vrot.lane.b32.xlu0 %v4498_v41, %s7942_s16  ;;  %v4499_v19 = vrot.slane %v12741_v5, 1  ;;  %vm15472_vm9 = vmmov %vm15450_vm7 }
 0x2b2   : > { %v4392_v30 = vpop.f32.mrf.mxu0  ;;  %v12755_v54 = vpop.f32.mrf.mxu1 }
 0x2b3   : > { %7836 = vmatmul.mubr.msk.f32.gmra.mxu1 %vm15444_vm6, %v6828_v55  ;;  %v6831_v55 = vld [vmem:[#allocation2 + $0x12c] sm:$0xff]  ;;  %v4627_v35 = vrot.slane %v4392_v30, 2  ;;  %v4500_v25 = vsel %vm543_vm1, %v4497_v12, %v4499_v19  ;;  %15458 = vst [vmem:[#allocation153_spill] sm:$0xff] %v12755_v54  ;;  %vm15461_vm6 = vmmov %vm15449_vm2  ;;  %v5007_v12 = vrot.slane %v12755_v54, 1 }
 0x2b4   : > { %7050 = vmatprep.mubr.f32.mxu1 %v14829_v28  ;;  %7806 = vmatmul.mubr.msk.f32.gmra.mxu0 %vm15336_vm0, %v6324_v31  ;;  %v5133_v31 = vrot.slane %v4890_v7, 2  ;;  %v12759_v61 = vpop.f32.mrf.mxu0  ;;  %v4896_v13 = vpop.f32.mrf.mxu1  ;;  %vm15466_vm0 = vmmov %vm15449_vm2 }
 0x2b5   : > { %6571 = vmatprep.mubr.f32.mxu0 %v14829_v28  ;;  %4535 = vrot.lane.b32.xlu1 %v4500_v25, %s7942_s16  ;;  %15459 = vst [vmem:[#allocation194_spill] sm:$0xff] %v12759_v61  ;;  %v4501_v14 = vrot.slane %v12759_v61, 1  ;;  %v12764_v36 = vsel %vm15461_vm6, %v4625_v21, %v4627_v35  ;;  %v5135_v29 = vrot.slane %v4896_v13, 2  ;;  %v5008_v41 = vsel %vm543_vm1, %v5005_v11, %v5007_v12  ;;  %vm15475_vm2 = vmmov %vm15466_vm0 }
 0x2b6   : > { %15462 = vst [vmem:[#allocation197_spill] sm:$0xff] %v12764_v36  ;;  %v12767_v3 = vsel %vm15463_vm3, %v5131_v40, %v5133_v31  ;;  %vm15483_vm10 = vmmov %vm15466_vm0 }
 0x2b7   : > { %7837 = vmatmul.mubr.msk.f32.gmra.mxu1 %vm15447_vm4, %v6829_v20  ;;  %v5004_v20 = vsel %vm543_vm1, %v5001_v17, %v5003_v2  ;;  %15464 = vst [vmem:[#allocation90_spill] sm:$0xff] %v12767_v3  ;;  %v4398_v17 = vpop.f32.mrf.mxu0  ;;  %v4502_v0 = vsel %vm543_vm1, %v4499_v19, %v4501_v14  ;;  %vm15468_vm4 = vmmov %vm15466_vm0 }
 0x2b8   : > { %7056 = vmatprep.mubr.f32.mxu1 %v14829_v28  ;;  %7807 = vmatmul.mubr.msk.f32.gmra.mxu0 %vm15450_vm7, %v6325_v59  ;;  %v5006_v59 = vsel %vm543_vm1, %v5003_v2, %v5005_v11  ;;  %v4629_v48 = vrot.slane %v4398_v17, 2  ;;  %v12780_v40 = vsel %vm15468_vm4, %v5133_v31, %v5135_v29  ;;  %v6834_v2 = vld [vmem:[#allocation2 + $0x144] sm:$0x3]  ;;  %vm15477_vm7 = vmmov %vm15466_vm0 }
 0x2b9   : > { %5039 = vrot.lane.b32.xlu0 %v5004_v20, %s7942_s16  ;;  %5041 = vrot.lane.b32.xlu1 %v5006_v59, %s7942_s16  ;;  %15469 = vst [vmem:[#allocation162_spill] sm:$0xff] %v12780_v40  ;;  %v12787_v19 = vpop.f32.mrf.mxu0  ;;  %vm15487_vm5 = vmmov %vm15466_vm0 }
 0x2ba   : > { %v12777_v21 = vsel %vm15466_vm0, %v4627_v35, %v4629_v48  ;;  %15471 = vst [vmem:[#allocation155_spill] sm:$0xff] %v12787_v19  ;;  %v4503_v30 = vrot.slane %v12787_v19, 1  ;;  %vm15493_vm8 = vmmov %vm15466_vm0 }
 0x2bb   : > { %7838 = vmatmul.mubr.msk.f32.gmra.mxu1 %vm15451_vm14, %v6830_v23  ;;  %v6833_v23 = vld [vmem:[#allocation2 + $0x13c] sm:$0xff]  ;;  %15467 = vst [vmem:[#allocation165_spill] sm:$0xff] %v12777_v21  ;;  %v4404_v7 = vpop.f32.mrf.mxu0  ;;  %vm15481_vm14 = vmmov %vm15466_vm0 }
 0x2bc   : > { %7062 = vmatprep.mubr.f32.mxu1 %v14829_v28  ;;  %v4631_v31 = vrot.slane %v4404_v7, 2  ;;  %vm15495_vm15 = vmmov %vm15466_vm0 }
 0x2bd   : > { %4537 = vrot.lane.b32.xlu0 %v4502_v0, %s7942_s16  ;;  %vm15501_vm6 = vmmov %vm15466_vm0 }
 0x2be   : > { %v12800_v13 = vsel %vm15475_vm2, %v4629_v48, %v4631_v31  ;;  %vm15504_vm3 = vmmov %vm15466_vm0 }
 0x2bf   : > { %7839 = vmatmul.mubr.msk.f32.gmra.mxu1 %vm15455_vm13, %v6831_v55  ;;  %v12784_v55 = vpop.f32.mrf.mxu1  ;;  %v12796_v11 = vpop.f32.mrf.mxu0  ;;  %15476 = vst [vmem:[#allocation167_spill] sm:$0xff] %v12800_v13  ;;  %vm15489_vm13 = vmmov %vm15466_vm0 }
 0x2c0   : > { %7068 = vmatprep.mubr.f32.mxu1 %v14829_v28  ;;  %15470 = vst [vmem:[#allocation150_spill] sm:$0xff] %v12784_v55  ;;  %v5009_v35 = vrot.slane %v12784_v55, 1  ;;  %15474 = vst [vmem:[#allocation169_spill] sm:$0xff] %v12796_v11  ;;  %v4505_v17 = vrot.slane %v12796_v11, 1 }
 0x2c1   : > { %5043 = vrot.lane.b32.xlu0 %v5008_v41, %s7942_s16  ;;  %v4410_v0 = vpop.f32.mrf.mxu0  ;;  %vm15510_vm4 = vmmov %vm15466_vm0 }
 0x2c2   : > { %v4633_v41 = vrot.slane %v4410_v0, 2  ;;  %v5010_v7 = vsel %vm543_vm1, %v5007_v12, %v5009_v35  ;;  %vm15514_vm2 = vmmov %vm15466_vm0 }
 0x2c3   : > { %7840 = vmatmul.mubr.msk.f32.gmra.mxu1 %vm15460_vm12, %v6832_v15  ;;  %v4902_v15 = vpop.f32.mrf.mxu1  ;;  %v12812_v48 = vpop.f32.mrf.mxu0  ;;  %vm15499_vm12 = vmmov %vm15466_vm0 }
 0x2c4   : > { %7074 = vmatprep.mubr.f32.mxu1 %v14829_v28  ;;  %v5137_v20 = vrot.slane %v4902_v15, 2  ;;  %v4506_v15 = vsel %vm543_vm1, %v4503_v30, %v4505_v17  ;;  %15480 = vst [vmem:[#allocation35_spill] sm:$0xff] %v12812_v48  ;;  %v12816_v56 = vsel %vm15481_vm14, %v4631_v31, %v4633_v41  ;;  %vm15519_vm14 = vmmov %vm15466_vm0 }
 0x2c5   : > { %v12793_v25 = vpop.f32.mrf.mxu1  ;;  %4541 = vrot.lane.b32.xlu0 %v4506_v15, %s7942_s16  ;;  %15482 = vst [vmem:[#allocation166_spill] sm:$0xff] %v12816_v56 }
 0x2c6   : > { %15473 = vst [vmem:[#allocation80_spill] sm:$0xff] %v12793_v25  ;;  %v12803_v59 = vsel %vm15477_vm7, %v5135_v29, %v5137_v20  ;;  %v4507_v29 = vrot.slane %v12812_v48, 1  ;;  %vm15516_vm7 = vmmov %vm15466_vm0 }
 0x2c7   : > { %7841 = vmatmul.mubr.msk.f32.gmra.mxu1 %vm15465_vm11, %v6833_v23  ;;  %15478 = vst [vmem:[#allocation154_spill] sm:$0xff] %v12803_v59  ;;  %v5011_v23 = vrot.slane %v12793_v25, 1  ;;  %vm15506_vm11 = vmmov %vm15466_vm0 }
 0x2c8   : > { %7080 = vmatprep.mubr.f32.mxu1 %v14829_v28  ;;  %v4504_v28 = vsel %vm543_vm1, %v4501_v14, %v4503_v30  ;;  %v4508_v15 = vsel %vm543_vm1, %v4505_v17, %v4507_v29 }
 0x2c9   : > { %4539 = vrot.lane.b32.xlu1 %v4504_v28, %s7942_s16  ;;  %v5012_v30 = vsel %vm543_vm1, %v5009_v35, %v5011_v23 }
 0x2ca   : > { %5047 = vrot.lane.b32.xlu0 %v5012_v30, %s7942_s16 }
 0x2cb   : > { %7842 = vmatmul.mubr.msk.f32.gmra.mxu1 %vm15472_vm9, %v6834_v2  ;;  %v4908_v2 = vpop.f32.mrf.mxu1  ;;  %vm15512_vm9 = vmmov %vm15466_vm0 }
 0x2cc   : > { %v5139_v14 = vrot.slane %v4908_v2, 2  ;;  %v4416_v2 = vpop.f32.mrf.mxu0 }
 0x2cd   : > { %v12808_v28 = vpop.f32.mrf.mxu1  ;;  %5045 = vrot.lane.b32.xlu1 %v5010_v7, %s7942_s16  ;;  %v4635_v11 = vrot.slane %v4416_v2, 2 }
 0x2ce   : > { %15479 = vst [vmem:[#allocation151_spill] sm:$0xff] %v12808_v28  ;;  %v12819_v0 = vsel %vm15483_vm10, %v5137_v20, %v5139_v14  ;;  %v5013_v25 = vrot.slane %v12808_v28, 1  ;;  %v12828_v31 = vpop.f32.mrf.mxu0  ;;  %vm15521_vm10 = vmmov %vm15466_vm0 }
 0x2cf   : > { %15484 = vst [vmem:[#allocation4_spill] sm:$0xff] %v12819_v0  ;;  %v4914_v12 = vpop.f32.mrf.mxu1  ;;  %15486 = vst [vmem:[#allocation174_spill] sm:$0xff] %v12828_v31  ;;  %v4509_v20 = vrot.slane %v12828_v31, 1  ;;  %v12832_v48 = vsel %vm15487_vm5, %v4633_v41, %v4635_v11 }
 0x2d0   : > { %v5141_v7 = vrot.slane %v4914_v12, 2  ;;  %15488 = vst [vmem:[#allocation161_spill] sm:$0xff] %v12832_v48  ;;  %v4422_v12 = vpop.f32.mrf.mxu0  ;;  %v5014_v30 = vsel %vm543_vm1, %v5011_v23, %v5013_v25  ;;  %vm15524_vm5 = vmmov %vm15466_vm0 }
 0x2d1   : > { %v12824_v55 = vpop.f32.mrf.mxu1  ;;  %4543 = vrot.lane.b32.xlu1 %v4508_v15, %s7942_s16  ;;  %v4637_v28 = vrot.slane %v4422_v12, 2  ;;  %v4510_v15 = vsel %vm543_vm1, %v4507_v29, %v4509_v20 }
 0x2d2   : > { %15485 = vst [vmem:[#allocation177_spill] sm:$0xff] %v12824_v55  ;;  %v12835_v35 = vsel %vm15489_vm13, %v5139_v14, %v5141_v7  ;;  %v5015_v2 = vrot.slane %v12824_v55, 1  ;;  %4545 = vrot.lane.b32.xlu0 %v4510_v15, %s7942_s16  ;;  %v12844_v41 = vpop.f32.mrf.mxu0  ;;  %vm15527_vm13 = vmmov %vm15466_vm0 }
 0x2d3   : > { %15490 = vst [vmem:[#allocation159_spill] sm:$0xff] %v12835_v35  ;;  %v4920_v17 = vpop.f32.mrf.mxu1  ;;  %15492 = vst [vmem:[#allocation203_spill] sm:$0xff] %v12844_v41  ;;  %v4511_v14 = vrot.slane %v12844_v41, 1  ;;  %v12848_v55 = vsel %vm15493_vm8, %v4635_v11, %v4637_v28 }
 0x2d4   : > { %v5143_v0 = vrot.slane %v4920_v17, 2  ;;  %15494 = vst [vmem:[#allocation175_spill] sm:$0xff] %v12848_v55  ;;  %v4428_v17 = vpop.f32.mrf.mxu0  ;;  %v5016_v29 = vsel %vm543_vm1, %v5013_v25, %v5015_v2  ;;  %vm15529_vm8 = vmmov %vm15466_vm0 }
 0x2d5   : > { %v12840_v56 = vpop.f32.mrf.mxu1  ;;  %5049 = vrot.lane.b32.xlu1 %v5014_v30, %s7942_s16  ;;  %v4639_v35 = vrot.slane %v4428_v17, 2  ;;  %v4512_v15 = vsel %vm543_vm1, %v4509_v20, %v4511_v14 }
 0x2d6   : > { %15491 = vst [vmem:[#allocation171_spill] sm:$0xff] %v12840_v56  ;;  %v12851_v12 = vsel %vm15495_vm15, %v5141_v7, %v5143_v0  ;;  %v5017_v31 = vrot.slane %v12840_v56, 1  ;;  %5051 = vrot.lane.b32.xlu0 %v5016_v29, %s7942_s16  ;;  %v12860_v11 = vpop.f32.mrf.mxu0  ;;  %vm15533_vm15 = vmmov %vm15466_vm0 }
 0x2d7   : > { %15496 = vst [vmem:[#allocation18_spill] sm:$0xff] %v12851_v12  ;;  %v4926_v23 = vpop.f32.mrf.mxu1  ;;  %15498 = vst [vmem:[#allocation178_spill] sm:$0xff] %v12860_v11  ;;  %v4513_v7 = vrot.slane %v12860_v11, 1  ;;  %v12864_v41 = vsel %vm15499_vm12, %v4637_v28, %v4639_v35 }
 0x2d8   : > { %v5145_v30 = vrot.slane %v4926_v23, 2  ;;  %15500 = vst [vmem:[#allocation170_spill] sm:$0xff] %v12864_v41  ;;  %v4434_v23 = vpop.f32.mrf.mxu0  ;;  %v5018_v29 = vsel %vm543_vm1, %v5015_v2, %v5017_v31  ;;  %vm15535_vm12 = vmmov %vm15466_vm0 }
 0x2d9   : > { %v12856_v48 = vpop.f32.mrf.mxu1  ;;  %4547 = vrot.lane.b32.xlu1 %v4512_v15, %s7942_s16  ;;  %v4641_v56 = vrot.slane %v4434_v23, 2  ;;  %v4514_v15 = vsel %vm543_vm1, %v4511_v14, %v4513_v7 }
 0x2da   : > { %15497 = vst [vmem:[#allocation44_spill] sm:$0xff] %v12856_v48  ;;  %v12867_v25 = vsel %vm15501_vm6, %v5143_v0, %v5145_v30  ;;  %v5019_v17 = vrot.slane %v12856_v48, 1  ;;  %4549 = vrot.lane.b32.xlu0 %v4514_v15, %s7942_s16  ;;  %v4438_v28 = vpop.f32.mrf.mxu0  ;;  %vm15539_vm6 = vmmov %vm15466_vm0 }
 0x2db   : > { %15502 = vst [vmem:[#allocation184_spill] sm:$0xff] %v12867_v25  ;;  %v4932_v20 = vpop.f32.mrf.mxu1  ;;  %v4515_v11 = vrot.slane %v4438_v28, 1  ;;  %v12877_v0 = vsel %vm15504_vm3, %v4639_v35, %v4641_v56  ;;  %vm15541_vm3 = vmmov %vm15466_vm0 }
 0x2dc   : > { %v5147_v12 = vrot.slane %v4932_v20, 2  ;;  %15505 = vst [vmem:[#allocation188_spill] sm:$0xff] %v12877_v0  ;;  %v4440_v23 = vpop.f32.mrf.mxu0  ;;  %v5020_v2 = vsel %vm543_vm1, %v5017_v31, %v5019_v17 }
 0x2dd   : > { %v12872_v55 = vpop.f32.mrf.mxu1  ;;  %5053 = vrot.lane.b32.xlu1 %v5018_v29, %s7942_s16  ;;  %v4643_v25 = vrot.slane %v4440_v23, 2  ;;  %v4516_v29 = vsel %vm543_vm1, %v4513_v7, %v4515_v11 }
 0x2de   : > { %15503 = vst [vmem:[#allocation191_spill] sm:$0xff] %v12872_v55  ;;  %v12880_v48 = vsel %vm15506_vm11, %v5145_v30, %v5147_v12  ;;  %v5021_v14 = vrot.slane %v12872_v55, 1  ;;  %5055 = vrot.lane.b32.xlu0 %v5020_v2, %s7942_s16  ;;  %v12889_v35 = vpop.f32.mrf.mxu0  ;;  %vm15545_vm11 = vmmov %vm15466_vm0 }
 0x2df   : > { %15507 = vst [vmem:[#allocation179_spill] sm:$0xff] %v12880_v48  ;;  %v4938_v20 = vpop.f32.mrf.mxu1  ;;  %v12893_v28 = vsel %vm15466_vm0, %v4641_v56, %v4643_v25 }
 0x2e0   : > { %v5149_v41 = vrot.slane %v4938_v20, 2  ;;  %15509 = vst [vmem:[#allocation192_spill] sm:$0xff] %v12893_v28  ;;  %v5352_v20 = vpop.f32.mrf.mxu0  ;;  %v5022_v11 = vsel %vm543_vm1, %v5019_v17, %v5021_v14 }
 0x2e1   : > { %4551 = vrot.lane.b32.xlu1 %v4516_v29, %s7942_s16  ;;  %v12887_v15 = vpop.f32.mrf.mxu1  ;;  %v5500_v29 = vrot.slane %v12889_v35, 1 }
 0x2e2   : > { %15508 = vst [vmem:[#allocation193_spill] sm:$0xff] %v12887_v15  ;;  %v5023_v30 = vrot.slane %v12887_v15, 1  ;;  %v12896_v31 = vsel %vm15510_vm4, %v5147_v12, %v5149_v41  ;;  %v12901_v2 = vpop.f32.mrf.mxu0  ;;  %v5628_v15 = vrot.slane %v5352_v20, 2  ;;  %vm15551_vm4 = vmmov %vm15466_vm0 }
 0x2e3   : > { %15511 = vst [vmem:[#allocation182_spill] sm:$0xff] %v12896_v31  ;;  %v4944_v23 = vpop.f32.mrf.mxu1  ;;  %v5501_v56 = vrot.slane %v12901_v2, 1 }
 0x2e4   : > { %v5151_v55 = vrot.slane %v4944_v23, 2  ;;  %v5024_v7 = vsel %vm543_vm1, %v5021_v14, %v5023_v30  ;;  %v5358_v25 = vpop.f32.mrf.mxu0 }
 0x2e5   : > { %5057 = vrot.lane.b32.xlu1 %v5022_v11, %s7942_s16  ;;  %5059 = vrot.lane.b32.xlu0 %v5024_v7, %s7942_s16  ;;  %v5629_v23 = vrot.slane %v5358_v25, 2  ;;  %v5502_v17 = vsel %vm543_vm1, %v5500_v29, %v5501_v56 }
 0x2e6   : > { %v12907_v12 = vsel %vm15512_vm9, %v5149_v41, %v5151_v55  ;;  %v12910_v28 = vpop.f32.mrf.mxu0  ;;  %vm15553_vm9 = vmmov %vm15466_vm0 }
 0x2e7   : > { %15513 = vst [vmem:[#allocation119_spill] sm:$0xff] %v12907_v12  ;;  %v5503_v14 = vrot.slane %v12910_v28, 1  ;;  %v12915_v11 = vsel %vm15514_vm2, %v5628_v15, %v5629_v23  ;;  %vm15557_vm2 = vmmov %vm15466_vm0 }
 0x2e8   : > { %15515 = vst [vmem:[#allocation108_spill] sm:$0xff] %v12915_v11  ;;  %v5364_v7 = vpop.f32.mrf.mxu0 }
 0x2e9   : > { %5537 = vrot.lane.b32.xlu0 %v5502_v17, %s7942_s16  ;;  %v5631_v31 = vrot.slane %v5364_v7, 2  ;;  %v5504_v48 = vsel %vm543_vm1, %v5501_v56, %v5503_v14 }
 0x2ea   : > { %5539 = vrot.lane.b32.xlu1 %v5504_v48, %s7942_s16  ;;  %v12919_v41 = vpop.f32.mrf.mxu0 }
 0x2eb   : > { %v5505_v29 = vrot.slane %v12919_v41, 1  ;;  %v12923_v25 = vsel %vm15516_vm7, %v5629_v23, %v5631_v31  ;;  %vm15559_vm7 = vmmov %vm15466_vm0 }
 0x2ec   : > { %v4948_v20 = vpop.f32.mrf.mxu1  ;;  %15517 = vst [vmem:[#allocation36_spill] sm:$0xff] %v12923_v25  ;;  %v5370_v12 = vpop.f32.mrf.mxu0 }
 0x2ed   : > { %v5025_v17 = vrot.slane %v4948_v20, 1  ;;  %v5633_v59 = vrot.slane %v5370_v12, 2  ;;  %v5506_v15 = vsel %vm543_vm1, %v5503_v14, %v5505_v29 }
 0x2ee   : > { %v4950_v0 = vpop.f32.mrf.mxu1  ;;  %v12926_v7 = vpop.f32.mrf.mxu0  ;;  %5541 = vrot.lane.b32.xlu0 %v5506_v15, %s7942_s16 }
 0x2ef   : > { %v5153_v11 = vrot.slane %v4950_v0, 2  ;;  %v5026_v48 = vsel %vm543_vm1, %v5023_v30, %v5025_v17  ;;  %v5507_v56 = vrot.slane %v12926_v7, 1  ;;  %v12935_v23 = vsel %vm15519_vm14, %v5631_v31, %v5633_v59  ;;  %vm15561_vm14 = vmmov %vm15466_vm0 }
 0x2f0   : > { %5061 = vrot.lane.b32.xlu1 %v5026_v48, %s7942_s16  ;;  %15520 = vst [vmem:[#allocation38_spill] sm:$0xff] %v12935_v23  ;;  %v5376_v20 = vpop.f32.mrf.mxu0 }
 0x2f1   : > { %v12932_v13 = vpop.f32.mrf.mxu1  ;;  %v12938_v12 = vsel %vm15521_vm10, %v5151_v55, %v5153_v11  ;;  %v5635_v0 = vrot.slane %v5376_v20, 2  ;;  %v5508_v25 = vsel %vm543_vm1, %v5505_v29, %v5507_v56  ;;  %vm15564_vm10 = vmmov %vm15466_vm0 }
 0x2f2   : > { %15518 = vst [vmem:[#allocation49_spill] sm:$0xff] %v12932_v13  ;;  %15522 = vst [vmem:[#allocation94_spill] sm:$0xff] %v12938_v12 }
 0x2f3   : > { %v5958_v14 = vpop.f32.mrf.mxu1  ;;  %v12948_v48 = vsel %vm15524_vm5, %v5633_v59, %v5635_v0  ;;  %vm15566_vm5 = vmmov %vm15466_vm0 }
 0x2f4   : > { %v12941_v15 = vpop.f32.mrf.mxu0  ;;  %5543 = vrot.lane.b32.xlu1 %v5508_v25, %s7942_s16  ;;  %15525 = vst [vmem:[#allocation181_spill] sm:$0xff] %v12948_v48  ;;  %v6234_v12 = vrot.slane %v5958_v14, 2  ;;  %v6106_v25 = vrot.slane %v12932_v13, 1 }
 0x2f5   : > { %v5509_v30 = vrot.slane %v12941_v15, 1  ;;  %v12945_v17 = vpop.f32.mrf.mxu1 }
 0x2f6   : > { %15523 = vst [vmem:[#allocation93_spill] sm:$0xff] %v12945_v17  ;;  %v5382_v31 = vpop.f32.mrf.mxu0  ;;  %v6107_v23 = vrot.slane %v12945_v17, 1 }
 0x2f7   : > { %v5637_v55 = vrot.slane %v5382_v31, 2  ;;  %v5964_v11 = vpop.f32.mrf.mxu1  ;;  %v5510_v20 = vsel %vm543_vm1, %v5507_v56, %v5509_v30 }
 0x2f8   : > { %v6235_v29 = vrot.slane %v5964_v11, 2  ;;  %v12952_v19 = vpop.f32.mrf.mxu0  ;;  %5545 = vrot.lane.b32.xlu0 %v5510_v20, %s7942_s16  ;;  %v6108_v20 = vsel %vm543_vm1, %v6106_v25, %v6107_v23 }
 0x2f9   : > { %v5511_v54 = vrot.slane %v12952_v19, 1  ;;  %v12957_v61 = vpop.f32.mrf.mxu1  ;;  %v12960_v59 = vsel %vm15527_vm13, %v5635_v0, %v5637_v55  ;;  %vm15568_vm13 = vmmov %vm15466_vm0 }
 0x2fa   : > { %15526 = vst [vmem:[#allocation185_spill] sm:$0xff] %v12957_v61  ;;  %15528 = vst [vmem:[#allocation56_spill] sm:$0xff] %v12960_v59  ;;  %v5388_v17 = vpop.f32.mrf.mxu0  ;;  %v12963_v31 = vsel %vm15529_vm8, %v6234_v12, %v6235_v29  ;;  %v6109_v56 = vrot.slane %v12957_v61, 1 }
 0x2fb   : > { %15530 = vst [vmem:[#allocation100_spill] sm:$0xff] %v12963_v31  ;;  %v5639_v14 = vrot.slane %v5388_v17, 2  ;;  %v5970_v11 = vpop.f32.mrf.mxu1  ;;  %v5512_v48 = vsel %vm543_vm1, %v5509_v30, %v5511_v54  ;;  %vm15570_vm8 = vmmov %vm15466_vm0 }
 0x2fc   : > { %v6237_v13 = vrot.slane %v5970_v11, 2  ;;  %v12968_v40 = vpop.f32.mrf.mxu0  ;;  %5547 = vrot.lane.b32.xlu1 %v5512_v48, %s7942_s16  ;;  %6143 = vrot.lane.b32.xlu0 %v6108_v20, %s7942_s16  ;;  %v6110_v48 = vsel %vm543_vm1, %v6107_v23, %v6109_v56 }
 0x2fd   : > { %15531 = vst [vmem:[#allocation61_spill] sm:$0xff] %v12968_v40  ;;  %v5513_v0 = vrot.slane %v12968_v40, 1  ;;  %v12973_v59 = vpop.f32.mrf.mxu1  ;;  %v12976_v12 = vsel %vm15533_vm15, %v5637_v55, %v5639_v14  ;;  %vm15571_vm15 = vmmov %vm15466_vm0 }
 0x2fe   : > { %15532 = vst [vmem:[#allocation71_spill] sm:$0xff] %v12973_v59  ;;  %15534 = vst [vmem:[#allocation23_spill] sm:$0xff] %v12976_v12  ;;  %v5394_v17 = vpop.f32.mrf.mxu0  ;;  %v12979_v61 = vsel %vm15535_vm12, %v6235_v29, %v6237_v13  ;;  %v6111_v30 = vrot.slane %v12973_v59, 1 }
 0x2ff   : > { %15536 = vst [vmem:[#allocation37_spill] sm:$0xff] %v12979_v61  ;;  %v5641_v25 = vrot.slane %v5394_v17, 2  ;;  %v5976_v11 = vpop.f32.mrf.mxu1  ;;  %v5514_v31 = vsel %vm543_vm1, %v5511_v54, %v5513_v0  ;;  %vm15572_vm12 = vmmov %vm15466_vm0 }
 0x300   : > { %v6239_v20 = vrot.slane %v5976_v11, 2  ;;  %v12984_v36 = vpop.f32.mrf.mxu0  ;;  %5549 = vrot.lane.b32.xlu0 %v5514_v31, %s7942_s16  ;;  %6145 = vrot.lane.b32.xlu1 %v6110_v48, %s7942_s16  ;;  %v6112_v31 = vsel %vm543_vm1, %v6109_v56, %v6111_v30 }
 0x301   : > { %15537 = vst [vmem:[#allocation74_spill] sm:$0xff] %v12984_v36  ;;  %v5515_v55 = vrot.slane %v12984_v36, 1  ;;  %v12989_v12 = vpop.f32.mrf.mxu1  ;;  %v12992_v29 = vsel %vm15539_vm6, %v5639_v14, %v5641_v25  ;;  %vm15573_vm6 = vmmov %vm15466_vm0 }
 0x302   : > { %15538 = vst [vmem:[#allocation22_spill] sm:$0xff] %v12989_v12  ;;  %15540 = vst [vmem:[#allocation54_spill] sm:$0xff] %v12992_v29  ;;  %v5400_v17 = vpop.f32.mrf.mxu0  ;;  %v12995_v59 = vsel %vm15541_vm3, %v6237_v13, %v6239_v20  ;;  %v6113_v54 = vrot.slane %v12989_v12, 1 }
 0x303   : > { %15542 = vst [vmem:[#allocation60_spill] sm:$0xff] %v12995_v59  ;;  %v5643_v23 = vrot.slane %v5400_v17, 2  ;;  %v5982_v11 = vpop.f32.mrf.mxu1  ;;  %v5516_v61 = vsel %vm543_vm1, %v5513_v0, %v5515_v55  ;;  %vm15574_vm3 = vmmov %vm15466_vm0 }
 0x304   : > { %v6241_v48 = vrot.slane %v5982_v11, 2  ;;  %5551 = vrot.lane.b32.xlu1 %v5516_v61, %s7942_s16  ;;  %6147 = vrot.lane.b32.xlu0 %v6112_v31, %s7942_s16  ;;  %v6114_v61 = vsel %vm543_vm1, %v6111_v30, %v6113_v54 }
 0x305   : > { %v13000_v40 = vpop.f32.mrf.mxu0  ;;  %v13008_v13 = vsel %vm15545_vm11, %v5641_v25, %v5643_v23  ;;  %v15549_v25 = vld [vmem:[#allocation135_spill] sm:$0xff]  ;;  %vm15575_vm11 = vmmov %vm15466_vm0 }
 0x306   : > { %15543 = vst [vmem:[#allocation89_spill] sm:$0xff] %v13000_v40  ;;  %v5517_v14 = vrot.slane %v13000_v40, 1  ;;  %v13005_v29 = vpop.f32.mrf.mxu1  ;;  %15546 = vst [vmem:[#allocation39_spill] sm:$0xff] %v13008_v13  ;;  %v13011_v12 = vsel %vm15466_vm0, %v6239_v20, %v6241_v48  ;;  %v4608_v13 = vrot.slane %v15549_v25, 2  ;;  %v4609_v20 = vrot.slane %v12586_v26, 2 }
 0x307   : > { %15544 = vst [vmem:[#allocation114_spill] sm:$0xff] %v13005_v29  ;;  %v5406_v17 = vpop.f32.mrf.mxu0  ;;  %15547 = vst [vmem:[#allocation127_spill] sm:$0xff] %v13011_v12  ;;  %v6115_v56 = vrot.slane %v13005_v29, 1  ;;  %v4518_v12 = vpop.permute.xlu0 %4517 }
 0x308   : > { %v5645_v0 = vrot.slane %v5406_v17, 2  ;;  %v5988_v11 = vpop.f32.mrf.mxu1  ;;  %v5518_v59 = vsel %vm543_vm1, %v5515_v55, %v5517_v14  ;;  %6149 = vrot.lane.b32.xlu1 %v6114_v61, %s7942_s16  ;;  %v4571_v21 = vadd.f32 %v4518_v12, %v15555_v52 }
 0x309   : > { %v6243_v31 = vrot.slane %v5988_v11, 2  ;;  %v13016_v36 = vpop.f32.mrf.mxu0  ;;  %5553 = vrot.lane.b32.xlu0 %v5518_v59, %s7942_s16  ;;  %v6116_v26 = vsel %vm543_vm1, %v6113_v54, %v6115_v56 }
 0x30a   : > { %15548 = vst [vmem:[#allocation78_spill] sm:$0xff] %v13016_v36  ;;  %v5519_v29 = vrot.slane %v13016_v36, 1  ;;  %v13023_v17 = vpop.f32.mrf.mxu1  ;;  %v13026_v55 = vsel %vm15551_vm4, %v5643_v23, %v5645_v0  ;;  %v4610_v23 = vsel %vm15557_vm2, %v4608_v13, %v4609_v20  ;;  %vm15577_vm4 = vmmov %vm15466_vm0 }
 0x30b   : > { %15550 = vst [vmem:[#allocation19_spill] sm:$0xff] %v13023_v17  ;;  %15552 = vst [vmem:[#allocation3_spill] sm:$0xff] %v13026_v55  ;;  %v5412_v30 = vpop.f32.mrf.mxu0  ;;  %v13029_v11 = vsel %vm15553_vm9, %v6241_v48, %v6243_v31  ;;  %v6117_v59 = vrot.slane %v13023_v17, 1 }
 0x30c   : > { %15554 = vst [vmem:[#allocation95_spill] sm:$0xff] %v13029_v11  ;;  %v5647_v40 = vrot.slane %v5412_v30, 2  ;;  %v5994_v61 = vpop.f32.mrf.mxu1  ;;  %v5520_v25 = vsel %vm543_vm1, %v5517_v14, %v5519_v29  ;;  %v4520_v14 = vpop.permute.xlu1 %4519  ;;  %v4663_v11 = vadd.f32 %v4610_v23, %v4571_v21  ;;  %vm15579_vm9 = vmmov %vm15466_vm0 }
 0x30d   : > { %v6245_v36 = vrot.slane %v5994_v61, 2  ;;  %v13035_v3 = vpop.f32.mrf.mxu0  ;;  %5555 = vrot.lane.b32.xlu1 %v5520_v25, %s7942_s16  ;;  %6151 = vrot.lane.b32.xlu0 %v6116_v26, %s7942_s16  ;;  %v6118_v13 = vsel %vm543_vm1, %v6115_v56, %v6117_v59  ;;  %vm15580_vm2 = vmmov %vm15466_vm0 }
 0x30e   : > { %15556 = vst [vmem:[#allocation48_spill] sm:$0xff] %v13035_v3  ;;  %v5521_v48 = vrot.slane %v13035_v3, 1  ;;  %v13044_v30 = vsel %vm15559_vm7, %v5645_v0, %v5647_v40  ;;  %v4572_v0 = vadd.f32 %v4520_v14, %v15428_v44  ;;  %v4953_v14 = vadd.f32 %v12591_v50, %v4663_v11  ;;  %vm15582_vm7 = vmmov %vm15466_vm0 }
 0x30f   : > { %v13041_v17 = vpop.f32.mrf.mxu1  ;;  %15560 = vst [vmem:[#allocation76_spill] sm:$0xff] %v13044_v30  ;;  %v5418_v54 = vpop.f32.mrf.mxu0  ;;  %v13047_v52 = vsel %vm15561_vm14, %v6243_v31, %v6245_v36  ;;  %vm15583_vm14 = vmmov %vm15466_vm0 }
 0x310   : > { %15558 = vst [vmem:[#allocation72_spill] sm:$0xff] %v13041_v17  ;;  %15562 = vst [vmem:[#allocation91_spill] sm:$0xff] %v13047_v52  ;;  %v6119_v12 = vrot.slane %v13041_v17, 1  ;;  %v5649_v61 = vrot.slane %v5418_v54, 2  ;;  %v5522_v26 = vsel %vm543_vm1, %v5519_v29, %v5521_v48  ;;  %v4522_v29 = vpop.permute.xlu0 %4521  ;;  %v4524_v11 = vpop.permute.xlu1 %4523 }
 0x311   : > { %v6000_v25 = vpop.f32.mrf.mxu1  ;;  %5557 = vrot.lane.b32.xlu0 %v5522_v26, %s7942_s16  ;;  %6153 = vrot.lane.b32.xlu1 %v6118_v13, %s7942_s16  ;;  %v15567_v13 = vrot.slane %v12597_v58, 2 }
 0x312   : > { %v6247_v55 = vrot.slane %v6000_v25, 2  ;;  %v13052_v3 = vpop.f32.mrf.mxu0  ;;  %v13061_v54 = vsel %vm15564_vm10, %v5647_v40, %v5649_v61  ;;  %v6120_v44 = vsel %vm543_vm1, %v6117_v59, %v6119_v12  ;;  %vm15586_vm10 = vmmov %vm15466_vm0 }
 0x313   : > { %v5523_v31 = vrot.slane %v13052_v3, 1  ;;  %v13058_v52 = vpop.f32.mrf.mxu1  ;;  %15565 = vst [vmem:[#allocation113_spill] sm:$0xff] %v13061_v54  ;;  %v4612_v40 = vsel %vm15568_vm13, %v4609_v20, %v15567_v13  ;;  %vm15590_vm13 = vmmov %vm15466_vm0 }
 0x314   : > { %15563 = vst [vmem:[#allocation97_spill] sm:$0xff] %v13058_v52  ;;  %v5424_v17 = vpop.f32.mrf.mxu0  ;;  %v13064_v21 = vsel %vm15566_vm5, %v6245_v36, %v6247_v55  ;;  %v6121_v56 = vrot.slane %v13058_v52, 1  ;;  %v4664_v36 = vadd.f32 %v4612_v40, %v4572_v0  ;;  %v5028_v58 = vpop.permute.xlu0 %5027  ;;  %v4574_v40 = vadd.f32 %v4524_v11, %v12606_v49  ;;  %vm15587_vm5 = vmmov %vm15466_vm0 }
 0x315   : > { %v5651_v23 = vrot.slane %v5424_v17, 2  ;;  %v6006_v25 = vpop.f32.mrf.mxu1  ;;  %v5524_v26 = vsel %vm543_vm1, %v5521_v48, %v5523_v31  ;;  %6155 = vrot.lane.b32.xlu0 %v6120_v44, %s7942_s16  ;;  %v4573_v17 = vadd.f32 %v4522_v29, %v12589_v24 }
 0x316   : > { %v6249_v54 = vrot.slane %v6006_v25, 2  ;;  %5559 = vrot.lane.b32.xlu1 %v5524_v26, %s7942_s16  ;;  %v5081_v25 = vadd.f32 %v5028_v58, %v4953_v14  ;;  %v6122_v24 = vsel %vm543_vm1, %v6119_v12, %v6121_v56  ;;  %v5030_v58 = vpop.permute.xlu1 %5029 }
 0x317   : > { %v13073_v30 = vpop.f32.mrf.mxu0  ;;  %v13079_v52 = vpop.f32.mrf.mxu1  ;;  %v13082_v50 = vsel %vm15570_vm8, %v5649_v61, %v5651_v23  ;;  %v4665_v61 = vadd.f32 %v12629_v39, %v4573_v17  ;;  %vm15597_vm8 = vmmov %vm15466_vm0 }
 0x318   : > { %v5525_v48 = vrot.slane %v13073_v30, 1  ;;  %15569 = vst [vmem:[#allocation41_spill] sm:$0xff] %v13079_v52  ;;  %v13085_v20 = vsel %vm15571_vm15, %v6247_v55, %v6249_v54  ;;  %v6123_v59 = vrot.slane %v13079_v52, 1  ;;  %v5173_v55 = vadd.f32 %v12632_v42, %v5081_v25  ;;  %vm15598_vm15 = vmmov %vm15466_vm0 }
 0x319   : > { %v5430_v26 = vpop.f32.mrf.mxu0  ;;  %v6012_v44 = vpop.f32.mrf.mxu1 }
 0x31a   : > { %v5526_v0 = vsel %vm543_vm1, %v5523_v31, %v5525_v48  ;;  %v5653_v29 = vrot.slane %v5430_v26, 2  ;;  %v6251_v13 = vrot.slane %v6012_v44, 2  ;;  %6157 = vrot.lane.b32.xlu1 %v6122_v24, %s7942_s16  ;;  %v4954_v31 = vadd.f32 %v12603_v1, %v4664_v36  ;;  %v4526_v26 = vpop.permute.xlu0 %4525 }
 0x31b   : > { %5561 = vrot.lane.b32.xlu0 %v5526_v0, %s7942_s16  ;;  %v13095_v52 = vpop.f32.mrf.mxu0  ;;  %v13097_v14 = vpop.f32.mrf.mxu1  ;;  %v4575_v42 = vadd.f32 %v4526_v26, %v12619_v57  ;;  %v6124_v11 = vsel %vm543_vm1, %v6121_v56, %v6123_v59  ;;  %v13110_v25 = vadd.f32 %v12889_v35, %v5173_v55  ;;  %v4955_v35 = vadd.f32 %v12616_v9, %v4665_v61 }
 0x31c   : > { %v5527_v12 = vrot.slane %v13095_v52, 1  ;;  %v13102_v44 = vsel %vm15572_vm12, %v5651_v23, %v5653_v29  ;;  %v13105_v0 = vsel %vm15573_vm6, %v6249_v54, %v6251_v13  ;;  %v5082_v39 = vadd.f32 %v5030_v58, %v4954_v31  ;;  %vm15604_vm12 = vmmov %vm15466_vm0 }
 0x31d   : > { %v5436_v49 = vpop.f32.mrf.mxu0  ;;  %v6018_v17 = vpop.f32.mrf.mxu1  ;;  %v6125_v1 = vrot.slane %v13097_v14, 1  ;;  %v4666_v54 = vadd.f32 %v12648_v46, %v4574_v40  ;;  %v4667_v55 = vadd.f32 %v12668_v53, %v4575_v42  ;;  %vm15606_vm6 = vmmov %vm15466_vm0 }
 0x31e   : > { %v5655_v36 = vrot.slane %v5436_v49, 2  ;;  %v6253_v24 = vrot.slane %v6018_v17, 2  ;;  %v5528_v23 = vsel %vm543_vm1, %v5525_v48, %v5527_v12  ;;  %v5174_v31 = vadd.f32 %v12651_v37, %v5082_v39  ;;  %v5032_v26 = vpop.permute.xlu0 %5031  ;;  %v4528_v48 = vpop.permute.xlu1 %4527 }
 0x31f   : > { %6159 = vrot.lane.b32.xlu0 %v6124_v11, %s7942_s16  ;;  %v13117_v57 = vpop.f32.mrf.mxu0  ;;  %5563 = vrot.lane.b32.xlu1 %v5528_v23, %s7942_s16  ;;  %v13120_v56 = vpop.f32.mrf.mxu1  ;;  %v5083_v40 = vadd.f32 %v5032_v26, %v4955_v35  ;;  %v6126_v42 = vsel %vm543_vm1, %v6123_v59, %v6125_v1  ;;  %v4576_v23 = vadd.f32 %v4528_v48, %v12642_v43 }
 0x320   : > { %v5529_v58 = vrot.slane %v13117_v57, 1  ;;  %v13126_v49 = vsel %vm15574_vm3, %v5653_v29, %v5655_v36  ;;  %v13129_v46 = vsel %vm15575_vm11, %v6251_v13, %v6253_v24  ;;  %v6127_v37 = vrot.slane %v13120_v56, 1  ;;  %vm15613_vm3 = vmmov %vm15466_vm0 }
 0x321   : > { %v5442_v39 = vpop.f32.mrf.mxu0  ;;  %v6024_v17 = vpop.f32.mrf.mxu1  ;;  %v13133_v11 = vadd.f32 %v12901_v2, %v5174_v31  ;;  %v5175_v29 = vadd.f32 %v12671_v38, %v5083_v40  ;;  %v4956_v2 = vadd.f32 %v12638_v45, %v4666_v54  ;;  %v4957_v59 = vadd.f32 %v12658_v18, %v4667_v55  ;;  %vm15615_vm11 = vmmov %vm15466_vm0 }
 0x322   : > { %v5657_v9 = vrot.slane %v5442_v39, 2  ;;  %v6255_v53 = vrot.slane %v6024_v17, 2  ;;  %v5530_v61 = vsel %vm543_vm1, %v5527_v12, %v5529_v58  ;;  %v5034_v26 = vpop.permute.xlu1 %5033  ;;  %v4530_v12 = vpop.permute.xlu0 %4529  ;;  %v4668_v55 = vadd.f32 %v12688_v60, %v4576_v23 }
 0x323   : > { %v13139_v13 = vpop.f32.mrf.mxu0  ;;  %5565 = vrot.lane.b32.xlu0 %v5530_v61, %s7942_s16  ;;  %6161 = vrot.lane.b32.xlu1 %v6126_v42, %s7942_s16  ;;  %v5084_v48 = vadd.f32 %v5034_v26, %v4956_v2  ;;  %v4577_v40 = vadd.f32 %v4530_v12, %v12662_v62  ;;  %v6128_v61 = vsel %vm543_vm1, %v6125_v1, %v6127_v37 }
 0x324   : > { %v5531_v31 = vrot.slane %v13139_v13, 1  ;;  %v13149_v38 = vsel %vm15466_vm0, %v5655_v36, %v5657_v9  ;;  %v13152_v43 = vsel %vm15577_vm4, %v6253_v24, %v6255_v53  ;;  %v13157_v45 = vadd.f32 %v12910_v28, %v5175_v29  ;;  %vm15632_vm4 = vmmov %vm15466_vm0 }
 0x325   : > { %v13143_v35 = vpop.f32.mrf.mxu1  ;;  %v5448_v39 = vpop.f32.mrf.mxu0  ;;  %v5176_v24 = vadd.f32 %v12691_v32, %v5084_v48  ;;  %v4669_v2 = vadd.f32 %v12708_v6, %v4577_v40 }
 0x326   : > { %15576 = vst [vmem:[#allocation130_spill] sm:$0xff] %v13143_v35  ;;  %v6129_v54 = vrot.slane %v13143_v35, 1  ;;  %v5659_v42 = vrot.slane %v5448_v39, 2  ;;  %v5532_v36 = vsel %vm543_vm1, %v5529_v58, %v5531_v31  ;;  %v5036_v29 = vpop.permute.xlu0 %5035  ;;  %v4532_v26 = vpop.permute.xlu1 %4531 }
 0x327   : > { %v6030_v17 = vpop.f32.mrf.mxu1  ;;  %v13164_v62 = vpop.f32.mrf.mxu0  ;;  %5567 = vrot.lane.b32.xlu1 %v5532_v36, %s7942_s16  ;;  %6163 = vrot.lane.b32.xlu0 %v6128_v61, %s7942_s16  ;;  %v5085_v6 = vadd.f32 %v5036_v29, %v4957_v59  ;;  %v13179_v48 = vadd.f32 %v12919_v41, %v5176_v24  ;;  %v4578_v36 = vadd.f32 %v4532_v26, %v12682_v33 }
 0x328   : > { %v6257_v18 = vrot.slane %v6030_v17, 2  ;;  %v5533_v1 = vrot.slane %v13164_v62, 1  ;;  %v13172_v58 = vsel %vm15579_vm9, %v5657_v9, %v5659_v42  ;;  %v6130_v61 = vsel %vm543_vm1, %v6127_v37, %v6129_v54  ;;  %vm15634_vm9 = vmmov %vm15466_vm0 }
 0x329   : > { %v13168_v28 = vpop.f32.mrf.mxu1  ;;  %v5454_v23 = vpop.f32.mrf.mxu0  ;;  %v5177_v9 = vadd.f32 %v12711_v34, %v5085_v6  ;;  %v4958_v41 = vadd.f32 %v12678_v16, %v4668_v55 }
 0x32a   : > { %15578 = vst [vmem:[#allocation199_spill] sm:$0xff] %v13168_v28  ;;  %v13175_v60 = vsel %vm15580_vm2, %v6255_v53, %v6257_v18  ;;  %v6131_v32 = vrot.slane %v13168_v28, 1  ;;  %v5661_v40 = vrot.slane %v5454_v23, 2  ;;  %v5534_v17 = vsel %vm543_vm1, %v5531_v31, %v5533_v1  ;;  %v5038_v29 = vpop.permute.xlu1 %5037  ;;  %v4534_v23 = vpop.permute.xlu0 %4533  ;;  %vm15643_vm2 = vmmov %vm15466_vm0 }
 0x32b   : > { %v6036_v12 = vpop.f32.mrf.mxu1  ;;  %v5458_v53 = vpop.f32.mrf.mxu0  ;;  %5569 = vrot.lane.b32.xlu0 %v5534_v17, %s7942_s16  ;;  %6165 = vrot.lane.b32.xlu1 %v6130_v61, %s7942_s16  ;;  %v4959_v31 = vadd.f32 %v12698_v4, %v4669_v2  ;;  %v5086_v33 = vadd.f32 %v5038_v29, %v4958_v41  ;;  %v4579_v26 = vadd.f32 %v4534_v23, %v12702_v22 }
 0x32c   : > { %v6259_v39 = vrot.slane %v6036_v12, 2  ;;  %v5535_v24 = vrot.slane %v5458_v53, 1  ;;  %v13192_v37 = vsel %vm15582_vm7, %v5659_v42, %v5661_v40  ;;  %v6132_v17 = vsel %vm543_vm1, %v6129_v54, %v6131_v32  ;;  %vm15645_vm7 = vmmov %vm15466_vm0 }
 0x32d   : > { %v13187_v59 = vpop.f32.mrf.mxu1  ;;  %v5460_v6 = vpop.f32.mrf.mxu0  ;;  %v13200_v16 = vadd.f32 %v12926_v7, %v5177_v9  ;;  %v4670_v2 = vadd.f32 %v12728_v10, %v4578_v36  ;;  %v4671_v53 = vadd.f32 %v12746_v27, %v4579_v26 }
 0x32e   : > { %15581 = vst [vmem:[#allocation189_spill] sm:$0xff] %v13187_v59  ;;  %v13195_v34 = vsel %vm15583_vm14, %v6257_v18, %v6259_v39  ;;  %v6133_v55 = vrot.slane %v13187_v59, 1  ;;  %v5663_v61 = vrot.slane %v5460_v6, 2  ;;  %v5536_v42 = vsel %vm543_vm1, %v5533_v1, %v5535_v24  ;;  %v5040_v9 = vpop.permute.xlu0 %5039  ;;  %v4536_v41 = vpop.permute.xlu1 %4535  ;;  %vm15654_vm14 = vmmov %vm15466_vm0 }
 0x32f   : > { %15584 = vst [vmem:[#allocation136_spill] sm:$0xff] %v13195_v34  ;;  %v6042_v12 = vpop.f32.mrf.mxu1  ;;  %v5178_v18 = vadd.f32 %v12731_v51, %v5086_v33  ;;  %5571 = vrot.lane.b32.xlu1 %v5536_v42, %s7942_s16  ;;  %6167 = vrot.lane.b32.xlu0 %v6132_v17, %s7942_s16  ;;  %v5087_v51 = vadd.f32 %v5040_v9, %v4959_v31  ;;  %v15620_v34 = vld [vmem:[#allocation166_spill] sm:$0xff] }
 0x330   : > { %v6261_v4 = vrot.slane %v6042_v12, 2  ;;  %v13207_v22 = vpop.f32.mrf.mxu0  ;;  %v13215_v1 = vsel %vm15586_vm10, %v5661_v40, %v5663_v61  ;;  %v6134_v23 = vsel %vm543_vm1, %v6131_v32, %v6133_v55  ;;  %v4580_v31 = vadd.f32 %v4536_v41, %v12722_v8  ;;  %vm15656_vm10 = vmmov %vm15466_vm0 }
 0x331   : > { %v13221_v24 = vadd.f32 %v12941_v15, %v5178_v18  ;;  %v6615_v26 = vrot.slane %v13207_v22, 1  ;;  %v5179_v6 = vadd.f32 %v12749_v63, %v5087_v51  ;;  %v4960_v15 = vadd.f32 %v12718_v47, %v4670_v2 }
 0x332   : > { %v13211_v7 = vpop.f32.mrf.mxu1  ;;  %v13218_v10 = vsel %vm15587_vm5, %v6259_v39, %v6261_v4  ;;  %v6467_v36 = vpop.f32.mrf.mxu0  ;;  %vm15664_vm5 = vmmov %vm15466_vm0 }
 0x333   : > { %15585 = vst [vmem:[#allocation146_spill] sm:$0xff] %v13211_v7  ;;  %v6135_v54 = vrot.slane %v13211_v7, 1  ;;  %15588 = vst [vmem:[#allocation190_spill] sm:$0xff] %v13218_v10  ;;  %6169 = vrot.lane.b32.xlu1 %v6134_v23, %s7942_s16  ;;  %v5042_v17 = vpop.permute.xlu1 %5041  ;;  %v6743_v61 = vrot.slane %v6467_v36, 2  ;;  %v15592_v23 = vld [vmem:[#allocation90_spill] sm:$0xff]  ;;  %v15618_v10 = vld [vmem:[#allocation167_spill] sm:$0xff] }
 0x334   : > { %v6048_v27 = vpop.f32.mrf.mxu1  ;;  %v13227_v40 = vpop.f32.mrf.mxu0  ;;  %v5088_v42 = vadd.f32 %v5042_v17, %v4960_v15 }
 0x335   : > { %v6263_v29 = vrot.slane %v6048_v27, 2  ;;  %v6136_v33 = vsel %vm543_vm1, %v6133_v55, %v6135_v54  ;;  %v6616_v32 = vrot.slane %v13227_v40, 1  ;;  %v4538_v55 = vpop.permute.xlu0 %4537  ;;  %v13242_v27 = vadd.f32 %v12952_v19, %v5179_v6  ;;  %v15596_v19 = vld [vmem:[#allocation32_spill] sm:$0xff] }
 0x336   : > { %6171 = vrot.lane.b32.xlu0 %v6136_v33, %s7942_s16  ;;  %v4581_v18 = vadd.f32 %v4538_v55, %v12741_v5  ;;  %v6473_v51 = vpop.f32.mrf.mxu0  ;;  %v5180_v33 = vadd.f32 %v15592_v23, %v5088_v42  ;;  %v4961_v36 = vadd.f32 %v15596_v19, %v4671_v53  ;;  %v15601_v23 = vld [vmem:[#allocation197_spill] sm:$0xff] }
 0x337   : > { %v13231_v39 = vpop.f32.mrf.mxu1  ;;  %v13238_v63 = vsel %vm15590_vm13, %v6261_v4, %v6263_v29  ;;  %v6744_v8 = vrot.slane %v6473_v51, 2  ;;  %v6617_v2 = vsel %vm543_vm1, %v6615_v26, %v6616_v32  ;;  %v4672_v19 = vadd.f32 %v15601_v23, %v4580_v31  ;;  %v15609_v23 = vld [vmem:[#allocation194_spill] sm:$0xff]  ;;  %vm15666_vm13 = vmmov %vm15466_vm0 }
 0x338   : > { %15589 = vst [vmem:[#allocation15_spill] sm:$0xff] %v13231_v39  ;;  %v6137_v12 = vrot.slane %v13231_v39, 1  ;;  %15591 = vst [vmem:[#allocation81_spill] sm:$0xff] %v13238_v63  ;;  %v15593_v39 = vld [vmem:[#allocation165_spill] sm:$0xff]  ;;  %v13248_v7 = vpop.f32.mrf.mxu0 }
 0x339   : > { %v6054_v9 = vpop.f32.mrf.mxu1  ;;  %v4673_v4 = vadd.f32 %v15593_v39, %v4581_v18  ;;  %15594 = vst [vmem:[#allocation117_spill] sm:$0xff] %v13248_v7  ;;  %v6618_v6 = vrot.slane %v13248_v7, 1  ;;  %v5044_v15 = vpop.permute.xlu0 %5043  ;;  %v15600_v18 = vld [vmem:[#allocation61_spill] sm:$0xff] }
 0x33a   : > { %v6265_v47 = vrot.slane %v6054_v9, 2  ;;  %v6138_v41 = vsel %vm543_vm1, %v6135_v54, %v6137_v12  ;;  %6652 = vrot.lane.b32.xlu0 %v6617_v2, %s7942_s16  ;;  %v13258_v54 = vsel %vm15597_vm8, %v6743_v61, %v6744_v8  ;;  %v5089_v17 = vadd.f32 %v5044_v15, %v4961_v36  ;;  %v6479_v42 = vpop.f32.mrf.mxu0  ;;  %vm15673_vm8 = vmmov %vm15466_vm0 }
 0x33b   : > { %6173 = vrot.lane.b32.xlu1 %v6138_v41, %s7942_s16  ;;  %v13252_v5 = vpop.f32.mrf.mxu1  ;;  %v13264_v9 = vadd.f32 %v15600_v18, %v5180_v33  ;;  %v6746_v2 = vrot.slane %v6479_v42, 2  ;;  %v6619_v53 = vsel %vm543_vm1, %v6616_v32, %v6618_v6  ;;  %v4540_v15 = vpop.permute.xlu1 %4539 }
 0x33c   : > { %15595 = vst [vmem:[#allocation57_spill] sm:$0xff] %v13252_v5  ;;  %v6139_v26 = vrot.slane %v13252_v5, 1  ;;  %v13261_v39 = vsel %vm15598_vm15, %v6263_v29, %v6265_v47  ;;  %v15602_v5 = vld [vmem:[#allocation162_spill] sm:$0xff]  ;;  %v13270_v63 = vpop.f32.mrf.mxu0  ;;  %vm15675_vm15 = vmmov %vm15466_vm0 }
 0x33d   : > { %15599 = vst [vmem:[#allocation101_spill] sm:$0xff] %v13261_v39  ;;  %v6060_v55 = vpop.f32.mrf.mxu1  ;;  %v5181_v61 = vadd.f32 %v15602_v5, %v5089_v17  ;;  %15603 = vst [vmem:[#allocation98_spill] sm:$0xff] %v13270_v63  ;;  %v6620_v33 = vrot.slane %v13270_v63, 1  ;;  %v15608_v5 = vld [vmem:[#allocation74_spill] sm:$0xff]  ;;  %v15627_v63 = vld [vmem:[#allocation169_spill] sm:$0xff] }
 0x33e   : > { %v6267_v51 = vrot.slane %v6060_v55, 2  ;;  %v6140_v41 = vsel %vm543_vm1, %v6137_v12, %v6139_v26  ;;  %v13276_v55 = vsel %vm15604_vm12, %v6744_v8, %v6746_v2  ;;  %v6485_v12 = vpop.f32.mrf.mxu0  ;;  %v15612_v8 = vld [vmem:[#allocation153_spill] sm:$0xff]  ;;  %vm15681_vm12 = vmmov %vm15466_vm0 }
 0x33f   : > { %6654 = vrot.lane.b32.xlu1 %v6619_v53, %s7942_s16  ;;  %6175 = vrot.lane.b32.xlu0 %v6140_v41, %s7942_s16  ;;  %v6064_v29 = vpop.f32.mrf.mxu1  ;;  %15605 = vst [vmem:[#allocation47_spill] sm:$0xff] %v13276_v55  ;;  %v13282_v17 = vadd.f32 %v15608_v5, %v5181_v61  ;;  %v6748_v18 = vrot.slane %v6485_v12, 2  ;;  %v6621_v53 = vsel %vm543_vm1, %v6618_v6, %v6620_v33  ;;  %v4542_v12 = vpop.permute.xlu0 %4541 }
 0x340   : > { %v6141_v36 = vrot.slane %v6064_v29, 1  ;;  %v13279_v32 = vsel %vm15606_vm6, %v6265_v47, %v6267_v51  ;;  %v4582_v29 = vadd.f32 %v4540_v15, %v15609_v23  ;;  %v13287_v39 = vpop.f32.mrf.mxu0  ;;  %v15617_v15 = vld [vmem:[#allocation155_spill] sm:$0xff]  ;;  %vm15682_vm6 = vmmov %vm15466_vm0 }
 0x341   : > { %15607 = vst [vmem:[#allocation105_spill] sm:$0xff] %v13279_v32  ;;  %v6066_v31 = vpop.f32.mrf.mxu1  ;;  %15610 = vst [vmem:[#allocation121_spill] sm:$0xff] %v13287_v39  ;;  %v4962_v32 = vadd.f32 %v15612_v8, %v4672_v19  ;;  %v6622_v61 = vrot.slane %v13287_v39, 1  ;;  %v13296_v6 = vsel %vm15613_vm3, %v6746_v2, %v6748_v18  ;;  %v4583_v5 = vadd.f32 %v4542_v12, %v15617_v15  ;;  %v15619_v8 = vld [vmem:[#allocation154_spill] sm:$0xff]  ;;  %v15625_v15 = vld [vmem:[#allocation89_spill] sm:$0xff] }
 0x342   : > { %v6269_v42 = vrot.slane %v6066_v31, 2  ;;  %v6142_v41 = vsel %vm543_vm1, %v6139_v26, %v6141_v36  ;;  %v5046_v31 = vpop.permute.xlu1 %5045  ;;  %15614 = vst [vmem:[#allocation43_spill] sm:$0xff] %v13296_v6  ;;  %v4674_v19 = vadd.f32 %v15618_v10, %v4582_v29  ;;  %v15623_v2 = vld [vmem:[#allocation150_spill] sm:$0xff]  ;;  %vm15688_vm3 = vmmov %vm15466_vm0 }
 0x343   : > { %6656 = vrot.lane.b32.xlu0 %v6621_v53, %s7942_s16  ;;  %6177 = vrot.lane.b32.xlu1 %v6142_v41, %s7942_s16  ;;  %v13291_v47 = vpop.f32.mrf.mxu1  ;;  %v5090_v36 = vadd.f32 %v5046_v31, %v4962_v32  ;;  %v6491_v53 = vpop.f32.mrf.mxu0  ;;  %v6623_v59 = vsel %vm543_vm1, %v6620_v33, %v6622_v61  ;;  %v4675_v35 = vadd.f32 %v15620_v34, %v4583_v5 }
 0x344   : > { %15611 = vst [vmem:[#allocation51_spill] sm:$0xff] %v13291_v47  ;;  %v13299_v26 = vsel %vm15615_vm11, %v6267_v51, %v6269_v42  ;;  %v6750_v41 = vrot.slane %v6491_v53, 2  ;;  %v4963_v32 = vadd.f32 %v15623_v2, %v4673_v4  ;;  %v5048_v31 = vpop.permute.xlu0 %5047  ;;  %v7124_v2 = vrot.slane %v13291_v47, 1  ;;  %vm15690_vm11 = vmmov %vm15466_vm0 }
 0x345   : > { %15616 = vst [vmem:[#allocation163_spill] sm:$0xff] %v13299_v26  ;;  %v6976_v23 = vpop.f32.mrf.mxu1  ;;  %v5182_v28 = vadd.f32 %v15619_v8, %v5090_v36  ;;  %v13306_v39 = vpop.f32.mrf.mxu0  ;;  %v15626_v26 = vld [vmem:[#allocation4_spill] sm:$0xff] }
 0x346   : > { %15621 = vst [vmem:[#allocation145_spill] sm:$0xff] %v13306_v39  ;;  %v6624_v42 = vrot.slane %v13306_v39, 1  ;;  %v4544_v12 = vpop.permute.xlu1 %4543  ;;  %v13314_v33 = vsel %vm15466_vm0, %v6748_v18, %v6750_v41  ;;  %v5091_v29 = vadd.f32 %v5048_v31, %v4963_v32  ;;  %v15630_v31 = vld [vmem:[#allocation80_spill] sm:$0xff] }
 0x347   : > { %6658 = vrot.lane.b32.xlu1 %v6623_v59, %s7942_s16  ;;  %v13309_v51 = vpop.f32.mrf.mxu1  ;;  %15624 = vst [vmem:[#allocation118_spill] sm:$0xff] %v13314_v33  ;;  %v6497_v36 = vpop.f32.mrf.mxu0  ;;  %v13318_v5 = vadd.f32 %v15625_v15, %v5182_v28  ;;  %v7252_v59 = vrot.slane %v6976_v23, 2  ;;  %v4584_v18 = vadd.f32 %v4544_v12, %v15627_v63  ;;  %v4964_v28 = vadd.f32 %v15630_v31, %v4674_v19  ;;  %v15631_v15 = vld [vmem:[#allocation151_spill] sm:$0xff]  ;;  %v15637_v19 = vld [vmem:[#allocation78_spill] sm:$0xff] }
 0x348   : > { %15622 = vst [vmem:[#allocation149_spill] sm:$0xff] %v13309_v51  ;;  %v7125_v10 = vrot.slane %v13309_v51, 1  ;;  %v6752_v53 = vrot.slane %v6497_v36, 2  ;;  %v6625_v4 = vsel %vm543_vm1, %v6622_v61, %v6624_v42  ;;  %v5183_v39 = vadd.f32 %v15626_v26, %v5091_v29  ;;  %v15636_v12 = vld [vmem:[#allocation35_spill] sm:$0xff] }
 0x349   : > { %v6982_v34 = vpop.f32.mrf.mxu1  ;;  %v13324_v33 = vpop.f32.mrf.mxu0  ;;  %6660 = vrot.lane.b32.xlu0 %v6625_v4, %s7942_s16  ;;  %v4965_v61 = vadd.f32 %v15631_v15, %v4675_v35  ;;  %v15638_v15 = vld [vmem:[#allocation161_spill] sm:$0xff] }
 0x34a   : > { %v7253_v8 = vrot.slane %v6982_v34, 2  ;;  %15628 = vst [vmem:[#allocation63_spill] sm:$0xff] %v13324_v33  ;;  %v6626_v23 = vrot.slane %v13324_v33, 1  ;;  %v5050_v36 = vpop.permute.xlu1 %5049  ;;  %v4546_v34 = vpop.permute.xlu0 %4545  ;;  %v13333_v51 = vsel %vm15632_vm4, %v6750_v41, %v6752_v53  ;;  %v7126_v6 = vsel %vm543_vm1, %v7124_v2, %v7125_v10  ;;  %vm15696_vm4 = vmmov %vm15466_vm0 }
 0x34b   : > { %v13327_v32 = vpop.f32.mrf.mxu1  ;;  %15633 = vst [vmem:[#allocation123_spill] sm:$0xff] %v13333_v51  ;;  %v5092_v63 = vadd.f32 %v5050_v36, %v4964_v28  ;;  %v4585_v29 = vadd.f32 %v4546_v34, %v15636_v12  ;;  %v6503_v4 = vpop.f32.mrf.mxu0  ;;  %v13341_v31 = vadd.f32 %v15637_v19, %v5183_v39  ;;  %v4676_v51 = vadd.f32 %v15638_v15, %v4584_v18  ;;  %v15640_v28 = vld [vmem:[#allocation175_spill] sm:$0xff] }
 0x34c   : > { %15629 = vst [vmem:[#allocation65_spill] sm:$0xff] %v13327_v32  ;;  %v13336_v26 = vsel %vm15634_vm9, %v7252_v59, %v7253_v8  ;;  %v7127_v33 = vrot.slane %v13327_v32, 1  ;;  %v6754_v7 = vrot.slane %v6503_v4, 2  ;;  %v6627_v41 = vsel %vm543_vm1, %v6624_v42, %v6626_v23  ;;  %v15639_v59 = vld [vmem:[#allocation159_spill] sm:$0xff] }
 0x34d   : > { %15635 = vst [vmem:[#allocation58_spill] sm:$0xff] %v13336_v26  ;;  %v6988_v47 = vpop.f32.mrf.mxu1  ;;  %v5184_v26 = vadd.f32 %v15639_v59, %v5092_v63  ;;  %v4677_v36 = vadd.f32 %v15640_v28, %v4585_v29  ;;  %v13348_v34 = vpop.f32.mrf.mxu0  ;;  %6662 = vrot.lane.b32.xlu1 %v6627_v41, %s7942_s16  ;;  %7161 = vrot.lane.b32.xlu0 %v7126_v6, %s7942_s16  ;;  %v15647_v41 = vld [vmem:[#allocation48_spill] sm:$0xff]  ;;  %vm15698_vm9 = vcmask 523264  }
 0x34e   : > { %v7255_v35 = vrot.slane %v6988_v47, 2  ;;  %15641 = vst [vmem:[#allocation17_spill] sm:$0xff] %v13348_v34  ;;  %v6628_v2 = vrot.slane %v13348_v34, 1  ;;  %v5052_v12 = vpop.permute.xlu0 %5051  ;;  %v4548_v47 = vpop.permute.xlu1 %4547  ;;  %v13356_v42 = vsel %vm15643_vm2, %v6752_v53, %v6754_v7  ;;  %v7128_v32 = vsel %vm543_vm1, %v7125_v10, %v7127_v33  ;;  %v15648_v34 = vld [vmem:[#allocation18_spill] sm:$0xff]  ;;  %vm15703_vm2 = vmmov %vm15466_vm0 }
 0x34f   : > { %v13352_v39 = vpop.f32.mrf.mxu1  ;;  %15644 = vst [vmem:[#allocation10_spill] sm:$0xff] %v13356_v42  ;;  %v5093_v29 = vadd.f32 %v5052_v12, %v4965_v61  ;;  %v6509_v4 = vpop.f32.mrf.mxu0  ;;  %v13363_v15 = vadd.f32 %v15647_v41, %v5184_v26  ;;  %v15649_v42 = vld [vmem:[#allocation174_spill] sm:$0xff]  ;;  %v15652_v26 = vld [vmem:[#allocation177_spill] sm:$0xff]  ;;  %v15653_v41 = vld [vmem:[#allocation171_spill] sm:$0xff] }
 0x350   : > { %15642 = vst [vmem:[#allocation172_spill] sm:$0xff] %v13352_v39  ;;  %v13359_v18 = vsel %vm15645_vm7, %v7253_v8, %v7255_v35  ;;  %v7129_v63 = vrot.slane %v13352_v39, 1  ;;  %v6756_v6 = vrot.slane %v6509_v4, 2  ;;  %v6629_v28 = vsel %vm543_vm1, %v6626_v23, %v6628_v2  ;;  %vm15704_vm7 = vmmov %vm15466_vm0 }
 0x351   : > { %15646 = vst [vmem:[#allocation156_spill] sm:$0xff] %v13359_v18  ;;  %v6994_v19 = vpop.f32.mrf.mxu1  ;;  %v5185_v53 = vadd.f32 %v15648_v34, %v5093_v29  ;;  %v4586_v55 = vadd.f32 %v4548_v47, %v15649_v42  ;;  %v13369_v8 = vpop.f32.mrf.mxu0  ;;  %6664 = vrot.lane.b32.xlu0 %v6629_v28, %s7942_s16  ;;  %7163 = vrot.lane.b32.xlu1 %v7128_v32, %s7942_s16  ;;  %v15658_v29 = vld [vmem:[#allocation203_spill] sm:$0xff] }
 0x352   : > { %v7257_v59 = vrot.slane %v6994_v19, 2  ;;  %15650 = vst [vmem:[#allocation52_spill] sm:$0xff] %v13369_v8  ;;  %v4966_v12 = vadd.f32 %v15652_v26, %v4676_v51  ;;  %v6630_v4 = vrot.slane %v13369_v8, 1  ;;  %v5054_v19 = vpop.permute.xlu1 %5053  ;;  %v4550_v23 = vpop.permute.xlu0 %4549  ;;  %v4967_v10 = vadd.f32 %v15653_v41, %v4677_v36  ;;  %v15659_v41 = vld [vmem:[#allocation170_spill] sm:$0xff] }
 0x353   : > { %v13373_v61 = vpop.f32.mrf.mxu1  ;;  %v13379_v34 = vsel %vm15654_vm14, %v6754_v7, %v6756_v6  ;;  %v4587_v28 = vadd.f32 %v4550_v23, %v15658_v29  ;;  %v6515_v32 = vpop.f32.mrf.mxu0  ;;  %v7130_v18 = vsel %vm543_vm1, %v7127_v33, %v7129_v63  ;;  %v13387_v51 = vadd.f32 %v13052_v3, %v5185_v53  ;;  %vm15706_vm14 = vmmov %vm15698_vm9 }
 0x354   : > { %15651 = vst [vmem:[#allocation157_spill] sm:$0xff] %v13373_v61  ;;  %15655 = vst [vmem:[#allocation164_spill] sm:$0xff] %v13379_v34  ;;  %v13382_v47 = vsel %vm15656_vm10, %v7255_v35, %v7257_v59  ;;  %v5094_v42 = vadd.f32 %v5054_v19, %v4966_v12  ;;  %v7131_v26 = vrot.slane %v13373_v61, 1  ;;  %v6758_v8 = vrot.slane %v6515_v32, 2  ;;  %v15660_v35 = vld [vmem:[#allocation184_spill] sm:$0xff]  ;;  %v15668_v61 = vld [vmem:[#allocation179_spill] sm:$0xff] }
 0x355   : > { %15657 = vst [vmem:[#allocation14_spill] sm:$0xff] %v13382_v47  ;;  %v7000_v39 = vpop.f32.mrf.mxu1  ;;  %v6631_v7 = vsel %vm543_vm1, %v6628_v2, %v6630_v4  ;;  %v4678_v34 = vadd.f32 %v15659_v41, %v4586_v55  ;;  %v15661_v12 = vld [vmem:[#allocation188_spill] sm:$0xff]  ;;  %v13394_v23 = vpop.f32.mrf.mxu0  ;;  %7165 = vrot.lane.b32.xlu0 %v7130_v18, %s7942_s16  ;;  %vm15710_vm10 = vmmov %vm15466_vm0 }
 0x356   : > { %v7259_v36 = vrot.slane %v7000_v39, 2  ;;  %v5186_v47 = vadd.f32 %v15660_v35, %v5094_v42  ;;  %v4679_v19 = vadd.f32 %v15661_v12, %v4587_v28  ;;  %15662 = vst [vmem:[#allocation50_spill] sm:$0xff] %v13394_v23  ;;  %6666 = vrot.lane.b32.xlu1 %v6631_v7, %s7942_s16  ;;  %v6632_v33 = vrot.slane %v13394_v23, 1  ;;  %v5056_v53 = vpop.permute.xlu0 %5055  ;;  %v4552_v39 = vpop.permute.xlu1 %4551 }
 0x357   : > { %v13398_v3 = vpop.f32.mrf.mxu1  ;;  %v13402_v2 = vsel %vm15664_vm5, %v6756_v6, %v6758_v8  ;;  %v5095_v29 = vadd.f32 %v5056_v53, %v4967_v10  ;;  %v6521_v28 = vpop.f32.mrf.mxu0  ;;  %v7132_v12 = vsel %vm543_vm1, %v7129_v63, %v7131_v26  ;;  %v15671_v10 = vld [vmem:[#allocation44_spill] sm:$0xff]  ;;  %vm15712_vm5 = vmmov %vm15466_vm0 }
 0x358   : > { %15663 = vst [vmem:[#allocation75_spill] sm:$0xff] %v13398_v3  ;;  %15665 = vst [vmem:[#allocation62_spill] sm:$0xff] %v13402_v2  ;;  %v13405_v55 = vsel %vm15666_vm13, %v7257_v59, %v7259_v36  ;;  %v7133_v42 = vrot.slane %v13398_v3, 1  ;;  %v13409_v7 = vadd.f32 %v13073_v30, %v5186_v47  ;;  %v6760_v18 = vrot.slane %v6521_v28, 2  ;;  %v15672_v30 = vld [vmem:[#allocation191_spill] sm:$0xff] }
 0x359   : > { %15667 = vst [vmem:[#allocation16_spill] sm:$0xff] %v13405_v55  ;;  %v7006_v32 = vpop.f32.mrf.mxu1  ;;  %v6633_v35 = vsel %vm543_vm1, %v6630_v4, %v6632_v33  ;;  %v5187_v6 = vadd.f32 %v15668_v61, %v5095_v29  ;;  %v13414_v23 = vpop.f32.mrf.mxu0  ;;  %v4968_v53 = vadd.f32 %v15671_v10, %v4678_v34  ;;  %v4969_v47 = vadd.f32 %v15672_v30, %v4679_v19  ;;  %v15678_v2 = vld [vmem:[#allocation119_spill] sm:$0xff]  ;;  %vm15714_vm13 = vmmov %vm15698_vm9 }
 0x35a   : > { %v7261_v41 = vrot.slane %v7006_v32, 2  ;;  %15669 = vst [vmem:[#allocation9_spill] sm:$0xff] %v13414_v23  ;;  %6668 = vrot.lane.b32.xlu0 %v6633_v35, %s7942_s16  ;;  %7167 = vrot.lane.b32.xlu1 %v7132_v12, %s7942_s16  ;;  %v6634_v28 = vrot.slane %v13414_v23, 1  ;;  %v5058_v32 = vpop.permute.xlu1 %5057  ;;  %v5060_v4 = vpop.permute.xlu0 %5059  ;;  %v13424_v63 = vsel %vm15673_vm8, %v6758_v8, %v6760_v18  ;;  %v7134_v55 = vsel %vm543_vm1, %v7131_v26, %v7133_v42  ;;  %v15677_v8 = vld [vmem:[#allocation182_spill] sm:$0xff]  ;;  %vm15718_vm8 = vmmov %vm15466_vm0 }
 0x35b   : > { %v13418_v59 = vpop.f32.mrf.mxu1  ;;  %15674 = vst [vmem:[#allocation125_spill] sm:$0xff] %v13424_v63  ;;  %v5096_v29 = vadd.f32 %v5058_v32, %v4968_v53  ;;  %v6527_v35 = vpop.f32.mrf.mxu0  ;;  %v5097_v3 = vadd.f32 %v5060_v4, %v4969_v47  ;;  %v13431_v34 = vadd.f32 %v13095_v52, %v5187_v6  ;;  %v15680_v52 = vld [vmem:[#allocation178_spill] sm:$0xff] }
 0x35c   : > { %15670 = vst [vmem:[#allocation195_spill] sm:$0xff] %v13418_v59  ;;  %v13427_v61 = vsel %vm15675_vm15, %v7259_v36, %v7261_v41  ;;  %v7135_v19 = vrot.slane %v13418_v59, 1  ;;  %v6762_v10 = vrot.slane %v6527_v35, 2  ;;  %v6635_v23 = vsel %vm543_vm1, %v6632_v33, %v6634_v28  ;;  %v15692_v59 = vld [vmem:[#allocation36_spill] sm:$0xff]  ;;  %vm15720_vm15 = vmmov %vm15466_vm0 }
 0x35d   : > { %15676 = vst [vmem:[#allocation84_spill] sm:$0xff] %v13427_v61  ;;  %v7012_v12 = vpop.f32.mrf.mxu1  ;;  %v5188_v63 = vadd.f32 %v15677_v8, %v5096_v29  ;;  %v5189_v36 = vadd.f32 %v15678_v2, %v5097_v3  ;;  %v13437_v61 = vpop.f32.mrf.mxu0  ;;  %v4588_v6 = vadd.f32 %v4552_v39, %v15680_v52 }
 0x35e   : > { %v7263_v30 = vrot.slane %v7012_v12, 2  ;;  %6670 = vrot.lane.b32.xlu1 %v6635_v23, %s7942_s16  ;;  %7169 = vrot.lane.b32.xlu0 %v7134_v55, %s7942_s16  ;;  %v6636_v53 = vrot.slane %v13437_v61, 1  ;;  %v5538_v47 = vpop.permute.xlu0 %5537  ;;  %v13446_v32 = vsel %vm15681_vm12, %v6760_v18, %v6762_v10  ;;  %v13462_v18 = vld [vmem:[%s13982_s4] ss:$0 sm:$0xff]  ;;  %v7136_v12 = vsel %vm543_vm1, %v7133_v42, %v7135_v19  ;;  %vm15725_vm12 = vmmov %vm15698_vm9 }
 0x35f   : > { %v13441_v26 = vpop.f32.mrf.mxu1  ;;  %v6533_v2 = vpop.f32.mrf.mxu0  ;;  %v5591_v23 = vadd.f32 %v5538_v47, %v13110_v25  ;;  %v13454_v4 = vadd.f32 %v13117_v57, %v5188_v63  ;;  %v13457_v39 = vadd.f32 %v13139_v13, %v5189_v36  ;;  %v15684_v25 = vld [vmem:[#allocation108_spill] sm:$0xff]  ;;  %v5726_v36 = vld [vmem:[%s8181_s13 + $0x13] sm:$0xff] }
 0x360   : > { %15679 = vst [vmem:[#allocation141_spill] sm:$0xff] %v13441_v26  ;;  %v13449_v33 = vsel %vm15682_vm6, %v7261_v41, %v7263_v30  ;;  %v7137_v3 = vrot.slane %v13441_v26, 1  ;;  %v6764_v29 = vrot.slane %v6533_v2, 2  ;;  %v6637_v35 = vsel %vm543_vm1, %v6634_v28, %v6636_v53  ;;  %v15687_v13 = vld [vmem:[#allocation192_spill] sm:$0xff]  ;;  %v5540_v2 = vpop.permute.xlu1 %5539  ;;  %vm15728_vm6 = vmmov %vm15466_vm0 }
 0x361   : > { %15683 = vst [vmem:[#allocation139_spill] sm:$0xff] %v13449_v33  ;;  %v7018_v55 = vpop.f32.mrf.mxu1  ;;  %v5683_v8 = vadd.f32 %v15684_v25, %v5591_v23  ;;  %v13467_v52 = vpop.f32.mrf.mxu0  ;;  %v4680_v63 = vadd.f32 %v15687_v13, %v4588_v6 }
 0x362   : > { %v7265_v41 = vrot.slane %v7018_v55, 2  ;;  %15685 = vst [vmem:[#allocation158_spill] sm:$0xff] %v13467_v52  ;;  %6672 = vrot.lane.b32.xlu0 %v6637_v35, %s7942_s16  ;;  %7171 = vrot.lane.b32.xlu1 %v7136_v12, %s7942_s16  ;;  %v6638_v47 = vrot.slane %v13467_v52, 1  ;;  %v13478_v28 = vsel %vm15688_vm3, %v6762_v10, %v6764_v29  ;;  %v5592_v55 = vadd.f32 %v5540_v2, %v13133_v11  ;;  %vm15730_vm3 = vmmov %vm15698_vm9 }
 0x363   : > { %v13471_v57 = vpop.f32.mrf.mxu1  ;;  %15689 = vst [vmem:[#allocation168_spill] sm:$0xff] %v13478_v28  ;;  %v5708_v23 = vadd.f32 %v13462_v18, %v5683_v8  ;;  %v6539_v35 = vpop.f32.mrf.mxu0  ;;  %v7138_v6 = vsel %vm543_vm1, %v7135_v19, %v7137_v3  ;;  %v5727_v19 = vld [vmem:[%s8181_s13 + $0x1b] sm:$0xff] }
 0x364   : > { %15686 = vst [vmem:[#allocation173_spill] sm:$0xff] %v13471_v57  ;;  %v13481_v42 = vsel %vm15690_vm11, %v7263_v30, %v7265_v41  ;;  %v7139_v25 = vrot.slane %v13471_v57, 1  ;;  %v6766_v13 = vrot.slane %v6539_v35, 2  ;;  %v6639_v52 = vsel %vm543_vm1, %v6636_v53, %v6638_v47  ;;  %v5542_v53 = vpop.permute.xlu0 %5541  ;;  %v5062_v57 = vpop.permute.xlu1 %5061  ;;  %vm15734_vm11 = vmmov %vm15466_vm0 }
 0x365   : > { %15691 = vst [vmem:[#allocation59_spill] sm:$0xff] %v13481_v42  ;;  %v7024_v12 = vpop.f32.mrf.mxu1  ;;  %v5744_v10 = vadd.f32 %v5726_v36, %v5708_v23  ;;  %v5684_v33 = vadd.f32 %v15692_v59, %v5592_v55  ;;  %v13489_v30 = vpop.f32.mrf.mxu0  ;;  %v15695_v36 = vld [vmem:[#allocation193_spill] sm:$0xff] }
 0x366   : > { %v7267_v26 = vrot.slane %v7024_v12, 2  ;;  %15693 = vst [vmem:[#allocation202_spill] sm:$0xff] %v13489_v30  ;;  %6674 = vrot.lane.b32.xlu1 %v6639_v52, %s7942_s16  ;;  %7173 = vrot.lane.b32.xlu0 %v7138_v6, %s7942_s16  ;;  %v6640_v8 = vrot.slane %v13489_v30, 1  ;;  %v4970_v59 = vadd.f32 %v15695_v36, %v4680_v63  ;;  %v13504_v2 = vsel %vm15466_vm0, %v6764_v29, %v6766_v13 }
 0x367   : > { %v13493_v11 = vpop.f32.mrf.mxu1  ;;  %v5762_v23 = vmax.f32 %v5744_v10, 0.0  ;;  %v5709_v55 = vadd.f32 %v13462_v18, %v5684_v33  ;;  %v6545_v12 = vpop.f32.mrf.mxu0  ;;  %v5593_v6 = vadd.f32 %v5542_v53, %v13157_v45  ;;  %v7140_v29 = vsel %vm543_vm1, %v7137_v3, %v7139_v25  ;;  %v15699_v10 = vld [vmem:[#allocation38_spill] sm:$0xff]  ;;  %v5728_v45 = vld [vmem:[%s8181_s13 + $0x23] sm:$0xff] }
 0x368   : > { %15694 = vst [vmem:[#allocation134_spill] sm:$0xff] %v13493_v11  ;;  %v13507_v52 = vsel %vm15696_vm4, %v7265_v41, %v7267_v26  ;;  %v7141_v35 = vrot.slane %v13493_v11, 1  ;;  %v6768_v30 = vrot.slane %v6545_v12, 2  ;;  %v5098_v42 = vadd.f32 %v5062_v57, %v4970_v59  ;;  %v15701_v53 = vld [vmem:[#allocation94_spill] sm:$0xff]  ;;  %vm15736_vm4 = vmmov %vm15730_vm3 }
 0x369   : > { %15697 = vst [vmem:[#allocation55_spill] sm:$0xff] %v13507_v52  ;;  %v7030_v28 = vpop.f32.mrf.mxu1  ;;  %v6641_v63 = vsel %vm543_vm1, %v6638_v47, %v6640_v8  ;;  %5780 = vst.msk [vmem:[%s13498_s23] sm:$0xff] %vm15698_vm9, %v5762_v23  ;;  %v5745_v41 = vadd.f32 %v5727_v19, %v5709_v55  ;;  %v5685_v36 = vadd.f32 %v15699_v10, %v5593_v6  ;;  %v13517_v52 = vpop.f32.mrf.mxu0 }
 0x36a   : > { %v7269_v33 = vrot.slane %v7030_v28, 2  ;;  %15700 = vst [vmem:[#allocation99_spill] sm:$0xff] %v13517_v52  ;;  %6676 = vrot.lane.b32.xlu0 %v6641_v63, %s7942_s16  ;;  %7175 = vrot.lane.b32.xlu1 %v7140_v29, %s7942_s16  ;;  %v13523_v57 = vadd.f32 %v15701_v53, %v5098_v42  ;;  %v6642_v47 = vrot.slane %v13517_v52, 1  ;;  %v13529_v19 = vsel %vm15703_vm2, %v6766_v13, %v6768_v30  ;;  %v5544_v55 = vpop.permute.xlu1 %5543  ;;  %vm15738_vm9 = vmmov %vm15466_vm0 }
 0x36b   : > { %v13526_v3 = vpop.f32.mrf.mxu1  ;;  %v5763_v59 = vmax.f32 %v5745_v41, 0.0  ;;  %v5710_v28 = vadd.f32 %v13462_v18, %v5685_v36  ;;  %v6551_v23 = vpop.f32.mrf.mxu0  ;;  %v7142_v12 = vsel %vm543_vm1, %v7139_v25, %v7141_v35  ;;  %v5594_v29 = vadd.f32 %v5544_v55, %v13179_v48  ;;  %vm15742_vm2 = vmmov %vm15466_vm0 }
 0x36c   : > { %15702 = vst [vmem:[#allocation66_spill] sm:$0xff] %v13526_v3  ;;  %v13534_v6 = vsel %vm15704_vm7, %v7267_v26, %v7269_v33  ;;  %v7143_v42 = vrot.slane %v13526_v3, 1  ;;  %v6770_v63 = vrot.slane %v6551_v23, 2  ;;  %v6643_v13 = vsel %vm543_vm1, %v6640_v8, %v6642_v47  ;;  %v15708_v26 = vld [vmem:[#allocation181_spill] sm:$0xff]  ;;  %v5546_v48 = vpop.permute.xlu0 %5545  ;;  %vm15745_vm7 = vmmov %vm15730_vm3 }
 0x36d   : > { %15705 = vst [vmem:[#allocation200_spill] sm:$0xff] %v13534_v6  ;;  %v7036_v10 = vpop.f32.mrf.mxu1  ;;  %5781 = vst.msk [vmem:[%s13498_s23 + $0x8] sm:$0xff] %vm15706_vm14, %v5763_v59  ;;  %v5746_v41 = vadd.f32 %v5728_v45, %v5710_v28  ;;  %v13541_v53 = vpop.f32.mrf.mxu0  ;;  %v5686_v25 = vadd.f32 %v15708_v26, %v5594_v29  ;;  %v5729_v45 = vld [vmem:[%s8181_s13 + $0x2b] sm:$0xff] }
 0x36e   : > { %v7271_v36 = vrot.slane %v7036_v10, 2  ;;  %15707 = vst [vmem:[#allocation13_spill] sm:$0xff] %v13541_v53  ;;  %6678 = vrot.lane.b32.xlu1 %v6643_v13, %s7942_s16  ;;  %7177 = vrot.lane.b32.xlu0 %v7142_v12, %s7942_s16  ;;  %v6644_v23 = vrot.slane %v13541_v53, 1  ;;  %v13550_v8 = vsel %vm15710_vm10, %v6768_v30, %v6770_v63  ;;  %v5595_v10 = vadd.f32 %v5546_v48, %v13200_v16  ;;  %vm15749_vm14 = vmmov %vm15466_vm0 }
 0x36f   : > { %v13547_v3 = vpop.f32.mrf.mxu1  ;;  %15711 = vst [vmem:[#allocation180_spill] sm:$0xff] %v13550_v8  ;;  %v5764_v59 = vmax.f32 %v5746_v41, 0.0  ;;  %v6557_v55 = vpop.f32.mrf.mxu0  ;;  %v5711_v29 = vadd.f32 %v13462_v18, %v5686_v25  ;;  %v7144_v30 = vsel %vm543_vm1, %v7141_v35, %v7143_v42  ;;  %v15715_v41 = vld [vmem:[#allocation56_spill] sm:$0xff]  ;;  %vm15750_vm10 = vmmov %vm15730_vm3 }
 0x370   : > { %15709 = vst [vmem:[#allocation24_spill] sm:$0xff] %v13547_v3  ;;  %v7145_v28 = vrot.slane %v13547_v3, 1  ;;  %v13556_v12 = vsel %vm15712_vm5, %v7269_v33, %v7271_v36  ;;  %v6772_v13 = vrot.slane %v6557_v55, 2  ;;  %v6645_v53 = vsel %vm543_vm1, %v6642_v47, %v6644_v23  ;;  %v5730_v33 = vld [vmem:[%s8181_s13 + $0x33] sm:$0xff]  ;;  %v5548_v47 = vpop.permute.xlu1 %5547  ;;  %vm15755_vm5 = vmmov %vm15466_vm0 }
 0x371   : > { %15713 = vst [vmem:[#allocation204_spill] sm:$0xff] %v13556_v12  ;;  %v13559_v26 = vpop.f32.mrf.mxu1  ;;  %5782 = vst.msk [vmem:[%s13498_s23 + $0x10] sm:$0xff] %vm15714_vm13, %v5764_v59  ;;  %v5687_v3 = vadd.f32 %v15715_v41, %v5595_v10  ;;  %v13567_v6 = vpop.f32.mrf.mxu0  ;;  %v5747_v16 = vadd.f32 %v5729_v45, %v5711_v29  ;;  %v5596_v45 = vadd.f32 %v5548_v47, %v13221_v24  ;;  %v5731_v24 = vld [vmem:[%s8181_s13 + $0x3b] sm:$0xff] }
 0x372   : > { %v7273_v11 = vrot.slane %v13559_v26, 2  ;;  %15716 = vst [vmem:[#allocation140_spill] sm:$0xff] %v13567_v6  ;;  %6680 = vrot.lane.b32.xlu0 %v6645_v53, %s7942_s16  ;;  %7179 = vrot.lane.b32.xlu1 %v7144_v30, %s7942_s16  ;;  %v6646_v25 = vrot.slane %v13567_v6, 1  ;;  %v7146_v35 = vsel %vm543_vm1, %v7143_v42, %v7145_v28  ;;  %v13577_v59 = vsel %vm15718_vm8, %v6770_v63, %v6772_v13  ;;  %v6144_v29 = vpop.permute.xlu0 %6143  ;;  %v15722_v6 = vld [vmem:[#allocation49_spill] sm:$0xff]  ;;  %vm15757_vm13 = vmmov %vm15730_vm3 }
 0x373   : > { %v13573_v48 = vpop.f32.mrf.mxu1  ;;  %15719 = vst [vmem:[#allocation111_spill] sm:$0xff] %v13577_v59  ;;  %v5712_v55 = vadd.f32 %v13462_v18, %v5687_v3  ;;  %v6563_v53 = vpop.f32.mrf.mxu0  ;;  %v5765_v30 = vmax.f32 %v5747_v16, 0.0  ;;  %v6197_v42 = vadd.f32 %v6144_v29, %v15722_v6  ;;  %v15723_v3 = vld [vmem:[#allocation23_spill] sm:$0xff]  ;;  %vm15761_vm8 = vmmov %vm15466_vm0 }
 0x374   : > { %15717 = vst [vmem:[#allocation112_spill] sm:$0xff] %v13573_v48  ;;  %v7147_v10 = vrot.slane %v13573_v48, 1  ;;  %v13583_v26 = vsel %vm15720_vm15, %v7271_v36, %v7273_v11  ;;  %v6774_v41 = vrot.slane %v6563_v53, 2  ;;  %v6647_v63 = vsel %vm543_vm1, %v6644_v23, %v6646_v25  ;;  %v15726_v36 = vld [vmem:[#allocation100_spill] sm:$0xff]  ;;  %vm15762_vm15 = vmmov %vm15730_vm3 }
 0x375   : > { %15721 = vst [vmem:[#allocation40_spill] sm:$0xff] %v13583_v26  ;;  %v7048_v12 = vpop.f32.mrf.mxu1  ;;  %v5748_v59 = vadd.f32 %v5730_v33, %v5712_v55  ;;  %v5688_v8 = vadd.f32 %v15723_v3, %v5596_v45  ;;  %v13588_v52 = vpop.f32.mrf.mxu0  ;;  %5783 = vst.msk [vmem:[%s13498_s23 + $0x18] sm:$0xff] %vm15725_vm12, %v5765_v30  ;;  %v13596_v16 = vadd.f32 %v15726_v36, %v6197_v42  ;;  %v15729_v42 = vld [vmem:[#allocation93_spill] sm:$0xff] }
 0x376   : > { %15724 = vst [vmem:[#allocation53_spill] sm:$0xff] %v13588_v52  ;;  %6682 = vrot.lane.b32.xlu1 %v6647_v63, %s7942_s16  ;;  %7181 = vrot.lane.b32.xlu0 %v7146_v35, %s7942_s16  ;;  %v7275_v47 = vrot.slane %v7048_v12, 2  ;;  %v6648_v6 = vrot.slane %v13588_v52, 1  ;;  %v6146_v33 = vpop.permute.xlu1 %6145  ;;  %v13602_v55 = vsel %vm15728_vm6, %v6772_v13, %v6774_v41  ;;  %v5550_v30 = vpop.permute.xlu0 %5549  ;;  %v7148_v13 = vsel %vm543_vm1, %v7145_v28, %v7147_v10 }
 0x377   : > { %v13599_v23 = vpop.f32.mrf.mxu1  ;;  %v5766_v53 = vmax.f32 %v5748_v59, 0.0  ;;  %v5713_v45 = vadd.f32 %v13462_v18, %v5688_v8  ;;  %v13606_v29 = vpop.f32.mrf.mxu0  ;;  %v6198_v63 = vadd.f32 %v6146_v33, %v15729_v42  ;;  %v5597_v3 = vadd.f32 %v5550_v30, %v13242_v27  ;;  %v15731_v59 = vld [vmem:[#allocation37_spill] sm:$0xff]  ;;  %v15732_v33 = vld [vmem:[#allocation54_spill] sm:$0xff] }
 0x378   : > { %15727 = vst [vmem:[#allocation12_spill] sm:$0xff] %v13599_v23  ;;  %v7149_v35 = vrot.slane %v13599_v23, 1  ;;  %v14293_v12 = vrot.slane %v13606_v29, 2  ;;  %v6649_v48 = vsel %vm543_vm1, %v6646_v25, %v6648_v6 }
 0x379   : > { %v7054_v36 = vpop.f32.mrf.mxu1  ;;  %5784 = vst.msk [vmem:[%s13498_s23 + $0x20] sm:$0xff] %vm15730_vm3, %v5766_v53  ;;  %v5749_v8 = vadd.f32 %v5731_v24, %v5713_v45  ;;  %v13616_v23 = vadd.f32 %v15731_v59, %v6198_v63  ;;  %v6573_v26 = vpop.f32.mrf.mxu0  ;;  %v5689_v27 = vadd.f32 %v15732_v33, %v5597_v3  ;;  %v13629_v24 = vsel %vm15466_vm0, %v7273_v11, %v7275_v47  ;;  %v5732_v45 = vld [vmem:[%s8181_s13 + $0x43] sm:$0xff]  ;;  %v15737_v11 = vld [vmem:[#allocation39_spill] sm:$0xff] }
 0x37a   : > { %v7277_v52 = vrot.slane %v7054_v36, 2  ;;  %6684 = vrot.lane.b32.xlu0 %v6649_v48, %s7942_s16  ;;  %7183 = vrot.lane.b32.xlu1 %v7148_v13, %s7942_s16  ;;  %v6650_v30 = vrot.slane %v6573_v26, 1  ;;  %v5552_v42 = vpop.permute.xlu1 %5551  ;;  %v13626_v28 = vsel %vm15734_vm11, %v6774_v41, %v14293_v12  ;;  %v6148_v63 = vpop.permute.xlu0 %6147  ;;  %v7150_v3 = vsel %vm543_vm1, %v7147_v10, %v7149_v35  ;;  %v15735_v13 = vld [vmem:[#allocation185_spill] sm:$0xff] }
 0x37b   : > { %v13621_v25 = vpop.f32.mrf.mxu1  ;;  %v5767_v53 = vmax.f32 %v5749_v8, 0.0  ;;  %v5598_v48 = vadd.f32 %v5552_v42, %v13264_v9  ;;  %v5714_v26 = vadd.f32 %v13462_v18, %v5689_v27  ;;  %v6199_v59 = vadd.f32 %v6148_v63, %v15735_v13  ;;  %v5733_v27 = vld [vmem:[%s8181_s13 + $0x4b] sm:$0xff]  ;;  %v15739_v42 = vld [vmem:[#allocation60_spill] sm:$0xff]  ;;  %v15741_v13 = vld [vmem:[#allocation71_spill] sm:$0xff] }
 0x37c   : > { %15733 = vst [vmem:[#allocation86_spill] sm:$0xff] %v13621_v25  ;;  %v7151_v36 = vrot.slane %v13621_v25, 1  ;;  %v6651_v41 = vsel %vm543_vm1, %v6648_v6, %v6650_v30  ;;  %v13644_v9 = vsel %vm15738_vm9, %v7275_v47, %v7277_v52 }
 0x37d   : > { %v7060_v33 = vpop.f32.mrf.mxu1  ;;  %5785 = vst.msk [vmem:[%s13498_s23 + $0x28] sm:$0xff] %vm15736_vm4, %v5767_v53  ;;  %v5690_v8 = vadd.f32 %v15737_v11, %v5598_v48  ;;  %v5750_v10 = vadd.f32 %v5732_v45, %v5714_v26  ;;  %v13648_v25 = vadd.f32 %v15739_v42, %v6199_v59  ;;  %v15744_v11 = vld [vmem:[#allocation127_spill] sm:$0xff] }
 0x37e   : > { %v7279_v12 = vrot.slane %v7060_v33, 2  ;;  %6686 = vrot.lane.b32.xlu1 %v6651_v41, %s7942_s16  ;;  %7185 = vrot.lane.b32.xlu0 %v7150_v3, %s7942_s16  ;;  %v6150_v6 = vpop.permute.xlu1 %6149  ;;  %v5554_v48 = vpop.permute.xlu0 %5553  ;;  %v7152_v59 = vsel %vm543_vm1, %v7149_v35, %v7151_v36 }
 0x37f   : > { %v13650_v63 = vpop.f32.mrf.mxu1  ;;  %v5715_v30 = vadd.f32 %v13462_v18, %v5690_v8  ;;  %v6200_v33 = vadd.f32 %v6150_v6, %v15741_v13  ;;  %v5768_v47 = vmax.f32 %v5750_v10, 0.0  ;;  %v5599_v45 = vadd.f32 %v5554_v48, %v13282_v17 }
 0x380   : > { %15740 = vst [vmem:[#allocation70_spill] sm:$0xff] %v13650_v63  ;;  %v7153_v53 = vrot.slane %v13650_v63, 1  ;;  %v13656_v3 = vsel %vm15742_vm2, %v7277_v52, %v7279_v12  ;;  %v15746_v52 = vld [vmem:[#allocation3_spill] sm:$0xff] }
 0x381   : > { %15743 = vst [vmem:[#allocation187_spill] sm:$0xff] %v13656_v3  ;;  %v7066_v26 = vpop.f32.mrf.mxu1  ;;  %v5751_v41 = vadd.f32 %v5733_v27, %v5715_v30  ;;  %v13661_v42 = vadd.f32 %v15744_v11, %v6200_v33  ;;  %5786 = vst.msk [vmem:[%s13498_s23 + $0x30] sm:$0xff] %vm15745_vm7, %v5768_v47  ;;  %v5691_v13 = vadd.f32 %v15746_v52, %v5599_v45  ;;  %v5734_v27 = vld [vmem:[%s8181_s13 + $0x53] sm:$0xff]  ;;  %v15751_v11 = vld [vmem:[#allocation76_spill] sm:$0xff] }
 0x382   : > { %v7281_v8 = vrot.slane %v7066_v26, 2  ;;  %7187 = vrot.lane.b32.xlu1 %v7152_v59, %s7942_s16  ;;  %v7154_v6 = vsel %vm543_vm1, %v7151_v36, %v7153_v53  ;;  %v5556_v35 = vpop.permute.xlu1 %5555  ;;  %v6152_v33 = vpop.permute.xlu0 %6151  ;;  %v15748_v36 = vld [vmem:[#allocation22_spill] sm:$0xff]  ;;  %v15752_v3 = vld [vmem:[#allocation95_spill] sm:$0xff] }
 0x383   : > { %7189 = vrot.lane.b32.xlu0 %v7154_v6, %s7942_s16  ;;  %v13669_v17 = vpop.f32.mrf.mxu1  ;;  %v5769_v10 = vmax.f32 %v5751_v41, 0.0  ;;  %v5600_v48 = vadd.f32 %v5556_v35, %v13318_v5  ;;  %v5716_v26 = vadd.f32 %v13462_v18, %v5691_v13  ;;  %v6201_v59 = vadd.f32 %v6152_v33, %v15748_v36 }
 0x384   : > { %15747 = vst [vmem:[#allocation11_spill] sm:$0xff] %v13669_v17  ;;  %v7155_v30 = vrot.slane %v13669_v17, 1  ;;  %v13677_v45 = vsel %vm15749_vm14, %v7279_v12, %v7281_v8  ;;  %v5735_v17 = vld [vmem:[%s8181_s13 + $0x5b] sm:$0xff] }
 0x385   : > { %v7072_v47 = vpop.f32.mrf.mxu1  ;;  %5787 = vst.msk [vmem:[%s13498_s23 + $0x38] sm:$0xff] %vm15750_vm10, %v5769_v10  ;;  %v5692_v6 = vadd.f32 %v15751_v11, %v5600_v48  ;;  %v5752_v63 = vadd.f32 %v5734_v27, %v5716_v26  ;;  %v13685_v5 = vadd.f32 %v15752_v3, %v6201_v59  ;;  %v15754_v48 = vld [vmem:[#allocation114_spill] sm:$0xff] }
 0x386   : > { %v7283_v52 = vrot.slane %v7072_v47, 2  ;;  %v7156_v41 = vsel %vm543_vm1, %v7153_v53, %v7155_v30  ;;  %v6154_v35 = vpop.permute.xlu1 %6153  ;;  %v5558_v33 = vpop.permute.xlu0 %5557  ;;  %v15756_v47 = vld [vmem:[#allocation91_spill] sm:$0xff] }
 0x387   : > { %7191 = vrot.lane.b32.xlu1 %v7156_v41, %s7942_s16  ;;  %v13688_v13 = vpop.f32.mrf.mxu1  ;;  %v5717_v12 = vadd.f32 %v13462_v18, %v5692_v6  ;;  %v6202_v36 = vadd.f32 %v6154_v35, %v15754_v48  ;;  %v5770_v27 = vmax.f32 %v5752_v63, 0.0  ;;  %v5601_v3 = vadd.f32 %v5558_v33, %v13341_v31  ;;  %v15758_v35 = vld [vmem:[#allocation113_spill] sm:$0xff]  ;;  %v15759_v6 = vld [vmem:[#allocation19_spill] sm:$0xff] }
 0x388   : > { %15753 = vst [vmem:[#allocation133_spill] sm:$0xff] %v13688_v13  ;;  %v7157_v10 = vrot.slane %v13688_v13, 1  ;;  %v13694_v53 = vsel %vm15755_vm5, %v7281_v8, %v7283_v52  ;;  %v5736_v33 = vld [vmem:[%s8181_s13 + $0x63] sm:$0xff] }
 0x389   : > { %v13697_v26 = vpop.f32.mrf.mxu1  ;;  %v5753_v59 = vadd.f32 %v5735_v17, %v5717_v12  ;;  %v13700_v11 = vadd.f32 %v15756_v47, %v6202_v36  ;;  %5788 = vst.msk [vmem:[%s13498_s23 + $0x40] sm:$0xff] %vm15757_vm13, %v5770_v27  ;;  %v5693_v48 = vadd.f32 %v15758_v35, %v5601_v3 }
 0x38a   : > { %v7158_v41 = vsel %vm543_vm1, %v7155_v30, %v7157_v10  ;;  %v5560_v31 = vpop.permute.xlu1 %5559  ;;  %v6156_v36 = vpop.permute.xlu0 %6155  ;;  %v15760_v30 = vrot.slane %v13697_v26, 2 }
 0x38b   : > { %7193 = vrot.lane.b32.xlu0 %v7158_v41, %s7942_s16  ;;  %v7082_v63 = vpop.f32.mrf.mxu1  ;;  %v5771_v8 = vmax.f32 %v5753_v59, 0.0  ;;  %v5602_v12 = vadd.f32 %v5560_v31, %v13363_v15  ;;  %v5718_v47 = vadd.f32 %v13462_v18, %v5693_v48  ;;  %v6203_v13 = vadd.f32 %v6156_v36, %v15759_v6  ;;  %v5737_v15 = vld [vmem:[%s8181_s13 + $0x6b] sm:$0xff] }
 0x38c   : > { %v7159_v17 = vrot.slane %v7082_v63, 1  ;;  %v13715_v27 = vsel %vm15761_vm8, %v7283_v52, %v15760_v30  ;;  %v15763_v63 = vld [vmem:[#allocation72_spill] sm:$0xff] }
 0x38d   : > { %5789 = vst.msk [vmem:[%s13498_s23 + $0x48] sm:$0xff] %vm15762_vm15, %v5771_v8  ;;  %v5694_v3 = vadd.f32 %v13082_v50, %v5602_v12  ;;  %v5754_v41 = vadd.f32 %v5736_v33, %v5718_v47  ;;  %v13723_v35 = vadd.f32 %v13064_v21, %v6203_v13 }
 0x38e   : > { %v7160_v59 = vsel %vm543_vm1, %v7157_v10, %v7159_v17  ;;  %v6158_v6 = vpop.permute.xlu1 %6157  ;;  %v5562_v52 = vpop.permute.xlu0 %5561  ;;  %vm15764_vm1 = vmmov %vm15730_vm3  ;;  %v5738_v17 = vld [vmem:[%s8181_s13 + $0x73] sm:$0xff] }
 0x38f   : > { %7195 = vrot.lane.b32.xlu1 %v7160_v59, %s7942_s16  ;;  %v5719_v48 = vadd.f32 %v13462_v18, %v5694_v3  ;;  %v6204_v31 = vadd.f32 %v6158_v6, %v15763_v63  ;;  %v5772_v8 = vmax.f32 %v5754_v41, 0.0  ;;  %v5603_v50 = vadd.f32 %v5562_v52, %v13387_v51  ;;  %v15765_v3 = vld [vmem:[#allocation97_spill] sm:$0xff]  ;;  %vm15766_vm12 = vmmov %vm15764_vm1 }
 0x390   : > { %v15767_v63 = vld [vmem:[#allocation41_spill] sm:$0xff]  ;;  %vm15768_vm6 = vmmov %vm15764_vm1 }
 0x391   : > { %v5755_v10 = vadd.f32 %v5737_v15, %v5719_v48  ;;  %v13730_v33 = vadd.f32 %v13085_v20, %v6204_v31  ;;  %5790 = vst.msk [vmem:[%s13498_s23 + $0x50] sm:$0xff] %vm15764_vm1, %v5772_v8  ;;  %v5695_v21 = vadd.f32 %v13102_v44, %v5603_v50  ;;  %v5739_v44 = vld [vmem:[%s8181_s13 + $0x7b] sm:$0xff]  ;;  %v5740_v50 = vld [vmem:[%s8181_s13 + $0x83] sm:$0xff]  ;;  %vm15769_vm3 = vmmov %vm15764_vm1 }
 0x392   : > { %v5564_v12 = vpop.permute.xlu1 %5563  ;;  %v6160_v36 = vpop.permute.xlu0 %6159  ;;  %vm15770_vm11 = vmmov %vm15764_vm1 }
 0x393   : > { %v5773_v13 = vmax.f32 %v5755_v10, 0.0  ;;  %v5720_v47 = vadd.f32 %v13462_v18, %v5695_v21  ;;  %v5604_v30 = vadd.f32 %v5564_v12, %v13409_v7  ;;  %v6205_v51 = vadd.f32 %v6160_v36, %v15765_v3  ;;  %vm15771_vm0 = vmmov %vm15764_vm1 }
 0x394   : > { %vm15772_vm4 = vmmov %vm15771_vm0 }
 0x395   : > { %5791 = vst.msk [vmem:[%s13498_s23 + $0x58] sm:$0xff] %vm15766_vm12, %v5773_v13  ;;  %v5756_v20 = vadd.f32 %v5738_v17, %v5720_v47  ;;  %v5696_v59 = vadd.f32 %v13126_v49, %v5604_v30  ;;  %v13743_v41 = vadd.f32 %v13105_v0, %v6205_v51  ;;  %v5741_v47 = vld [vmem:[%s8181_s13 + $0x8b] sm:$0xff]  ;;  %vm15773_vm9 = vmmov %vm15771_vm0 }
 0x396   : > { %v5566_v15 = vpop.permute.xlu0 %5565  ;;  %v6162_v6 = vpop.permute.xlu1 %6161  ;;  %vm15792_vm2 = vmmov %vm15771_vm0 }
 0x397   : > { %v5774_v48 = vmax.f32 %v5756_v20, 0.0  ;;  %v5721_v52 = vadd.f32 %v13462_v18, %v5696_v59  ;;  %v5605_v7 = vadd.f32 %v5566_v15, %v13431_v34  ;;  %v6206_v31 = vadd.f32 %v6162_v6, %v15767_v63  ;;  %v5742_v15 = vld [vmem:[%s8181_s13 + $0x93] sm:$0xff]  ;;  %vm15797_vm7 = vmmov %vm15771_vm0 }
 0x398   : > { %vm15803_vm14 = vmmov %vm15771_vm0 }
 0x399   : > { %5792 = vst.msk [vmem:[%s13498_s23 + $0x60] sm:$0xff] %vm15768_vm6, %v5774_v48  ;;  %v5757_v8 = vadd.f32 %v5739_v44, %v5721_v52  ;;  %v5697_v49 = vadd.f32 %v13149_v38, %v5605_v7  ;;  %v13753_v0 = vadd.f32 %v13129_v46, %v6206_v31  ;;  %v5480_v44 = vadd.f32 %v13164_v62, %v13523_v57  ;;  %vm15808_vm10 = vmmov %vm15771_vm0 }
 0x39a   : > { %v5568_v10 = vpop.permute.xlu1 %5567  ;;  %v6164_v21 = vpop.permute.xlu0 %6163  ;;  %vm15815_vm5 = vmmov %vm15771_vm0  ;;  %vm15847_vm6 = vcmask 1045504  }
 0x39b   : > { %v5775_v13 = vmax.f32 %v5757_v8, 0.0  ;;  %v5722_v17 = vadd.f32 %v13462_v18, %v5697_v49  ;;  %v5606_v34 = vadd.f32 %v5568_v10, %v13454_v4  ;;  %v6207_v12 = vadd.f32 %v6164_v21, %v13097_v14  ;;  %vm15821_vm13 = vmmov %vm15771_vm0 }
 0x39c   : > { %v6578_v49 = vadd.f32 %v13207_v22, %v13596_v16  ;;  %v15775_v22 = vld [vmem:[#allocation117_spill] sm:$0xff]  ;;  %vm15827_vm8 = vmmov %vm15771_vm0 }
 0x39d   : > { %5793 = vst.msk [vmem:[%s13498_s23 + $0x68] sm:$0xff] %vm15769_vm3, %v5775_v13  ;;  %v5758_v36 = vadd.f32 %v5740_v50, %v5722_v17  ;;  %v5698_v38 = vadd.f32 %v13172_v58, %v5606_v34  ;;  %v13763_v46 = vadd.f32 %v13152_v43, %v6207_v12  ;;  %v6579_v17 = vadd.f32 %v13227_v40, %v13616_v23  ;;  %v15778_v23 = vld [vmem:[#allocation118_spill] sm:$0xff]  ;;  %vm15834_vm15 = vmmov %vm15771_vm0 }
 0x39e   : > { %v5570_v30 = vpop.permute.xlu0 %5569  ;;  %v6166_v3 = vpop.permute.xlu1 %6165  ;;  %v6580_v16 = vadd.f32 %v15775_v22, %v13648_v25  ;;  %v15780_v25 = vld [vmem:[#allocation123_spill] sm:$0xff]  ;;  %vm15840_vm1 = vmmov %vm15771_vm0 }
 0x39f   : > { %v5776_v51 = vmax.f32 %v5758_v36, 0.0  ;;  %v5723_v20 = vadd.f32 %v13462_v18, %v5698_v38  ;;  %v5607_v4 = vadd.f32 %v5570_v30, %v13457_v39  ;;  %v6208_v14 = vadd.f32 %v6166_v3, %v13120_v56  ;;  %v15774_v38 = vld [vmem:[#allocation47_spill] sm:$0xff]  ;;  %vm15844_vm12 = vmmov %vm15771_vm0 }
 0x3a0   : > { %vm15848_vm3 = vmmov %vm15771_vm0 }
 0x3a1   : > { %5794 = vst.msk [vmem:[%s13498_s23 + $0x70] sm:$0xff] %vm15770_vm11, %v5776_v51  ;;  %v5759_v59 = vadd.f32 %v5741_v47, %v5723_v20  ;;  %v5699_v58 = vadd.f32 %v13192_v37, %v5607_v4  ;;  %v13773_v43 = vadd.f32 %v13175_v60, %v6208_v14  ;;  %v5743_v60 = vld [vmem:[%s8181_s13 + $0x9b] sm:$0xff]  ;;  %vm15851_vm11 = vmmov %vm15771_vm0 }
 0x3a2   : > { %v5572_v6 = vpop.permute.xlu1 %5571  ;;  %v13778_v48 = vpop.permute.xlu0 %6167  ;;  %v15776_v20 = vld [vmem:[#allocation43_spill] sm:$0xff] }
 0x3a3   : > { %v5777_v39 = vmax.f32 %v5759_v59, 0.0  ;;  %v5724_v52 = vadd.f32 %v13462_v18, %v5699_v58  ;;  %v5608_v56 = vadd.f32 %v5572_v6, %v5480_v44  ;;  %v15779_v44 = vld [vmem:[#allocation121_spill] sm:$0xff] }
 0x3a5   : > { %5795 = vst.msk [vmem:[%s13498_s23 + $0x78] sm:$0xff] %vm15771_vm0, %v5777_v39  ;;  %v5760_v7 = vadd.f32 %v5742_v15, %v5724_v52  ;;  %v5700_v37 = vadd.f32 %v13215_v1, %v5608_v56  ;;  %v6582_v15 = vadd.f32 %v15779_v44, %v13685_v5  ;;  %v15781_v56 = vld [vmem:[#allocation145_spill] sm:$0xff]  ;;  %v15785_v5 = vld [vmem:[#allocation63_spill] sm:$0xff] }
 0x3a6   : > { %v13785_v63 = vpop.permute.xlu1 %6169 }
 0x3a7   : > { %v5778_v62 = vmax.f32 %v5760_v7, 0.0  ;;  %v5725_v57 = vadd.f32 %v13462_v18, %v5700_v37  ;;  %v6583_v7 = vadd.f32 %v15781_v56, %v13700_v11  ;;  %v15782_v37 = vld [vmem:[#allocation51_spill] sm:$0xff] }
 0x3a8   : > { %v13787_v31 = vpop.permute.xlu0 %6171 }
 0x3a9   : > { %5796 = vst.msk [vmem:[%s13498_s23 + $0x80] sm:$0xff] %vm15772_vm4, %v5778_v62  ;;  %v5761_v8 = vadd.f32 %v5743_v60, %v5725_v57  ;;  %vm15855_vm4 = vmmov %vm15771_vm0 }
 0x3ab   : > { %v5779_v21 = vmax.f32 %v5761_v8, 0.0 }
 0x3ac   : > { %v6653_v50 = vpop.permute.xlu0 %6652 }
 0x3ad   : > { %v13794_v10 = vpop.permute.xlu1 %6173  ;;  %v6706_v13 = vadd.f32 %v6653_v50, %v6578_v49  ;;  %5797 = vst.msk [vmem:[%s13498_s23 + $0x88] sm:$0xff] %vm15773_vm9, %v5779_v21  ;;  %v15783_v49 = vld [vmem:[#allocation10_spill] sm:$0xff]  ;;  %vm15856_vm9 = vmmov %vm15771_vm0 }
 0x3ae   : > { %v15784_v21 = vld [vmem:[#allocation58_spill] sm:$0xff] }
 0x3af   : > { %v6798_v1 = vadd.f32 %v13258_v54, %v6706_v13  ;;  %v15777_v54 = vld [vmem:[#allocation98_spill] sm:$0xff] }
 0x3b0   : > { %v6581_v14 = vadd.f32 %v15777_v54, %v13661_v42 }
 0x3b1   : > { %v6655_v34 = vpop.permute.xlu1 %6654  ;;  %v13801_v12 = vpop.permute.xlu0 %6175  ;;  %v7087_v60 = vadd.f32 %v15782_v37, %v6798_v1  ;;  %v15791_v37 = vld [vmem:[#allocation52_spill] sm:$0xff] }
 0x3b2   : > { %v6707_v36 = vadd.f32 %v6655_v34, %v6579_v17  ;;  %v6584_v17 = vadd.f32 %v15785_v5, %v13723_v35  ;;  %v15786_v34 = vld [vmem:[#allocation149_spill] sm:$0xff] }
 0x3b3   : > { %v15790_v35 = vld [vmem:[#allocation65_spill] sm:$0xff] }
 0x3b4   : > { %v6799_v47 = vadd.f32 %v15774_v38, %v6707_v36  ;;  %v7350_v38 = vld [vmem:[%s8181_s13 + $0xa3] sm:$0xff] }
 0x3b5   : > { %v6657_v30 = vpop.permute.xlu0 %6656  ;;  %v13806_v3 = vpop.permute.xlu1 %6177 }
 0x3b6   : > { %v6708_v51 = vadd.f32 %v6657_v30, %v6580_v16  ;;  %v7088_v36 = vadd.f32 %v15786_v34, %v6799_v47  ;;  %v7351_v47 = vld [vmem:[%s8181_s13 + $0xab] sm:$0xff] }
 0x3b8   : > { %v6800_v4 = vadd.f32 %v15776_v20, %v6708_v51  ;;  %v15787_v51 = vld [vmem:[#allocation17_spill] sm:$0xff] }
 0x3b9   : > { %v6659_v59 = vpop.permute.xlu1 %6658  ;;  %v6585_v20 = vadd.f32 %v15787_v51, %v13730_v33  ;;  %v6586_v33 = vadd.f32 %v15791_v37, %v13743_v41  ;;  %v15796_v41 = vld [vmem:[#allocation50_spill] sm:$0xff]  ;;  %v15805_v37 = vld [vmem:[#allocation75_spill] sm:$0xff] }
 0x3ba   : > { %v6709_v40 = vadd.f32 %v6659_v59, %v6581_v14  ;;  %v15788_v14 = vld [vmem:[#allocation164_spill] sm:$0xff]  ;;  %v7089_v44 = vadd.f32 %v15790_v35, %v6800_v4 }
 0x3bb   : > { %v6661_v6 = vpop.permute.xlu0 %6660 }
 0x3bc   : > { %v6801_v58 = vadd.f32 %v15778_v23, %v6709_v40  ;;  %v6710_v39 = vadd.f32 %v6661_v6, %v6582_v15  ;;  %v15789_v40 = vld [vmem:[#allocation156_spill] sm:$0xff] }
 0x3be   : > { %v6802_v52 = vadd.f32 %v15780_v25, %v6710_v39 }
 0x3bf   : > { %v6663_v62 = vpop.permute.xlu1 %6662  ;;  %v7162_v57 = vpop.permute.xlu0 %7161 }
 0x3c0   : > { %v6711_v42 = vadd.f32 %v6663_v62, %v6583_v7  ;;  %v7215_v8 = vadd.f32 %v7162_v57, %v7087_v60  ;;  %v15793_v62 = vld [vmem:[#allocation62_spill] sm:$0xff] }
 0x3c2   : > { %v6803_v50 = vadd.f32 %v15783_v49, %v6711_v42  ;;  %v7307_v13 = vadd.f32 %v15784_v21, %v7215_v8  ;;  %v15794_v42 = vld [vmem:[#allocation14_spill] sm:$0xff]  ;;  %v15795_v8 = vld [vmem:[#allocation172_spill] sm:$0xff] }
 0x3c3   : > { %v6665_v22 = vpop.permute.xlu0 %6664  ;;  %v7164_v16 = vpop.permute.xlu1 %7163  ;;  %v7090_v49 = vadd.f32 %v15795_v8, %v6801_v58  ;;  %v7352_v21 = vld [vmem:[%s8181_s13 + $0xb3] sm:$0xff]  ;;  %v15800_v58 = vld [vmem:[#allocation157_spill] sm:$0xff] }
 0x3c4   : > { %v7332_v11 = vadd.f32 %v13462_v18, %v7307_v13  ;;  %v6712_v1 = vadd.f32 %v6665_v22, %v6584_v17  ;;  %v7216_v30 = vadd.f32 %v7164_v16, %v7088_v36  ;;  %v6587_v22 = vadd.f32 %v15796_v41, %v13753_v0  ;;  %v15811_v41 = vld [vmem:[#allocation195_spill] sm:$0xff] }
 0x3c6   : > { %v7368_v54 = vadd.f32 %v7350_v38, %v7332_v11  ;;  %v6804_v59 = vadd.f32 %v15788_v14, %v6712_v1  ;;  %v7308_v23 = vadd.f32 %v15789_v40, %v7216_v30  ;;  %v15798_v11 = vld [vmem:[#allocation125_spill] sm:$0xff]  ;;  %v15799_v30 = vld [vmem:[#allocation16_spill] sm:$0xff] }
 0x3c7   : > { %v7166_v6 = vpop.permute.xlu0 %7165 }
 0x3c8   : > { %v6667_v15 = vpop.permute.xlu1 %6666  ;;  %v7386_v39 = vmax.f32 %v7368_v54, 0.0  ;;  %v7333_v25 = vadd.f32 %v13462_v18, %v7308_v23  ;;  %v7217_v7 = vadd.f32 %v7166_v6, %v7089_v44  ;;  %v7353_v54 = vld [vmem:[%s8181_s13 + $0xbb] sm:$0xff]  ;;  %v15802_v6 = vld [vmem:[#allocation9_spill] sm:$0xff] }
 0x3c9   : > { %v6713_v56 = vadd.f32 %v6667_v15, %v6585_v20  ;;  %v7091_v20 = vadd.f32 %v15800_v58, %v6802_v52  ;;  %v15801_v15 = vld [vmem:[#allocation130_spill] sm:$0xff] }
 0x3ca   : > { %7404 = vst.msk [vmem:[%s13498_s23 + $0x90] sm:$0xff] %vm15792_vm2, %v7386_v39  ;;  %v7369_v60 = vadd.f32 %v7351_v47, %v7333_v25  ;;  %v7309_v4 = vadd.f32 %v15794_v42, %v7217_v7  ;;  %v6209_v0 = vadd.f32 %v13778_v48, %v15801_v15  ;;  %v6588_v39 = vadd.f32 %v15802_v6, %v13763_v46  ;;  %v15806_v46 = vld [vmem:[#allocation136_spill] sm:$0xff]  ;;  %v15817_v15 = vld [vmem:[#allocation141_spill] sm:$0xff]  ;;  %v7356_v6 = vld [vmem:[%s8181_s13 + $0xd3] sm:$0xff] }
 0x3cb   : > { %v6805_v57 = vadd.f32 %v15793_v62, %v6713_v56  ;;  %v15804_v56 = vld [vmem:[#allocation84_spill] sm:$0xff]  ;;  %vm15859_vm2 = vmmov %vm15847_vm6 }
 0x3cc   : > { %v6669_v13 = vpop.permute.xlu0 %6668  ;;  %v7168_v5 = vpop.permute.xlu1 %7167  ;;  %v7387_v17 = vmax.f32 %v7369_v60, 0.0  ;;  %v7334_v34 = vadd.f32 %v13462_v18, %v7309_v4  ;;  %v7354_v60 = vld [vmem:[%s8181_s13 + $0xc3] sm:$0xff] }
 0x3cd   : > { %v6714_v36 = vadd.f32 %v6669_v13, %v6586_v33  ;;  %v7218_v38 = vadd.f32 %v7168_v5, %v7090_v49  ;;  %v7092_v33 = vadd.f32 %v15805_v37, %v6803_v50  ;;  %v15807_v13 = vld [vmem:[#allocation199_spill] sm:$0xff] }
 0x3ce   : > { %7405 = vst.msk [vmem:[%s13498_s23 + $0x98] sm:$0xff] %vm15797_vm7, %v7387_v17  ;;  %v7370_v16 = vadd.f32 %v7352_v21, %v7334_v34  ;;  %v6301_v21 = vadd.f32 %v15806_v46, %v6209_v0  ;;  %v6210_v5 = vadd.f32 %v13785_v63, %v15807_v13  ;;  %v15809_v17 = vld [vmem:[#allocation168_spill] sm:$0xff]  ;;  %v7094_v0 = vadd.f32 %v15817_v15, %v6805_v57  ;;  %v15823_v46 = vld [vmem:[#allocation173_spill] sm:$0xff]  ;;  %vm15860_vm7 = vmmov %vm15771_vm0 }
 0x3cf   : > { %v6806_v1 = vadd.f32 %v15798_v11, %v6714_v36  ;;  %v7310_v51 = vadd.f32 %v15799_v30, %v7218_v38  ;;  %v15810_v36 = vld [vmem:[#allocation139_spill] sm:$0xff]  ;;  %v15832_v15 = vld [vmem:[#allocation57_spill] sm:$0xff] }
 0x3d0   : > { %v6671_v14 = vpop.permute.xlu1 %6670  ;;  %v7170_v40 = vpop.permute.xlu0 %7169  ;;  %v7388_v23 = vmax.f32 %v7370_v16, 0.0  ;;  %v7355_v16 = vld [vmem:[%s8181_s13 + $0xcb] sm:$0xff]  ;;  %v7357_v13 = vld [vmem:[%s8181_s13 + $0xdb] sm:$0xff] }
 0x3d1   : > { %v7335_v35 = vadd.f32 %v13462_v18, %v7310_v51  ;;  %v6715_v44 = vadd.f32 %v6671_v14, %v6587_v22  ;;  %v7219_v47 = vadd.f32 %v7170_v40, %v7091_v20  ;;  %v7093_v22 = vadd.f32 %v15811_v41, %v6804_v59  ;;  %v15814_v40 = vld [vmem:[#allocation158_spill] sm:$0xff] }
 0x3d2   : > { %7406 = vst.msk [vmem:[%s13498_s23 + $0xa0] sm:$0xff] %vm15803_vm14, %v7388_v23  ;;  %v6590_v23 = vadd.f32 %v15814_v40, %v6301_v21  ;;  %v7095_v21 = vadd.f32 %v15823_v46, %v6806_v1  ;;  %v15839_v46 = vld [vmem:[#allocation140_spill] sm:$0xff]  ;;  %vm15861_vm14 = vmmov %vm15771_vm0 }
 0x3d3   : > { %v7371_v25 = vadd.f32 %v7353_v54, %v7335_v35  ;;  %v6807_v52 = vadd.f32 %v13446_v32, %v6715_v44  ;;  %v7311_v7 = vadd.f32 %v15804_v56, %v7219_v47  ;;  %v6589_v32 = vadd.f32 %v13437_v61, %v13773_v43  ;;  %v15812_v61 = vld [vmem:[#allocation190_spill] sm:$0xff]  ;;  %v15813_v54 = vld [vmem:[#allocation189_spill] sm:$0xff]  ;;  %v15816_v44 = vld [vmem:[#allocation59_spill] sm:$0xff] }
 0x3d4   : > { %v6673_v62 = vpop.permute.xlu0 %6672  ;;  %v7172_v42 = vpop.permute.xlu1 %7171  ;;  %v6302_v43 = vadd.f32 %v15812_v61, %v6210_v5  ;;  %v6211_v14 = vadd.f32 %v13787_v31, %v15813_v54 }
 0x3d5   : > { %v7389_v4 = vmax.f32 %v7371_v25, 0.0  ;;  %v7336_v48 = vadd.f32 %v13462_v18, %v7311_v7  ;;  %v6716_v8 = vadd.f32 %v6673_v62, %v6588_v39  ;;  %v7220_v49 = vadd.f32 %v7172_v42, %v7092_v33  ;;  %v15818_v33 = vld [vmem:[#allocation81_spill] sm:$0xff]  ;;  %v15819_v62 = vld [vmem:[#allocation146_spill] sm:$0xff] }
 0x3d6   : > { %v6212_v42 = vadd.f32 %v13794_v10, %v15819_v62 }
 0x3d7   : > { %7407 = vst.msk [vmem:[%s13498_s23 + $0xa8] sm:$0xff] %vm15808_vm10, %v7389_v4  ;;  %v7372_v50 = vadd.f32 %v7354_v60, %v7336_v48  ;;  %v6808_v34 = vadd.f32 %v15809_v17, %v6716_v8  ;;  %v7312_v38 = vadd.f32 %v15810_v36, %v7220_v49  ;;  %v6303_v60 = vadd.f32 %v15818_v33, %v6211_v14  ;;  %v15820_v4 = vld [vmem:[#allocation202_spill] sm:$0xff]  ;;  %v15822_v8 = vld [vmem:[#allocation55_spill] sm:$0xff]  ;;  %vm15862_vm10 = vmmov %vm15771_vm0 }
 0x3d8   : > { %v6675_v11 = vpop.permute.xlu1 %6674  ;;  %v7174_v30 = vpop.permute.xlu0 %7173 }
 0x3d9   : > { %v7390_v51 = vmax.f32 %v7372_v50, 0.0  ;;  %v7337_v63 = vadd.f32 %v13462_v18, %v7312_v38  ;;  %v6717_v58 = vadd.f32 %v6675_v11, %v6589_v32  ;;  %v7221_v20 = vadd.f32 %v7174_v30, %v7093_v22  ;;  %v15824_v38 = vld [vmem:[#allocation101_spill] sm:$0xff]  ;;  %v15825_v22 = vld [vmem:[#allocation15_spill] sm:$0xff]  ;;  %v15828_v30 = vld [vmem:[#allocation180_spill] sm:$0xff] }
 0x3da   : > { %v6304_v41 = vadd.f32 %v15824_v38, %v6212_v42  ;;  %v15826_v11 = vld [vmem:[#allocation99_spill] sm:$0xff] }
 0x3db   : > { %7408 = vst.msk [vmem:[%s13498_s23 + $0xb0] sm:$0xff] %vm15815_vm5, %v7390_v51  ;;  %v7373_v59 = vadd.f32 %v7355_v16, %v7337_v63  ;;  %v6809_v35 = vadd.f32 %v13504_v2, %v6717_v58  ;;  %v7313_v47 = vadd.f32 %v15816_v44, %v7221_v20  ;;  %v6591_v2 = vadd.f32 %v15820_v4, %v6302_v43  ;;  %v15829_v63 = vld [vmem:[#allocation200_spill] sm:$0xff]  ;;  %v15830_v20 = vld [vmem:[#allocation134_spill] sm:$0xff]  ;;  %v15831_v44 = vld [vmem:[#allocation105_spill] sm:$0xff] }
 0x3dc   : > { %v6677_v39 = vpop.permute.xlu0 %6676  ;;  %v7176_v25 = vpop.permute.xlu1 %7175  ;;  %v6213_v16 = vadd.f32 %v13801_v12, %v15825_v22  ;;  %v7096_v61 = vadd.f32 %v15830_v20, %v6807_v52  ;;  %v7358_v43 = vld [vmem:[%s8181_s13 + $0xe3] sm:$0xff] }
 0x3dd   : > { %v7391_v56 = vmax.f32 %v7373_v59, 0.0  ;;  %v7338_v7 = vadd.f32 %v13462_v18, %v7313_v47  ;;  %v6718_v31 = vadd.f32 %v6677_v39, %v6590_v23  ;;  %v7222_v37 = vadd.f32 %v7176_v25, %v7094_v0  ;;  %v15835_v25 = vld [vmem:[#allocation111_spill] sm:$0xff]  ;;  %v15845_v20 = vld [vmem:[#allocation112_spill] sm:$0xff] }
 0x3de   : > { %v6305_v47 = vadd.f32 %v15831_v44, %v6213_v16  ;;  %v6214_v0 = vadd.f32 %v13806_v3, %v15832_v15  ;;  %v15846_v44 = vrot.slane %v13606_v29, 2  ;;  %v15849_v15 = vld [vmem:[#allocation12_spill] sm:$0xff] }
 0x3df   : > { %7409 = vst.msk [vmem:[%s13498_s23 + $0xb8] sm:$0xff] %vm15821_vm13, %v7391_v56  ;;  %v7374_v57 = vadd.f32 %v7356_v6, %v7338_v7  ;;  %v6810_v48 = vadd.f32 %v13529_v19, %v6718_v31  ;;  %v7314_v49 = vadd.f32 %v15822_v8, %v7222_v37  ;;  %v6592_v19 = vadd.f32 %v15826_v11, %v6303_v60  ;;  %v15833_v6 = vld [vmem:[#allocation13_spill] sm:$0xff]  ;;  %v15836_v7 = vld [vmem:[#allocation204_spill] sm:$0xff]  ;;  %v15837_v37 = vld [vmem:[#allocation66_spill] sm:$0xff] }
 0x3e0   : > { %v6679_v5 = vpop.permute.xlu1 %6678  ;;  %v7178_v32 = vpop.permute.xlu0 %7177  ;;  %v6593_v39 = vadd.f32 %v15833_v6, %v6304_v41  ;;  %v7097_v33 = vadd.f32 %v15837_v37, %v6808_v34  ;;  %v7359_v60 = vld [vmem:[%s8181_s13 + $0xeb] sm:$0xff]  ;;  %v15838_v8 = vld [vmem:[#allocation163_spill] sm:$0xff]  ;;  %v7362_v6 = vld [vmem:[%s8181_s13 + $0x103] sm:$0xff] }
 0x3e1   : > { %v7392_v50 = vmax.f32 %v7374_v57, 0.0  ;;  %v7339_v17 = vadd.f32 %v13462_v18, %v7314_v49  ;;  %v6719_v10 = vadd.f32 %v6679_v5, %v6591_v2  ;;  %v7223_v36 = vadd.f32 %v7178_v32, %v7095_v21  ;;  %v15841_v32 = vld [vmem:[#allocation40_spill] sm:$0xff] }
 0x3e2   : > { %v6306_v49 = vadd.f32 %v15838_v8, %v6214_v0  ;;  %v6594_v21 = vadd.f32 %v15839_v46, %v6305_v47  ;;  %v7932_v29 = vld [vmem:[%s13982_s4] ss:$0 sm:$0xff] }
 0x3e3   : > { %7410 = vst.msk [vmem:[%s13498_s23 + $0xc0] sm:$0xff] %vm15827_vm8, %v7392_v50  ;;  %v7375_v1 = vadd.f32 %v7357_v13, %v7339_v17  ;;  %v6811_v51 = vadd.f32 %v15828_v30, %v6719_v10  ;;  %v7315_v58 = vadd.f32 %v15829_v63, %v7223_v36  ;;  %v6575_v13 = vpop.f32.mrf.mxu0  ;;  %v15842_v17 = vld [vmem:[#allocation24_spill] sm:$0xff]  ;;  %v7360_v36 = vld [vmem:[%s8181_s13 + $0xf3] sm:$0xff]  ;;  %v15843_v30 = vld [vmem:[#allocation53_spill] sm:$0xff] }
 0x3e4   : > { %v6681_v54 = vpop.permute.xlu0 %6680  ;;  %v7180_v14 = vpop.permute.xlu1 %7179  ;;  %v7098_v10 = vadd.f32 %v15842_v17, %v6809_v35  ;;  %v6595_v63 = vadd.f32 %v15843_v30, %v6306_v49 }
 0x3e5   : > { %v7393_v40 = vmax.f32 %v7375_v1, 0.0  ;;  %v7340_v23 = vadd.f32 %v13462_v18, %v7315_v58  ;;  %v6720_v12 = vadd.f32 %v6681_v54, %v6592_v19  ;;  %v7224_v59 = vadd.f32 %v7180_v14, %v7096_v61 }
 0x3e6   : > { %v6778_v1 = vrot.slane %v6575_v13, 2  ;;  %v7099_v61 = vadd.f32 %v15845_v20, %v6810_v48  ;;  %v7100_v0 = vadd.f32 %v15849_v15, %v6811_v51  ;;  %v7084_v13 = vpop.f32.mrf.mxu1 }
 0x3e7   : > { %7411 = vst.msk [vmem:[%s13498_s23 + $0xc8] sm:$0xff] %vm15834_vm15, %v7393_v40  ;;  %v7376_v52 = vadd.f32 %v7358_v43, %v7340_v23  ;;  %v6812_v56 = vadd.f32 %v15835_v25, %v6720_v12  ;;  %v7316_v31 = vadd.f32 %v15836_v7, %v7224_v59  ;;  %v7361_v43 = vld [vmem:[%s8181_s13 + $0xfb] sm:$0xff] }
 0x3e8   : > { %v6683_v62 = vpop.permute.xlu1 %6682  ;;  %v7182_v42 = vpop.permute.xlu0 %7181  ;;  %v6779_v47 = vsel %vm15847_vm6, %v15846_v44, %v6778_v1  ;;  %v7366_v1 = vld [vmem:[%s8181_s13 + $0x123] sm:$0xff] }
 0x3e9   : > { %v7394_v4 = vmax.f32 %v7376_v52, 0.0  ;;  %v7341_v2 = vadd.f32 %v13462_v18, %v7316_v31  ;;  %v6721_v3 = vadd.f32 %v6683_v62, %v6593_v39  ;;  %v7225_v57 = vadd.f32 %v7182_v42, %v7097_v33  ;;  %v15850_v52 = vld [vmem:[#allocation86_spill] sm:$0xff] }
 0x3ea   : > { %v7363_v62 = vld [vmem:[%s8181_s13 + $0x10b] sm:$0xff] }
 0x3eb   : > { %7412 = vst.msk [vmem:[%s13498_s23 + $0xd0] sm:$0xff] %vm15840_vm1, %v7394_v4  ;;  %v7377_v5 = vadd.f32 %v7359_v60, %v7341_v2  ;;  %v6813_v34 = vadd.f32 %v13602_v55, %v6721_v3  ;;  %v7317_v50 = vadd.f32 %v15841_v32, %v7225_v57  ;;  %v15852_v60 = vld [vmem:[#allocation187_spill] sm:$0xff] }
 0x3ec   : > { %v6685_v38 = vpop.permute.xlu0 %6684  ;;  %v7184_v41 = vpop.permute.xlu1 %7183  ;;  %v7364_v57 = vld [vmem:[%s8181_s13 + $0x113] sm:$0xff] }
 0x3ed   : > { %v7395_v22 = vmax.f32 %v7377_v5, 0.0  ;;  %v7342_v16 = vadd.f32 %v13462_v18, %v7317_v50  ;;  %v6722_v11 = vadd.f32 %v6685_v38, %v6594_v21  ;;  %v7226_v19 = vadd.f32 %v7184_v41, %v7098_v10  ;;  %v15854_v50 = vld [vmem:[#allocation11_spill] sm:$0xff] }
 0x3ef   : > { %7413 = vst.msk [vmem:[%s13498_s23 + $0xd8] sm:$0xff] %vm15844_vm12, %v7395_v22  ;;  %v7378_v55 = vadd.f32 %v7360_v36, %v7342_v16  ;;  %v6814_v58 = vadd.f32 %v13626_v28, %v6722_v11  ;;  %v7318_v35 = vadd.f32 %v13629_v24, %v7226_v19  ;;  %v7287_v22 = vrot.slane %v7084_v13, 2 }
 0x3f0   : > { %v6687_v54 = vpop.permute.xlu1 %6686  ;;  %v7186_v14 = vpop.permute.xlu0 %7185 }
 0x3f1   : > { %v7396_v40 = vmax.f32 %v7378_v55, 0.0  ;;  %v7343_v23 = vadd.f32 %v13462_v18, %v7318_v35  ;;  %v6723_v12 = vadd.f32 %v6687_v54, %v6595_v63  ;;  %v7227_v59 = vadd.f32 %v7186_v14, %v7099_v61  ;;  %v7367_v54 = vld [vmem:[%s8181_s13 + $0x12b] sm:$0xff] }
 0x3f2   : > { %v7101_v18 = vadd.f32 %v15850_v52, %v6812_v56  ;;  %v15853_v56 = vld [vmem:[#allocation70_spill] sm:$0xff]  ;;  %v15858_v35 = vrot.slane %v13697_v26, 2 }
 0x3f3   : > { %7414 = vst.msk [vmem:[%s13498_s23 + $0xe0] sm:$0xff] %vm15848_vm3, %v7396_v40  ;;  %v7379_v28 = vadd.f32 %v7361_v43, %v7343_v23  ;;  %v6815_v24 = vadd.f32 %v6779_v47, %v6723_v12  ;;  %v7319_v48 = vadd.f32 %v13644_v9, %v7227_v59  ;;  %v7102_v4 = vadd.f32 %v15853_v56, %v6813_v34  ;;  %v7365_v34 = vld [vmem:[%s8181_s13 + $0x11b] sm:$0xff] }
 0x3f4   : > { %v7188_v39 = vpop.permute.xlu1 %7187  ;;  %v7288_v20 = vsel %vm15859_vm2, %v15858_v35, %v7287_v22 }
 0x3f5   : > { %v7397_v25 = vmax.f32 %v7379_v28, 0.0  ;;  %v7344_v7 = vadd.f32 %v7932_v29, %v7319_v48  ;;  %v7228_v31 = vadd.f32 %v7188_v39, %v7100_v0  ;;  %v7190_v37 = vpop.permute.xlu0 %7189 }
 0x3f6   : > { %v7229_v33 = vadd.f32 %v7190_v37, %v7101_v18 }
 0x3f7   : > { %7415 = vst.msk [vmem:[%s13498_s23 + $0xe8] sm:$0xff] %vm15851_vm11, %v7397_v25  ;;  %v7380_v9 = vadd.f32 %v7362_v6, %v7344_v7  ;;  %v7320_v51 = vadd.f32 %v15852_v60, %v7228_v31 }
 0x3f8   : > { %v7321_v42 = vadd.f32 %v13677_v45, %v7229_v33  ;;  %v7103_v45 = vadd.f32 %v15854_v50, %v6814_v58 }
 0x3f9   : > { %v7398_v2 = vmax.f32 %v7380_v9, 0.0  ;;  %v7345_v3 = vadd.f32 %v7932_v29, %v7320_v51  ;;  %v7192_v8 = vpop.permute.xlu1 %7191 }
 0x3fa   : > { %v7346_v49 = vadd.f32 %v7932_v29, %v7321_v42  ;;  %v7230_v46 = vadd.f32 %v7192_v8, %v7102_v4 }
 0x3fb   : > { %7416 = vst.msk [vmem:[%s13498_s23 + $0xf0] sm:$0xff] %vm15771_vm0, %v7398_v2  ;;  %v7381_v21 = vadd.f32 %v7363_v62, %v7345_v3 }
 0x3fc   : > { %v7382_v5 = vadd.f32 %v7364_v57, %v7346_v49  ;;  %v7322_v32 = vadd.f32 %v13694_v53, %v7230_v46  ;;  %v15857_v53 = vld [vmem:[#allocation133_spill] sm:$0xff] }
 0x3fd   : > { %v7399_v17 = vmax.f32 %v7381_v21, 0.0  ;;  %v7194_v10 = vpop.permute.xlu0 %7193  ;;  %v7104_v19 = vadd.f32 %v15857_v53, %v6815_v24 }
 0x3fe   : > { %v7400_v36 = vmax.f32 %v7382_v5, 0.0  ;;  %v7347_v38 = vadd.f32 %v7932_v29, %v7322_v32  ;;  %v7231_v41 = vadd.f32 %v7194_v10, %v7103_v45 }
 0x3ff   : > { %7417 = vst.msk [vmem:[%s13498_s23 + $0xf8] sm:$0xff] %vm15855_vm4, %v7399_v17 }
 0x400   : > { %7418 = vst.msk [vmem:[%s13498_s23 + $0x100] sm:$0xff] %vm15856_vm9, %v7400_v36  ;;  %v7383_v16 = vadd.f32 %v7365_v34, %v7347_v38  ;;  %v7323_v11 = vadd.f32 %v13715_v27, %v7231_v41 }
 0x401   : > { %v7196_v30 = vpop.permute.xlu1 %7195 }
 0x402   : > { %v7401_v63 = vmax.f32 %v7383_v16, 0.0  ;;  %v7348_v55 = vadd.f32 %v7932_v29, %v7323_v11  ;;  %v7232_v58 = vadd.f32 %v7196_v30, %v7104_v19 }
 0x404   : > { %7419 = vst.msk [vmem:[%s13498_s23 + $0x108] sm:$0xff] %vm15860_vm7, %v7401_v63  ;;  %v7384_v61 = vadd.f32 %v7366_v1, %v7348_v55  ;;  %v7324_v43 = vadd.f32 %v7288_v20, %v7232_v58 }
 0x406   : > { %v7402_v14 = vmax.f32 %v7384_v61, 0.0  ;;  %v7349_v40 = vadd.f32 %v7932_v29, %v7324_v43 }
 0x408   : > { %7420 = vst.msk [vmem:[%s13498_s23 + $0x110] sm:$0xff] %vm15861_vm14, %v7402_v14  ;;  %v7385_v27 = vadd.f32 %v7367_v54, %v7349_v40 }
 0x40a   : > { %v7403_v23 = vmax.f32 %v7385_v27, 0.0 }
 0x40c   : > { %7421 = vst.msk [vmem:[%s13498_s23 + $0x118] sm:$0xff] %vm15862_vm10, %v7403_v23 }
 0x40d PF: > { %s15_s18 = sadd.s32 1, %s7939_s18  }
 0x40e   : > { %p12_p4 = scmp.ge.s32.totalorder %s15_s18, 4  }
 0x410   :  { %14 = sbr.rel (!%p12_p4) target bundleno = 1 (0x1), region = 74 }

</bundles_post_ra>
